<compile_context>
chip_gen: v5e
topology: v5e:2x2
jax: 0.10.0
libtpu: 0.0.40
codegen_flags: <defaults>
</compile_context>

<pallas_src>
import math
import functools

import jax
import jax.numpy as jnp
from jax.experimental import pallas as pl
from jax.experimental.pallas import tpu as pltpu


# ---------------------------------------------------------------------------
# Fused kernel: conv1x1 (no bias) -> ReLU -> separable 5x5 depthwise Gaussian
# (valid) -> stacked-offset correlation matmul -> fused HW-chunk max.
#
# torch reference semantics:
#   corrs[n, c1, o*C + c2] = sum_p x[n,c1,p] * x[n,c2,(h-i)%H,(w-j)%W],  o = i*W + j
#   c_ij[n, c1*C + q2]     = max over { (o,c2) : o*C + c2 in [q2*HW, (q2+1)*HW) }
# With the split-roll identity (h -> (h'+i)%H):
#   S[i*C + c1, j*C + c2] = sum_p x[c1,(h+i)%H,w] * x[c2,h,(w-j)%W] = corrs[c1, o*C+c2]
# so q2 = i*NG + g is the max over the contiguous column range [g*HW,(g+1)*HW) of
# row (i, c1) of S.
# ---------------------------------------------------------------------------
def _cooc_fused_kernel(x_ref, w_ref, o_ref, lhs_ref, rhs_ref, *,
                       C, H, W, Wp, NG, g1d, mm_dtype):
    # x_ref:   (1, Cin_p, Hp*Wp) f32  reflect-padded activation, channel-major (lane dense)
    # w_ref:   (C, Cin_p)        f32  1x1 conv weight (transposed, zero rows for Cin pad)
    # o_ref:   (1, H, C, NG)     f32  [i, c1, g]  ->  c_ij[c1*C + i*NG + g]
    # lhs_ref: (H*C, HW) mm_dtype     stacked row-offset copies  x[c1, (h+i)%H, w]
    # rhs_ref: (W*C, HW) mm_dtype     stacked col-offset copies  x[c2, h, (w-j)%W]
    HW = H * W
    HWp = H * Wp

    # ---- 1x1 conv (pointwise, bias-free): one small MXU dot, lane-dense N = Hp*Wp ----
    y = jax.lax.dot_general(w_ref[...], x_ref[0],
                            dimension_numbers=(((1,), (0,)), ((), ())),
                            preferred_element_type=jnp.float32)          # (C, Hp*Wp)
    y = jnp.maximum(y, 0.0)                                              # ReLU (f32 VPU)

    # ---- separable 5x5 depthwise Gaussian (valid), channel-major lane windows ----
    # vertical: v[c, h*Wp + wp] = sum_a g[a] * y[c, (h+a)*Wp + wp]
    v = y[:, 0:HWp] * g1d[0]
    for a in range(1, 5):
        v = v + y[:, a * Wp:a * Wp + HWp] * g1d[a]                       # (C, H*Wp)
    # horizontal over the padded width: hf[c, q] = sum_b g[b] * v[c, q + b]
    hf = v[:, 0:HWp - 4] * g1d[0]
    for b in range(1, 5):
        hf = hf + v[:, b:b + HWp - 4] * g1d[b]                           # (C, H*Wp - 4)
    # drop the width padding: s[c, h*W + w] = hf[c, h*Wp + w]
    s = jnp.concatenate([hf[:, h * Wp:h * Wp + W] for h in range(H)],
                        axis=-1)                                         # (C, HW)

    # ---- build stacked circular-offset operands; cast to bf16 only at the write ----
    sd = jnp.concatenate([s, s], axis=-1)                                # (C, 2*HW)
    lane_w = jax.lax.broadcasted_iota(jnp.int32, (C, HW), 1) % W         # hoisted once

    for i in range(H):        # LHS rows i*C + c1  =  x[c1, (h + i) % H, w]
        lhs_ref[i * C:(i + 1) * C, :] = sd[:, i * W:i * W + HW].astype(mm_dtype)

    for j in range(W):        # RHS rows j*C + c2  =  x[c2, h, (w - j) % W]
        if j == 0:
            rhs_ref[0:C, :] = s.astype(mm_dtype)
        else:
            hi = sd[:, HW - j:2 * HW - j]     # flat (p - j) mod HW      (w >= j)
            lo = sd[:, W - j:W - j + HW]      # flat  p + W - j          (w <  j)
            rhs_ref[j * C:(j + 1) * C, :] = (
                jnp.where(lane_w >= j, hi, lo).astype(mm_dtype))         # select in f32

    # ---- correlation + fused max, chunked per reduction group g ----
    # Each 256-row RHS chunk = columns [g*HW, (g+1)*HW) of S; A.B^T contracts the minor
    # dims of both operands (native MXU form, no RHS transpose), f32 accumulation.
    lhs = lhs_ref[...]                                                   # (H*C, HW)
    cols = []
    for g in range(NG):
        blk = jax.lax.dot_general(
            lhs, rhs_ref[g * HW:(g + 1) * HW, :],
            dimension_numbers=(((1,), (1,)), ((), ())),
            preferred_element_type=jnp.float32)                          # (H*C, HW) f32
        cols.append(jnp.max(blk, axis=-1, keepdims=True))                # (H*C, 1)
    red = cols[0] if NG == 1 else jnp.concatenate(cols, axis=-1)         # (H*C, NG)
    o_ref[0] = red.reshape(H, C, NG)                                     # [i, c1, g]


# ---------------------------------------------------------------------------
# Deterministic separable Gaussian taps (same construction as the PyTorch module:
# outer(g/s, g/s) == outer(g, g) / sum(outer(g, g))).
# ---------------------------------------------------------------------------
def make_gaussian_taps(ksize=5, sigma=1.0):
    mean = (ksize - 1) / 2.0
    g = [math.exp(-(((a - mean) / sigma) ** 2) / 2.0) / (sigma * math.sqrt(2.0 * math.pi))
         for a in range(ksize)]
    ssum = sum(g)
    return tuple(float(v / ssum) for v in g)


# ---------------------------------------------------------------------------
# Full forward pass.
# ---------------------------------------------------------------------------
def cooc_layer_forward(x, conv_w, g1d, *, mm_dtype=jnp.bfloat16):
    """x: (N, Cin, H, W) f32 NCHW.  conv_w: (Cin, C) (= torch conv1.weight[:,:,0,0].T).
    Returns c_ij: (N, C*C) f32.  mm_dtype=bf16 gives native-rate MXU with f32
    accumulation (validate vs. the f32 reference with a tolerance); pass jnp.float32
    for bit-closer numerics."""
    N, Cin, H, W = x.shape
    C = conv_w.shape[1]
    # The fused in-kernel max requires torch's length-HW view chunks to tile each
    # per-row-offset slab (lane width W*C) exactly.
    # TODO(synk): C % H != 0 would need a scatter-max epilogue; not implemented.
    assert C % H == 0, "CoocLayer Pallas kernel requires out_channels % H == 0"
    HW = H * W
    NG = C // H
    Hp, Wp = H + 4, W + 4

    # reflect pad; commutes exactly with the bias-free pointwise conv + ReLU.
    x_pad = jnp.pad(x, ((0, 0), (0, 0), (2, 2), (2, 2)), mode="reflect")  # (N,Cin,Hp,Wp)
    x_cm = x_pad.reshape(N, Cin, Hp * Wp)        # channel-major, lane-dense (free reshape)

    # zero-pad the tiny contraction dim (Cin=4 -> 8) so the f32 (8,128) tiling of the
    # conv matmul operands is aligned; mathematically a no-op.
    Cin_p = max(8, ((Cin + 7) // 8) * 8)
    w_t = conv_w.T.astype(jnp.float32)                                    # (C, Cin)
    if Cin_p != Cin:
        x_cm = jnp.pad(x_cm, ((0, 0), (0, Cin_p - Cin), (0, 0)))
        w_t = jnp.pad(w_t, ((0, 0), (0, Cin_p - Cin)))

    kern = functools.partial(_cooc_fused_kernel, C=C, H=H, W=W, Wp=Wp, NG=NG,
                             g1d=g1d, mm_dtype=mm_dtype)
    o4 = pl.pallas_call(
        kern,
        out_shape=jax.ShapeDtypeStruct((N, H, C, NG), jnp.float32),
        grid=(N,),
        in_specs=[
            pl.BlockSpec((1, Cin_p, Hp * Wp), lambda n: (n, 0, 0)),
            pl.BlockSpec((C, Cin_p), lambda n: (0, 0)),
        ],
        out_specs=pl.BlockSpec((1, H, C, NG), lambda n: (n, 0, 0, 0)),
        scratch_shapes=[
            pltpu.VMEM((H * C, HW), mm_dtype),    # stacked LHS (row offsets)
            pltpu.VMEM((W * C, HW), mm_dtype),    # stacked RHS (col offsets)
        ],
        # ~1 MiB/step total -> fits every generation's scoped VMEM default; N=2 parallel
        # steps map one batch per TensorCore on v7x.
        compiler_params=pltpu.CompilerParams(dimension_semantics=("parallel",)),
    )(x_cm, w_t)

    # torch output index is c1*C + q2 with q2 = i*NG + g (tiny ~8 KB epilogue permute).
    return jnp.transpose(o4, (0, 2, 1, 3)).reshape(N, C * C)


if __name__ == "__main__":
    N, Cin, H, W = 2, 4, 16, 16
    Cout = 32

    key = jax.random.PRNGKey(0)
    kx, kw = jax.random.split(key)
    x = jax.random.normal(kx, (N, Cin, H, W), dtype=jnp.float32)

    # torch conv1.weight: (Cout, Cin, 1, 1), bias=False; the kernel wants (Cin, Cout).
    w_oc_ic = jax.random.normal(kw, (Cout, Cin), dtype=jnp.float32) * (1.0 / math.sqrt(Cin))
    conv_w = w_oc_ic.T                                                    # (Cin, Cout)

    g1d = make_gaussian_taps(ksize=5, sigma=1.0)

    fwd = jax.jit(functools.partial(cooc_layer_forward, g1d=g1d))
    out = jax.block_until_ready(fwd(x, conv_w))
    assert out.shape == (N, Cout * Cout) and out.dtype == jnp.float32
    print("KERNEL_OK")
</pallas_src>

<mosaic_0001>
module attributes {stable_mosaic.version = 11 : i64} {
  func.func @_cooc_fused_kernel(%arg0: i32, %arg1: memref<1x8x400xf32, #tpu.memory_space<vmem>>, %arg2: memref<32x8xf32, #tpu.memory_space<vmem>>, %arg3: memref<1x16x32x2xf32, #tpu.memory_space<vmem>>, %arg4: memref<512x256xbf16, #tpu.memory_space<vmem>>, %arg5: memref<512x256xbf16, #tpu.memory_space<vmem>>) attributes {dimension_semantics = [#tpu.dimension_semantics<parallel>], iteration_bounds = array<i64: 2>, scalar_prefetch = 0 : i64, scratch_operands = 2 : i64, tpu.core_type = #tpu.core_type<tc>, window_params = [{transform_indices = @transform_0, window_bounds = array<i64: 1, 8, 400>}, {pipeline_mode = #tpu.pipeline_mode<synchronous>, transform_indices = @transform_1, window_bounds = array<i64: 32, 8>}, {transform_indices = @transform_2, window_bounds = array<i64: 1, 16, 32, 2>}]} {
    %c0 = arith.constant 0 : index
    %c0_0 = arith.constant 0 : index
    %0 = vector.load %arg2[%c0, %c0_0] : memref<32x8xf32, #tpu.memory_space<vmem>>, vector<32x8xf32>
    %c0_1 = arith.constant 0 : index
    %c0_2 = arith.constant 0 : index
    %c0_3 = arith.constant 0 : index
    %1 = vector.load %arg1[%c0_1, %c0_2, %c0_3] : memref<1x8x400xf32, #tpu.memory_space<vmem>>, vector<1x8x400xf32>
    %2 = vector.shape_cast %1 : vector<1x8x400xf32> to vector<8x400xf32>
    %cst = arith.constant dense<0.000000e+00> : vector<32x400xf32>
    %3 = tpu.matmul %0, %2, %cst {dimension_numbers = #tpu.dot_dimension_numbers<[1], [0], [0], [1], [0, 0, 1, 1], [], []>} : vector<32x8xf32>, vector<8x400xf32>, vector<32x400xf32> -> vector<32x400xf32>
    %cst_4 = arith.constant 0.000000e+00 : f32
    %4 = vector.broadcast %cst_4 : f32 to vector<32x400xf32>
    %5 = arith.maximumf %3, %4 : vector<32x400xf32>
    %6 = vector.extract_strided_slice %5 {offsets = [0, 0], sizes = [32, 320], strides = [1, 1]} : vector<32x400xf32> to vector<32x320xf32>
    %cst_5 = arith.constant 0.054488685 : f32
    %7 = vector.broadcast %cst_5 : f32 to vector<32x320xf32>
    %8 = arith.mulf %6, %7 : vector<32x320xf32>
    %9 = vector.extract_strided_slice %5 {offsets = [0, 20], sizes = [32, 320], strides = [1, 1]} : vector<32x400xf32> to vector<32x320xf32>
    %cst_6 = arith.constant 0.244201347 : f32
    %10 = vector.broadcast %cst_6 : f32 to vector<32x320xf32>
    %11 = arith.mulf %9, %10 : vector<32x320xf32>
    %12 = arith.addf %8, %11 : vector<32x320xf32>
    %13 = vector.extract_strided_slice %5 {offsets = [0, 40], sizes = [32, 320], strides = [1, 1]} : vector<32x400xf32> to vector<32x320xf32>
    %cst_7 = arith.constant 0.402619958 : f32
    %14 = vector.broadcast %cst_7 : f32 to vector<32x320xf32>
    %15 = arith.mulf %13, %14 : vector<32x320xf32>
    %16 = arith.addf %12, %15 : vector<32x320xf32>
    %17 = vector.extract_strided_slice %5 {offsets = [0, 60], sizes = [32, 320], strides = [1, 1]} : vector<32x400xf32> to vector<32x320xf32>
    %cst_8 = arith.constant 0.244201347 : f32
    %18 = vector.broadcast %cst_8 : f32 to vector<32x320xf32>
    %19 = arith.mulf %17, %18 : vector<32x320xf32>
    %20 = arith.addf %16, %19 : vector<32x320xf32>
    %21 = vector.extract_strided_slice %5 {offsets = [0, 80], sizes = [32, 320], strides = [1, 1]} : vector<32x400xf32> to vector<32x320xf32>
    %cst_9 = arith.constant 0.054488685 : f32
    %22 = vector.broadcast %cst_9 : f32 to vector<32x320xf32>
    %23 = arith.mulf %21, %22 : vector<32x320xf32>
    %24 = arith.addf %20, %23 : vector<32x320xf32>
    %25 = vector.extract_strided_slice %24 {offsets = [0, 0], sizes = [32, 316], strides = [1, 1]} : vector<32x320xf32> to vector<32x316xf32>
    %cst_10 = arith.constant 0.054488685 : f32
    %26 = vector.broadcast %cst_10 : f32 to vector<32x316xf32>
    %27 = arith.mulf %25, %26 : vector<32x316xf32>
    %28 = vector.extract_strided_slice %24 {offsets = [0, 1], sizes = [32, 316], strides = [1, 1]} : vector<32x320xf32> to vector<32x316xf32>
    %cst_11 = arith.constant 0.244201347 : f32
    %29 = vector.broadcast %cst_11 : f32 to vector<32x316xf32>
    %30 = arith.mulf %28, %29 : vector<32x316xf32>
    %31 = arith.addf %27, %30 : vector<32x316xf32>
    %32 = vector.extract_strided_slice %24 {offsets = [0, 2], sizes = [32, 316], strides = [1, 1]} : vector<32x320xf32> to vector<32x316xf32>
    %cst_12 = arith.constant 0.402619958 : f32
    %33 = vector.broadcast %cst_12 : f32 to vector<32x316xf32>
    %34 = arith.mulf %32, %33 : vector<32x316xf32>
    %35 = arith.addf %31, %34 : vector<32x316xf32>
    %36 = vector.extract_strided_slice %24 {offsets = [0, 3], sizes = [32, 316], strides = [1, 1]} : vector<32x320xf32> to vector<32x316xf32>
    %cst_13 = arith.constant 0.244201347 : f32
    %37 = vector.broadcast %cst_13 : f32 to vector<32x316xf32>
    %38 = arith.mulf %36, %37 : vector<32x316xf32>
    %39 = arith.addf %35, %38 : vector<32x316xf32>
    %40 = vector.extract_strided_slice %24 {offsets = [0, 4], sizes = [32, 316], strides = [1, 1]} : vector<32x320xf32> to vector<32x316xf32>
    %cst_14 = arith.constant 0.054488685 : f32
    %41 = vector.broadcast %cst_14 : f32 to vector<32x316xf32>
    %42 = arith.mulf %40, %41 : vector<32x316xf32>
    %43 = arith.addf %39, %42 : vector<32x316xf32>
    %44 = vector.extract_strided_slice %43 {offsets = [0, 0], sizes = [32, 16], strides = [1, 1]} : vector<32x316xf32> to vector<32x16xf32>
    %45 = vector.extract_strided_slice %43 {offsets = [0, 20], sizes = [32, 16], strides = [1, 1]} : vector<32x316xf32> to vector<32x16xf32>
    %46 = vector.extract_strided_slice %43 {offsets = [0, 40], sizes = [32, 16], strides = [1, 1]} : vector<32x316xf32> to vector<32x16xf32>
    %47 = vector.extract_strided_slice %43 {offsets = [0, 60], sizes = [32, 16], strides = [1, 1]} : vector<32x316xf32> to vector<32x16xf32>
    %48 = vector.extract_strided_slice %43 {offsets = [0, 80], sizes = [32, 16], strides = [1, 1]} : vector<32x316xf32> to vector<32x16xf32>
    %49 = vector.extract_strided_slice %43 {offsets = [0, 100], sizes = [32, 16], strides = [1, 1]} : vector<32x316xf32> to vector<32x16xf32>
    %50 = vector.extract_strided_slice %43 {offsets = [0, 120], sizes = [32, 16], strides = [1, 1]} : vector<32x316xf32> to vector<32x16xf32>
    %51 = vector.extract_strided_slice %43 {offsets = [0, 140], sizes = [32, 16], strides = [1, 1]} : vector<32x316xf32> to vector<32x16xf32>
    %52 = vector.extract_strided_slice %43 {offsets = [0, 160], sizes = [32, 16], strides = [1, 1]} : vector<32x316xf32> to vector<32x16xf32>
    %53 = vector.extract_strided_slice %43 {offsets = [0, 180], sizes = [32, 16], strides = [1, 1]} : vector<32x316xf32> to vector<32x16xf32>
    %54 = vector.extract_strided_slice %43 {offsets = [0, 200], sizes = [32, 16], strides = [1, 1]} : vector<32x316xf32> to vector<32x16xf32>
    %55 = vector.extract_strided_slice %43 {offsets = [0, 220], sizes = [32, 16], strides = [1, 1]} : vector<32x316xf32> to vector<32x16xf32>
    %56 = vector.extract_strided_slice %43 {offsets = [0, 240], sizes = [32, 16], strides = [1, 1]} : vector<32x316xf32> to vector<32x16xf32>
    %57 = vector.extract_strided_slice %43 {offsets = [0, 260], sizes = [32, 16], strides = [1, 1]} : vector<32x316xf32> to vector<32x16xf32>
    %58 = vector.extract_strided_slice %43 {offsets = [0, 280], sizes = [32, 16], strides = [1, 1]} : vector<32x316xf32> to vector<32x16xf32>
    %59 = vector.extract_strided_slice %43 {offsets = [0, 300], sizes = [32, 16], strides = [1, 1]} : vector<32x316xf32> to vector<32x16xf32>
    %60 = tpu.concatenate %44, %45, %46, %47, %48, %49, %50, %51, %52, %53, %54, %55, %56, %57, %58, %59 in 1 : vector<32x16xf32>, vector<32x16xf32>, vector<32x16xf32>, vector<32x16xf32>, vector<32x16xf32>, vector<32x16xf32>, vector<32x16xf32>, vector<32x16xf32>, vector<32x16xf32>, vector<32x16xf32>, vector<32x16xf32>, vector<32x16xf32>, vector<32x16xf32>, vector<32x16xf32>, vector<32x16xf32>, vector<32x16xf32> -> vector<32x256xf32>
    %61 = tpu.concatenate %60, %60 in 1 : vector<32x256xf32>, vector<32x256xf32> -> vector<32x512xf32>
    %62 = tpu.iota {dimensions = array<i32: 1>} : vector<32x256xi32>
    %c16_i32 = arith.constant 16 : i32
    %c0_i32 = arith.constant 0 : i32
    %63 = arith.cmpi eq, %c16_i32, %c0_i32 : i32
    %c1_i32 = arith.constant 1 : i32
    %64 = arith.select %63, %c1_i32, %c16_i32 : i32
    %65 = vector.broadcast %64 : i32 to vector<32x256xi32>
    %66 = arith.remsi %62, %65 : vector<32x256xi32>
    %c0_i32_15 = arith.constant 0 : i32
    %67 = vector.broadcast %c0_i32_15 : i32 to vector<32x256xi32>
    %68 = arith.cmpi ne, %66, %67 : vector<32x256xi32>
    %c0_i32_16 = arith.constant 0 : i32
    %69 = vector.broadcast %c0_i32_16 : i32 to vector<32x256xi32>
    %70 = arith.cmpi slt, %66, %69 : vector<32x256xi32>
    %c0_i32_17 = arith.constant 0 : i32
    %71 = arith.cmpi slt, %64, %c0_i32_17 : i32
    %72 = vector.broadcast %71 : i1 to vector<32x256xi1>
    %73 = vector.broadcast %72 : vector<32x256xi1> to vector<32x256xi1>
    %74 = arith.xori %70, %73 : vector<32x256xi1>
    %75 = arith.andi %74, %68 : vector<32x256xi1>
    %76 = vector.broadcast %64 : i32 to vector<32x256xi32>
    %77 = arith.addi %66, %76 : vector<32x256xi32>
    %78 = arith.select %75, %77, %66 : vector<32x256xi1>, vector<32x256xi32>
    %79 = vector.extract_strided_slice %61 {offsets = [0, 0], sizes = [32, 256], strides = [1, 1]} : vector<32x512xf32> to vector<32x256xf32>
    %80 = arith.truncf %79 : vector<32x256xf32> to vector<32x256xbf16>
    %c0_18 = arith.constant 0 : index
    %c0_19 = arith.constant 0 : index
    %81 = vector.load %arg4[%c0_18, %c0_19] : memref<512x256xbf16, #tpu.memory_space<vmem>>, vector<32x256xbf16>
    tpu.vector_store %arg4[%c0_18, %c0_19], %80 {strides = array<i32>} : memref<512x256xbf16, #tpu.memory_space<vmem>>, vector<32x256xbf16>,
    %82 = vector.extract_strided_slice %61 {offsets = [0, 16], sizes = [32, 256], strides = [1, 1]} : vector<32x512xf32> to vector<32x256xf32>
    %83 = arith.truncf %82 : vector<32x256xf32> to vector<32x256xbf16>
    %c32 = arith.constant 32 : index
    %c0_20 = arith.constant 0 : index
    %84 = vector.load %arg4[%c32, %c0_20] : memref<512x256xbf16, #tpu.memory_space<vmem>>, vector<32x256xbf16>
    tpu.vector_store %arg4[%c32, %c0_20], %83 {strides = array<i32>} : memref<512x256xbf16, #tpu.memory_space<vmem>>, vector<32x256xbf16>,
    %85 = vector.extract_strided_slice %61 {offsets = [0, 32], sizes = [32, 256], strides = [1, 1]} : vector<32x512xf32> to vector<32x256xf32>
    %86 = arith.truncf %85 : vector<32x256xf32> to vector<32x256xbf16>
    %c64 = arith.constant 64 : index
    %c0_21 = arith.constant 0 : index
    %87 = vector.load %arg4[%c64, %c0_21] : memref<512x256xbf16, #tpu.memory_space<vmem>>, vector<32x256xbf16>
    tpu.vector_store %arg4[%c64, %c0_21], %86 {strides = array<i32>} : memref<512x256xbf16, #tpu.memory_space<vmem>>, vector<32x256xbf16>,
    %88 = vector.extract_strided_slice %61 {offsets = [0, 48], sizes = [32, 256], strides = [1, 1]} : vector<32x512xf32> to vector<32x256xf32>
    %89 = arith.truncf %88 : vector<32x256xf32> to vector<32x256xbf16>
    %c96 = arith.constant 96 : index
    %c0_22 = arith.constant 0 : index
    %90 = vector.load %arg4[%c96, %c0_22] : memref<512x256xbf16, #tpu.memory_space<vmem>>, vector<32x256xbf16>
    tpu.vector_store %arg4[%c96, %c0_22], %89 {strides = array<i32>} : memref<512x256xbf16, #tpu.memory_space<vmem>>, vector<32x256xbf16>,
    %91 = vector.extract_strided_slice %61 {offsets = [0, 64], sizes = [32, 256], strides = [1, 1]} : vector<32x512xf32> to vector<32x256xf32>
    %92 = arith.truncf %91 : vector<32x256xf32> to vector<32x256xbf16>
    %c128 = arith.constant 128 : index
    %c0_23 = arith.constant 0 : index
    %93 = vector.load %arg4[%c128, %c0_23] : memref<512x256xbf16, #tpu.memory_space<vmem>>, vector<32x256xbf16>
    tpu.vector_store %arg4[%c128, %c0_23], %92 {strides = array<i32>} : memref<512x256xbf16, #tpu.memory_space<vmem>>, vector<32x256xbf16>,
    %94 = vector.extract_strided_slice %61 {offsets = [0, 80], sizes = [32, 256], strides = [1, 1]} : vector<32x512xf32> to vector<32x256xf32>
    %95 = arith.truncf %94 : vector<32x256xf32> to vector<32x256xbf16>
    %c160 = arith.constant 160 : index
    %c0_24 = arith.constant 0 : index
    %96 = vector.load %arg4[%c160, %c0_24] : memref<512x256xbf16, #tpu.memory_space<vmem>>, vector<32x256xbf16>
    tpu.vector_store %arg4[%c160, %c0_24], %95 {strides = array<i32>} : memref<512x256xbf16, #tpu.memory_space<vmem>>, vector<32x256xbf16>,
    %97 = vector.extract_strided_slice %61 {offsets = [0, 96], sizes = [32, 256], strides = [1, 1]} : vector<32x512xf32> to vector<32x256xf32>
    %98 = arith.truncf %97 : vector<32x256xf32> to vector<32x256xbf16>
    %c192 = arith.constant 192 : index
    %c0_25 = arith.constant 0 : index
    %99 = vector.load %arg4[%c192, %c0_25] : memref<512x256xbf16, #tpu.memory_space<vmem>>, vector<32x256xbf16>
    tpu.vector_store %arg4[%c192, %c0_25], %98 {strides = array<i32>} : memref<512x256xbf16, #tpu.memory_space<vmem>>, vector<32x256xbf16>,
    %100 = vector.extract_strided_slice %61 {offsets = [0, 112], sizes = [32, 256], strides = [1, 1]} : vector<32x512xf32> to vector<32x256xf32>
    %101 = arith.truncf %100 : vector<32x256xf32> to vector<32x256xbf16>
    %c224 = arith.constant 224 : index
    %c0_26 = arith.constant 0 : index
    %102 = vector.load %arg4[%c224, %c0_26] : memref<512x256xbf16, #tpu.memory_space<vmem>>, vector<32x256xbf16>
    tpu.vector_store %arg4[%c224, %c0_26], %101 {strides = array<i32>} : memref<512x256xbf16, #tpu.memory_space<vmem>>, vector<32x256xbf16>,
    %103 = vector.extract_strided_slice %61 {offsets = [0, 128], sizes = [32, 256], strides = [1, 1]} : vector<32x512xf32> to vector<32x256xf32>
    %104 = arith.truncf %103 : vector<32x256xf32> to vector<32x256xbf16>
    %c256 = arith.constant 256 : index
    %c0_27 = arith.constant 0 : index
    %105 = vector.load %arg4[%c256, %c0_27] : memref<512x256xbf16, #tpu.memory_space<vmem>>, vector<32x256xbf16>
    tpu.vector_store %arg4[%c256, %c0_27], %104 {strides = array<i32>} : memref<512x256xbf16, #tpu.memory_space<vmem>>, vector<32x256xbf16>,
    %106 = vector.extract_strided_slice %61 {offsets = [0, 144], sizes = [32, 256], strides = [1, 1]} : vector<32x512xf32> to vector<32x256xf32>
    %107 = arith.truncf %106 : vector<32x256xf32> to vector<32x256xbf16>
    %c288 = arith.constant 288 : index
    %c0_28 = arith.constant 0 : index
    %108 = vector.load %arg4[%c288, %c0_28] : memref<512x256xbf16, #tpu.memory_space<vmem>>, vector<32x256xbf16>
    tpu.vector_store %arg4[%c288, %c0_28], %107 {strides = array<i32>} : memref<512x256xbf16, #tpu.memory_space<vmem>>, vector<32x256xbf16>,
    %109 = vector.extract_strided_slice %61 {offsets = [0, 160], sizes = [32, 256], strides = [1, 1]} : vector<32x512xf32> to vector<32x256xf32>
    %110 = arith.truncf %109 : vector<32x256xf32> to vector<32x256xbf16>
    %c320 = arith.constant 320 : index
    %c0_29 = arith.constant 0 : index
    %111 = vector.load %arg4[%c320, %c0_29] : memref<512x256xbf16, #tpu.memory_space<vmem>>, vector<32x256xbf16>
    tpu.vector_store %arg4[%c320, %c0_29], %110 {strides = array<i32>} : memref<512x256xbf16, #tpu.memory_space<vmem>>, vector<32x256xbf16>,
    %112 = vector.extract_strided_slice %61 {offsets = [0, 176], sizes = [32, 256], strides = [1, 1]} : vector<32x512xf32> to vector<32x256xf32>
    %113 = arith.truncf %112 : vector<32x256xf32> to vector<32x256xbf16>
    %c352 = arith.constant 352 : index
    %c0_30 = arith.constant 0 : index
    %114 = vector.load %arg4[%c352, %c0_30] : memref<512x256xbf16, #tpu.memory_space<vmem>>, vector<32x256xbf16>
    tpu.vector_store %arg4[%c352, %c0_30], %113 {strides = array<i32>} : memref<512x256xbf16, #tpu.memory_space<vmem>>, vector<32x256xbf16>,
    %115 = vector.extract_strided_slice %61 {offsets = [0, 192], sizes = [32, 256], strides = [1, 1]} : vector<32x512xf32> to vector<32x256xf32>
    %116 = arith.truncf %115 : vector<32x256xf32> to vector<32x256xbf16>
    %c384 = arith.constant 384 : index
    %c0_31 = arith.constant 0 : index
    %117 = vector.load %arg4[%c384, %c0_31] : memref<512x256xbf16, #tpu.memory_space<vmem>>, vector<32x256xbf16>
    tpu.vector_store %arg4[%c384, %c0_31], %116 {strides = array<i32>} : memref<512x256xbf16, #tpu.memory_space<vmem>>, vector<32x256xbf16>,
    %118 = vector.extract_strided_slice %61 {offsets = [0, 208], sizes = [32, 256], strides = [1, 1]} : vector<32x512xf32> to vector<32x256xf32>
    %119 = arith.truncf %118 : vector<32x256xf32> to vector<32x256xbf16>
    %c416 = arith.constant 416 : index
    %c0_32 = arith.constant 0 : index
    %120 = vector.load %arg4[%c416, %c0_32] : memref<512x256xbf16, #tpu.memory_space<vmem>>, vector<32x256xbf16>
    tpu.vector_store %arg4[%c416, %c0_32], %119 {strides = array<i32>} : memref<512x256xbf16, #tpu.memory_space<vmem>>, vector<32x256xbf16>,
    %121 = vector.extract_strided_slice %61 {offsets = [0, 224], sizes = [32, 256], strides = [1, 1]} : vector<32x512xf32> to vector<32x256xf32>
    %122 = arith.truncf %121 : vector<32x256xf32> to vector<32x256xbf16>
    %c448 = arith.constant 448 : index
    %c0_33 = arith.constant 0 : index
    %123 = vector.load %arg4[%c448, %c0_33] : memref<512x256xbf16, #tpu.memory_space<vmem>>, vector<32x256xbf16>
    tpu.vector_store %arg4[%c448, %c0_33], %122 {strides = array<i32>} : memref<512x256xbf16, #tpu.memory_space<vmem>>, vector<32x256xbf16>,
    %124 = vector.extract_strided_slice %61 {offsets = [0, 240], sizes = [32, 256], strides = [1, 1]} : vector<32x512xf32> to vector<32x256xf32>
    %125 = arith.truncf %124 : vector<32x256xf32> to vector<32x256xbf16>
    %c480 = arith.constant 480 : index
    %c0_34 = arith.constant 0 : index
    %126 = vector.load %arg4[%c480, %c0_34] : memref<512x256xbf16, #tpu.memory_space<vmem>>, vector<32x256xbf16>
    tpu.vector_store %arg4[%c480, %c0_34], %125 {strides = array<i32>} : memref<512x256xbf16, #tpu.memory_space<vmem>>, vector<32x256xbf16>,
    %127 = arith.truncf %60 : vector<32x256xf32> to vector<32x256xbf16>
    %c0_35 = arith.constant 0 : index
    %c0_36 = arith.constant 0 : index
    %128 = vector.load %arg5[%c0_35, %c0_36] : memref<512x256xbf16, #tpu.memory_space<vmem>>, vector<32x256xbf16>
    tpu.vector_store %arg5[%c0_35, %c0_36], %127 {strides = array<i32>} : memref<512x256xbf16, #tpu.memory_space<vmem>>, vector<32x256xbf16>,
    %129 = vector.extract_strided_slice %61 {offsets = [0, 255], sizes = [32, 256], strides = [1, 1]} : vector<32x512xf32> to vector<32x256xf32>
    %130 = vector.extract_strided_slice %61 {offsets = [0, 15], sizes = [32, 256], strides = [1, 1]} : vector<32x512xf32> to vector<32x256xf32>
    %c1_i32_37 = arith.constant 1 : i32
    %131 = vector.broadcast %c1_i32_37 : i32 to vector<32x256xi32>
    %132 = arith.cmpi sge, %78, %131 : vector<32x256xi32>
    %133 = arith.select %132, %129, %130 : vector<32x256xi1>, vector<32x256xf32>
    %134 = arith.truncf %133 : vector<32x256xf32> to vector<32x256xbf16>
    %c32_38 = arith.constant 32 : index
    %c0_39 = arith.constant 0 : index
    %135 = vector.load %arg5[%c32_38, %c0_39] : memref<512x256xbf16, #tpu.memory_space<vmem>>, vector<32x256xbf16>
    tpu.vector_store %arg5[%c32_38, %c0_39], %134 {strides = array<i32>} : memref<512x256xbf16, #tpu.memory_space<vmem>>, vector<32x256xbf16>,
    %136 = vector.extract_strided_slice %61 {offsets = [0, 254], sizes = [32, 256], strides = [1, 1]} : vector<32x512xf32> to vector<32x256xf32>
    %137 = vector.extract_strided_slice %61 {offsets = [0, 14], sizes = [32, 256], strides = [1, 1]} : vector<32x512xf32> to vector<32x256xf32>
    %c2_i32 = arith.constant 2 : i32
    %138 = vector.broadcast %c2_i32 : i32 to vector<32x256xi32>
    %139 = arith.cmpi sge, %78, %138 : vector<32x256xi32>
    %140 = arith.select %139, %136, %137 : vector<32x256xi1>, vector<32x256xf32>
    %141 = arith.truncf %140 : vector<32x256xf32> to vector<32x256xbf16>
    %c64_40 = arith.constant 64 : index
    %c0_41 = arith.constant 0 : index
    %142 = vector.load %arg5[%c64_40, %c0_41] : memref<512x256xbf16, #tpu.memory_space<vmem>>, vector<32x256xbf16>
    tpu.vector_store %arg5[%c64_40, %c0_41], %141 {strides = array<i32>} : memref<512x256xbf16, #tpu.memory_space<vmem>>, vector<32x256xbf16>,
    %143 = vector.extract_strided_slice %61 {offsets = [0, 253], sizes = [32, 256], strides = [1, 1]} : vector<32x512xf32> to vector<32x256xf32>
    %144 = vector.extract_strided_slice %61 {offsets = [0, 13], sizes = [32, 256], strides = [1, 1]} : vector<32x512xf32> to vector<32x256xf32>
    %c3_i32 = arith.constant 3 : i32
    %145 = vector.broadcast %c3_i32 : i32 to vector<32x256xi32>
    %146 = arith.cmpi sge, %78, %145 : vector<32x256xi32>
    %147 = arith.select %146, %143, %144 : vector<32x256xi1>, vector<32x256xf32>
    %148 = arith.truncf %147 : vector<32x256xf32> to vector<32x256xbf16>
    %c96_42 = arith.constant 96 : index
    %c0_43 = arith.constant 0 : index
    %149 = vector.load %arg5[%c96_42, %c0_43] : memref<512x256xbf16, #tpu.memory_space<vmem>>, vector<32x256xbf16>
    tpu.vector_store %arg5[%c96_42, %c0_43], %148 {strides = array<i32>} : memref<512x256xbf16, #tpu.memory_space<vmem>>, vector<32x256xbf16>,
    %150 = vector.extract_strided_slice %61 {offsets = [0, 252], sizes = [32, 256], strides = [1, 1]} : vector<32x512xf32> to vector<32x256xf32>
    %151 = vector.extract_strided_slice %61 {offsets = [0, 12], sizes = [32, 256], strides = [1, 1]} : vector<32x512xf32> to vector<32x256xf32>
    %c4_i32 = arith.constant 4 : i32
    %152 = vector.broadcast %c4_i32 : i32 to vector<32x256xi32>
    %153 = arith.cmpi sge, %78, %152 : vector<32x256xi32>
    %154 = arith.select %153, %150, %151 : vector<32x256xi1>, vector<32x256xf32>
    %155 = arith.truncf %154 : vector<32x256xf32> to vector<32x256xbf16>
    %c128_44 = arith.constant 128 : index
    %c0_45 = arith.constant 0 : index
    %156 = vector.load %arg5[%c128_44, %c0_45] : memref<512x256xbf16, #tpu.memory_space<vmem>>, vector<32x256xbf16>
    tpu.vector_store %arg5[%c128_44, %c0_45], %155 {strides = array<i32>} : memref<512x256xbf16, #tpu.memory_space<vmem>>, vector<32x256xbf16>,
    %157 = vector.extract_strided_slice %61 {offsets = [0, 251], sizes = [32, 256], strides = [1, 1]} : vector<32x512xf32> to vector<32x256xf32>
    %158 = vector.extract_strided_slice %61 {offsets = [0, 11], sizes = [32, 256], strides = [1, 1]} : vector<32x512xf32> to vector<32x256xf32>
    %c5_i32 = arith.constant 5 : i32
    %159 = vector.broadcast %c5_i32 : i32 to vector<32x256xi32>
    %160 = arith.cmpi sge, %78, %159 : vector<32x256xi32>
    %161 = arith.select %160, %157, %158 : vector<32x256xi1>, vector<32x256xf32>
    %162 = arith.truncf %161 : vector<32x256xf32> to vector<32x256xbf16>
    %c160_46 = arith.constant 160 : index
    %c0_47 = arith.constant 0 : index
    %163 = vector.load %arg5[%c160_46, %c0_47] : memref<512x256xbf16, #tpu.memory_space<vmem>>, vector<32x256xbf16>
    tpu.vector_store %arg5[%c160_46, %c0_47], %162 {strides = array<i32>} : memref<512x256xbf16, #tpu.memory_space<vmem>>, vector<32x256xbf16>,
    %164 = vector.extract_strided_slice %61 {offsets = [0, 250], sizes = [32, 256], strides = [1, 1]} : vector<32x512xf32> to vector<32x256xf32>
    %165 = vector.extract_strided_slice %61 {offsets = [0, 10], sizes = [32, 256], strides = [1, 1]} : vector<32x512xf32> to vector<32x256xf32>
    %c6_i32 = arith.constant 6 : i32
    %166 = vector.broadcast %c6_i32 : i32 to vector<32x256xi32>
    %167 = arith.cmpi sge, %78, %166 : vector<32x256xi32>
    %168 = arith.select %167, %164, %165 : vector<32x256xi1>, vector<32x256xf32>
    %169 = arith.truncf %168 : vector<32x256xf32> to vector<32x256xbf16>
    %c192_48 = arith.constant 192 : index
    %c0_49 = arith.constant 0 : index
    %170 = vector.load %arg5[%c192_48, %c0_49] : memref<512x256xbf16, #tpu.memory_space<vmem>>, vector<32x256xbf16>
    tpu.vector_store %arg5[%c192_48, %c0_49], %169 {strides = array<i32>} : memref<512x256xbf16, #tpu.memory_space<vmem>>, vector<32x256xbf16>,
    %171 = vector.extract_strided_slice %61 {offsets = [0, 249], sizes = [32, 256], strides = [1, 1]} : vector<32x512xf32> to vector<32x256xf32>
    %172 = vector.extract_strided_slice %61 {offsets = [0, 9], sizes = [32, 256], strides = [1, 1]} : vector<32x512xf32> to vector<32x256xf32>
    %c7_i32 = arith.constant 7 : i32
    %173 = vector.broadcast %c7_i32 : i32 to vector<32x256xi32>
    %174 = arith.cmpi sge, %78, %173 : vector<32x256xi32>
    %175 = arith.select %174, %171, %172 : vector<32x256xi1>, vector<32x256xf32>
    %176 = arith.truncf %175 : vector<32x256xf32> to vector<32x256xbf16>
    %c224_50 = arith.constant 224 : index
    %c0_51 = arith.constant 0 : index
    %177 = vector.load %arg5[%c224_50, %c0_51] : memref<512x256xbf16, #tpu.memory_space<vmem>>, vector<32x256xbf16>
    tpu.vector_store %arg5[%c224_50, %c0_51], %176 {strides = array<i32>} : memref<512x256xbf16, #tpu.memory_space<vmem>>, vector<32x256xbf16>,
    %178 = vector.extract_strided_slice %61 {offsets = [0, 248], sizes = [32, 256], strides = [1, 1]} : vector<32x512xf32> to vector<32x256xf32>
    %179 = vector.extract_strided_slice %61 {offsets = [0, 8], sizes = [32, 256], strides = [1, 1]} : vector<32x512xf32> to vector<32x256xf32>
    %c8_i32 = arith.constant 8 : i32
    %180 = vector.broadcast %c8_i32 : i32 to vector<32x256xi32>
    %181 = arith.cmpi sge, %78, %180 : vector<32x256xi32>
    %182 = arith.select %181, %178, %179 : vector<32x256xi1>, vector<32x256xf32>
    %183 = arith.truncf %182 : vector<32x256xf32> to vector<32x256xbf16>
    %c256_52 = arith.constant 256 : index
    %c0_53 = arith.constant 0 : index
    %184 = vector.load %arg5[%c256_52, %c0_53] : memref<512x256xbf16, #tpu.memory_space<vmem>>, vector<32x256xbf16>
    tpu.vector_store %arg5[%c256_52, %c0_53], %183 {strides = array<i32>} : memref<512x256xbf16, #tpu.memory_space<vmem>>, vector<32x256xbf16>,
    %185 = vector.extract_strided_slice %61 {offsets = [0, 247], sizes = [32, 256], strides = [1, 1]} : vector<32x512xf32> to vector<32x256xf32>
    %186 = vector.extract_strided_slice %61 {offsets = [0, 7], sizes = [32, 256], strides = [1, 1]} : vector<32x512xf32> to vector<32x256xf32>
    %c9_i32 = arith.constant 9 : i32
    %187 = vector.broadcast %c9_i32 : i32 to vector<32x256xi32>
    %188 = arith.cmpi sge, %78, %187 : vector<32x256xi32>
    %189 = arith.select %188, %185, %186 : vector<32x256xi1>, vector<32x256xf32>
    %190 = arith.truncf %189 : vector<32x256xf32> to vector<32x256xbf16>
    %c288_54 = arith.constant 288 : index
    %c0_55 = arith.constant 0 : index
    %191 = vector.load %arg5[%c288_54, %c0_55] : memref<512x256xbf16, #tpu.memory_space<vmem>>, vector<32x256xbf16>
    tpu.vector_store %arg5[%c288_54, %c0_55], %190 {strides = array<i32>} : memref<512x256xbf16, #tpu.memory_space<vmem>>, vector<32x256xbf16>,
    %192 = vector.extract_strided_slice %61 {offsets = [0, 246], sizes = [32, 256], strides = [1, 1]} : vector<32x512xf32> to vector<32x256xf32>
    %193 = vector.extract_strided_slice %61 {offsets = [0, 6], sizes = [32, 256], strides = [1, 1]} : vector<32x512xf32> to vector<32x256xf32>
    %c10_i32 = arith.constant 10 : i32
    %194 = vector.broadcast %c10_i32 : i32 to vector<32x256xi32>
    %195 = arith.cmpi sge, %78, %194 : vector<32x256xi32>
    %196 = arith.select %195, %192, %193 : vector<32x256xi1>, vector<32x256xf32>
    %197 = arith.truncf %196 : vector<32x256xf32> to vector<32x256xbf16>
    %c320_56 = arith.constant 320 : index
    %c0_57 = arith.constant 0 : index
    %198 = vector.load %arg5[%c320_56, %c0_57] : memref<512x256xbf16, #tpu.memory_space<vmem>>, vector<32x256xbf16>
    tpu.vector_store %arg5[%c320_56, %c0_57], %197 {strides = array<i32>} : memref<512x256xbf16, #tpu.memory_space<vmem>>, vector<32x256xbf16>,
    %199 = vector.extract_strided_slice %61 {offsets = [0, 245], sizes = [32, 256], strides = [1, 1]} : vector<32x512xf32> to vector<32x256xf32>
    %200 = vector.extract_strided_slice %61 {offsets = [0, 5], sizes = [32, 256], strides = [1, 1]} : vector<32x512xf32> to vector<32x256xf32>
    %c11_i32 = arith.constant 11 : i32
    %201 = vector.broadcast %c11_i32 : i32 to vector<32x256xi32>
    %202 = arith.cmpi sge, %78, %201 : vector<32x256xi32>
    %203 = arith.select %202, %199, %200 : vector<32x256xi1>, vector<32x256xf32>
    %204 = arith.truncf %203 : vector<32x256xf32> to vector<32x256xbf16>
    %c352_58 = arith.constant 352 : index
    %c0_59 = arith.constant 0 : index
    %205 = vector.load %arg5[%c352_58, %c0_59] : memref<512x256xbf16, #tpu.memory_space<vmem>>, vector<32x256xbf16>
    tpu.vector_store %arg5[%c352_58, %c0_59], %204 {strides = array<i32>} : memref<512x256xbf16, #tpu.memory_space<vmem>>, vector<32x256xbf16>,
    %206 = vector.extract_strided_slice %61 {offsets = [0, 244], sizes = [32, 256], strides = [1, 1]} : vector<32x512xf32> to vector<32x256xf32>
    %207 = vector.extract_strided_slice %61 {offsets = [0, 4], sizes = [32, 256], strides = [1, 1]} : vector<32x512xf32> to vector<32x256xf32>
    %c12_i32 = arith.constant 12 : i32
    %208 = vector.broadcast %c12_i32 : i32 to vector<32x256xi32>
    %209 = arith.cmpi sge, %78, %208 : vector<32x256xi32>
    %210 = arith.select %209, %206, %207 : vector<32x256xi1>, vector<32x256xf32>
    %211 = arith.truncf %210 : vector<32x256xf32> to vector<32x256xbf16>
    %c384_60 = arith.constant 384 : index
    %c0_61 = arith.constant 0 : index
    %212 = vector.load %arg5[%c384_60, %c0_61] : memref<512x256xbf16, #tpu.memory_space<vmem>>, vector<32x256xbf16>
    tpu.vector_store %arg5[%c384_60, %c0_61], %211 {strides = array<i32>} : memref<512x256xbf16, #tpu.memory_space<vmem>>, vector<32x256xbf16>,
    %213 = vector.extract_strided_slice %61 {offsets = [0, 243], sizes = [32, 256], strides = [1, 1]} : vector<32x512xf32> to vector<32x256xf32>
    %214 = vector.extract_strided_slice %61 {offsets = [0, 3], sizes = [32, 256], strides = [1, 1]} : vector<32x512xf32> to vector<32x256xf32>
    %c13_i32 = arith.constant 13 : i32
    %215 = vector.broadcast %c13_i32 : i32 to vector<32x256xi32>
    %216 = arith.cmpi sge, %78, %215 : vector<32x256xi32>
    %217 = arith.select %216, %213, %214 : vector<32x256xi1>, vector<32x256xf32>
    %218 = arith.truncf %217 : vector<32x256xf32> to vector<32x256xbf16>
    %c416_62 = arith.constant 416 : index
    %c0_63 = arith.constant 0 : index
    %219 = vector.load %arg5[%c416_62, %c0_63] : memref<512x256xbf16, #tpu.memory_space<vmem>>, vector<32x256xbf16>
    tpu.vector_store %arg5[%c416_62, %c0_63], %218 {strides = array<i32>} : memref<512x256xbf16, #tpu.memory_space<vmem>>, vector<32x256xbf16>,
    %220 = vector.extract_strided_slice %61 {offsets = [0, 242], sizes = [32, 256], strides = [1, 1]} : vector<32x512xf32> to vector<32x256xf32>
    %221 = vector.extract_strided_slice %61 {offsets = [0, 2], sizes = [32, 256], strides = [1, 1]} : vector<32x512xf32> to vector<32x256xf32>
    %c14_i32 = arith.constant 14 : i32
    %222 = vector.broadcast %c14_i32 : i32 to vector<32x256xi32>
    %223 = arith.cmpi sge, %78, %222 : vector<32x256xi32>
    %224 = arith.select %223, %220, %221 : vector<32x256xi1>, vector<32x256xf32>
    %225 = arith.truncf %224 : vector<32x256xf32> to vector<32x256xbf16>
    %c448_64 = arith.constant 448 : index
    %c0_65 = arith.constant 0 : index
    %226 = vector.load %arg5[%c448_64, %c0_65] : memref<512x256xbf16, #tpu.memory_space<vmem>>, vector<32x256xbf16>
    tpu.vector_store %arg5[%c448_64, %c0_65], %225 {strides = array<i32>} : memref<512x256xbf16, #tpu.memory_space<vmem>>, vector<32x256xbf16>,
    %227 = vector.extract_strided_slice %61 {offsets = [0, 241], sizes = [32, 256], strides = [1, 1]} : vector<32x512xf32> to vector<32x256xf32>
    %228 = vector.extract_strided_slice %61 {offsets = [0, 1], sizes = [32, 256], strides = [1, 1]} : vector<32x512xf32> to vector<32x256xf32>
    %c15_i32 = arith.constant 15 : i32
    %229 = vector.broadcast %c15_i32 : i32 to vector<32x256xi32>
    %230 = arith.cmpi sge, %78, %229 : vector<32x256xi32>
    %231 = arith.select %230, %227, %228 : vector<32x256xi1>, vector<32x256xf32>
    %232 = arith.truncf %231 : vector<32x256xf32> to vector<32x256xbf16>
    %c480_66 = arith.constant 480 : index
    %c0_67 = arith.constant 0 : index
    %233 = vector.load %arg5[%c480_66, %c0_67] : memref<512x256xbf16, #tpu.memory_space<vmem>>, vector<32x256xbf16>
    tpu.vector_store %arg5[%c480_66, %c0_67], %232 {strides = array<i32>} : memref<512x256xbf16, #tpu.memory_space<vmem>>, vector<32x256xbf16>,
    %c0_68 = arith.constant 0 : index
    %c0_69 = arith.constant 0 : index
    %234 = vector.load %arg4[%c0_68, %c0_69] : memref<512x256xbf16, #tpu.memory_space<vmem>>, vector<512x256xbf16>
    %c0_70 = arith.constant 0 : index
    %c0_71 = arith.constant 0 : index
    %235 = vector.load %arg5[%c0_70, %c0_71] : memref<512x256xbf16, #tpu.memory_space<vmem>>, vector<256x256xbf16>
    %cst_72 = arith.constant dense<0.000000e+00> : vector<512x256xf32>
    %236 = tpu.matmul %234, %235, %cst_72 {dimension_numbers = #tpu.dot_dimension_numbers<[1], [1], [0], [0], [0, 0, 1, 0], [], []>} : vector<512x256xbf16>, vector<256x256xbf16>, vector<512x256xf32> -> vector<512x256xf32>
    %cst_73 = arith.constant dense<0xFF800000> : vector<512xf32>
    %237 = vector.multi_reduction <maximumf>, %236, %cst_73 [1] : vector<512x256xf32> to vector<512xf32>
    %238 = vector.shape_cast %237 : vector<512xf32> to vector<512x1xf32>
    %c256_74 = arith.constant 256 : index
    %c0_75 = arith.constant 0 : index
    %239 = vector.load %arg5[%c256_74, %c0_75] : memref<512x256xbf16, #tpu.memory_space<vmem>>, vector<256x256xbf16>
    %cst_76 = arith.constant dense<0.000000e+00> : vector<512x256xf32>
    %240 = tpu.matmul %234, %239, %cst_76 {dimension_numbers = #tpu.dot_dimension_numbers<[1], [1], [0], [0], [0, 0, 1, 0], [], []>} : vector<512x256xbf16>, vector<256x256xbf16>, vector<512x256xf32> -> vector<512x256xf32>
    %cst_77 = arith.constant dense<0xFF800000> : vector<512xf32>
    %241 = vector.multi_reduction <maximumf>, %240, %cst_77 [1] : vector<512x256xf32> to vector<512xf32>
    %242 = vector.shape_cast %241 : vector<512xf32> to vector<512x1xf32>
    %243 = tpu.concatenate %238, %242 in 1 : vector<512x1xf32>, vector<512x1xf32> -> vector<512x2xf32>
    %244 = vector.shape_cast %243 : vector<512x2xf32> to vector<16x32x2xf32>
    %c0_78 = arith.constant 0 : index
    %c0_79 = arith.constant 0 : index
    %c0_80 = arith.constant 0 : index
    %c0_81 = arith.constant 0 : index
    %245 = vector.load %arg3[%c0_78, %c0_79, %c0_80, %c0_81] : memref<1x16x32x2xf32, #tpu.memory_space<vmem>>, vector<1x16x32x2xf32>
    %246 = vector.shape_cast %245 : vector<1x16x32x2xf32> to vector<16x32x2xf32>
    %247 = vector.shape_cast %244 : vector<16x32x2xf32> to vector<1x16x32x2xf32>
    tpu.vector_store %arg3[%c0_78, %c0_79, %c0_80, %c0_81], %247 {strides = array<i32>} : memref<1x16x32x2xf32, #tpu.memory_space<vmem>>, vector<1x16x32x2xf32>,
    return
  }
  func.func @transform_0(%arg0: i32) -> (i32, i32, i32) {
    %c0_i32 = arith.constant 0 : i32
    %c0_i32_0 = arith.constant 0 : i32
    %c0_i32_1 = arith.constant 0 : i32
    return %arg0, %c0_i32, %c0_i32_0 : i32, i32, i32
  }
  func.func @transform_1(%arg0: i32) -> (i32, i32) {
    %c0_i32 = arith.constant 0 : i32
    %c0_i32_0 = arith.constant 0 : i32
    %c0_i32_1 = arith.constant 0 : i32
    return %c0_i32, %c0_i32_0 : i32, i32
  }
  func.func @transform_2(%arg0: i32) -> (i32, i32, i32, i32) {
    %c0_i32 = arith.constant 0 : i32
    %c0_i32_0 = arith.constant 0 : i32
    %c0_i32_1 = arith.constant 0 : i32
    %c0_i32_2 = arith.constant 0 : i32
    return %arg0, %c0_i32, %c0_i32_0, %c0_i32_1 : i32, i32, i32, i32
  }
}

</mosaic_0001>

<bundles_post_ra>
// kernel: cooc_layer_forward.1
= control target key start
LH: loop header
LB: loop body
LE: loop exit
PB: predicated region body
PF: predicated region fallthrough
CT: control target
= control target key end

     0   :  { %s7336_s9 = smov 0   ;;  %s10265_s0 = inlined_call_operand.vmem [shape: f32[2,8,400], index: 0, kind: input, shape index: {}]   ;;  %s10266_s1 = inlined_call_operand.vmem [shape: f32[32,8], index: 1, kind: input, shape index: {}]   ;;  %s10267_s2 = inlined_call_operand.vmem [shape: f32[2,16,32,2], index: 2, kind: output, shape index: {}]  }
   0x1 LB: > { %s5773_s10 = sadd.s32 4294967295, %s7273_s9   ;;  %p5777_p0 = scmp.ge.s32.totalorder %s7273_s9, 1  ;;  %s7273_s9 = sphi %s7336_s9, %s12_s9  }
   0x2   : > { %p112_p1 = scmp.lt.s32.totalorder %s7273_s9, 3 }
   0x4   : > { %p113_p2 = pnand %p5777_p0, %p112_p1 }
   0x6   : > { %116 = sbr.rel (%p113_p2) target bundleno = 2330 (0x91a), region = 28 }
   0xb   : > { %p134_p3 = scmp.lt.s32.totalorder %s5773_s10, 1  ;;  %v144_v0 = vld [vmem:[%s10266_s1] sm:$0xff]  ;;  %vm10268_vm0 = vcmask 64512   ;;  %v145_v5 = vld [vmem:[%s10266_s1 + $0x8] sm:$0xff]  ;;  %v146_v6 = vld [vmem:[%s10266_s1 + $0x10] sm:$0xff]  ;;  %s7275_s23 = smov 108  }
   0xc   : > { %v147_v7 = vld [vmem:[%s10266_s1 + $0x18] sm:$0xff]  ;;  %s7276_s24 = smov 88   ;;  %s7277_s25 = smov 68   ;;  %vm357_vm1 = vcmask 883712   ;;  %vm438_vm2 = vcmask 719872   ;;  %vm495_vm3 = vcmask 556032  }
   0xd   : > { %s10695_s10 = smov (!%p134_p3, %s5773_s10), 1  ;;  %s7278_s26 = smov 48   ;;  %vm10282_vm4 = vcmask 392192   ;;  %vm10272_vm5 = vcmask 1039360   ;;  %vm10271_vm6 = vcmask 1031168   ;;  %vm10270_vm7 = vcmask 1022976  }
   0xe   : > { %s6312_s11 = sshll.u32 %s10695_s10, 5  ;;  %s7279_s27 = smov 127   ;;  %vm10269_vm8 = vcmask 1014784   ;;  %vm10273_vm9 = vcmask 130048   ;;  %vm10281_vm10 = vcmask 261120   ;;  %vm1001_vm11 = vcmask 850944  }
   0xf   : > { %s138_s14 = scalar_lea.vmem %s10265_s0, %s6312_s11  ;;  %s7280_s28 = smov 126   ;;  %vm10283_vm12 = vcmask 523264   ;;  %vm10284_vm13 = vcmask 654336   ;;  %vm1146_vm14 = vcmask 785408   ;;  %vm1151_vm15 = vcmask 916480  }
  0x10   : > { %v148_v1 = vld [vmem:[%s138_s14] sm:$0xff]  ;;  %v149_v2 = vld [vmem:[%s138_s14 + $0x8] sm:$0xff]  ;;  %v150_v3 = vld [vmem:[%s138_s14 + $0x10] sm:$0xff]  ;;  %s7281_s29 = smov 125   ;;  %s7282_s30 = smov 124  }
  0x11   : > { %180 = vmatpush.msra.mxu0 %v148_v1  ;;  %209 = vmatpush.msra.mxu1 %v149_v2  ;;  %v151_v4 = vld [vmem:[%s138_s14 + $0x18] sm:$0xff]  ;;  %s7283_s3 = smov 104   ;;  %s7284_s4 = smov 72  }
  0x12   : > { %238 = vmatpush.msra.mxu2 %v150_v3  ;;  %5782 = vmatmul.msk.f32.vlgmr.msra.gmra.mxu0 %vm10268_vm0, %v144_v0  ;;  %s7285_s5 = smov 76   ;;  %s7286_s6 = smov 116  }
  0x13   : > { %5786 = vmatmul.msk.f32.vlgmr.msra.gmra.mxu1 %vm10268_vm0, %v144_v0  ;;  %5790 = vmatmul.msk.f32.vlgmr.msra.gmra.mxu2 %vm10268_vm0, %v144_v0  ;;  %s7287_s7 = smov 120   ;;  %s7288_s8 = smov 96  }
  0x14   : > { %267 = vmatpush.msra.mxu3 %v151_v4  ;;  %s7289_s11 = smov 112   ;;  %s7290_s12 = smov 84  }
  0x15   : > { %5794 = vmatmul.msk.f32.vlgmr.msra.gmra.mxu3 %vm10268_vm0, %v144_v0  ;;  %s7291_s13 = smov 92   ;;  %s7292_s14 = smov 100  }
  0x16   : > { %s7293_s15 = smov 80   ;;  %s7294_s16 = smov 3  }
  0x17   : > { %s7295_s17 = smov 119   ;;  %s7296_s18 = smov 7  }
  0x18   : > { %s7297_s19 = smov 115   ;;  %s7298_s20 = smov 64  }
  0x19   : > { %s7299_s21 = smov 32   ;;  %s7300_s22 = smov 6  }
  0x1a   : > { %5783 = vmatmul.msk.f32.gmra.mxu0 %vm10268_vm0, %v145_v5 }
  0x1b   : > { %5787 = vmatmul.msk.f32.gmra.mxu1 %vm10268_vm0, %v145_v5  ;;  %5791 = vmatmul.msk.f32.gmra.mxu2 %vm10268_vm0, %v145_v5 }
  0x1d   : > { %5795 = vmatmul.msk.f32.gmra.mxu3 %vm10268_vm0, %v145_v5 }
  0x22   : > { %5784 = vmatmul.msk.f32.gmra.mxu0 %vm10268_vm0, %v146_v6 }
  0x23   : > { %5788 = vmatmul.msk.f32.gmra.mxu1 %vm10268_vm0, %v146_v6  ;;  %5792 = vmatmul.msk.f32.gmra.mxu2 %vm10268_vm0, %v146_v6 }
  0x25   : > { %5796 = vmatmul.msk.f32.gmra.mxu3 %vm10268_vm0, %v146_v6 }
  0x2a   : > { %5785 = vmatmul.msk.f32.gmra.mxu0 %vm10268_vm0, %v147_v7 }
  0x2b   : > { %5789 = vmatmul.msk.f32.gmra.mxu1 %vm10268_vm0, %v147_v7  ;;  %5793 = vmatmul.msk.f32.gmra.mxu2 %vm10268_vm0, %v147_v7 }
  0x2d   : > { %5797 = vmatmul.msk.f32.gmra.mxu3 %vm10268_vm0, %v147_v7 }
  0x8f   : > { %v182_v8 = vpop.f32.mrf.mxu0 }
  0x90   : > { %v281_v9 = vmax.f32 %v182_v8, 0.0  ;;  %v211_v10 = vpop.f32.mrf.mxu1 }
  0x91   : > { %v282_v11 = vmax.f32 %v211_v10, 0.0 }
  0x92   : > { %v309_v12 = vmul.f32 0.24420135, %v281_v9  ;;  %v390_v19 = vmul.f32 0.40261996, %v281_v9  ;;  %v7395_v29 = vmul.f32 0.054488685, %v281_v9 }
  0x93   : > { %v391_v13 = vmul.f32 0.40261996, %v282_v11  ;;  %v310_v16 = vmul.f32 0.24420135, %v282_v11  ;;  %v7384_v20 = vmul.f32 0.054488685, %v282_v11 }
  0x94   : > { %333 = vrot.lane.b32.xlu0 %v309_v12, %s7275_s23 }
  0x95   : > { %416 = vrot.lane.b32.xlu1 %v391_v13, %s7276_s24 }
  0x96   : > { %v240_v14 = vpop.f32.mrf.mxu2 }
  0x97   : > { %v283_v15 = vmax.f32 %v240_v14, 0.0  ;;  %v185_v23 = vpop.f32.mrf.mxu0 }
  0x98   : > { %v214_v22 = vpop.f32.mrf.mxu1  ;;  %v285_v25 = vmax.f32 %v185_v23, 0.0  ;;  %v269_v28 = vpop.f32.mrf.mxu3 }
  0x99   : > { %v392_v17 = vmul.f32 0.40261996, %v283_v15  ;;  %v311_v18 = vmul.f32 0.24420135, %v283_v15  ;;  %v7389_v21 = vmul.f32 0.054488685, %v283_v15 }
  0x9a   : > { %v286_v24 = vmax.f32 %v214_v22, 0.0  ;;  %v312_v27 = vmul.f32 0.24420135, %v285_v25  ;;  %v284_v30 = vmax.f32 %v269_v28, 0.0  ;;  %v393_v37 = vmul.f32 0.40261996, %v285_v25 }
  0x9b   : > { %418 = vrot.lane.b32.xlu2 %v392_v17, %s7276_s24  ;;  %v7411_v40 = vmul.f32 0.054488685, %v285_v25 }
  0x9c   : > { %335 = vrot.lane.b32.xlu0 %v310_v16, %s7275_s23  ;;  %v313_v26 = vmul.f32 0.24420135, %v286_v24  ;;  %v7401_v31 = vmul.f32 0.054488685, %v286_v24  ;;  %v528_v32 = vmul.f32 0.054488685, %v284_v30 }
  0x9d   : > { %473 = vrot.lane.b32.xlu1 %v310_v16, %s7277_s25  ;;  %v394_v34 = vmul.f32 0.40261996, %v286_v24 }
  0x9e   : > { %v243_v33 = vpop.f32.mrf.mxu2 }
  0x9f   : > { %v287_v35 = vmax.f32 %v243_v33, 0.0  ;;  %v188_v43 = vpop.f32.mrf.mxu0 }
  0xa0   : > { %v272_v39 = vpop.f32.mrf.mxu3  ;;  %v217_v45 = vpop.f32.mrf.mxu1  ;;  %v289_v46 = vmax.f32 %v188_v43, 0.0 }
  0xa1   : > { %v314_v36 = vmul.f32 0.24420135, %v287_v35  ;;  %v395_v38 = vmul.f32 0.40261996, %v287_v35  ;;  %v288_v41 = vmax.f32 %v272_v39, 0.0  ;;  %v290_v47 = vmax.f32 %v217_v45, 0.0 }
  0xa2   : > { %v7416_v42 = vmul.f32 0.054488685, %v287_v35  ;;  %v7422_v48 = vmul.f32 0.054488685, %v289_v46  ;;  %v315_v49 = vmul.f32 0.24420135, %v289_v46 }
  0xa3   : > { %475 = vrot.lane.b32.xlu2 %v311_v18, %s7277_s25  ;;  %v529_v44 = vmul.f32 0.054488685, %v288_v41  ;;  %v316_v51 = vmul.f32 0.24420135, %v290_v47  ;;  %v396_v54 = vmul.f32 0.40261996, %v289_v46 }
  0xa4   : > { %414 = vrot.lane.b32.xlu0 %v390_v19, %s7276_s24  ;;  %v397_v55 = vmul.f32 0.40261996, %v290_v47  ;;  %v7434_v57 = vmul.f32 0.054488685, %v290_v47 }
  0xa5   : > { %550 = vrot.lane.b32.xlu1 %v7384_v20, %s7278_s26 }
  0xa6   : > { %v246_v50 = vpop.f32.mrf.mxu2 }
  0xa7   : > { %v291_v52 = vmax.f32 %v246_v50, 0.0  ;;  %v191_v60 = vpop.f32.mrf.mxu0 }
  0xa8   : > { %v275_v58 = vpop.f32.mrf.mxu3  ;;  %v220_v61 = vpop.f32.mrf.mxu1  ;;  %v293_v63 = vmax.f32 %v191_v60, 0.0 }
  0xa9   : > { %v317_v53 = vmul.f32 0.24420135, %v291_v52  ;;  %v398_v56 = vmul.f32 0.40261996, %v291_v52  ;;  %v7436_v59 = vmul.f32 0.054488685, %v291_v52 }
  0xaa   : > { %v292_v62 = vmax.f32 %v275_v58, 0.0  ;;  %v294_v1 = vmax.f32 %v220_v61, 0.0  ;;  %v318_v3 = vmul.f32 0.24420135, %v293_v63  ;;  %v399_v9 = vmul.f32 0.40261996, %v293_v63 }
  0xab   : > { %552 = vrot.lane.b32.xlu2 %v7389_v21, %s7278_s26  ;;  %v7460_v22 = vmul.f32 0.054488685, %v293_v63 }
  0xac   : > { %471 = vrot.lane.b32.xlu0 %v309_v12, %s7277_s25  ;;  %v530_v2 = vmul.f32 0.054488685, %v292_v62  ;;  %v319_v5 = vmul.f32 0.24420135, %v294_v1  ;;  %v400_v10 = vmul.f32 0.40261996, %v294_v1 }
  0xad   : > { %337 = vrot.lane.b32.xlu1 %v311_v18, %s7275_s23  ;;  %v7458_v18 = vmul.f32 0.054488685, %v294_v1 }
  0xae   : > { %v249_v4 = vpop.f32.mrf.mxu2 }
  0xaf   : > { %v295_v6 = vmax.f32 %v249_v4, 0.0 }
  0xb0   : > { %v278_v19 = vpop.f32.mrf.mxu3 }
  0xb1   : > { %v320_v8 = vmul.f32 0.24420135, %v295_v6  ;;  %v401_v14 = vmul.f32 0.40261996, %v295_v6  ;;  %v296_v23 = vmax.f32 %v278_v19, 0.0 }
  0xb3   : > { %341 = vrot.lane.b32.xlu2 %v313_v26, %s7275_s23  ;;  %v531_v28 = vmul.f32 0.054488685, %v296_v23 }
  0xb4   : > { %548 = vrot.lane.b32.xlu0 %v7395_v29, %s7278_s26 }
  0xb5   : > { %339 = vrot.lane.b32.xlu1 %v312_v27, %s7275_s23 }
  0xbb   : > { %558 = vrot.lane.b32.xlu2 %v7401_v31, %s7278_s26 }
  0xbc   : > { %554 = vrot.lane.b32.xlu0 %v528_v32, %s7278_s26 }
  0xbd   : > { %422 = vrot.lane.b32.xlu1 %v394_v34, %s7276_s24 }
  0xc3   : > { %343 = vrot.lane.b32.xlu2 %v314_v36, %s7275_s23 }
  0xc4   : > { %420 = vrot.lane.b32.xlu0 %v393_v37, %s7276_s24 }
  0xc5   : > { %479 = vrot.lane.b32.xlu1 %v313_v26, %s7277_s25 }
  0xcb   : > { %424 = vrot.lane.b32.xlu2 %v395_v38, %s7276_s24 }
  0xcc   : > { %477 = vrot.lane.b32.xlu0 %v312_v27, %s7277_s25  ;;  %v7469_v27 = vmul.f32 0.054488685, %v295_v6 }
  0xcd   : > { %556 = vrot.lane.b32.xlu1 %v7411_v40, %s7278_s26 }
  0xd3   : > { %481 = vrot.lane.b32.xlu2 %v314_v36, %s7277_s25 }
  0xd4   : > { %560 = vrot.lane.b32.xlu0 %v7416_v42, %s7278_s26 }
  0xd5   : > { %562 = vrot.lane.b32.xlu1 %v529_v44, %s7278_s26 }
  0xdb   : > { %564 = vrot.lane.b32.xlu2 %v7422_v48, %s7278_s26 }
  0xdc   : > { %345 = vrot.lane.b32.xlu0 %v315_v49, %s7275_s23 }
  0xdd   : > { %347 = vrot.lane.b32.xlu1 %v316_v51, %s7275_s23 }
  0xe3   : > { %349 = vrot.lane.b32.xlu2 %v317_v53, %s7275_s23 }
  0xe4   : > { %426 = vrot.lane.b32.xlu0 %v396_v54, %s7276_s24 }
  0xe5   : > { %428 = vrot.lane.b32.xlu1 %v397_v55, %s7276_s24 }
  0xeb   : > { %430 = vrot.lane.b32.xlu2 %v398_v56, %s7276_s24 }
  0xec   : > { %483 = vrot.lane.b32.xlu0 %v315_v49, %s7277_s25 }
  0xed   : > { %485 = vrot.lane.b32.xlu1 %v316_v51, %s7277_s25 }
  0xf3   : > { %487 = vrot.lane.b32.xlu2 %v317_v53, %s7277_s25 }
  0xf4   : > { %566 = vrot.lane.b32.xlu0 %v7434_v57, %s7278_s26 }
  0xf5   : > { %v7441_v0 = vpop.permute.xlu2 %418  ;;  %568 = vrot.lane.b32.xlu1 %v7436_v59, %s7278_s26 }
  0xfb   : > { %570 = vrot.lane.b32.xlu2 %v530_v2, %s7278_s26 }
  0xfc   : > { %351 = vrot.lane.b32.xlu0 %v318_v3, %s7275_s23 }
  0xfd   : > { %v7447_v7 = vpop.permute.xlu2 %475  ;;  %353 = vrot.lane.b32.xlu1 %v319_v5, %s7275_s23 }
 0x103   : > { %355 = vrot.lane.b32.xlu2 %v320_v8, %s7275_s23 }
 0x104   : > { %432 = vrot.lane.b32.xlu0 %v399_v9, %s7276_s24 }
 0x105   : > { %v553_v11 = vpop.permute.xlu2 %552  ;;  %434 = vrot.lane.b32.xlu1 %v400_v10, %s7276_s24 }
 0x106   : > { %v334_v12 = vpop.permute.xlu0 %333 }
 0x107   : > { %v417_v13 = vpop.permute.xlu1 %416 }
 0x108   : > { %v440_v38 = vsel %vm438_vm2, %v417_v13, %v7441_v0 }
 0x10b   : > { %436 = vrot.lane.b32.xlu2 %v401_v14, %s7276_s24 }
 0x10c   : > { %489 = vrot.lane.b32.xlu0 %v318_v3, %s7277_s25 }
 0x10d   : > { %v7455_v15 = vpop.permute.xlu2 %341  ;;  %491 = vrot.lane.b32.xlu1 %v319_v5, %s7277_s25 }
 0x10e   : > { %v336_v16 = vpop.permute.xlu0 %335 }
 0x10f   : > { %v474_v17 = vpop.permute.xlu1 %473  ;;  %v358_v33 = vsel %vm357_vm1, %v334_v12, %v336_v16 }
 0x110   : > { %v378_v39 = vadd.f32 %v358_v33, %v7395_v29  ;;  %v497_v44 = vsel %vm495_vm3, %v474_v17, %v7447_v7 }
 0x113   : > { %493 = vrot.lane.b32.xlu2 %v320_v8, %s7277_s25 }
 0x114   : > { %572 = vrot.lane.b32.xlu0 %v7460_v22, %s7278_s26 }
 0x115   : > { %v7465_v24 = vpop.permute.xlu2 %558  ;;  %574 = vrot.lane.b32.xlu1 %v7458_v18, %s7278_s26 }
 0x116   : > { %v415_v25 = vpop.permute.xlu0 %414 }
 0x117   : > { %v551_v26 = vpop.permute.xlu1 %550  ;;  %v439_v36 = vsel %vm438_vm2, %v415_v25, %v417_v13 }
 0x118   : > { %v459_v45 = vadd.f32 %v439_v36, %v378_v39  ;;  %v582_v49 = vsel %vm10282_vm4, %v551_v26, %v553_v11 }
 0x11b   : > { %576 = vrot.lane.b32.xlu2 %v7469_v27, %s7278_s26 }
 0x11c   : > { %578 = vrot.lane.b32.xlu0 %v531_v28, %s7278_s26 }
 0x11d   : > { %v7474_v30 = vpop.permute.xlu2 %343 }
 0x11e   : > { %v472_v32 = vpop.permute.xlu0 %471  ;;  %v361_v12 = vsel %vm357_vm1, %v7455_v15, %v7474_v30 }
 0x11f   : > { %v338_v34 = vpop.permute.xlu1 %337  ;;  %v496_v43 = vsel %vm495_vm3, %v472_v32, %v474_v17  ;;  %v382_v25 = vadd.f32 %v361_v12, %v7401_v31 }
 0x120   : > { %v359_v35 = vsel %vm357_vm1, %v336_v16, %v338_v34  ;;  %v516_v50 = vadd.f32 %v496_v43, %v459_v45 }
 0x121   : > { %v379_v37 = vadd.f32 %v359_v35, %v7384_v20  ;;  %v380_v20 = vadd.f32 %v338_v34, %v7389_v21 }
 0x123   : > { %v460_v41 = vadd.f32 %v440_v38, %v379_v37  ;;  %v461_v56 = vadd.f32 %v7441_v0, %v380_v20  ;;  %v383_v38 = vadd.f32 %v7474_v30, %v7416_v42 }
 0x125   : > { %v517_v46 = vadd.f32 %v497_v44, %v460_v41  ;;  %v7486_v47 = vpop.permute.xlu2 %424  ;;  %v518_v61 = vadd.f32 %v7447_v7, %v461_v56 }
 0x126   : > { %v549_v51 = vpop.permute.xlu0 %548  ;;  %v464_v44 = vadd.f32 %v7486_v47, %v383_v38 }
 0x127   : > { %v581_v52 = vsel %vm10282_vm4, %v549_v51, %v551_v26  ;;  %v340_v29 = vpop.permute.xlu1 %339  ;;  %v606_v53 = vadd.f32 %v582_v49, %v517_v46 }
 0x128   : > { %v605_v54 = vadd.f32 %v581_v52, %v516_v50  ;;  %v360_v8 = vsel %vm357_vm1, %v340_v29, %v7455_v15 }
 0x129   : > { %v630_v55 = vmul.f32 0.24420135, %v606_v53  ;;  %v711_v2 = vmul.f32 0.40261996, %v606_v53  ;;  %v381_v10 = vadd.f32 %v360_v8, %v7411_v40  ;;  %v7516_v23 = vmul.f32 0.054488685, %v606_v53 }
 0x12a   : > { %v629_v58 = vmul.f32 0.24420135, %v605_v54  ;;  %v710_v3 = vmul.f32 0.40261996, %v605_v54  ;;  %v7519_v40 = vmul.f32 0.054488685, %v605_v54 }
 0x12b   : > { %655 = vrot.lane.b32.xlu2 %v630_v55, %s7279_s27 }
 0x12c   : > { %653 = vrot.lane.b32.xlu1 %v629_v58, %s7279_s27 }
 0x12d   : > { %v482_v60 = vpop.permute.xlu2 %481 }
 0x12e   : > { %v555_v21 = vpop.permute.xlu0 %554  ;;  %v521_v49 = vadd.f32 %v482_v60, %v464_v44 }
 0x12f   : > { %v583_v62 = vsel %vm10282_vm4, %v553_v11, %v555_v21  ;;  %v423_v63 = vpop.permute.xlu1 %422 }
 0x130   : > { %v607_v1 = vadd.f32 %v583_v62, %v518_v61  ;;  %v442_v19 = vsel %vm438_vm2, %v423_v63, %v7486_v47 }
 0x131   : > { %v463_v15 = vadd.f32 %v442_v19, %v382_v25 }
 0x132   : > { %v631_v4 = vmul.f32 0.24420135, %v607_v1  ;;  %v712_v7 = vmul.f32 0.40261996, %v607_v1  ;;  %v7534_v45 = vmul.f32 0.054488685, %v607_v1 }
 0x133   : > { %736 = vrot.lane.b32.xlu2 %v711_v2, %s7280_s28 }
 0x134   : > { %734 = vrot.lane.b32.xlu1 %v710_v3, %s7280_s28  ;;  %657 = vrot.lane.b32.xlu0 %v631_v4, %s7279_s27 }
 0x135   : > { %v7499_v0 = vpop.permute.xlu2 %564 }
 0x136   : > { %v421_v5 = vpop.permute.xlu0 %420 }
 0x137   : > { %v480_v6 = vpop.permute.xlu1 %479  ;;  %v441_v9 = vsel %vm438_vm2, %v421_v5, %v423_v63 }
 0x138   : > { %v462_v16 = vadd.f32 %v441_v9, %v381_v10  ;;  %v499_v28 = vsel %vm495_vm3, %v480_v6, %v482_v60 }
 0x139   : > { %v520_v33 = vadd.f32 %v499_v28, %v463_v15 }
 0x13b   : > { %793 = vrot.lane.b32.xlu2 %v630_v55, %s7281_s29 }
 0x13c   : > { %791 = vrot.lane.b32.xlu1 %v629_v58, %s7281_s29  ;;  %738 = vrot.lane.b32.xlu0 %v712_v7, %s7280_s28 }
 0x13d   : > { %v7512_v17 = vpop.permute.xlu2 %349 }
 0x13e   : > { %v478_v11 = vpop.permute.xlu0 %477 }
 0x13f   : > { %v498_v13 = vsel %vm495_vm3, %v478_v11, %v480_v6  ;;  %v557_v14 = vpop.permute.xlu1 %556 }
 0x140   : > { %v519_v26 = vadd.f32 %v498_v13, %v462_v16  ;;  %v584_v32 = vsel %vm10282_vm4, %v557_v14, %v7465_v24  ;;  %v386_v13 = vadd.f32 %v7512_v17, %v7436_v59 }
 0x142   : > { %v608_v31 = vadd.f32 %v584_v32, %v519_v26 }
 0x143   : > { %862 = vrot.lane.b32.xlu2 %v7516_v23, %s7282_s30 }
 0x144   : > { %860 = vrot.lane.b32.xlu1 %v7519_v40, %s7282_s30  ;;  %795 = vrot.lane.b32.xlu0 %v631_v4, %s7281_s29  ;;  %v632_v41 = vmul.f32 0.24420135, %v608_v31  ;;  %v713_v30 = vmul.f32 0.40261996, %v608_v31  ;;  %v7553_v63 = vmul.f32 0.054488685, %v608_v31 }
 0x145   : > { %v431_v39 = vpop.permute.xlu2 %430 }
 0x146   : > { %v561_v34 = vpop.permute.xlu0 %560  ;;  %v467_v19 = vadd.f32 %v431_v39, %v386_v13 }
 0x147   : > { %v585_v35 = vsel %vm10282_vm4, %v7465_v24, %v561_v34  ;;  %v563_v36 = vpop.permute.xlu1 %562 }
 0x148   : > { %v609_v37 = vadd.f32 %v585_v35, %v520_v33  ;;  %v586_v46 = vsel %vm10282_vm4, %v561_v34, %v563_v36 }
 0x149   : > { %v610_v20 = vadd.f32 %v586_v46, %v521_v49 }
 0x14a   : > { %v633_v43 = vmul.f32 0.24420135, %v609_v37  ;;  %v714_v50 = vmul.f32 0.40261996, %v609_v37  ;;  %v7555_v1 = vmul.f32 0.054488685, %v609_v37 }
 0x14b   : > { %v634_v51 = vmul.f32 0.24420135, %v610_v20  ;;  %v715_v53 = vmul.f32 0.40261996, %v610_v20  ;;  %v7570_v26 = vmul.f32 0.054488685, %v610_v20 }
 0x14c   : > { %659 = vrot.lane.b32.xlu1 %v632_v41, %s7279_s27  ;;  %661 = vrot.lane.b32.xlu2 %v633_v43, %s7279_s27 }
 0x14d   : > { %864 = vrot.lane.b32.xlu0 %v7534_v45, %s7282_s30  ;;  %v488_v52 = vpop.permute.xlu2 %487 }
 0x14e   : > { %v346_v24 = vpop.permute.xlu0 %345  ;;  %v524_v15 = vadd.f32 %v488_v52, %v467_v19 }
 0x14f   : > { %v348_v42 = vpop.permute.xlu1 %347 }
 0x150   : > { %v362_v56 = vsel %vm357_vm1, %v346_v24, %v348_v42  ;;  %v363_v60 = vsel %vm357_vm1, %v348_v42, %v7512_v17 }
 0x151   : > { %v384_v21 = vadd.f32 %v362_v56, %v7422_v48  ;;  %v385_v2 = vadd.f32 %v363_v60, %v7434_v57 }
 0x154   : > { %740 = vrot.lane.b32.xlu1 %v713_v30, %s7280_s28  ;;  %742 = vrot.lane.b32.xlu2 %v714_v50, %s7280_s28 }
 0x155   : > { %663 = vrot.lane.b32.xlu0 %v634_v51, %s7279_s27  ;;  %v571_v54 = vpop.permute.xlu2 %570 }
 0x156   : > { %v427_v47 = vpop.permute.xlu0 %426 }
 0x157   : > { %v429_v29 = vpop.permute.xlu1 %428 }
 0x158   : > { %v443_v61 = vsel %vm438_vm2, %v427_v47, %v429_v29  ;;  %v444_v62 = vsel %vm438_vm2, %v429_v29, %v431_v39 }
 0x159   : > { %v465_v4 = vadd.f32 %v443_v61, %v384_v21  ;;  %v466_v48 = vadd.f32 %v444_v62, %v385_v2 }
 0x15c   : > { %797 = vrot.lane.b32.xlu1 %v632_v41, %s7281_s29  ;;  %799 = vrot.lane.b32.xlu2 %v633_v43, %s7281_s29 }
 0x15d   : > { %744 = vrot.lane.b32.xlu0 %v715_v53, %s7280_s28  ;;  %v356_v10 = vpop.permute.xlu2 %355 }
 0x15e   : > { %v484_v55 = vpop.permute.xlu0 %483  ;;  %v389_v61 = vadd.f32 %v356_v10, %v7469_v27 }
 0x15f   : > { %v486_v58 = vpop.permute.xlu1 %485 }
 0x160   : > { %v500_v3 = vsel %vm495_vm3, %v484_v55, %v486_v58  ;;  %v501_v5 = vsel %vm495_vm3, %v486_v58, %v488_v52 }
 0x161   : > { %v522_v6 = vadd.f32 %v500_v3, %v465_v4  ;;  %v523_v8 = vadd.f32 %v501_v5, %v466_v48 }
 0x164   : > { %866 = vrot.lane.b32.xlu1 %v7553_v63, %s7282_s30  ;;  %868 = vrot.lane.b32.xlu2 %v7555_v1, %s7282_s30 }
 0x165   : > { %801 = vrot.lane.b32.xlu0 %v634_v51, %s7281_s29  ;;  %v437_v59 = vpop.permute.xlu2 %436 }
 0x166   : > { %v567_v7 = vpop.permute.xlu0 %566  ;;  %v470_v3 = vadd.f32 %v437_v59, %v389_v61 }
 0x167   : > { %v569_v9 = vpop.permute.xlu1 %568  ;;  %v587_v57 = vsel %vm10282_vm4, %v7499_v0, %v567_v7 }
 0x168   : > { %v588_v11 = vsel %vm10282_vm4, %v567_v7, %v569_v9  ;;  %v611_v12 = vadd.f32 %v587_v57, %v522_v6  ;;  %v589_v28 = vsel %vm10282_vm4, %v569_v9, %v571_v54 }
 0x169   : > { %v612_v14 = vadd.f32 %v588_v11, %v523_v8  ;;  %v613_v32 = vadd.f32 %v589_v28, %v524_v15 }
 0x16a   : > { %v635_v16 = vmul.f32 0.24420135, %v611_v12  ;;  %v716_v17 = vmul.f32 0.40261996, %v611_v12  ;;  %v7587_v24 = vmul.f32 0.054488685, %v611_v12 }
 0x16b   : > { %v636_v25 = vmul.f32 0.24420135, %v612_v14  ;;  %v717_v31 = vmul.f32 0.40261996, %v612_v14  ;;  %v637_v34 = vmul.f32 0.24420135, %v613_v32 }
 0x16c   : > { %665 = vrot.lane.b32.xlu1 %v635_v16, %s7279_s27  ;;  %v718_v37 = vmul.f32 0.40261996, %v613_v32  ;;  %v7591_v30 = vmul.f32 0.054488685, %v612_v14  ;;  %v7603_v62 = vmul.f32 0.054488685, %v613_v32 }
 0x16d   : > { %667 = vrot.lane.b32.xlu2 %v636_v25, %s7279_s27  ;;  %870 = vrot.lane.b32.xlu0 %v7570_v26, %s7282_s30  ;;  %v494_v38 = vpop.permute.xlu2 %493 }
 0x16e   : > { %v352_v0 = vpop.permute.xlu0 %351  ;;  %v527_v4 = vadd.f32 %v494_v38, %v470_v3 }
 0x16f   : > { %v354_v33 = vpop.permute.xlu1 %353 }
 0x170   : > { %v365_v43 = vsel %vm357_vm1, %v354_v33, %v356_v10  ;;  %v364_v44 = vsel %vm357_vm1, %v352_v0, %v354_v33  ;;  %vm2353_vm1 = vcmask 56320  }
 0x171   : > { %v388_v20 = vadd.f32 %v365_v43, %v7458_v18  ;;  %v387_v42 = vadd.f32 %v364_v44, %v7460_v22 }
 0x174   : > { %746 = vrot.lane.b32.xlu1 %v716_v17, %s7280_s28 }
 0x175   : > { %748 = vrot.lane.b32.xlu2 %v717_v31, %s7280_s28  ;;  %669 = vrot.lane.b32.xlu0 %v637_v34, %s7279_s27  ;;  %v577_v50 = vpop.permute.xlu2 %576 }
 0x176   : > { %v433_v35 = vpop.permute.xlu0 %432 }
 0x177   : > { %v435_v36 = vpop.permute.xlu1 %434 }
 0x178   : > { %v446_v46 = vsel %vm438_vm2, %v435_v36, %v437_v59  ;;  %v445_v49 = vsel %vm438_vm2, %v433_v35, %v435_v36  ;;  %vm2050_vm2 = vcmask 941056  }
 0x179   : > { %v469_v47 = vadd.f32 %v446_v46, %v388_v20  ;;  %v468_v29 = vadd.f32 %v445_v49, %v387_v42 }
 0x17c   : > { %803 = vrot.lane.b32.xlu1 %v635_v16, %s7281_s29 }
 0x17d   : > { %805 = vrot.lane.b32.xlu2 %v636_v25, %s7281_s29  ;;  %750 = vrot.lane.b32.xlu0 %v718_v37, %s7280_s28 }
 0x17e   : > { %v490_v39 = vpop.permute.xlu0 %489 }
 0x17f   : > { %v492_v41 = vpop.permute.xlu1 %491 }
 0x180   : > { %v503_v51 = vsel %vm495_vm3, %v492_v41, %v494_v38  ;;  %v502_v52 = vsel %vm495_vm3, %v490_v39, %v492_v41 }
 0x181   : > { %v526_v53 = vadd.f32 %v503_v51, %v469_v47  ;;  %v525_v22 = vadd.f32 %v502_v52, %v468_v29 }
 0x184   : > { %872 = vrot.lane.b32.xlu1 %v7587_v24, %s7282_s30 }
 0x185   : > { %874 = vrot.lane.b32.xlu2 %v7591_v30, %s7282_s30  ;;  %807 = vrot.lane.b32.xlu0 %v637_v34, %s7281_s29  ;;  %v656_v5 = vpop.permute.xlu2 %655 }
 0x186   : > { %v573_v18 = vpop.permute.xlu0 %572 }
 0x187   : > { %v575_v54 = vpop.permute.xlu1 %574 }
 0x188   : > { %v591_v55 = vsel %vm10282_vm4, %v575_v54, %v577_v50  ;;  %v590_v56 = vsel %vm10282_vm4, %v573_v18, %v575_v54 }
 0x189   : > { %v615_v58 = vadd.f32 %v591_v55, %v526_v53  ;;  %v614_v60 = vadd.f32 %v590_v56, %v525_v22 }
 0x18b   : > { %v639_v21 = vmul.f32 0.24420135, %v615_v58  ;;  %v638_v2 = vmul.f32 0.24420135, %v614_v60  ;;  %v720_v27 = vmul.f32 0.40261996, %v615_v58 }
 0x18c   : > { %v719_v9 = vmul.f32 0.40261996, %v614_v60  ;;  %v7616_v13 = vmul.f32 0.054488685, %v615_v58  ;;  %v7618_v14 = vmul.f32 0.054488685, %v614_v60 }
 0x18d   : > { %673 = vrot.lane.b32.xlu2 %v639_v21, %s7279_s27  ;;  %876 = vrot.lane.b32.xlu0 %v7603_v62, %s7282_s30  ;;  %v737_v57 = vpop.permute.xlu2 %736 }
 0x18e   : > { %671 = vrot.lane.b32.xlu1 %v638_v2, %s7279_s27  ;;  %v579_v48 = vpop.permute.xlu0 %578 }
 0x18f   : > { %v592_v6 = vsel %vm10282_vm4, %v577_v50, %v579_v48 }
 0x190   : > { %v616_v7 = vadd.f32 %v592_v6, %v527_v4 }
 0x192   : > { %v640_v8 = vmul.f32 0.24420135, %v616_v7  ;;  %v721_v10 = vmul.f32 0.40261996, %v616_v7  ;;  %v7625_v25 = vmul.f32 0.054488685, %v616_v7 }
 0x195   : > { %754 = vrot.lane.b32.xlu2 %v720_v27, %s7280_s28  ;;  %675 = vrot.lane.b32.xlu0 %v640_v8, %s7279_s27  ;;  %v794_v12 = vpop.permute.xlu2 %793 }
 0x196   : > { %752 = vrot.lane.b32.xlu1 %v719_v9, %s7280_s28 }
 0x19d   : > { %811 = vrot.lane.b32.xlu2 %v639_v21, %s7281_s29  ;;  %756 = vrot.lane.b32.xlu0 %v721_v10, %s7280_s28  ;;  %v863_v28 = vpop.permute.xlu2 %862 }
 0x19e   : > { %809 = vrot.lane.b32.xlu1 %v638_v2, %s7281_s29  ;;  %v654_v11 = vpop.permute.xlu1 %653 }
 0x19f   : > { %v678_v17 = vsel %vm10272_vm5, %v654_v11, %v656_v5 }
 0x1a0   : > { %v698_v36 = vadd.f32 %v678_v17, %v7519_v40 }
 0x1a5   : > { %880 = vrot.lane.b32.xlu2 %v7616_v13, %s7282_s30  ;;  %813 = vrot.lane.b32.xlu0 %v640_v8, %s7281_s29 }
 0x1a6   : > { %878 = vrot.lane.b32.xlu1 %v7618_v14, %s7282_s30  ;;  %v735_v16 = vpop.permute.xlu1 %734  ;;  %v658_v19 = vpop.permute.xlu0 %657 }
 0x1a7   : > { %v662_v32 = vpop.permute.xlu2 %661  ;;  %v679_v31 = vsel %vm10272_vm5, %v656_v5, %v658_v19  ;;  %v759_v34 = vsel %vm10271_vm6, %v735_v16, %v737_v57  ;;  %v700_v58 = vadd.f32 %v658_v19, %v7534_v45 }
 0x1a8   : > { %v699_v37 = vadd.f32 %v679_v31, %v7516_v23  ;;  %v779_v41 = vadd.f32 %v759_v34, %v698_v36 }
 0x1ad   : > { %882 = vrot.lane.b32.xlu0 %v7625_v25, %s7282_s30 }
 0x1ae   : > { %v792_v15 = vpop.permute.xlu1 %791  ;;  %v739_v0 = vpop.permute.xlu0 %738 }
 0x1af   : > { %v760_v35 = vsel %vm10271_vm6, %v737_v57, %v739_v0  ;;  %v816_v38 = vsel %vm10270_vm7, %v792_v15, %v794_v12  ;;  %v743_v44 = vpop.permute.xlu2 %742  ;;  %v781_v61 = vadd.f32 %v739_v0, %v700_v58 }
 0x1b0   : > { %v780_v43 = vadd.f32 %v760_v35, %v699_v37  ;;  %v836_v20 = vadd.f32 %v816_v38, %v779_v41 }
 0x1b6   : > { %v861_v33 = vpop.permute.xlu1 %860  ;;  %v796_v59 = vpop.permute.xlu0 %795 }
 0x1b7   : > { %v817_v39 = vsel %vm10270_vm7, %v794_v12, %v796_v59  ;;  %v885_v46 = vsel %vm10269_vm8, %v861_v33, %v863_v28  ;;  %v800_v18 = vpop.permute.xlu2 %799  ;;  %v838_v4 = vadd.f32 %v796_v59, %v781_v61 }
 0x1b8   : > { %v837_v42 = vadd.f32 %v817_v39, %v780_v43  ;;  %v7639_v52 = vadd.f32 %v885_v46, %v836_v20 }
 0x1be   : > { %v660_v49 = vpop.permute.xlu1 %659 }
 0x1bf   : > { %v865_v50 = vpop.permute.xlu0 %864  ;;  %v869_v54 = vpop.permute.xlu2 %868  ;;  %v680_v3 = vsel %vm10272_vm5, %v660_v49, %v662_v32 }
 0x1c0   : > { %v886_v51 = vsel %vm10269_vm8, %v863_v28, %v865_v50  ;;  %v701_v8 = vadd.f32 %v680_v3, %v7553_v63  ;;  %v907_v27 = vadd.f32 %v865_v50, %v838_v4 }
 0x1c1   : > { %v906_v40 = vadd.f32 %v886_v51, %v837_v42 }
 0x1c3   : > { %v6496_v23 = vpack.i.bf16 %v906_v40, %v7639_v52 }
 0x1c5   : > { %6497 = vrot.lane.b32.xlu2 %v6496_v23, %s7283_s3 }
 0x1c6   : > { %v741_v47 = vpop.permute.xlu1 %740 }
 0x1c7   : > { %v664_v29 = vpop.permute.xlu0 %663  ;;  %v668_v21 = vpop.permute.xlu2 %667  ;;  %v761_v6 = vsel %vm10271_vm6, %v741_v47, %v743_v44 }
 0x1c8   : > { %v703_v60 = vadd.f32 %v664_v29, %v7570_v26  ;;  %v782_v45 = vadd.f32 %v761_v6, %v701_v8  ;;  %v681_v12 = vsel %vm10272_vm5, %v662_v32, %v664_v29 }
 0x1c9   : > { %v702_v0 = vadd.f32 %v681_v12, %v7555_v1 }
 0x1ce   : > { %v798_v53 = vpop.permute.xlu1 %797 }
 0x1cf   : > { %v745_v22 = vpop.permute.xlu0 %744  ;;  %v818_v57 = vsel %vm10270_vm7, %v798_v53, %v800_v18  ;;  %v749_v63 = vpop.permute.xlu2 %748 }
 0x1d0   : > { %v784_v2 = vadd.f32 %v745_v22, %v703_v60  ;;  %v839_v11 = vadd.f32 %v818_v57, %v782_v45  ;;  %v762_v28 = vsel %vm10271_vm6, %v743_v44, %v745_v22 }
 0x1d1   : > { %v783_v59 = vadd.f32 %v762_v28, %v702_v0 }
 0x1d6   : > { %v867_v55 = vpop.permute.xlu1 %866 }
 0x1d7   : > { %v802_v56 = vpop.permute.xlu0 %801  ;;  %v887_v26 = vsel %vm10269_vm8, %v867_v55, %v869_v54  ;;  %v806_v36 = vpop.permute.xlu2 %805 }
 0x1d8   : > { %v841_v5 = vadd.f32 %v802_v56, %v784_v2  ;;  %v7654_v16 = vadd.f32 %v887_v26, %v839_v11  ;;  %v819_v33 = vsel %vm10270_vm7, %v800_v18, %v802_v56 }
 0x1d9   : > { %v840_v31 = vadd.f32 %v819_v33, %v783_v59 }
 0x1da   : > { %v6526_v17 = vpack.i.bf16 %v7654_v16, %v7639_v52 }
 0x1de   : > { %v666_v48 = vpop.permute.xlu1 %665 }
 0x1df   : > { %v871_v7 = vpop.permute.xlu0 %870  ;;  %v875_v41 = vpop.permute.xlu2 %874  ;;  %v682_v49 = vsel %vm10272_vm5, %v666_v48, %v668_v21 }
 0x1e0   : > { %v910_v9 = vadd.f32 %v871_v7, %v841_v5  ;;  %v888_v32 = vsel %vm10269_vm8, %v869_v54, %v871_v7  ;;  %v704_v23 = vadd.f32 %v682_v49, %v7587_v24 }
 0x1e1   : > { %v909_v34 = vadd.f32 %v888_v32, %v840_v31 }
 0x1e2   : > { %v6506_v10 = vpack.i.bf16 %v910_v9, %v907_v27 }
 0x1e3   : > { %v6551_v37 = vpack.i.bf16 %v909_v34, %v906_v40  ;;  %v6541_v43 = vpack.i.bf16 %v909_v34, %v7654_v16 }
 0x1e4   : > { %6507 = vrot.lane.b32.xlu2 %v6506_v10, %s7284_s4  ;;  %6502 = vrot.lane.b32.xlu0 %v6506_v10, %s7285_s5 }
 0x1e5   : > { %6512 = vrot.lane.b32.xlu1 %v6506_v10, %s7277_s25 }
 0x1e6   : > { %v747_v19 = vpop.permute.xlu1 %746 }
 0x1e7   : > { %v7657_v15 = vpop.permute.xlu0 %669  ;;  %v763_v50 = vsel %vm10271_vm6, %v747_v19, %v749_v63  ;;  %v674_v29 = vpop.permute.xlu2 %673 }
 0x1e8   : > { %v683_v44 = vsel %vm10272_vm5, %v668_v21, %v7657_v15  ;;  %v785_v22 = vadd.f32 %v763_v50, %v704_v23  ;;  %v706_v48 = vadd.f32 %v7657_v15, %v7603_v62 }
 0x1e9   : > { %v705_v42 = vadd.f32 %v683_v44, %v7591_v30 }
 0x1ec   : > { %6527 = vrot.lane.b32.xlu2 %v6526_v17, %s7286_s6  ;;  %6522 = vrot.lane.b32.xlu0 %v6526_v17, %s7287_s7 }
 0x1ed   : > { %6517 = vrot.lane.b32.xlu1 %v6526_v17, %s7282_s30 }
 0x1ee   : > { %v804_v35 = vpop.permute.xlu1 %803 }
 0x1ef   : > { %v751_v1 = vpop.permute.xlu0 %750  ;;  %v820_v18 = vsel %vm10270_vm7, %v804_v35, %v806_v36  ;;  %v755_v21 = vpop.permute.xlu2 %754 }
 0x1f0   : > { %v764_v20 = vsel %vm10271_vm6, %v749_v63, %v751_v1  ;;  %v842_v55 = vadd.f32 %v820_v18, %v785_v22  ;;  %v787_v7 = vadd.f32 %v751_v1, %v706_v48 }
 0x1f1   : > { %v786_v47 = vadd.f32 %v764_v20, %v705_v42 }
 0x1f4   : > { %6537 = vrot.lane.b32.xlu0 %v6526_v17, %s7275_s23  ;;  %6552 = vrot.lane.b32.xlu2 %v6551_v37, %s7288_s8 }
 0x1f5   : > { %6532 = vrot.lane.b32.xlu1 %v6526_v17, %s7289_s11 }
 0x1f6   : > { %v873_v39 = vpop.permute.xlu1 %872 }
 0x1f7   : > { %v808_v38 = vpop.permute.xlu0 %807  ;;  %v889_v30 = vsel %vm10269_vm8, %v873_v39, %v875_v41  ;;  %v812_v5 = vpop.permute.xlu2 %811 }
 0x1f8   : > { %v821_v51 = vsel %vm10270_vm7, %v806_v36, %v808_v38  ;;  %v7687_v24 = vadd.f32 %v889_v30, %v842_v55  ;;  %v844_v9 = vadd.f32 %v808_v38, %v787_v7 }
 0x1f9   : > { %v843_v54 = vadd.f32 %v821_v51, %v786_v47 }
 0x1fc   : > { %6567 = vrot.lane.b32.xlu2 %v6551_v37, %s7290_s12  ;;  %6542 = vrot.lane.b32.xlu0 %v6541_v43, %s7283_s3 }
 0x1fd   : > { %6557 = vrot.lane.b32.xlu1 %v6551_v37, %s7291_s13 }
 0x1ff   : > { %v877_v46 = vpop.permute.xlu0 %876  ;;  %v881_v28 = vpop.permute.xlu2 %880 }
 0x200   : > { %v672_v40 = vpop.permute.xlu1 %671  ;;  %v890_v53 = vsel %vm10269_vm8, %v875_v41, %v877_v46  ;;  %v913_v26 = vadd.f32 %v877_v46, %v844_v9 }
 0x201   : > { %v912_v56 = vadd.f32 %v890_v53, %v843_v54  ;;  %v684_v27 = vsel %vm10272_vm5, %v672_v40, %v674_v29 }
 0x202   : > { %v707_v11 = vadd.f32 %v684_v27, %v7618_v14 }
 0x203   : > { %v6576_v60 = vpack.i.bf16 %v912_v56, %v7687_v24 }
 0x204   : > { %6547 = vrot.lane.b32.xlu0 %v6551_v37, %s7292_s14 }
 0x205   : > { %6572 = vrot.lane.b32.xlu1 %v6551_v37, %s7293_s15 }
 0x207   : > { %v676_v58 = vpop.permute.xlu0 %675 }
 0x208   : > { %v753_v61 = vpop.permute.xlu1 %752  ;;  %v709_v6 = vadd.f32 %v676_v58, %v7625_v25  ;;  %v685_v33 = vsel %vm10272_vm5, %v674_v29, %v676_v58  ;;  %vm1255_vm5 = vcmask 1043456  }
 0x209   : > { %v765_v45 = vsel %vm10271_vm6, %v753_v61, %v755_v21  ;;  %v708_v17 = vadd.f32 %v685_v33, %v7616_v13 }
 0x20a   : > { %v788_v62 = vadd.f32 %v765_v45, %v707_v11 }
 0x20c   : > { %6562 = vrot.lane.b32.xlu0 %v6551_v37, %s7276_s24 }
 0x20d   : > { %6577 = vrot.lane.b32.xlu1 %v6576_v60, %s7283_s3 }
 0x20f   : > { %v757_v2 = vpop.permute.xlu0 %756 }
 0x210   : > { %v810_v3 = vpop.permute.xlu1 %809  ;;  %v790_v8 = vadd.f32 %v757_v2, %v709_v6  ;;  %v766_v14 = vsel %vm10271_vm6, %v755_v21, %v757_v2  ;;  %vm10276_vm6 = vcmask 973824  }
 0x211   : > { %v822_v19 = vsel %vm10270_vm7, %v810_v3, %v812_v5  ;;  %v789_v31 = vadd.f32 %v766_v14, %v708_v17 }
 0x212   : > { %v845_v0 = vadd.f32 %v822_v19, %v788_v62 }
 0x217   : > { %v814_v4 = vpop.permute.xlu0 %813 }
 0x218   : > { %v847_v57 = vadd.f32 %v814_v4, %v790_v8  ;;  %v879_v12 = vpop.permute.xlu1 %878  ;;  %v823_v32 = vsel %vm10270_vm7, %v812_v5, %v814_v4 }
 0x219   : > { %v891_v25 = vsel %vm10269_vm8, %v879_v12, %v881_v28  ;;  %v846_v1 = vadd.f32 %v823_v32, %v789_v31 }
 0x21a   : > { %v7704_v59 = vadd.f32 %v891_v25, %v845_v0 }
 0x21c   : > { %v6606_v34 = vpack.i.bf16 %v7704_v59, %v7687_v24 }
 0x21f   : > { %v883_v10 = vpop.permute.xlu0 %882  ;;  %v6498_v38 = vpop.permute.xlu2 %6497 }
 0x220   : > { %v916_v63 = vadd.f32 %v883_v10, %v847_v57  ;;  %v892_v35 = vsel %vm10269_vm8, %v881_v28, %v883_v10  ;;  %v6500_v29 = vunpack.i.h.bf16 %v6498_v38  ;;  %v6499_v18 = vunpack.i.l.bf16 %v6498_v38 }
 0x221   : > { %v915_v36 = vadd.f32 %v892_v35, %v846_v1 }
 0x222   : > { %v6591_v15 = vpack.i.bf16 %v916_v63, %v913_v26 }
 0x223   : > { %v6631_v37 = vpack.i.bf16 %v915_v36, %v912_v56  ;;  %v6621_v13 = vpack.i.bf16 %v915_v36, %v7704_v59  ;;  %v1002_v56 = vsel %vm1001_vm11, %v6499_v18, %v6500_v29 }
 0x224   : > { %6592 = vrot.lane.b32.xlu2 %v6591_v15, %s7277_s25  ;;  %6587 = vrot.lane.b32.xlu0 %v6591_v15, %s7284_s4  ;;  %s7303_s25 = smov 118   ;;  %s7305_s4 = smov 117  }
 0x225   : > { %6582 = vrot.lane.b32.xlu1 %v6591_v15, %s7285_s5  ;;  %s7306_s5 = smov 1  }
 0x22c   : > { %6607 = vrot.lane.b32.xlu0 %v6606_v34, %s7286_s6  ;;  %6597 = vrot.lane.b32.xlu2 %v6606_v34, %s7282_s30 }
 0x22d   : > { %6602 = vrot.lane.b32.xlu1 %v6606_v34, %s7287_s7 }
 0x234   : > { %6632 = vrot.lane.b32.xlu0 %v6631_v37, %s7288_s8  ;;  %6612 = vrot.lane.b32.xlu2 %v6606_v34, %s7289_s11 }
 0x235   : > { %6617 = vrot.lane.b32.xlu1 %v6606_v34, %s7275_s23  ;;  %s7301_s23 = smov 114  }
 0x23c   : > { %6647 = vrot.lane.b32.xlu0 %v6631_v37, %s7290_s12  ;;  %6622 = vrot.lane.b32.xlu2 %v6621_v13, %s7283_s3  ;;  %s7304_s3 = smov 5   ;;  %s7307_s12 = smov 113  }
 0x23d   : > { %6627 = vrot.lane.b32.xlu1 %v6631_v37, %s7292_s14  ;;  %s7309_s14 = smov 16  }
 0x23e   : > { %v7729_v43 = vpop.permute.xlu2 %6507 }
 0x23f   : > { %v6510_v58 = vunpack.i.h.bf16 %v7729_v43  ;;  %v6509_v61 = vunpack.i.l.bf16 %v7729_v43 }
 0x244   : > { %6637 = vrot.lane.b32.xlu2 %v6631_v37, %s7291_s13  ;;  %s7308_s13 = smov 4  }
 0x245   : > { %6642 = vrot.lane.b32.xlu1 %v6631_v37, %s7276_s24  ;;  %s7302_s24 = smov 2  }
 0x246   : > { %v7731_v49 = vpop.permute.xlu2 %6527 }
 0x247   : > { %v6529_v60 = vunpack.i.l.bf16 %v7731_v49  ;;  %v6530_v21 = vunpack.i.h.bf16 %v7731_v49 }
 0x24c   : > { %6652 = vrot.lane.b32.xlu2 %v6631_v37, %s7293_s15 }
 0x24e   : > { %v6553_v51 = vpop.permute.xlu2 %6552 }
 0x24f   : > { %v6555_v48 = vunpack.i.h.bf16 %v6553_v51  ;;  %v6554_v27 = vunpack.i.l.bf16 %v6553_v51 }
 0x256   : > { %v7725_v39 = vpop.permute.xlu0 %6502 }
 0x257   : > { %v7727_v41 = vpop.permute.xlu1 %6512  ;;  %v6505_v45 = vunpack.i.h.bf16 %v7725_v39  ;;  %v6504_v10 = vunpack.i.l.bf16 %v7725_v39 }
 0x258   : > { %v6514_v34 = vunpack.i.l.bf16 %v7727_v41 }
 0x25e   : > { %v6523_v44 = vpop.permute.xlu0 %6522 }
 0x25f   : > { %v6518_v46 = vpop.permute.xlu1 %6517  ;;  %v6524_v23 = vunpack.i.l.bf16 %v6523_v44  ;;  %v6525_v2 = vunpack.i.h.bf16 %v6523_v44 }
 0x260   : > { %v6519_v40 = vunpack.i.l.bf16 %v6518_v46  ;;  %v6520_v54 = vunpack.i.h.bf16 %v6518_v46 }
 0x262   : > { %v1123_v53 = vsel %vm10273_vm9, %v7639_v52, %v6519_v40  ;;  %v6568_v52 = vpop.permute.xlu2 %6567  ;;  %v1124_v3 = vsel %vm10273_vm9, %v7654_v16, %v6520_v54  ;;  %v6515_v16 = vunpack.i.h.bf16 %v7727_v41 }
 0x263   : > { %v1128_v30 = vsel %vm10281_vm10, %v1123_v53, %v6524_v23  ;;  %v6570_v9 = vunpack.i.h.bf16 %v6568_v52  ;;  %v6569_v57 = vunpack.i.l.bf16 %v6568_v52  ;;  %v1129_v26 = vsel %vm10281_vm10, %v1124_v3, %v6525_v2 }
 0x264   : > { %v1132_v5 = vsel %vm10282_vm4, %v1128_v30, %v6529_v60  ;;  %v1133_v13 = vsel %vm10282_vm4, %v1129_v26, %v6530_v21 }
 0x266   : > { %v7733_v20 = vpop.permute.xlu0 %6537 }
 0x267   : > { %v7735_v42 = vpop.permute.xlu1 %6532  ;;  %v6539_v4 = vunpack.i.l.bf16 %v7733_v20  ;;  %v6540_v37 = vunpack.i.h.bf16 %v7733_v20 }
 0x268   : > { %v6534_v55 = vunpack.i.l.bf16 %v7735_v42  ;;  %v6535_v63 = vunpack.i.h.bf16 %v7735_v42 }
 0x26a   : > { %v1137_v6 = vsel %vm10283_vm12, %v1132_v5, %v6534_v55  ;;  %v1138_v43 = vsel %vm10283_vm12, %v1133_v13, %v6535_v63 }
 0x26b   : > { %v1142_v19 = vsel %vm10284_vm13, %v1137_v6, %v6539_v4 }
 0x26c   : > { %v1147_v44 = vsel %vm1146_vm14, %v1142_v19, %v1002_v56 }
 0x26e   : > { %v7737_v50 = vpop.permute.xlu0 %6542 }
 0x26f   : > { %v6558_v47 = vpop.permute.xlu1 %6557  ;;  %v6545_v15 = vunpack.i.h.bf16 %v7737_v50  ;;  %v6544_v25 = vunpack.i.l.bf16 %v7737_v50 }
 0x270   : > { %v6560_v7 = vunpack.i.h.bf16 %v6558_v47  ;;  %v6559_v8 = vunpack.i.l.bf16 %v6558_v47  ;;  %v1143_v47 = vsel %vm10284_vm13, %v1138_v43, %v6540_v37 }
 0x271   : > { %v1003_v49 = vsel %vm1001_vm11, %v6544_v25, %v6545_v15 }
 0x272   : > { %v1157_v0 = vsel %vm10273_vm9, %v6555_v48, %v6560_v7  ;;  %v1156_v33 = vsel %vm10273_vm9, %v6554_v27, %v6559_v8 }
 0x276   : > { %v7741_v22 = vpop.permute.xlu0 %6547 }
 0x277   : > { %v6573_v11 = vpop.permute.xlu1 %6572  ;;  %v6549_v35 = vunpack.i.l.bf16 %v7741_v22  ;;  %v6550_v42 = vunpack.i.h.bf16 %v7741_v22  ;;  %v1148_v22 = vsel %vm1146_vm14, %v1143_v47, %v1003_v49 }
 0x278   : > { %v6575_v14 = vunpack.i.h.bf16 %v6573_v11  ;;  %v6574_v17 = vunpack.i.l.bf16 %v6573_v11 }
 0x279   : > { %v1152_v40 = vsel %vm1151_vm15, %v1147_v44, %v6549_v35  ;;  %v7802_v30 = vsel %vm1151_vm15, %v1148_v22, %v6550_v42 }
 0x27a   : > { %v7826_v21 = vpack.c.bf16 %v1152_v40, %v1152_v40 }
 0x27e   : > { %v6563_v12 = vpop.permute.xlu0 %6562  ;;  %v7781_v50 = vpop.permute.xlu2 %6592 }
 0x27f   : > { %v6565_v28 = vunpack.i.h.bf16 %v6563_v12  ;;  %v6564_v62 = vunpack.i.l.bf16 %v6563_v12  ;;  %v7824_v60 = vpop.permute.xlu1 %6577  ;;  %v6595_v11 = vunpack.i.h.bf16 %v7781_v50  ;;  %v6594_v12 = vunpack.i.l.bf16 %v7781_v50 }
 0x280   : > { %v6580_v63 = vunpack.i.h.bf16 %v7824_v60  ;;  %v6579_v19 = vunpack.i.l.bf16 %v7824_v60 }
 0x281   : > { %v1160_v32 = vsel %vm10281_vm10, %v1156_v33, %v6564_v62  ;;  %v1161_v31 = vsel %vm10281_vm10, %v1157_v0, %v6565_v28 }
 0x282   : > { %v1164_v1 = vsel %vm10282_vm4, %v1160_v32, %v6569_v57  ;;  %v1165_v36 = vsel %vm10282_vm4, %v1161_v31, %v6570_v9 }
 0x283   : > { %v1168_v38 = vsel %vm10283_vm12, %v1164_v1, %v6574_v17  ;;  %v1169_v39 = vsel %vm10283_vm12, %v1165_v36, %v6575_v14 }
 0x284   : > { %v1172_v41 = vsel %vm10284_vm13, %v1168_v38, %v6504_v10  ;;  %v1173_v46 = vsel %vm10284_vm13, %v1169_v39, %v6505_v45 }
 0x285   : > { %v1176_v20 = vsel %vm1146_vm14, %v1172_v41, %v6509_v61  ;;  %v1177_v51 = vsel %vm1146_vm14, %v1173_v46, %v6510_v58 }
 0x286   : > { %v7787_v23 = vsel %vm1151_vm15, %v1176_v20, %v6514_v34  ;;  %v7791_v29 = vsel %vm1151_vm15, %v1177_v51, %v6515_v16  ;;  %v6598_v61 = vpop.permute.xlu2 %6597 }
 0x287   : > { %v7794_v18 = vpack.i.bf16 %v1152_v40, %v7787_v23  ;;  %v7797_v53 = vpack.i.bf16 %v7787_v23, %v1152_v40  ;;  %v1211_v54 = vpack.c.bf16 %v7787_v23, %v1152_v40  ;;  %v7812_v55 = vpack.c.bf16 %v7791_v29, %v7802_v30 }
 0x288   : > { %v7816_v56 = vpack.i.bf16 %v7802_v30, %v7791_v29  ;;  %v7821_v58 = vpack.i.bf16 %v7791_v29, %v7802_v30  ;;  %v1519_v52 = vpack.c.bf16 %v1152_v40, %v7787_v23  ;;  %v1520_v2 = vpack.c.bf16 %v7802_v30, %v7791_v29 }
 0x289   : > { %6667 = vrot.lane.b32.xlu0 %v7794_v18, %s7294_s16  ;;  %6662 = vrot.lane.b32.xlu1 %v7797_v53, %s7295_s17  ;;  %1215 = vst [vmem:[#allocation2] sm:$0xff] %v1211_v54  ;;  %v6600_v57 = vunpack.i.h.bf16 %v6598_v61  ;;  %v6599_v45 = vunpack.i.l.bf16 %v6598_v61 }
 0x28a   : > { %6657 = vrot.lane.b32.xlu2 %v7794_v18, %s7296_s18  ;;  %1819 = vst [vmem:[#allocation3] sm:$0xff] %v1211_v54 }
 0x28b   : > { %1216 = vst [vmem:[#allocation2 + $0x8] sm:$0xff] %v7812_v55  ;;  %v1126_v28 = vsel %vm10273_vm9, %v7704_v59, %v6600_v57  ;;  %v1125_v62 = vsel %vm10273_vm9, %v7687_v24, %v6599_v45 }
 0x28c   : > { %1820 = vst [vmem:[#allocation3 + $0x8] sm:$0xff] %v7812_v55 }
 0x28d   : > { %1523 = vst [vmem:[#allocation2 + $0x100] sm:$0xff] %v1519_v52 }
 0x28e   : > { %1524 = vst [vmem:[#allocation2 + $0x108] sm:$0xff] %v1520_v2  ;;  %v7840_v5 = vpop.permute.xlu2 %6612 }
 0x28f   : > { %v6615_v0 = vunpack.i.h.bf16 %v7840_v5  ;;  %v6614_v33 = vunpack.i.l.bf16 %v7840_v5 }
 0x291   : > { %1231 = vrot.lane.b32.xlu0 %v1211_v54, %s7289_s11  ;;  %1233 = vrot.lane.b32.xlu1 %v7826_v21, %s7289_s11 }
 0x292   : > { %6672 = vrot.lane.b32.xlu2 %v7797_v53, %s7297_s19 }
 0x296   : > { %v7838_v4 = vpop.permute.xlu0 %6587  ;;  %v7851_v7 = vpop.permute.xlu2 %6622 }
 0x297   : > { %v7836_v3 = vpop.permute.xlu1 %6582  ;;  %v6590_v32 = vunpack.i.h.bf16 %v7838_v4  ;;  %v6589_v59 = vunpack.i.l.bf16 %v7838_v4  ;;  %v6625_v1 = vunpack.i.h.bf16 %v7851_v7  ;;  %v6624_v36 = vunpack.i.l.bf16 %v7851_v7 }
 0x298   : > { %v6585_v24 = vunpack.i.h.bf16 %v7836_v3  ;;  %v6584_v35 = vunpack.i.l.bf16 %v7836_v3 }
 0x299   : > { %1275 = vrot.lane.b32.xlu0 %v7826_v21, %s7288_s8  ;;  %1314 = vrot.lane.b32.xlu1 %v1211_v54, %s7293_s15 }
 0x29a   : > { %1273 = vrot.lane.b32.xlu2 %v1211_v54, %s7288_s8 }
 0x29e   : > { %v6608_v6 = vpop.permute.xlu0 %6607  ;;  %v6638_v9 = vpop.permute.xlu2 %6637 }
 0x29f   : > { %v6603_v48 = vpop.permute.xlu1 %6602  ;;  %v6610_v15 = vunpack.i.h.bf16 %v6608_v6  ;;  %v6609_v25 = vunpack.i.l.bf16 %v6608_v6  ;;  %v6640_v39 = vunpack.i.h.bf16 %v6638_v9  ;;  %v6639_v43 = vunpack.i.l.bf16 %v6638_v9 }
 0x2a0   : > { %v6605_v16 = vunpack.i.h.bf16 %v6603_v48  ;;  %v6604_v26 = vunpack.i.l.bf16 %v6603_v48 }
 0x2a1   : > { %1355 = vrot.lane.b32.xlu0 %v1211_v54, %s7298_s20  ;;  %1357 = vrot.lane.b32.xlu1 %v7826_v21, %s7298_s20 }
 0x2a2   : > { %1316 = vrot.lane.b32.xlu2 %v7826_v21, %s7293_s15  ;;  %v1130_v14 = vsel %vm10281_vm10, %v1125_v62, %v6604_v26  ;;  %v1131_v17 = vsel %vm10281_vm10, %v1126_v28, %v6605_v16  ;;  %v7915_v28 = vpack.c.bf16 %v7802_v30, %v7802_v30  ;;  %v1004_v62 = vsel %vm1001_vm11, %v6579_v19, %v6580_v63 }
 0x2a3   : > { %v1134_v13 = vsel %vm10282_vm4, %v1130_v14, %v6609_v25  ;;  %v1135_v38 = vsel %vm10282_vm4, %v1131_v17, %v6610_v15  ;;  %v1005_v15 = vsel %vm1001_vm11, %v6624_v36, %v6625_v1  ;;  %vm2017_vm11 = vcmask 23552  }
 0x2a4   : > { %v1139_v2 = vsel %vm10283_vm12, %v1134_v13, %v6614_v33  ;;  %v1140_v3 = vsel %vm10283_vm12, %v1135_v38, %v6615_v0 }
 0x2a6   : > { %v6633_v27 = vpop.permute.xlu0 %6632  ;;  %v6653_v44 = vpop.permute.xlu2 %6652 }
 0x2a7   : > { %v7853_v8 = vpop.permute.xlu1 %6617  ;;  %v6635_v31 = vunpack.i.h.bf16 %v6633_v27  ;;  %v6634_v34 = vunpack.i.l.bf16 %v6633_v27  ;;  %v6654_v60 = vunpack.i.l.bf16 %v6653_v44 }
 0x2a8   : > { %v6620_v46 = vunpack.i.h.bf16 %v7853_v8  ;;  %v6619_v49 = vunpack.i.l.bf16 %v7853_v8 }
 0x2a9   : > { %1398 = vrot.lane.b32.xlu0 %v7826_v21, %s7278_s26  ;;  %1437 = vrot.lane.b32.xlu1 %v1211_v54, %s7299_s21  ;;  %v1158_v51 = vsel %vm10273_vm9, %v6634_v34, %v6639_v43  ;;  %v1159_v40 = vsel %vm10273_vm9, %v6635_v31, %v6640_v39  ;;  %vm10279_vm9 = vcmask 15360  }
 0x2aa   : > { %1396 = vrot.lane.b32.xlu2 %v1211_v54, %s7278_s26  ;;  %v6655_v54 = vunpack.i.h.bf16 %v6653_v44  ;;  %v1144_v48 = vsel %vm10284_vm13, %v1139_v2, %v6619_v49  ;;  %v1145_v6 = vsel %vm10284_vm13, %v1140_v3, %v6620_v46 }
 0x2ab   : > { %v1149_v0 = vsel %vm1146_vm14, %v1144_v48, %v1004_v62  ;;  %v1150_v33 = vsel %vm1146_vm14, %v1145_v6, %v1005_v15 }
 0x2ae   : > { %v6648_v37 = vpop.permute.xlu0 %6647 }
 0x2af   : > { %v7859_v10 = vpop.permute.xlu1 %6627  ;;  %v6650_v47 = vunpack.i.h.bf16 %v6648_v37  ;;  %v6649_v22 = vunpack.i.l.bf16 %v6648_v37 }
 0x2b0   : > { %v6630_v27 = vunpack.i.h.bf16 %v7859_v10  ;;  %v6629_v9 = vunpack.i.l.bf16 %v7859_v10 }
 0x2b1   : > { %6677 = vrot.lane.b32.xlu0 %v7816_v56, %s7296_s18  ;;  %6687 = vrot.lane.b32.xlu1 %v7816_v56, %s7294_s16 }
 0x2b2   : > { %1439 = vrot.lane.b32.xlu2 %v7826_v21, %s7299_s21  ;;  %v1154_v14 = vsel %vm1151_vm15, %v1149_v0, %v6629_v9  ;;  %v7931_v30 = vsel %vm1151_vm15, %v1150_v33, %v6630_v27 }
 0x2b7   : > { %v6643_v41 = vpop.permute.xlu1 %6642 }
 0x2b8   : > { %v6645_v42 = vunpack.i.h.bf16 %v6643_v41  ;;  %v6644_v20 = vunpack.i.l.bf16 %v6643_v41 }
 0x2b9   : > { %6692 = vrot.lane.b32.xlu0 %v7821_v58, %s7297_s19  ;;  %1277 = vrot.lane.b32.xlu1 %v7812_v55, %s7288_s8 }
 0x2ba   : > { %v1162_v61 = vsel %vm10281_vm10, %v1158_v51, %v6644_v20  ;;  %v1163_v52 = vsel %vm10281_vm10, %v1159_v40, %v6645_v42  ;;  %6682 = vrot.lane.b32.xlu2 %v7821_v58, %s7295_s17 }
 0x2bb   : > { %v1166_v4 = vsel %vm10282_vm4, %v1162_v61, %v6649_v22  ;;  %v1167_v5 = vsel %vm10282_vm4, %v1163_v52, %v6650_v47 }
 0x2bc   : > { %v1170_v7 = vsel %vm10283_vm12, %v1166_v4, %v6654_v60  ;;  %v1171_v8 = vsel %vm10283_vm12, %v1167_v5, %v6655_v54 }
 0x2bd   : > { %v1174_v57 = vsel %vm10284_vm13, %v1170_v7, %v6584_v35  ;;  %v1175_v45 = vsel %vm10284_vm13, %v1171_v8, %v6585_v24  ;;  %v7997_v35 = vpack.c.bf16 %v1154_v14, %v1154_v14 }
 0x2be   : > { %v1178_v16 = vsel %vm1146_vm14, %v1174_v57, %v6589_v59  ;;  %v1179_v26 = vsel %vm1146_vm14, %v1175_v45, %v6590_v32 }
 0x2bf   : > { %v7920_v25 = vsel %vm1151_vm15, %v1178_v16, %v6594_v12  ;;  %v7925_v10 = vsel %vm1151_vm15, %v1179_v26, %v6595_v11 }
 0x2c0   : > { %v7940_v50 = vpack.c.bf16 %v7920_v25, %v1154_v14  ;;  %v7944_v11 = vpack.i.bf16 %v7931_v30, %v7925_v10  ;;  %v7948_v12 = vpack.i.bf16 %v7925_v10, %v7931_v30  ;;  %v7953_v63 = vpack.c.bf16 %v7925_v10, %v7931_v30 }
 0x2c1   : > { %1237 = vrot.lane.b32.xlu0 %v7915_v28, %s7289_s11  ;;  %1320 = vrot.lane.b32.xlu1 %v7915_v28, %s7293_s15  ;;  %v7957_v19 = vpack.i.bf16 %v1154_v14, %v7920_v25  ;;  %v7960_v17 = vpack.i.bf16 %v7920_v25, %v1154_v14  ;;  %v1521_v32 = vpack.c.bf16 %v1154_v14, %v7920_v25 }
 0x2c2   : > { %1235 = vrot.lane.b32.xlu2 %v7812_v55, %s7289_s11  ;;  %1217 = vst [vmem:[#allocation2 + $0x10] sm:$0xff] %v7940_v50  ;;  %v1522_v59 = vpack.c.bf16 %v7931_v30, %v7925_v10 }
 0x2c3   : > { %1821 = vst [vmem:[#allocation3 + $0x10] sm:$0xff] %v7940_v50 }
 0x2c4   : > { %1218 = vst [vmem:[#allocation2 + $0x18] sm:$0xff] %v7953_v63 }
 0x2c5   : > { %1822 = vst [vmem:[#allocation3 + $0x18] sm:$0xff] %v7953_v63 }
 0x2c6   : > { %1525 = vst [vmem:[#allocation2 + $0x110] sm:$0xff] %v1521_v32 }
 0x2c7   : > { %1526 = vst [vmem:[#allocation2 + $0x118] sm:$0xff] %v1522_v59 }
 0x2c9   : > { %1318 = vrot.lane.b32.xlu0 %v7812_v55, %s7293_s15  ;;  %1400 = vrot.lane.b32.xlu1 %v7812_v55, %s7278_s26 }
 0x2ca   : > { %1279 = vrot.lane.b32.xlu2 %v7915_v28, %s7288_s8 }
 0x2d1   : > { %1361 = vrot.lane.b32.xlu0 %v7915_v28, %s7298_s20  ;;  %1443 = vrot.lane.b32.xlu1 %v7915_v28, %s7299_s21 }
 0x2d2   : > { %1359 = vrot.lane.b32.xlu2 %v7812_v55, %s7298_s20 }
 0x2d9   : > { %1441 = vrot.lane.b32.xlu0 %v7812_v55, %s7299_s21  ;;  %6707 = vrot.lane.b32.xlu1 %v7957_v19, %s7294_s16  ;;  %v1184_v55 = vlaneseq }
 0x2da   : > { %1402 = vrot.lane.b32.xlu2 %v7915_v28, %s7278_s26 }
 0x2db   : > { %v1185_v24 = vand.u32 127, %v1184_v55 }
 0x2dd   : > { %v1186_v1 = vadd.s32 128, %v1185_v24  ;;  %v8007_v37 = vand.u32 15, %v1185_v24 }
 0x2df   : > { %v8009_v13 = vand.u32 15, %v1186_v1  ;;  %vm1999_vm3 = vcmp.ge.s32.totalorder %v8007_v37, 3  ;;  %vm10274_vm8 = vcmp.ge.s32.totalorder %v8007_v37, 7 }
 0x2e1   : > { %6717 = vrot.lane.b32.xlu1 %v7957_v19, %s7300_s22  ;;  %6697 = vrot.lane.b32.xlu0 %v7957_v19, %s7296_s18  ;;  %vm2000_vm0 = vcmp.ge.s32.totalorder %v8009_v13, 3  ;;  %vm10275_vm7 = vcmp.ge.s32.totalorder %v8009_v13, 7 }
 0x2e2   : > { %6702 = vrot.lane.b32.xlu2 %v7960_v17, %s7295_s17 }
 0x2e4   : > { %v6658_v31 = vpop.permute.xlu2 %6657 }
 0x2e5   : > { %v6660_v38 = vunpack.i.h.bf16 %v6658_v31  ;;  %v6659_v39 = vunpack.i.l.bf16 %v6658_v31 }
 0x2e7   : > { %v2354_v47 = vsel %vm2353_vm1, %v6659_v39, %v6660_v38  ;;  %v2355_v22 = vsel %vm2353_vm1, %v6660_v38, %v6659_v39 }
 0x2e9   : > { %6732 = vrot.lane.b32.xlu1 %v7960_v17, %s7301_s23  ;;  %6712 = vrot.lane.b32.xlu0 %v7960_v17, %s7297_s19 }
 0x2ea   : > { %6727 = vrot.lane.b32.xlu2 %v7957_v19, %s7302_s24 }
 0x2ec   : > { %v6673_v34 = vpop.permute.xlu2 %6672 }
 0x2ed   : > { %v6675_v43 = vunpack.i.h.bf16 %v6673_v34  ;;  %v6674_v44 = vunpack.i.l.bf16 %v6673_v34 }
 0x2ef   : > { %v2051_v54 = vsel %vm2050_vm2, %v6674_v44, %v6675_v43  ;;  %v2052_v60 = vsel %vm2050_vm2, %v6675_v43, %v6674_v44 }
 0x2f1   : > { %6722 = vrot.lane.b32.xlu0 %v7960_v17, %s7303_s25  ;;  %1239 = vrot.lane.b32.xlu1 %v7940_v50, %s7289_s11 }
 0x2f2   : > { %1241 = vrot.lane.b32.xlu2 %v7997_v35, %s7289_s11 }
 0x2f4   : > { %v8005_v36 = vpop.permute.xlu2 %1273 }
 0x2f5   : > { %v1289_v33 = vrot.slane %v8005_v36, 4 }
 0x2f9   : > { %1281 = vrot.lane.b32.xlu0 %v7940_v50, %s7288_s8  ;;  %1283 = vrot.lane.b32.xlu1 %v7997_v35, %s7288_s8 }
 0x2fa   : > { %1322 = vrot.lane.b32.xlu2 %v7940_v50, %s7293_s15 }
 0x2fb   : > { %v6668_v41 = vpop.permute.xlu0 %6667  ;;  %v6663_v46 = vpop.permute.xlu1 %6662 }
 0x2fc   : > { %v6670_v49 = vunpack.i.h.bf16 %v6668_v41  ;;  %v6669_v42 = vunpack.i.l.bf16 %v6668_v41  ;;  %v6665_v20 = vunpack.i.h.bf16 %v6663_v46  ;;  %v6664_v51 = vunpack.i.l.bf16 %v6663_v46  ;;  %v1317_v40 = vpop.permute.xlu2 %1316 }
 0x2fd   : > { %v1331_v14 = vrot.slane %v1317_v40, 4 }
 0x2fe   : > { %v2018_v61 = vsel %vm2017_vm11, %v6669_v42, %v6670_v49  ;;  %v2019_v52 = vsel %vm2017_vm11, %v6670_v49, %v6669_v42  ;;  %v2387_v2 = vsel %vm10276_vm6, %v6664_v51, %v6665_v20  ;;  %v2388_v3 = vsel %vm10276_vm6, %v6665_v20, %v6664_v51 }
 0x2ff   : > { %v2067_v4 = vsel %vm1999_vm3, %v2018_v61, %v2051_v54  ;;  %v2068_v5 = vsel %vm2000_vm0, %v2019_v52, %v2052_v60  ;;  %v2403_v48 = vsel %vm10274_vm8, %v2354_v47, %v2387_v2  ;;  %v2404_v6 = vsel %vm10275_vm7, %v2355_v22, %v2388_v3 }
 0x300   : > { %v2075_v7 = vpack.c.bf16 %v2068_v5, %v2067_v4  ;;  %v2411_v8 = vpack.c.bf16 %v2404_v6, %v2403_v48 }
 0x301   : > { %1324 = vrot.lane.b32.xlu0 %v7997_v35, %s7293_s15  ;;  %1363 = vrot.lane.b32.xlu1 %v7940_v50, %s7298_s20 }
 0x302   : > { %2079 = vst [vmem:[#allocation3 + $0x60] sm:$0xff] %v2075_v7  ;;  %1365 = vrot.lane.b32.xlu2 %v7997_v35, %s7298_s20 }
 0x303   : > { %2415 = vst [vmem:[#allocation3 + $0xe0] sm:$0xff] %v2411_v8  ;;  %v1232_v27 = vpop.permute.xlu0 %1231  ;;  %v1234_v9 = vpop.permute.xlu1 %1233 }
 0x304   : > { %v1247_v57 = vrot.slane %v1232_v27, 4  ;;  %v1248_v45 = vrot.slane %v1234_v9, 4  ;;  %v1397_v16 = vpop.permute.xlu2 %1396 }
 0x305   : > { %v1412_v42 = vrot.slane %v1397_v16, 4 }
 0x306   : > { %v1256_v26 = vsel %vm1255_vm5, %v1247_v57, %v1248_v45 }
 0x307   : > { %v1258_v62 = vsel %vm1151_vm15, %v1232_v27, %v1256_v26 }
 0x308   : > { %1269 = vst [vmem:[#allocation2 + $0x20] sm:$0xff] %v1258_v62 }
 0x309   : > { %1404 = vrot.lane.b32.xlu0 %v7940_v50, %s7278_s26  ;;  %1406 = vrot.lane.b32.xlu1 %v7997_v35, %s7278_s26 }
 0x30a   : > { %1445 = vrot.lane.b32.xlu2 %v7940_v50, %s7299_s21 }
 0x30b   : > { %v1276_v15 = vpop.permute.xlu0 %1275  ;;  %v1315_v0 = vpop.permute.xlu1 %1314 }
 0x30c   : > { %v1290_v32 = vrot.slane %v1276_v15, 4  ;;  %v1330_v59 = vrot.slane %v1315_v0, 4  ;;  %v1440_v31 = vpop.permute.xlu2 %1439 }
 0x30d   : > { %v1454_v20 = vrot.slane %v1440_v31, 4 }
 0x30e   : > { %v1297_v55 = vsel %vm1255_vm5, %v1289_v33, %v1290_v32  ;;  %v1338_v34 = vsel %vm1255_vm5, %v1330_v59, %v1331_v14 }
 0x30f   : > { %v1299_v24 = vsel %vm1146_vm14, %v8005_v36, %v1297_v55  ;;  %v1340_v1 = vsel %vm10284_vm13, %v1315_v0, %v1338_v34 }
 0x310   : > { %1310 = vst [vmem:[#allocation2 + $0x40] sm:$0xff] %v1299_v24 }
 0x311   : > { %1351 = vst [vmem:[#allocation2 + $0x60] sm:$0xff] %v1340_v1  ;;  %1447 = vrot.lane.b32.xlu0 %v7997_v35, %s7299_s21  ;;  %6737 = vrot.lane.b32.xlu1 %v7944_v11, %s7296_s18  ;;  %s7320_s18 = smov 8  }
 0x312   : > { %6747 = vrot.lane.b32.xlu2 %v7944_v11, %s7294_s16  ;;  %s7317_s16 = smov 9  }
 0x313   : > { %v1356_v50 = vpop.permute.xlu0 %1355  ;;  %v1358_v38 = vpop.permute.xlu1 %1357 }
 0x314   : > { %v1371_v39 = vrot.slane %v1356_v50, 4  ;;  %v1372_v43 = vrot.slane %v1358_v38, 4  ;;  %v6683_v44 = vpop.permute.xlu2 %6682 }
 0x315   : > { %v6685_v52 = vunpack.i.h.bf16 %v6683_v44  ;;  %v6684_v2 = vunpack.i.l.bf16 %v6683_v44 }
 0x316   : > { %v1379_v36 = vsel %vm1255_vm5, %v1371_v39, %v1372_v43 }
 0x317   : > { %v1381_v41 = vsel %vm10283_vm12, %v1356_v50, %v1379_v36  ;;  %v2389_v7 = vsel %vm10276_vm6, %v6684_v2, %v6685_v52  ;;  %v2390_v8 = vsel %vm10276_vm6, %v6685_v52, %v6684_v2 }
 0x318   : > { %1392 = vst [vmem:[#allocation2 + $0x80] sm:$0xff] %v1381_v41 }
 0x319   : > { %6742 = vrot.lane.b32.xlu0 %v7948_v12, %s7295_s17  ;;  %6752 = vrot.lane.b32.xlu1 %v7948_v12, %s7297_s19  ;;  %s7318_s17 = smov 121  }
 0x31a   : > { %6757 = vrot.lane.b32.xlu2 %v7944_v11, %s7300_s22 }
 0x31b   : > { %v1399_v46 = vpop.permute.xlu0 %1398  ;;  %v1438_v49 = vpop.permute.xlu1 %1437 }
 0x31c   : > { %v1413_v51 = vrot.slane %v1399_v46, 4  ;;  %v1453_v40 = vrot.slane %v1438_v49, 4  ;;  %v1236_v47 = vpop.permute.xlu2 %1235 }
 0x31d   : > { %v1249_v46 = vrot.slane %v1236_v47, 4 }
 0x31e   : > { %v1420_v22 = vsel %vm1255_vm5, %v1412_v42, %v1413_v51  ;;  %v1461_v54 = vsel %vm1255_vm5, %v1453_v40, %v1454_v20 }
 0x31f   : > { %v1422_v60 = vsel %vm10282_vm4, %v1397_v16, %v1420_v22  ;;  %v1463_v61 = vsel %vm10281_vm10, %v1438_v49, %v1461_v54  ;;  %v8091_v16 = vpack.c.bf16 %v7931_v30, %v7931_v30 }
 0x320   : > { %1433 = vst [vmem:[#allocation2 + $0xa0] sm:$0xff] %v1422_v60 }
 0x321   : > { %1474 = vst [vmem:[#allocation2 + $0xc0] sm:$0xff] %v1463_v61  ;;  %6767 = vrot.lane.b32.xlu0 %v7944_v11, %s7302_s24  ;;  %6762 = vrot.lane.b32.xlu1 %v7948_v12, %s7303_s25 }
 0x322   : > { %6772 = vrot.lane.b32.xlu2 %v7948_v12, %s7301_s23 }
 0x323   : > { %v6678_v3 = vpop.permute.xlu0 %6677  ;;  %v6688_v4 = vpop.permute.xlu1 %6687 }
 0x324   : > { %v6680_v5 = vunpack.i.h.bf16 %v6678_v3  ;;  %v6679_v48 = vunpack.i.l.bf16 %v6678_v3  ;;  %v1280_v6 = vpop.permute.xlu2 %1279  ;;  %v6690_v62 = vunpack.i.h.bf16 %v6688_v4  ;;  %v6689_v15 = vunpack.i.l.bf16 %v6688_v4 }
 0x325   : > { %v1292_v14 = vrot.slane %v1280_v6, 4 }
 0x326   : > { %v2356_v27 = vsel %vm2353_vm1, %v6679_v48, %v6680_v5  ;;  %v2357_v9 = vsel %vm2353_vm1, %v6680_v5, %v6679_v48  ;;  %v2020_v55 = vsel %vm2017_vm11, %v6689_v15, %v6690_v62  ;;  %v2021_v34 = vsel %vm2017_vm11, %v6690_v62, %v6689_v15 }
 0x327   : > { %v2405_v57 = vsel %vm10274_vm8, %v2356_v27, %v2389_v7  ;;  %v2406_v45 = vsel %vm10275_vm7, %v2357_v9, %v2390_v8 }
 0x328   : > { %v2412_v26 = vpack.c.bf16 %v2406_v45, %v2405_v57 }
 0x329   : > { %1243 = vrot.lane.b32.xlu0 %v7953_v63, %s7289_s11  ;;  %1245 = vrot.lane.b32.xlu1 %v8091_v16, %s7289_s11 }
 0x32a   : > { %2416 = vst [vmem:[#allocation3 + $0xe8] sm:$0xff] %v2412_v26  ;;  %1285 = vrot.lane.b32.xlu2 %v7953_v63, %s7288_s8 }
 0x32b   : > { %v6693_v0 = vpop.permute.xlu0 %6692  ;;  %v1278_v33 = vpop.permute.xlu1 %1277 }
 0x32c   : > { %v6695_v32 = vunpack.i.h.bf16 %v6693_v0  ;;  %v6694_v59 = vunpack.i.l.bf16 %v6693_v0  ;;  %v1291_v30 = vrot.slane %v1278_v33, 4  ;;  %v1360_v31 = vpop.permute.xlu2 %1359 }
 0x32d   : > { %v1373_v7 = vrot.slane %v1360_v31, 4 }
 0x32e   : > { %v2053_v24 = vsel %vm2050_vm2, %v6694_v59, %v6695_v32  ;;  %v2054_v1 = vsel %vm2050_vm2, %v6695_v32, %v6694_v59  ;;  %v1300_v50 = vsel %vm1255_vm5, %v1291_v30, %v1292_v14 }
 0x32f   : > { %v2069_v38 = vsel %vm1999_vm3, %v2020_v55, %v2053_v24  ;;  %v2070_v39 = vsel %vm2000_vm0, %v2021_v34, %v2054_v1  ;;  %v1301_v43 = vsel %vm1146_vm14, %v1278_v33, %v1300_v50 }
 0x330   : > { %v2076_v44 = vpack.c.bf16 %v2070_v39, %v2069_v38  ;;  %1311 = vst [vmem:[#allocation2 + $0x48] sm:$0xff] %v1301_v43 }
 0x331   : > { %1287 = vrot.lane.b32.xlu0 %v8091_v16, %s7288_s8  ;;  %1326 = vrot.lane.b32.xlu1 %v7953_v63, %s7293_s15 }
 0x332   : > { %2080 = vst [vmem:[#allocation3 + $0x68] sm:$0xff] %v2076_v44  ;;  %1328 = vrot.lane.b32.xlu2 %v8091_v16, %s7293_s15 }
 0x333   : > { %v1238_v36 = vpop.permute.xlu0 %1237  ;;  %v1321_v41 = vpop.permute.xlu1 %1320 }
 0x334   : > { %v1250_v49 = vrot.slane %v1238_v36, 4  ;;  %v1403_v42 = vpop.permute.xlu2 %1402  ;;  %v1333_v54 = vrot.slane %v1321_v41, 4 }
 0x335   : > { %v1415_v60 = vrot.slane %v1403_v42, 4 }
 0x336   : > { %v1259_v20 = vsel %vm1255_vm5, %v1249_v46, %v1250_v49 }
 0x337   : > { %v1260_v51 = vsel %vm1151_vm15, %v1236_v47, %v1259_v20 }
 0x338   : > { %1270 = vst [vmem:[#allocation2 + $0x28] sm:$0xff] %v1260_v51 }
 0x339   : > { %1367 = vrot.lane.b32.xlu0 %v7953_v63, %s7298_s20  ;;  %1369 = vrot.lane.b32.xlu1 %v8091_v16, %s7298_s20 }
 0x33a   : > { %1408 = vrot.lane.b32.xlu2 %v7953_v63, %s7278_s26 }
 0x33b   : > { %v1319_v40 = vpop.permute.xlu0 %1318  ;;  %v1401_v22 = vpop.permute.xlu1 %1400 }
 0x33c   : > { %v1332_v61 = vrot.slane %v1319_v40, 4  ;;  %v1414_v52 = vrot.slane %v1401_v22, 4  ;;  %v6703_v2 = vpop.permute.xlu2 %6702 }
 0x33d   : > { %v6705_v14 = vunpack.i.h.bf16 %v6703_v2  ;;  %v6704_v32 = vunpack.i.l.bf16 %v6703_v2 }
 0x33e   : > { %v1341_v3 = vsel %vm1255_vm5, %v1332_v61, %v1333_v54  ;;  %v1423_v47 = vsel %vm1255_vm5, %v1414_v52, %v1415_v60 }
 0x33f   : > { %v1342_v4 = vsel %vm10284_vm13, %v1319_v40, %v1341_v3  ;;  %v1424_v5 = vsel %vm10282_vm4, %v1401_v22, %v1423_v47  ;;  %v2391_v24 = vsel %vm10276_vm6, %v6704_v32, %v6705_v14  ;;  %v2392_v1 = vsel %vm10276_vm6, %v6705_v14, %v6704_v32 }
 0x340   : > { %1352 = vst [vmem:[#allocation2 + $0x68] sm:$0xff] %v1342_v4  ;;  %vm10280_vm6 = vcmask 932864  }
 0x341   : > { %1434 = vst [vmem:[#allocation2 + $0xa8] sm:$0xff] %v1424_v5  ;;  %1410 = vrot.lane.b32.xlu0 %v8091_v16, %s7278_s26  ;;  %1449 = vrot.lane.b32.xlu1 %v7953_v63, %s7299_s21 }
 0x342   : > { %1451 = vrot.lane.b32.xlu2 %v8091_v16, %s7299_s21 }
 0x343   : > { %v1362_v48 = vpop.permute.xlu0 %1361  ;;  %v1444_v6 = vpop.permute.xlu1 %1443 }
 0x344   : > { %v1374_v8 = vrot.slane %v1362_v48, 4  ;;  %v6728_v27 = vpop.permute.xlu2 %6727  ;;  %v1456_v26 = vrot.slane %v1444_v6, 4 }
 0x345   : > { %v6730_v36 = vunpack.i.h.bf16 %v6728_v27  ;;  %v6729_v41 = vunpack.i.l.bf16 %v6728_v27 }
 0x346   : > { %v1382_v9 = vsel %vm1255_vm5, %v1373_v7, %v1374_v8 }
 0x347   : > { %v1383_v57 = vsel %vm10283_vm12, %v1360_v31, %v1382_v9  ;;  %v1938_v61 = vsel %vm10279_vm9, %v6729_v41, %v6730_v36  ;;  %v1939_v52 = vsel %vm10279_vm9, %v6730_v36, %v6729_v41  ;;  %vm2252_vm9 = vcmp.ge.s32.totalorder %v8009_v13, 6 }
 0x348   : > { %1393 = vst [vmem:[#allocation2 + $0x88] sm:$0xff] %v1383_v57 }
 0x349   : > { %6777 = vrot.lane.b32.xlu0 %v7794_v18, %s7300_s22  ;;  %6782 = vrot.lane.b32.xlu1 %v7816_v56, %s7300_s22 }
 0x34a   : > { %6787 = vrot.lane.b32.xlu2 %v7797_v53, %s7303_s25 }
 0x34b   : > { %v1442_v63 = vpop.permute.xlu0 %1441  ;;  %v6708_v45 = vpop.permute.xlu1 %6707 }
 0x34c   : > { %v1455_v62 = vrot.slane %v1442_v63, 4  ;;  %v8141_v15 = vpop.permute.xlu2 %1241  ;;  %v6710_v46 = vunpack.i.h.bf16 %v6708_v45  ;;  %v6709_v49 = vunpack.i.l.bf16 %v6708_v45 }
 0x34e   : > { %v1464_v0 = vsel %vm1255_vm5, %v1455_v62, %v1456_v26  ;;  %v2022_v2 = vsel %vm2017_vm11, %v6709_v49, %v6710_v46  ;;  %v2023_v3 = vsel %vm2017_vm11, %v6710_v46, %v6709_v49 }
 0x34f   : > { %v1465_v33 = vsel %vm10281_vm10, %v1442_v63, %v1464_v0  ;;  %v1252_v0 = vrot.slane %v8141_v15, 4 }
 0x350   : > { %1475 = vst [vmem:[#allocation2 + $0xc8] sm:$0xff] %v1465_v33 }
 0x351   : > { %6792 = vrot.lane.b32.xlu0 %v7821_v58, %s7303_s25  ;;  %6797 = vrot.lane.b32.xlu1 %v7794_v18, %s7302_s24 }
 0x352   : > { %6802 = vrot.lane.b32.xlu2 %v7816_v56, %s7302_s24 }
 0x353   : > { %v8151_v59 = vpop.permute.xlu1 %6717  ;;  %v6698_v30 = vpop.permute.xlu0 %6697 }
 0x354   : > { %v6700_v31 = vunpack.i.h.bf16 %v6698_v30  ;;  %v6699_v55 = vunpack.i.l.bf16 %v6698_v30  ;;  %v8153_v34 = vpop.permute.xlu2 %1322  ;;  %v6720_v63 = vunpack.i.h.bf16 %v8151_v59  ;;  %v6719_v45 = vunpack.i.l.bf16 %v8151_v59 }
 0x356   : > { %v2358_v50 = vsel %vm2353_vm1, %v6699_v55, %v6700_v31  ;;  %v2359_v38 = vsel %vm2353_vm1, %v6700_v31, %v6699_v55 }
 0x357   : > { %v2407_v39 = vsel %vm10274_vm8, %v2358_v50, %v2391_v24  ;;  %v2408_v43 = vsel %vm10275_vm7, %v2359_v38, %v2392_v1  ;;  %vm10278_vm8 = vcmp.ge.s32.totalorder %v8007_v37, 2  ;;  %vm10277_vm7 = vcmp.ge.s32.totalorder %v8009_v13, 2 }
 0x358   : > { %v2413_v44 = vpack.c.bf16 %v2408_v43, %v2407_v39 }
 0x359   : > { %6807 = vrot.lane.b32.xlu0 %v7797_v53, %s7301_s23  ;;  %6812 = vrot.lane.b32.xlu1 %v7821_v58, %s7301_s23 }
 0x35a   : > { %2417 = vst [vmem:[#allocation3 + $0xf0] sm:$0xff] %v2413_v44  ;;  %6817 = vrot.lane.b32.xlu2 %v7957_v19, %s7304_s3 }
 0x35b   : > { %v6733_v42 = vpop.permute.xlu1 %6732  ;;  %v6713_v20 = vpop.permute.xlu0 %6712 }
 0x35c   : > { %v6735_v51 = vunpack.i.h.bf16 %v6733_v42  ;;  %v6734_v40 = vunpack.i.l.bf16 %v6733_v42  ;;  %v6715_v22 = vunpack.i.h.bf16 %v6713_v20  ;;  %v6714_v54 = vunpack.i.l.bf16 %v6713_v20  ;;  %v8171_v60 = vpop.permute.xlu2 %1365 }
 0x35e   : > { %v1971_v47 = vsel %vm10280_vm6, %v6734_v40, %v6735_v51  ;;  %v1972_v4 = vsel %vm10280_vm6, %v6735_v51, %v6734_v40  ;;  %v2055_v5 = vsel %vm2050_vm2, %v6714_v54, %v6715_v22  ;;  %v2056_v48 = vsel %vm2050_vm2, %v6715_v22, %v6714_v54 }
 0x35f   : > { %v1987_v6 = vsel %vm10278_vm8, %v1938_v61, %v1971_v47  ;;  %v1988_v7 = vsel %vm10277_vm7, %v1939_v52, %v1972_v4  ;;  %v2071_v8 = vsel %vm1999_vm3, %v2022_v2, %v2055_v5  ;;  %v2072_v27 = vsel %vm2000_vm0, %v2023_v3, %v2056_v48 }
 0x360   : > { %v1993_v9 = vpack.c.bf16 %v1988_v7, %v1987_v6  ;;  %v2077_v57 = vpack.c.bf16 %v2072_v27, %v2071_v8  ;;  %vm2269_vm7 = vcmask 48128   ;;  %vm2251_vm8 = vcmp.ge.s32.totalorder %v8007_v37, 6 }
 0x361   : > { %6822 = vrot.lane.b32.xlu0 %v7944_v11, %s7304_s3  ;;  %6827 = vrot.lane.b32.xlu1 %v7960_v17, %s7305_s4  ;;  %vm2302_vm6 = vcmask 965632   ;;  %v2274_v30 = vsel %vm2269_vm7, %v6719_v45, %v6720_v63  ;;  %v2275_v31 = vsel %vm2269_vm7, %v6720_v63, %v6719_v45  ;;  %v1334_v40 = vrot.slane %v8153_v34, 4 }
 0x362   : > { %1997 = vst [vmem:[#allocation3 + $0x50] sm:$0xff] %v1993_v9  ;;  %6832 = vrot.lane.b32.xlu2 %v7948_v12, %s7305_s4  ;;  %v1376_v22 = vrot.slane %v8171_v60, 4 }
 0x363   : > { %2081 = vst [vmem:[#allocation3 + $0x70] sm:$0xff] %v2077_v57  ;;  %v6723_v26 = vpop.permute.xlu0 %6722  ;;  %v1240_v62 = vpop.permute.xlu1 %1239 }
 0x364   : > { %v6725_v33 = vunpack.i.h.bf16 %v6723_v26  ;;  %v6724_v14 = vunpack.i.l.bf16 %v6723_v26  ;;  %v8200_v32 = vpop.permute.xlu2 %1445  ;;  %v1251_v59 = vrot.slane %v1240_v62, 4 }
 0x365   : > { %v1457_v57 = vrot.slane %v8200_v32, 4 }
 0x366   : > { %v2307_v55 = vsel %vm2302_vm6, %v6724_v14, %v6725_v33  ;;  %v2308_v24 = vsel %vm2302_vm6, %v6725_v33, %v6724_v14  ;;  %v1261_v1 = vsel %vm1255_vm5, %v1251_v59, %v1252_v0 }
 0x367   : > { %v2323_v50 = vsel %vm2251_vm8, %v2274_v30, %v2307_v55  ;;  %v2324_v15 = vsel %vm2252_vm9, %v2275_v31, %v2308_v24  ;;  %v1262_v38 = vsel %vm1151_vm15, %v1240_v62, %v1261_v1 }
 0x368   : > { %v2329_v39 = vpack.c.bf16 %v2324_v15, %v2323_v50  ;;  %1271 = vst [vmem:[#allocation2 + $0x30] sm:$0xff] %v1262_v38 }
 0x369   : > { %6837 = vrot.lane.b32.xlu0 %v7957_v19, %s7306_s5  ;;  %6842 = vrot.lane.b32.xlu1 %v7944_v11, %s7306_s5 }
 0x36a   : > { %2333 = vst [vmem:[#allocation3 + $0xd0] sm:$0xff] %v2329_v39  ;;  %6847 = vrot.lane.b32.xlu2 %v7960_v17, %s7307_s12 }
 0x36b   : > { %v1282_v43 = vpop.permute.xlu0 %1281  ;;  %v1284_v44 = vpop.permute.xlu1 %1283 }
 0x36c   : > { %v6748_v36 = vpop.permute.xlu2 %6747  ;;  %v1293_v41 = vrot.slane %v1282_v43, 4  ;;  %v1294_v46 = vrot.slane %v1284_v44, 4 }
 0x36d   : > { %v6750_v0 = vunpack.i.h.bf16 %v6748_v36  ;;  %v6749_v33 = vunpack.i.l.bf16 %v6748_v36 }
 0x36e   : > { %v1302_v49 = vsel %vm1255_vm5, %v1293_v41, %v1294_v46 }
 0x36f   : > { %v1303_v42 = vsel %vm1146_vm14, %v1282_v43, %v1302_v49  ;;  %v2024_v15 = vsel %vm2017_vm11, %v6749_v33, %v6750_v0  ;;  %v2025_v38 = vsel %vm2017_vm11, %v6750_v0, %v6749_v33  ;;  %vm10381_vm11 = vcmask 392192  }
 0x370   : > { %1312 = vst [vmem:[#allocation2 + $0x50] sm:$0xff] %v1303_v42 }
 0x371   : > { %6852 = vrot.lane.b32.xlu0 %v7948_v12, %s7307_s12  ;;  %6857 = vrot.lane.b32.xlu1 %v7794_v18, %s7304_s3 }
 0x372   : > { %6862 = vrot.lane.b32.xlu2 %v7816_v56, %s7304_s3 }
 0x373   : > { %v1325_v20 = vpop.permute.xlu0 %1324  ;;  %v1364_v51 = vpop.permute.xlu1 %1363 }
 0x374   : > { %v8228_v54 = vpop.permute.xlu2 %6757  ;;  %v1335_v61 = vrot.slane %v1325_v20, 4  ;;  %v1375_v52 = vrot.slane %v1364_v51, 4 }
 0x376   : > { %v1343_v2 = vsel %vm1255_vm5, %v1334_v40, %v1335_v61  ;;  %v1384_v3 = vsel %vm1255_vm5, %v1375_v52, %v1376_v22  ;;  %v6760_v61 = vunpack.i.h.bf16 %v8228_v54  ;;  %v6759_v52 = vunpack.i.l.bf16 %v8228_v54 }
 0x377   : > { %v1344_v47 = vsel %vm10284_vm13, %v8153_v34, %v1343_v2  ;;  %v1385_v4 = vsel %vm10283_vm12, %v1364_v51, %v1384_v3  ;;  %vm10371_vm12 = vcmp.ge.s32.totalorder %v8007_v37, 7  ;;  %vm10372_vm13 = vcmp.ge.s32.totalorder %v8009_v13, 7 }
 0x378   : > { %1353 = vst [vmem:[#allocation2 + $0x70] sm:$0xff] %v1344_v47 }
 0x379   : > { %1394 = vst [vmem:[#allocation2 + $0x90] sm:$0xff] %v1385_v4  ;;  %6867 = vrot.lane.b32.xlu0 %v7797_v53, %s7305_s4  ;;  %6872 = vrot.lane.b32.xlu1 %v7821_v58, %s7305_s4 }
 0x37a   : > { %6877 = vrot.lane.b32.xlu2 %v7794_v18, %s7306_s5 }
 0x37b   : > { %v1405_v60 = vpop.permute.xlu0 %1404  ;;  %v1407_v5 = vpop.permute.xlu1 %1406 }
 0x37c   : > { %v8241_v48 = vpop.permute.xlu2 %6772  ;;  %v1416_v6 = vrot.slane %v1405_v60, 4  ;;  %v1417_v7 = vrot.slane %v1407_v5, 4 }
 0x37d   : > { %v6775_v2 = vunpack.i.h.bf16 %v8241_v48  ;;  %v6774_v3 = vunpack.i.l.bf16 %v8241_v48  ;;  %v2276_v48 = vsel %vm2269_vm7, %v6759_v52, %v6760_v61 }
 0x37e   : > { %v1425_v34 = vsel %vm1255_vm5, %v1416_v6, %v1417_v7 }
 0x37f   : > { %v1426_v8 = vsel %vm10282_vm4, %v1405_v60, %v1425_v34  ;;  %v2277_v34 = vsel %vm2269_vm7, %v6760_v61, %v6759_v52  ;;  %v6407_v52 = vld [vmem:[#allocation3 + $0xe4] sm:$0xf0] }
 0x380   : > { %1435 = vst [vmem:[#allocation2 + $0xb0] sm:$0xff] %v1426_v8 }
 0x381   : > { %6882 = vrot.lane.b32.xlu0 %v7816_v56, %s7306_s5  ;;  %6887 = vrot.lane.b32.xlu1 %v7797_v53, %s7307_s12 }
 0x382   : > { %6892 = vrot.lane.b32.xlu2 %v7821_v58, %s7307_s12 }
 0x383   : > { %v1448_v27 = vpop.permute.xlu0 %1447  ;;  %v6738_v9 = vpop.permute.xlu1 %6737 }
 0x384   : > { %v8252_v63 = vpop.permute.xlu2 %1285  ;;  %v1458_v45 = vrot.slane %v1448_v27, 4  ;;  %v6740_v14 = vunpack.i.h.bf16 %v6738_v9  ;;  %v6739_v59 = vunpack.i.l.bf16 %v6738_v9 }
 0x386   : > { %v1466_v26 = vsel %vm1255_vm5, %v1457_v57, %v1458_v45  ;;  %v2360_v39 = vsel %vm2353_vm1, %v6739_v59, %v6740_v14  ;;  %v2361_v43 = vsel %vm2353_vm1, %v6740_v14, %v6739_v59  ;;  %vm10378_vm1 = vcmp.ge.s32.totalorder %v8009_v13, 2 }
 0x387   : > { %v1467_v62 = vsel %vm10281_vm10, %v8200_v32, %v1466_v26  ;;  %vm10369_vm10 = vcmask 973824  }
 0x388   : > { %1476 = vst [vmem:[#allocation2 + $0xd0] sm:$0xff] %v1467_v62  ;;  %vm10370_vm4 = vmmov %vm10369_vm10 }
 0x389   : > { %6897 = vrot.lane.b32.xlu0 %v7957_v19, %s7308_s13  ;;  %6902 = vrot.lane.b32.xlu1 %v7944_v11, %s7308_s13 }
 0x38a   : > { %6907 = vrot.lane.b32.xlu2 %v7960_v17, %s7286_s6 }
 0x38b   : > { %v6743_v30 = vpop.permute.xlu0 %6742  ;;  %v6753_v31 = vpop.permute.xlu1 %6752 }
 0x38c   : > { %v8263_v55 = vpop.permute.xlu2 %1328  ;;  %v6745_v32 = vunpack.i.h.bf16 %v6743_v30  ;;  %v6744_v24 = vunpack.i.l.bf16 %v6743_v30  ;;  %v6755_v1 = vunpack.i.h.bf16 %v6753_v31  ;;  %v6754_v50 = vunpack.i.l.bf16 %v6753_v31  ;;  %v6112_v31 = vld [vmem:[#allocation3 + $0x70] sm:$0xf] }
 0x38e   : > { %v2393_v44 = vsel %vm10369_vm10, %v6744_v24, %v6745_v32  ;;  %v2394_v36 = vsel %vm10370_vm4, %v6745_v32, %v6744_v24  ;;  %v2057_v41 = vsel %vm2050_vm2, %v6754_v50, %v6755_v1  ;;  %v2058_v46 = vsel %vm2050_vm2, %v6755_v1, %v6754_v50  ;;  %v6176_v32 = vld [vmem:[#allocation3 + $0xf0] sm:$0xf]  ;;  %v6408_v24 = vld [vmem:[#allocation3 + $0xf4] sm:$0xf] }
 0x38f   : > { %v2409_v49 = vsel %vm10371_vm12, %v2360_v39, %v2393_v44  ;;  %v2410_v42 = vsel %vm10372_vm13, %v2361_v43, %v2394_v36  ;;  %v2073_v20 = vsel %vm1999_vm3, %v2024_v15, %v2057_v41  ;;  %v2074_v51 = vsel %vm2000_vm0, %v2025_v38, %v2058_v46  ;;  %v6392_v1 = vld [vmem:[#allocation3 + $0x74] sm:$0xf]  ;;  %v7256_v38 = vld [vmem:[#allocation2] sm:$0xff] }
 0x390   : > { %v2414_v40 = vpack.c.bf16 %v2410_v42, %v2409_v49  ;;  %v2078_v22 = vpack.c.bf16 %v2074_v51, %v2073_v20  ;;  %vm10373_vm0 = vcmask 932864   ;;  %vm10375_vm10 = vcmask 15360  }
 0x391   : > { %6912 = vrot.lane.b32.xlu0 %v7948_v12, %s7286_s6  ;;  %6917 = vrot.lane.b32.xlu1 %v7794_v18, %s7308_s13  ;;  %v1973_v8 = vsel %vm10373_vm0, %v6774_v3, %v6775_v2  ;;  %vm10374_vm4 = vmmov %vm10373_vm0  ;;  %vm10377_vm13 = vcmp.ge.s32.totalorder %v8007_v37, 2  ;;  %vm10379_vm2 = vcmask 654336   ;;  %vm10380_vm3 = vcmask 523264  }
 0x392   : > { %2418 = vst [vmem:[#allocation3 + $0xf8] sm:$0xff] %v2414_v40  ;;  %6922 = vrot.lane.b32.xlu2 %v7816_v56, %s7308_s13  ;;  %v1974_v27 = vsel %vm10374_vm4, %v6775_v2, %v6774_v3  ;;  %vm10376_vm12 = vmmov %vm10375_vm10  ;;  %v6170_v2 = vld [vmem:[#allocation3 + $0xe8] sm:$0xf0]  ;;  %v6391_v3 = vld [vmem:[#allocation3 + $0x64] sm:$0xf0]  ;;  %vm10382_vm0 = vcmask 261120  }
 0x393   : > { %2082 = vst [vmem:[#allocation3 + $0x78] sm:$0xff] %v2078_v22  ;;  %v6768_v47 = vpop.permute.xlu0 %6767  ;;  %v6763_v4 = vpop.permute.xlu1 %6762 }
 0x394   : > { %v8291_v60 = vpop.permute.xlu2 %1408  ;;  %v6770_v54 = vunpack.i.h.bf16 %v6768_v47  ;;  %v6769_v5 = vunpack.i.l.bf16 %v6768_v47  ;;  %v6765_v6 = vunpack.i.h.bf16 %v6763_v4  ;;  %v6764_v7 = vunpack.i.l.bf16 %v6763_v4  ;;  %v6106_v47 = vld [vmem:[#allocation3 + $0x68] sm:$0xf0] }
 0x395   : > { %v7257_v4 = vld [vmem:[#allocation2 + $0x8] sm:$0xff] }
 0x396   : > { %v1940_v9 = vsel %vm10375_vm10, %v6769_v5, %v6770_v54  ;;  %v1941_v57 = vsel %vm10376_vm12, %v6770_v54, %v6769_v5  ;;  %v2309_v45 = vsel %vm2302_vm6, %v6764_v7, %v6765_v6  ;;  %v2310_v26 = vsel %vm2302_vm6, %v6765_v6, %v6764_v7  ;;  %v6168_v54 = vld [vmem:[#allocation3 + $0xe0] sm:$0xf]  ;;  %v6406_v5 = vld [vmem:[#allocation3 + $0xe4] sm:$0xf] }
 0x397   : > { %v1989_v62 = vsel %vm10377_vm13, %v1940_v9, %v1973_v8  ;;  %v1990_v0 = vsel %vm10378_vm1, %v1941_v57, %v1974_v27  ;;  %v2325_v33 = vsel %vm2251_vm8, %v2276_v48, %v2309_v45  ;;  %v2326_v14 = vsel %vm2252_vm9, %v2277_v34, %v2310_v26  ;;  %v6104_v6 = vld [vmem:[#allocation3 + $0x60] sm:$0xf]  ;;  %v6390_v7 = vld [vmem:[#allocation3 + $0x64] sm:$0xf] }
 0x398   : > { %v1994_v59 = vpack.c.bf16 %v1990_v0, %v1989_v62  ;;  %v2330_v30 = vpack.c.bf16 %v2326_v14, %v2325_v33  ;;  %v6169_v48 = vor.u32 %v6407_v52, %v6168_v54  ;;  %v6173_v34 = vor.u32 %v6406_v5, %v6170_v2 }
 0x399   : > { %6927 = vrot.lane.b32.xlu0 %v7797_v53, %s7286_s6  ;;  %6932 = vrot.lane.b32.xlu1 %v7821_v58, %s7286_s6  ;;  %v6409_v50 = vld [vmem:[#allocation3 + $0xf4] sm:$0xf0]  ;;  %v6178_v15 = vld [vmem:[#allocation3 + $0xf8] sm:$0xf0]  ;;  %v6105_v9 = vor.u32 %v6391_v3, %v6104_v6  ;;  %v6109_v57 = vor.u32 %v6390_v7, %v6106_v47  ;;  %v1295_v45 = vrot.slane %v8252_v63, 4  ;;  %v1418_v3 = vrot.slane %v8291_v60, 4 }
 0x39a   : > { %1998 = vst [vmem:[#allocation3 + $0x58] sm:$0xff] %v1994_v59  ;;  %1478 = vrot.lane.b32.xlu2 %v7256_v38, %s7309_s14  ;;  %v6393_v39 = vld [vmem:[#allocation3 + $0x74] sm:$0xf0]  ;;  %v6114_v43 = vld [vmem:[#allocation3 + $0x78] sm:$0xf0]  ;;  %v6177_v44 = vor.u32 %v6409_v50, %v6176_v32  ;;  %v6181_v36 = vor.u32 %v6408_v24, %v6178_v15  ;;  %v7258_v24 = vld [vmem:[#allocation2 + $0x10] sm:$0xff] }
 0x39b   : > { %2334 = vst [vmem:[#allocation3 + $0xd8] sm:$0xff] %v2330_v30  ;;  %v1244_v41 = vpop.permute.xlu0 %1243  ;;  %v1246_v46 = vpop.permute.xlu1 %1245  ;;  %v6113_v49 = vor.u32 %v6393_v39, %v6112_v31  ;;  %v6117_v42 = vor.u32 %v6392_v1, %v6114_v43  ;;  %v6160_v1 = vld [vmem:[#allocation3 + $0xd0] sm:$0xf]  ;;  %v6404_v50 = vld [vmem:[#allocation3 + $0xd4] sm:$0xf]  ;;  %v7259_v15 = vld [vmem:[#allocation2 + $0x18] sm:$0xff] }
 0x39c   : > { %v8314_v20 = vpop.permute.xlu2 %1451  ;;  %v1253_v51 = vrot.slane %v1244_v41, 4  ;;  %v1254_v40 = vrot.slane %v1246_v46, 4  ;;  %4000 = vmatpush.bf16.xpose.msrb.mxu2 %v6177_v44  ;;  %4169 = vmatpush.bf16.xpose.msrb.mxu3 %v6181_v36  ;;  %v6388_v38 = vld [vmem:[#allocation3 + $0x54] sm:$0xf]  ;;  %vm10390_vm1 = vcmp.ge.s32.totalorder %v8007_v37, 2  ;;  %s7311_s6 = smov 11  }
 0x39d   : > { %3662 = vmatpush.bf16.xpose.msrb.mxu0 %v6113_v49  ;;  %3831 = vmatpush.bf16.xpose.msrb.mxu1 %v6117_v42  ;;  %v1460_v47 = vrot.slane %v8314_v20, 4  ;;  %v8365_v20 = vld [vmem:[#allocation2 + $0x108] sm:$0xff] }
 0x39e   : > { %v1263_v22 = vsel %vm1255_vm5, %v1253_v51, %v1254_v40 }
 0x39f   : > { %v1264_v61 = vsel %vm1151_vm15, %v1244_v41, %v1263_v22  ;;  %v8342_v22 = vpack.c.bf16 %v7787_v23, %v7787_v23 }
 0x3a0   : > { %1272 = vst [vmem:[#allocation2 + $0x38] sm:$0xff] %v1264_v61  ;;  %v8346_v61 = vld [vmem:[#allocation2 + $0x100] sm:$0xff] }
 0x3a1   : > { %1480 = vrot.lane.b32.xlu0 %v7826_v21, %s7309_s14  ;;  %1482 = vrot.lane.b32.xlu1 %v7257_v4, %s7309_s14  ;;  %v1337_v21 = vrot.slane %v8263_v55, 4  ;;  %v6389_v55 = vld [vmem:[#allocation3 + $0x54] sm:$0xf0]  ;;  %v6098_v32 = vld [vmem:[#allocation3 + $0x58] sm:$0xf0] }
 0x3a2   : > { %1484 = vrot.lane.b32.xlu2 %v7915_v28, %s7309_s14  ;;  %v6405_v30 = vld [vmem:[#allocation3 + $0xd4] sm:$0xf0]  ;;  %v6162_v31 = vld [vmem:[#allocation3 + $0xd8] sm:$0xf0]  ;;  %v6101_v46 = vor.u32 %v6388_v38, %v6098_v32 }
 0x3a3   : > { %v1288_v8 = vpop.permute.xlu0 %1287  ;;  %v1327_v27 = vpop.permute.xlu1 %1326  ;;  %v6161_v39 = vor.u32 %v6405_v30, %v6160_v1  ;;  %v6165_v43 = vor.u32 %v6404_v50, %v6162_v31  ;;  %v8393_v30 = vpack.c.bf16 %v7925_v10, %v7925_v10  ;;  %v8397_v31 = vld [vmem:[#allocation2 + $0x118] sm:$0xff] }
 0x3a4   : > { %v8325_v26 = vpop.permute.xlu2 %6787  ;;  %v1296_v62 = vrot.slane %v1288_v8, 4  ;;  %v1336_v0 = vrot.slane %v1327_v27, 4  ;;  %4001 = vmatpush.bf16.xpose.msrb.mxu2 %v6169_v48  ;;  %4170 = vmatpush.bf16.xpose.msrb.mxu3 %v6173_v34  ;;  %v8363_v48 = vpack.c.bf16 %v7791_v29, %v7791_v29  ;;  %v8373_v8 = vld [vmem:[#allocation2 + $0x110] sm:$0xff] }
 0x3a5   : > { %3663 = vmatpush.bf16.xpose.msrb.mxu0 %v6105_v9  ;;  %3832 = vmatpush.bf16.xpose.msrb.mxu1 %v6109_v57  ;;  %v6790_v34 = vunpack.i.h.bf16 %v8325_v26 }
 0x3a6   : > { %v1304_v28 = vsel %vm1255_vm5, %v1295_v45, %v1296_v62  ;;  %v1345_v33 = vsel %vm1255_vm5, %v1336_v0, %v1337_v21 }
 0x3a7   : > { %v1305_v14 = vsel %vm1146_vm14, %v8252_v63, %v1304_v28  ;;  %v1346_v59 = vsel %vm10379_vm2, %v1327_v27, %v1345_v33  ;;  %v6096_v63 = vld [vmem:[#allocation3 + $0x50] sm:$0xf]  ;;  %vm10391_vm2 = vcmp.ge.s32.totalorder %v8009_v13, 2 }
 0x3a8   : > { %1313 = vst [vmem:[#allocation2 + $0x58] sm:$0xff] %v1305_v14  ;;  %v6097_v41 = vor.u32 %v6389_v55, %v6096_v63  ;;  %v8389_v14 = vpack.c.bf16 %v7920_v25, %v7920_v25 }
 0x3a9   : > { %1354 = vst [vmem:[#allocation2 + $0x78] sm:$0xff] %v1346_v59  ;;  %1486 = vrot.lane.b32.xlu0 %v7258_v24, %s7309_s14  ;;  %1488 = vrot.lane.b32.xlu1 %v7997_v35, %s7309_s14 }
 0x3aa   : > { %1490 = vrot.lane.b32.xlu2 %v7259_v15, %s7309_s14 }
 0x3ab   : > { %v1368_v44 = vpop.permute.xlu0 %1367  ;;  %v1370_v36 = vpop.permute.xlu1 %1369 }
 0x3ac   : > { %v8336_v49 = vpop.permute.xlu2 %6802  ;;  %v1377_v42 = vrot.slane %v1368_v44, 4  ;;  %v1378_v51 = vrot.slane %v1370_v36, 4  ;;  %4002 = vmatpush.bf16.xpose.msrb.mxu2 %v6161_v39  ;;  %4171 = vmatpush.bf16.xpose.msrb.mxu3 %v6165_v43 }
 0x3ad   : > { %3664 = vmatpush.bf16.xpose.msrb.mxu0 %v6097_v41  ;;  %3833 = vmatpush.bf16.xpose.msrb.mxu1 %v6101_v46 }
 0x3ae   : > { %v1386_v35 = vsel %vm1255_vm5, %v1377_v42, %v1378_v51  ;;  %v6805_v42 = vunpack.i.h.bf16 %v8336_v49  ;;  %v6804_v51 = vunpack.i.l.bf16 %v8336_v49 }
 0x3af   : > { %v1387_v40 = vsel %vm10380_vm3, %v1368_v44, %v1386_v35  ;;  %vm10392_vm3 = vmmov %vm10390_vm1 }
 0x3b0   : > { %1395 = vst [vmem:[#allocation2 + $0x98] sm:$0xff] %v1387_v40 }
 0x3b1   : > { %1492 = vrot.lane.b32.xlu0 %v8091_v16, %s7309_s14  ;;  %1539 = vrot.lane.b32.xlu1 %v8346_v61, %s7289_s11 }
 0x3b2   : > { %1541 = vrot.lane.b32.xlu2 %v8342_v22, %s7289_s11 }
 0x3b3   : > { %v1411_v52 = vpop.permute.xlu0 %1410  ;;  %v1450_v2 = vpop.permute.xlu1 %1449 }
 0x3b4   : > { %v8354_v4 = vpop.permute.xlu2 %6817  ;;  %v1419_v23 = vrot.slane %v1411_v52, 4  ;;  %v1459_v54 = vrot.slane %v1450_v2, 4 }
 0x3b6   : > { %v1427_v16 = vsel %vm1255_vm5, %v1418_v3, %v1419_v23  ;;  %v1468_v5 = vsel %vm1255_vm5, %v1459_v54, %v1460_v47 }
 0x3b7   : > { %v1428_v6 = vsel %vm10381_vm11, %v8291_v60, %v1427_v16  ;;  %v1469_v7 = vsel %vm10382_vm0, %v1450_v2, %v1468_v5  ;;  %v6789_v60 = vunpack.i.l.bf16 %v8325_v26  ;;  %vm10393_vm11 = vmmov %vm10391_vm2  ;;  %vm2185_vm0 = vcmask 39936  }
 0x3b8   : > { %1436 = vst [vmem:[#allocation2 + $0xb8] sm:$0xff] %v1428_v6 }
 0x3b9   : > { %1477 = vst [vmem:[#allocation2 + $0xd8] sm:$0xff] %v1469_v7  ;;  %1543 = vrot.lane.b32.xlu0 %v8365_v20, %s7289_s11  ;;  %1545 = vrot.lane.b32.xlu1 %v8363_v48, %s7289_s11  ;;  %v2303_v21 = vsel %vm2302_vm6, %v6789_v60, %v6790_v34  ;;  %v2304_v62 = vsel %vm2302_vm6, %v6790_v34, %v6789_v60 }
 0x3ba   : > { %1547 = vrot.lane.b32.xlu2 %v8373_v8, %s7289_s11 }
 0x3bb   : > { %v6778_v29 = vpop.permute.xlu0 %6777  ;;  %v6783_v27 = vpop.permute.xlu1 %6782 }
 0x3bc   : > { %v8377_v9 = vpop.permute.xlu2 %6832  ;;  %v6780_v57 = vunpack.i.h.bf16 %v6778_v29  ;;  %v6779_v45 = vunpack.i.l.bf16 %v6778_v29  ;;  %v6785_v55 = vunpack.i.h.bf16 %v6783_v27  ;;  %v6784_v32 = vunpack.i.l.bf16 %v6783_v27 }
 0x3be   : > { %v2270_v0 = vsel %vm2269_vm7, %v6779_v45, %v6780_v57  ;;  %v2271_v28 = vsel %vm2269_vm7, %v6780_v57, %v6779_v45  ;;  %v2272_v15 = vsel %vm2269_vm7, %v6784_v32, %v6785_v55  ;;  %v2273_v63 = vsel %vm2269_vm7, %v6785_v55, %v6784_v32 }
 0x3bf   : > { %v2319_v26 = vsel %vm2251_vm8, %v2270_v0, %v2303_v21  ;;  %v2320_v33 = vsel %vm2252_vm9, %v2271_v28, %v2304_v62  ;;  %v6835_v0 = vunpack.i.h.bf16 %v8377_v9  ;;  %v6834_v28 = vunpack.i.l.bf16 %v8377_v9 }
 0x3c0   : > { %v2327_v59 = vpack.c.bf16 %v2320_v33, %v2319_v26  ;;  %v6820_v9 = vunpack.i.h.bf16 %v8354_v4 }
 0x3c1   : > { %1549 = vrot.lane.b32.xlu0 %v8389_v14, %s7289_s11  ;;  %1551 = vrot.lane.b32.xlu1 %v8397_v31, %s7289_s11 }
 0x3c2   : > { %2331 = vst [vmem:[#allocation3 + $0xc0] sm:$0xff] %v2327_v59  ;;  %1553 = vrot.lane.b32.xlu2 %v8393_v30, %s7289_s11  ;;  %s7314_s11 = smov 10  }
 0x3c3   : > { %v6793_v25 = vpop.permute.xlu0 %6792  ;;  %v6798_v24 = vpop.permute.xlu1 %6797 }
 0x3c4   : > { %v8403_v1 = vpop.permute.xlu2 %6847  ;;  %v6795_v10 = vunpack.i.h.bf16 %v6793_v25  ;;  %v6794_v50 = vunpack.i.l.bf16 %v6793_v25  ;;  %v6800_v41 = vunpack.i.h.bf16 %v6798_v24  ;;  %v6799_v46 = vunpack.i.l.bf16 %v6798_v24 }
 0x3c5   : > { %v6819_v24 = vunpack.i.l.bf16 %v8354_v4 }
 0x3c6   : > { %v2305_v38 = vsel %vm2302_vm6, %v6794_v50, %v6795_v10  ;;  %v2306_v39 = vsel %vm2302_vm6, %v6795_v10, %v6794_v50  ;;  %vm10383_vm6 = vmmov %vm10375_vm10 }
 0x3c7   : > { %v2321_v43 = vsel %vm2251_vm8, %v2272_v15, %v2305_v38  ;;  %v2322_v44 = vsel %vm2252_vm9, %v2273_v63, %v2306_v39  ;;  %v1934_v54 = vsel %vm10383_vm6, %v6799_v46, %v6800_v41  ;;  %vm10384_vm7 = vmmov %vm10383_vm6 }
 0x3c8   : > { %v2328_v36 = vpack.c.bf16 %v2322_v44, %v2321_v43  ;;  %v1935_v16 = vsel %vm10384_vm7, %v6800_v41, %v6799_v46  ;;  %vm10385_vm8 = vmmov %vm10374_vm4  ;;  %vm2167_vm7 = vcmp.ge.s32.totalorder %v8007_v37, 5 }
 0x3c9   : > { %1579 = vrot.lane.b32.xlu0 %v8346_v61, %s7288_s8  ;;  %1581 = vrot.lane.b32.xlu1 %v8342_v22, %s7288_s8  ;;  %vm10386_vm9 = vmmov %vm10374_vm4  ;;  %v6152_v62 = vld [vmem:[#allocation3 + $0xc0] sm:$0xf]  ;;  %v6402_v59 = vld [vmem:[#allocation3 + $0xc4] sm:$0xf] }
 0x3ca   : > { %2332 = vst [vmem:[#allocation3 + $0xc8] sm:$0xff] %v2328_v36  ;;  %1583 = vrot.lane.b32.xlu2 %v8365_v20, %s7288_s8  ;;  %vm10387_vm10 = vmmov %vm10374_vm4 }
 0x3cb   : > { %v6808_v35 = vpop.permute.xlu0 %6807  ;;  %v6813_v40 = vpop.permute.xlu1 %6812  ;;  %vm10388_vm12 = vmmov %vm10383_vm6 }
 0x3cc   : > { %v8421_v52 = vpop.permute.xlu2 %6862  ;;  %v6810_v2 = vunpack.i.h.bf16 %v6808_v35  ;;  %v6809_v3 = vunpack.i.l.bf16 %v6808_v35  ;;  %v6815_v47 = vunpack.i.h.bf16 %v6813_v40  ;;  %v6814_v23 = vunpack.i.l.bf16 %v6813_v40  ;;  %vm10389_vm13 = vmmov %vm10383_vm6 }
 0x3cd   : > { %v1936_v34 = vsel %vm10388_vm12, %v6804_v51, %v6805_v42  ;;  %v1937_v60 = vsel %vm10389_vm13, %v6805_v42, %v6804_v51  ;;  %vm2218_vm6 = vcmask 957440   ;;  %v2190_v51 = vsel %vm2185_vm0, %v6819_v24, %v6820_v9 }
 0x3ce   : > { %v1967_v5 = vsel %vm10385_vm8, %v6809_v3, %v6810_v2  ;;  %v1968_v6 = vsel %vm10386_vm9, %v6810_v2, %v6809_v3  ;;  %v1969_v7 = vsel %vm10374_vm4, %v6814_v23, %v6815_v47  ;;  %v1970_v49 = vsel %vm10387_vm10, %v6815_v47, %v6814_v23 }
 0x3cf   : > { %v1983_v29 = vsel %vm10390_vm1, %v1934_v54, %v1967_v5  ;;  %v1984_v27 = vsel %vm10391_vm2, %v1935_v16, %v1968_v6  ;;  %v1985_v45 = vsel %vm10392_vm3, %v1936_v34, %v1969_v7  ;;  %v1986_v21 = vsel %vm10393_vm11, %v1937_v60, %v1970_v49 }
 0x3d0   : > { %v1991_v57 = vpack.c.bf16 %v1984_v27, %v1983_v29  ;;  %v1992_v26 = vpack.c.bf16 %v1986_v21, %v1985_v45  ;;  %vm2168_vm8 = vcmp.ge.s32.totalorder %v8009_v13, 5  ;;  %v2225_v44 = vsel %vm2218_vm6, %v6834_v28, %v6835_v0 }
 0x3d1   : > { %1585 = vrot.lane.b32.xlu0 %v8363_v48, %s7288_s8  ;;  %1587 = vrot.lane.b32.xlu1 %v8373_v8, %s7288_s8  ;;  %v6403_v33 = vld [vmem:[#allocation3 + $0xc4] sm:$0xf0]  ;;  %v6154_v55 = vld [vmem:[#allocation3 + $0xc8] sm:$0xf0]  ;;  %v2226_v36 = vsel %vm2218_vm6, %v6835_v0, %v6834_v28  ;;  %v2191_v35 = vsel %vm2185_vm0, %v6820_v9, %v6819_v24  ;;  %v6850_v6 = vunpack.i.h.bf16 %v8403_v1  ;;  %v6849_v7 = vunpack.i.l.bf16 %v8403_v1 }
 0x3d2   : > { %1995 = vst [vmem:[#allocation3 + $0x40] sm:$0xff] %v1991_v57  ;;  %1589 = vrot.lane.b32.xlu2 %v8389_v14, %s7288_s8  ;;  %v6153_v32 = vor.u32 %v6403_v33, %v6152_v62  ;;  %v6157_v25 = vor.u32 %v6402_v59, %v6154_v55  ;;  %vm1882_vm9 = vcmask 924672   ;;  %vm1823_vm4 = vcmp.ge.s32.totalorder %v8007_v37, 1 }
 0x3d3   : > { %1996 = vst [vmem:[#allocation3 + $0x48] sm:$0xff] %v1992_v26  ;;  %v6823_v10 = vpop.permute.xlu0 %6822  ;;  %v6828_v50 = vpop.permute.xlu1 %6827  ;;  %vm1824_vm10 = vcmp.ge.s32.totalorder %v8009_v13, 1  ;;  %vm1849_vm12 = vcmask 7168   ;;  %v1887_v62 = vsel %vm1882_vm9, %v6849_v7, %v6850_v6  ;;  %v1888_v0 = vsel %vm1882_vm9, %v6850_v6, %v6849_v7 }
 0x3d4   : > { %v8451_v15 = vpop.permute.xlu2 %6877  ;;  %v6825_v63 = vunpack.i.h.bf16 %v6823_v10  ;;  %v6824_v38 = vunpack.i.l.bf16 %v6823_v10  ;;  %v6830_v39 = vunpack.i.h.bf16 %v6828_v50  ;;  %v6829_v43 = vunpack.i.l.bf16 %v6828_v50  ;;  %4003 = vmatpush.bf16.xpose.msrb.mxu2 %v6153_v32  ;;  %4172 = vmatpush.bf16.xpose.msrb.mxu3 %v6157_v25 }
 0x3d5   : > { %vm2134_vm13 = vcmask 949248   ;;  %vm2083_vm1 = vcmp.ge.s32.totalorder %v8007_v37, 4  ;;  %vm2084_vm2 = vcmp.ge.s32.totalorder %v8009_v13, 4  ;;  %vm2101_vm3 = vcmask 31744  }
 0x3d6   : > { %v2192_v4 = vsel %vm2185_vm0, %v6824_v38, %v6825_v63  ;;  %v2193_v41 = vsel %vm2185_vm0, %v6825_v63, %v6824_v38  ;;  %v2223_v46 = vsel %vm2218_vm6, %v6829_v43, %v6830_v39  ;;  %v2224_v42 = vsel %vm2218_vm6, %v6830_v39, %v6829_v43 }
 0x3d7   : > { %v2241_v40 = vsel %vm2167_vm7, %v2192_v4, %v2225_v44  ;;  %v2242_v2 = vsel %vm2168_vm8, %v2193_v41, %v2226_v36  ;;  %v2239_v47 = vsel %vm2167_vm7, %v2190_v51, %v2223_v46  ;;  %v2240_v23 = vsel %vm2168_vm8, %v2191_v35, %v2224_v42 }
 0x3d8   : > { %v2246_v3 = vpack.c.bf16 %v2242_v2, %v2241_v40  ;;  %v2245_v54 = vpack.c.bf16 %v2240_v23, %v2239_v47  ;;  %v6865_v23 = vunpack.i.h.bf16 %v8421_v52  ;;  %vm10394_vm11 = vcmask 130048  }
 0x3d9   : > { %1591 = vrot.lane.b32.xlu0 %v8397_v31, %s7288_s8  ;;  %1593 = vrot.lane.b32.xlu1 %v8393_v30, %s7288_s8  ;;  %v6088_v16 = vld [vmem:[#allocation3 + $0x40] sm:$0xf]  ;;  %v6386_v5 = vld [vmem:[#allocation3 + $0x44] sm:$0xf]  ;;  %s7312_s8 = smov 123  }
 0x3da   : > { %2250 = vst [vmem:[#allocation3 + $0xb8] sm:$0xff] %v2246_v3  ;;  %1619 = vrot.lane.b32.xlu2 %v8346_v61, %s7293_s15  ;;  %v6387_v49 = vld [vmem:[#allocation3 + $0x44] sm:$0xf0]  ;;  %v6090_v34 = vld [vmem:[#allocation3 + $0x48] sm:$0xf0] }
 0x3db   : > { %2249 = vst [vmem:[#allocation3 + $0xb0] sm:$0xff] %v2245_v54  ;;  %v6838_v60 = vpop.permute.xlu0 %6837  ;;  %v6843_v29 = vpop.permute.xlu1 %6842  ;;  %v6089_v27 = vor.u32 %v6387_v49, %v6088_v16  ;;  %v6093_v57 = vor.u32 %v6386_v5, %v6090_v34  ;;  %v6864_v54 = vunpack.i.l.bf16 %v8421_v52 }
 0x3dc   : > { %v8477_v45 = vpop.permute.xlu2 %6892  ;;  %v6840_v21 = vunpack.i.h.bf16 %v6838_v60  ;;  %v6839_v1 = vunpack.i.l.bf16 %v6838_v60  ;;  %v6845_v9 = vunpack.i.h.bf16 %v6843_v29  ;;  %v6844_v24 = vunpack.i.l.bf16 %v6843_v29 }
 0x3dd   : > { %3665 = vmatpush.bf16.xpose.msrb.mxu0 %v6089_v27  ;;  %3834 = vmatpush.bf16.xpose.msrb.mxu1 %v6093_v57 }
 0x3de   : > { %v1854_v28 = vsel %vm1849_vm12, %v6839_v1, %v6840_v21  ;;  %v1855_v26 = vsel %vm1849_vm12, %v6840_v21, %v6839_v1  ;;  %v1856_v41 = vsel %vm1849_vm12, %v6844_v24, %v6845_v9  ;;  %v1857_v46 = vsel %vm1849_vm12, %v6845_v9, %v6844_v24 }
 0x3df   : > { %v1903_v33 = vsel %vm1823_vm4, %v1854_v28, %v1887_v62  ;;  %v1904_v59 = vsel %vm1824_vm10, %v1855_v26, %v1888_v0  ;;  %v2188_v62 = vsel %vm2185_vm0, %v6864_v54, %v6865_v23  ;;  %v2189_v0 = vsel %vm2185_vm0, %v6865_v23, %v6864_v54 }
 0x3e0   : > { %v1909_v55 = vpack.c.bf16 %v1904_v59, %v1903_v33  ;;  %v6880_v33 = vunpack.i.h.bf16 %v8451_v15  ;;  %v6879_v9 = vunpack.i.l.bf16 %v8451_v15  ;;  %v6895_v24 = vunpack.i.h.bf16 %v8477_v45 }
 0x3e1   : > { %1621 = vrot.lane.b32.xlu0 %v8342_v22, %s7293_s15  ;;  %1623 = vrot.lane.b32.xlu1 %v8365_v20, %s7293_s15  ;;  %v6401_v32 = vld [vmem:[#allocation3 + $0xb4] sm:$0xf0]  ;;  %v6146_v25 = vld [vmem:[#allocation3 + $0xb8] sm:$0xf0] }
 0x3e2   : > { %1913 = vst [vmem:[#allocation3 + $0x30] sm:$0xff] %v1909_v55  ;;  %1625 = vrot.lane.b32.xlu2 %v8363_v48, %s7293_s15  ;;  %v6144_v10 = vld [vmem:[#allocation3 + $0xb0] sm:$0xf]  ;;  %v6400_v50 = vld [vmem:[#allocation3 + $0xb4] sm:$0xf] }
 0x3e3   : > { %v6853_v63 = vpop.permute.xlu0 %6852  ;;  %v6858_v38 = vpop.permute.xlu1 %6857  ;;  %v6145_v39 = vor.u32 %v6401_v32, %v6144_v10  ;;  %v6149_v43 = vor.u32 %v6400_v50, %v6146_v25  ;;  %v6894_v10 = vunpack.i.l.bf16 %v8477_v45 }
 0x3e4   : > { %v8495_v44 = vpop.permute.xlu2 %6907  ;;  %v6855_v36 = vunpack.i.h.bf16 %v6853_v63  ;;  %v6854_v4 = vunpack.i.l.bf16 %v6853_v63  ;;  %v6860_v3 = vunpack.i.h.bf16 %v6858_v38  ;;  %v6859_v47 = vunpack.i.l.bf16 %v6858_v38 }
 0x3e5   : > { %4004 = vmatpush.bf16.xpose.msrb.mxu2 %v6145_v39  ;;  %4173 = vmatpush.bf16.xpose.msrb.mxu3 %v6149_v43 }
 0x3e6   : > { %v1889_v42 = vsel %vm1882_vm9, %v6854_v4, %v6855_v36  ;;  %v1890_v51 = vsel %vm1882_vm9, %v6855_v36, %v6854_v4  ;;  %v2186_v29 = vsel %vm2185_vm0, %v6859_v47, %v6860_v3  ;;  %v2187_v27 = vsel %vm2185_vm0, %v6860_v3, %v6859_v47  ;;  %vm10395_vm0 = vmmov %vm10394_vm11 }
 0x3e7   : > { %v1905_v35 = vsel %vm1823_vm4, %v1856_v41, %v1889_v42  ;;  %v1906_v40 = vsel %vm1824_vm10, %v1857_v46, %v1890_v51  ;;  %v1886_v3 = vsel %vm1882_vm9, %v6895_v24, %v6894_v10 }
 0x3e8   : > { %v1910_v2 = vpack.c.bf16 %v1906_v40, %v1905_v35  ;;  %v1850_v35 = vsel %vm1849_vm12, %v6879_v9, %v6880_v33  ;;  %v1851_v40 = vsel %vm1849_vm12, %v6880_v33, %v6879_v9 }
 0x3e9   : > { %1627 = vrot.lane.b32.xlu0 %v8373_v8, %s7293_s15  ;;  %1629 = vrot.lane.b32.xlu1 %v8389_v14, %s7293_s15  ;;  %v6080_v25 = vld [vmem:[#allocation3 + $0x30] sm:$0xf]  ;;  %v6384_v38 = vld [vmem:[#allocation3 + $0x34] sm:$0xf] }
 0x3ea   : > { %1914 = vst [vmem:[#allocation3 + $0x38] sm:$0xff] %v1910_v2  ;;  %1631 = vrot.lane.b32.xlu2 %v8397_v31, %s7293_s15  ;;  %v1885_v2 = vsel %vm1882_vm9, %v6894_v10, %v6895_v24 }
 0x3eb   : > { %v6868_v16 = vpop.permute.xlu0 %6867  ;;  %v6873_v5 = vpop.permute.xlu1 %6872 }
 0x3ec   : > { %v8513_v6 = vpop.permute.xlu2 %6922  ;;  %v6870_v7 = vunpack.i.h.bf16 %v6868_v16  ;;  %v6869_v49 = vunpack.i.l.bf16 %v6868_v16  ;;  %v6875_v34 = vunpack.i.h.bf16 %v6873_v5  ;;  %v6874_v60 = vunpack.i.l.bf16 %v6873_v5 }
 0x3ee   : > { %v2219_v57 = vsel %vm2218_vm6, %v6869_v49, %v6870_v7  ;;  %v2220_v21 = vsel %vm2218_vm6, %v6870_v7, %v6869_v49  ;;  %v2221_v1 = vsel %vm2218_vm6, %v6874_v60, %v6875_v34  ;;  %v2222_v52 = vsel %vm2218_vm6, %v6875_v34, %v6874_v60  ;;  %vm10398_vm6 = vmmov %vm10395_vm0 }
 0x3ef   : > { %v2235_v28 = vsel %vm2167_vm7, %v2186_v29, %v2219_v57  ;;  %v2236_v26 = vsel %vm2168_vm8, %v2187_v27, %v2220_v21  ;;  %v2237_v55 = vsel %vm2167_vm7, %v2188_v62, %v2221_v1  ;;  %v2238_v32 = vsel %vm2168_vm8, %v2189_v0, %v2222_v52  ;;  %vm10399_vm7 = vmmov %vm10395_vm0 }
 0x3f0   : > { %v2243_v59 = vpack.c.bf16 %v2236_v26, %v2235_v28  ;;  %v2244_v50 = vpack.c.bf16 %v2238_v32, %v2237_v55  ;;  %v6910_v21 = vunpack.i.h.bf16 %v8495_v44  ;;  %v6909_v1 = vunpack.i.l.bf16 %v8495_v44 }
 0x3f1   : > { %1633 = vrot.lane.b32.xlu0 %v8393_v30, %s7293_s15  ;;  %1659 = vrot.lane.b32.xlu1 %v8346_v61, %s7298_s20  ;;  %v6385_v63 = vld [vmem:[#allocation3 + $0x34] sm:$0xf0]  ;;  %v6082_v39 = vld [vmem:[#allocation3 + $0x38] sm:$0xf0]  ;;  %s7315_s15 = smov 122  }
 0x3f2   : > { %2247 = vst [vmem:[#allocation3 + $0xa0] sm:$0xff] %v2243_v59  ;;  %1661 = vrot.lane.b32.xlu2 %v8342_v22, %s7298_s20  ;;  %v6081_v43 = vor.u32 %v6385_v63, %v6080_v25  ;;  %v6085_v15 = vor.u32 %v6384_v38, %v6082_v39  ;;  %v2139_v32 = vsel %vm2134_vm13, %v6909_v1, %v6910_v21 }
 0x3f3   : > { %2248 = vst [vmem:[#allocation3 + $0xa8] sm:$0xff] %v2244_v50  ;;  %v6883_v36 = vpop.permute.xlu0 %6882  ;;  %v6888_v4 = vpop.permute.xlu1 %6887  ;;  %v2140_v25 = vsel %vm2134_vm13, %v6910_v21, %v6909_v1 }
 0x3f4   : > { %v8541_v45 = vpop.permute.xlu2 %1478  ;;  %v6885_v41 = vunpack.i.h.bf16 %v6883_v36  ;;  %v6884_v46 = vunpack.i.l.bf16 %v6883_v36  ;;  %v6890_v42 = vunpack.i.h.bf16 %v6888_v4  ;;  %v6889_v51 = vunpack.i.l.bf16 %v6888_v4  ;;  %3666 = vmatpush.bf16.xpose.msrb.mxu0 %v6081_v43  ;;  %3835 = vmatpush.bf16.xpose.msrb.mxu1 %v6085_v15 }
 0x3f6   : > { %v1852_v47 = vsel %vm1849_vm12, %v6884_v46, %v6885_v41  ;;  %v1853_v23 = vsel %vm1849_vm12, %v6885_v41, %v6884_v46  ;;  %v1883_v54 = vsel %vm1882_vm9, %v6889_v51, %v6890_v42  ;;  %v1884_v16 = vsel %vm1882_vm9, %v6890_v42, %v6889_v51 }
 0x3f7   : > { %v1901_v5 = vsel %vm1823_vm4, %v1852_v47, %v1885_v2  ;;  %v1902_v7 = vsel %vm1824_vm10, %v1853_v23, %v1886_v3  ;;  %v1899_v49 = vsel %vm1823_vm4, %v1850_v35, %v1883_v54  ;;  %v1900_v34 = vsel %vm1824_vm10, %v1851_v40, %v1884_v16 }
 0x3f8   : > { %v1908_v60 = vpack.c.bf16 %v1902_v7, %v1901_v5  ;;  %v1907_v29 = vpack.c.bf16 %v1900_v34, %v1899_v49  ;;  %v6925_v16 = vunpack.i.h.bf16 %v8513_v6  ;;  %v6924_v5 = vunpack.i.l.bf16 %v8513_v6  ;;  %v6064_v34 = vld [vmem:[#allocation3 + $0x10] sm:$0xf] }
 0x3f9   : > { %1663 = vrot.lane.b32.xlu0 %v8365_v20, %s7298_s20  ;;  %1665 = vrot.lane.b32.xlu1 %v8363_v48, %s7298_s20  ;;  %v6136_v27 = vld [vmem:[#allocation3 + $0xa0] sm:$0xf]  ;;  %v6398_v57 = vld [vmem:[#allocation3 + $0xa4] sm:$0xf]  ;;  %vm10412_vm4 = vcmask 523264  }
 0x3fa   : > { %1912 = vst [vmem:[#allocation3 + $0x28] sm:$0xff] %v1908_v60  ;;  %1667 = vrot.lane.b32.xlu2 %v8373_v8, %s7298_s20  ;;  %v6399_v52 = vld [vmem:[#allocation3 + $0xa4] sm:$0xf0]  ;;  %v6138_v62 = vld [vmem:[#allocation3 + $0xa8] sm:$0xf0]  ;;  %v2104_v6 = vsel %vm2101_vm3, %v6924_v5, %v6925_v16  ;;  %vm10415_vm10 = vmmov %vm10412_vm4 }
 0x3fb   : > { %1911 = vst [vmem:[#allocation3 + $0x20] sm:$0xff] %v1907_v29  ;;  %v6898_v0 = vpop.permute.xlu0 %6897  ;;  %v6903_v28 = vpop.permute.xlu1 %6902  ;;  %v6137_v26 = vor.u32 %v6399_v52, %v6136_v27  ;;  %v6141_v33 = vor.u32 %v6398_v57, %v6138_v62  ;;  %v6381_v29 = vld [vmem:[#allocation3 + $0x14] sm:$0xf0]  ;;  %v6380_v27 = vld [vmem:[#allocation3 + $0x14] sm:$0xf] }
 0x3fc   : > { %v8567_v59 = vpop.permute.xlu2 %1484  ;;  %v6900_v55 = vunpack.i.h.bf16 %v6898_v0  ;;  %v6899_v44 = vunpack.i.l.bf16 %v6898_v0  ;;  %v6905_v43 = vunpack.i.h.bf16 %v6903_v28  ;;  %v6904_v15 = vunpack.i.l.bf16 %v6903_v28  ;;  %v6066_v57 = vld [vmem:[#allocation3 + $0x18] sm:$0xf0] }
 0x3fd   : > { %4005 = vmatpush.bf16.xpose.msrb.mxu2 %v6137_v26  ;;  %4174 = vmatpush.bf16.xpose.msrb.mxu3 %v6141_v33  ;;  %v6065_v0 = vor.u32 %v6381_v29, %v6064_v34  ;;  %v6069_v28 = vor.u32 %v6380_v27, %v6066_v57  ;;  %v1497_v29 = vrot.slane %v8567_v59, 4  ;;  %v6314_v59 = vld [vmem:[#allocation2 + $0x4] sm:$0xf] }
 0x3fe   : > { %v2106_v9 = vsel %vm2101_vm3, %v6899_v44, %v6900_v55  ;;  %v2107_v24 = vsel %vm2101_vm3, %v6900_v55, %v6899_v44  ;;  %v2108_v3 = vsel %vm2101_vm3, %v6904_v15, %v6905_v43  ;;  %v2109_v47 = vsel %vm2101_vm3, %v6905_v43, %v6904_v15 }
 0x3ff   : > { %v2155_v10 = vsel %vm2083_vm1, %v2106_v9, %v2139_v32  ;;  %v2156_v50 = vsel %vm2084_vm2, %v2107_v24, %v2140_v25  ;;  %v2105_v25 = vsel %vm2101_vm3, %v6925_v16, %v6924_v5 }
 0x400   : > { %v2161_v63 = vpack.c.bf16 %v2156_v50, %v2155_v10 }
 0x401   : > { %1669 = vrot.lane.b32.xlu0 %v8389_v14, %s7298_s20  ;;  %1671 = vrot.lane.b32.xlu1 %v8397_v31, %s7298_s20  ;;  %v6383_v38 = vld [vmem:[#allocation3 + $0x24] sm:$0xf0]  ;;  %v6074_v39 = vld [vmem:[#allocation3 + $0x28] sm:$0xf0] }
 0x402   : > { %2165 = vst [vmem:[#allocation3 + $0x90] sm:$0xff] %v2161_v63  ;;  %1673 = vrot.lane.b32.xlu2 %v8393_v30, %s7298_s20  ;;  %v6072_v36 = vld [vmem:[#allocation3 + $0x20] sm:$0xf]  ;;  %v6382_v4 = vld [vmem:[#allocation3 + $0x24] sm:$0xf] }
 0x403   : > { %v6913_v41 = vpop.permute.xlu0 %6912  ;;  %v6918_v46 = vpop.permute.xlu1 %6917  ;;  %v6073_v42 = vor.u32 %v6383_v38, %v6072_v36  ;;  %v6077_v51 = vor.u32 %v6382_v4, %v6074_v39  ;;  %v6056_v4 = vld [vmem:[#allocation3] sm:$0xf] }
 0x404   : > { %v8585_v35 = vpop.permute.xlu2 %1490  ;;  %v6915_v40 = vunpack.i.h.bf16 %v6913_v41  ;;  %v6914_v2 = vunpack.i.l.bf16 %v6913_v41  ;;  %v6920_v21 = vunpack.i.h.bf16 %v6918_v46  ;;  %v6919_v1 = vunpack.i.l.bf16 %v6918_v46  ;;  %v6378_v41 = vld [vmem:[#allocation3 + $0x4] sm:$0xf] }
 0x405   : > { %3667 = vmatpush.bf16.xpose.msrb.mxu0 %v6073_v42  ;;  %3836 = vmatpush.bf16.xpose.msrb.mxu1 %v6077_v51  ;;  %v6379_v51 = vld [vmem:[#allocation3 + $0x4] sm:$0xf0] }
 0x406   : > { %v2141_v23 = vsel %vm2134_vm13, %v6914_v2, %v6915_v40  ;;  %v2142_v54 = vsel %vm2134_vm13, %v6915_v40, %v6914_v2  ;;  %v2102_v9 = vsel %vm2101_vm3, %v6919_v1, %v6920_v21  ;;  %v2103_v24 = vsel %vm2101_vm3, %v6920_v21, %v6919_v1  ;;  %v6058_v40 = vld [vmem:[#allocation3 + $0x8] sm:$0xf0] }
 0x407   : > { %v2157_v7 = vsel %vm2083_vm1, %v2108_v3, %v2141_v23  ;;  %v2158_v49 = vsel %vm2084_vm2, %v2109_v47, %v2142_v54  ;;  %v6061_v34 = vor.u32 %v6378_v41, %v6058_v40 }
 0x408   : > { %v2162_v60 = vpack.c.bf16 %v2158_v49, %v2157_v7  ;;  %v6057_v49 = vor.u32 %v6379_v51, %v6056_v4 }
 0x409   : > { %1699 = vrot.lane.b32.xlu0 %v8346_v61, %s7278_s26  ;;  %1701 = vrot.lane.b32.xlu1 %v8342_v22, %s7278_s26  ;;  %v6128_v2 = vld [vmem:[#allocation3 + $0x90] sm:$0xf]  ;;  %v6396_v47 = vld [vmem:[#allocation3 + $0x94] sm:$0xf] }
 0x40a   : > { %2166 = vst [vmem:[#allocation3 + $0x98] sm:$0xff] %v2162_v60  ;;  %1703 = vrot.lane.b32.xlu2 %v8365_v20, %s7278_s26  ;;  %v1494_v60 = vrot.slane %v8541_v45, 4 }
 0x40b   : > { %v6928_v52 = vpop.permute.xlu0 %6927  ;;  %v6933_v62 = vpop.permute.xlu1 %6932 }
 0x40c   : > { %v8604_v26 = vpop.permute.xlu2 %1541  ;;  %v6930_v33 = vunpack.i.h.bf16 %v6928_v52  ;;  %v6929_v55 = vunpack.i.l.bf16 %v6928_v52  ;;  %v6935_v44 = vunpack.i.h.bf16 %v6933_v62  ;;  %v6934_v32 = vunpack.i.l.bf16 %v6933_v62  ;;  %v5800_v52 = vld [vmem:[#allocation2] sm:$0xf] }
 0x40d   : > { %3668 = vmatpush.bf16.xpose.msrb.mxu0 %v6065_v0  ;;  %3837 = vmatpush.bf16.xpose.msrb.mxu1 %v6069_v28  ;;  %v6315_v28 = vld [vmem:[#allocation2 + $0x4] sm:$0xf0] }
 0x40e   : > { %v2135_v10 = vsel %vm2134_vm13, %v6929_v55, %v6930_v33  ;;  %v2136_v50 = vsel %vm2134_vm13, %v6930_v33, %v6929_v55  ;;  %v2137_v63 = vsel %vm2134_vm13, %v6934_v32, %v6935_v44  ;;  %v2138_v38 = vsel %vm2134_vm13, %v6935_v44, %v6934_v32  ;;  %v5802_v33 = vld [vmem:[#allocation2 + $0x8] sm:$0xf0]  ;;  %vm10416_vm13 = vmmov %vm10412_vm4 }
 0x40f   : > { %v2151_v39 = vsel %vm2083_vm1, %v2102_v9, %v2135_v10  ;;  %v2152_v43 = vsel %vm2084_vm2, %v2103_v24, %v2136_v50  ;;  %v2153_v15 = vsel %vm2083_vm1, %v2104_v6, %v2137_v63  ;;  %v2154_v36 = vsel %vm2084_vm2, %v2105_v25, %v2138_v38  ;;  %vm10417_vm1 = vmmov %vm10412_vm4 }
 0x410   : > { %v2159_v46 = vpack.c.bf16 %v2152_v43, %v2151_v39  ;;  %v2160_v42 = vpack.c.bf16 %v2154_v36, %v2153_v15  ;;  %v8642_v32 = vor.u32 %v6315_v28, %v5800_v52  ;;  %vm10420_vm2 = vcmask 392192  }
 0x411   : > { %1705 = vrot.lane.b32.xlu0 %v8363_v48, %s7278_s26  ;;  %1707 = vrot.lane.b32.xlu1 %v8373_v8, %s7278_s26  ;;  %v6397_v3 = vld [vmem:[#allocation3 + $0x94] sm:$0xf0]  ;;  %v6130_v23 = vld [vmem:[#allocation3 + $0x98] sm:$0xf0]  ;;  %vm10421_vm3 = vmmov %vm10420_vm2 }
 0x412   : > { %2163 = vst [vmem:[#allocation3 + $0x80] sm:$0xff] %v2159_v46  ;;  %1709 = vrot.lane.b32.xlu2 %v8389_v14, %s7278_s26  ;;  %v6129_v54 = vor.u32 %v6397_v3, %v6128_v2  ;;  %v6133_v16 = vor.u32 %v6396_v47, %v6130_v23  ;;  %v1500_v46 = vrot.slane %v8585_v35, 4  ;;  %v5808_v47 = vld [vmem:[#allocation2 + $0x10] sm:$0xf] }
 0x413   : > { %2164 = vst [vmem:[#allocation3 + $0x88] sm:$0xff] %v2160_v42  ;;  %v1481_v5 = vpop.permute.xlu0 %1480  ;;  %v1483_v7 = vpop.permute.xlu1 %1482  ;;  %v1556_v42 = vrot.slane %v8604_v26, 4  ;;  %v6316_v26 = vld [vmem:[#allocation2 + $0x14] sm:$0xf] }
 0x414   : > { %v8629_v27 = vpop.permute.xlu2 %1547  ;;  %v1495_v57 = vrot.slane %v1481_v5, 4  ;;  %v1496_v21 = vrot.slane %v1483_v7, 4  ;;  %4006 = vmatpush.bf16.xpose.msrb.mxu2 %v6129_v54  ;;  %4175 = vmatpush.bf16.xpose.msrb.mxu3 %v6133_v16  ;;  %10396 = vst [vmem:[#allocation4_spill] sm:$0xff] %v8642_v32  ;;  %v6317_v16 = vld [vmem:[#allocation2 + $0x14] sm:$0xf0] }
 0x415   : > { %3669 = vmatpush.bf16.xpose.msrb.mxu0 %v6057_v49  ;;  %3838 = vmatpush.bf16.xpose.msrb.mxu1 %v6061_v34  ;;  %v5810_v5 = vld [vmem:[#allocation2 + $0x18] sm:$0xf0] }
 0x416   : > { %v1502_v1 = vsel %vm1255_vm5, %v1494_v60, %v1495_v57  ;;  %v1505_v6 = vsel %vm1255_vm5, %v1496_v21, %v1497_v29  ;;  %v8675_v49 = vor.u32 %v6316_v26, %v5810_v5  ;;  %v5824_v26 = vld [vmem:[#allocation2 + $0x30] sm:$0xf]  ;;  %v6320_v5 = vld [vmem:[#allocation2 + $0x34] sm:$0xf] }
 0x417   : > { %v1504_v62 = vsel %vm10394_vm11, %v8541_v45, %v1502_v1  ;;  %v1506_v0 = vsel %vm10395_vm0, %v1483_v7, %v1505_v6  ;;  %v8644_v45 = vor.u32 %v6314_v59, %v5802_v33  ;;  %v8673_v7 = vor.u32 %v6317_v16, %v5808_v47  ;;  %v5826_v16 = vld [vmem:[#allocation2 + $0x38] sm:$0xf0]  ;;  %vm10422_vm11 = vmmov %vm10420_vm2 }
 0x418   : > { %1515 = vst [vmem:[#allocation2 + $0xe0] sm:$0xff] %v1504_v62  ;;  %v1559_v6 = vrot.slane %v8629_v27, 4  ;;  %vm10425_vm0 = vmmov %vm10420_vm2 }
 0x419   : > { %1516 = vst [vmem:[#allocation2 + $0xe8] sm:$0xff] %v1506_v0  ;;  %1711 = vrot.lane.b32.xlu0 %v8397_v31, %s7278_s26  ;;  %1713 = vrot.lane.b32.xlu1 %v8393_v30, %s7278_s26  ;;  %v6120_v55 = vld [vmem:[#allocation3 + $0x80] sm:$0xf]  ;;  %v6394_v44 = vld [vmem:[#allocation3 + $0x84] sm:$0xf]  ;;  %s7310_s26 = smov 15  }
 0x41a   : > { %1739 = vrot.lane.b32.xlu2 %v8346_v61, %s7299_s21  ;;  %10397 = vst [vmem:[#allocation5_spill] sm:$0xff] %v8644_v45  ;;  %v6395_v25 = vld [vmem:[#allocation3 + $0x84] sm:$0xf0]  ;;  %v6122_v9 = vld [vmem:[#allocation3 + $0x88] sm:$0xf0] }
 0x41b   : > { %v1487_v24 = vpop.permute.xlu0 %1486  ;;  %v1489_v10 = vpop.permute.xlu1 %1488  ;;  %v6121_v50 = vor.u32 %v6395_v25, %v6120_v55  ;;  %v6125_v63 = vor.u32 %v6394_v44, %v6122_v9  ;;  %10400 = vst [vmem:[#allocation6_spill] sm:$0xff] %v8673_v7  ;;  %v6319_v55 = vld [vmem:[#allocation2 + $0x24] sm:$0xf0]  ;;  %v5818_v44 = vld [vmem:[#allocation2 + $0x28] sm:$0xf0] }
 0x41c   : > { %v1554_v38 = vpop.permute.xlu2 %1553  ;;  %v1498_v39 = vrot.slane %v1487_v24, 4  ;;  %v1499_v43 = vrot.slane %v1489_v10, 4  ;;  %3670 = vmatmul.bf16.vlgmr.msrb.gmra.mxu0 %v8642_v32  ;;  %3839 = vmatmul.bf16.vlgmr.msrb.gmra.mxu1 %v8644_v45  ;;  %10401 = vst [vmem:[#allocation7_spill] sm:$0xff] %v8675_v49  ;;  %v5816_v25 = vld [vmem:[#allocation2 + $0x20] sm:$0xf] }
 0x41d   : > { %4007 = vmatpush.bf16.xpose.msrb.mxu2 %v6121_v50  ;;  %4176 = vmatpush.bf16.xpose.msrb.mxu3 %v6125_v63  ;;  %v1562_v52 = vrot.slane %v1554_v38, 4  ;;  %v6318_v9 = vld [vmem:[#allocation2 + $0x24] sm:$0xf] }
 0x41e   : > { %v1507_v15 = vsel %vm1255_vm5, %v1498_v39, %v1499_v43 }
 0x41f   : > { %v1508_v36 = vsel %vm10398_vm6, %v1487_v24, %v1507_v15  ;;  %v8703_v24 = vor.u32 %v6319_v55, %v5816_v25  ;;  %v6323_v25 = vld [vmem:[#allocation2 + $0x44] sm:$0xf0]  ;;  %vm10426_vm6 = vcmask 261120  }
 0x420   : > { %1517 = vst [vmem:[#allocation2 + $0xf0] sm:$0xff] %v1508_v36 }
 0x421   : > { %1741 = vrot.lane.b32.xlu0 %v8342_v22, %s7299_s21  ;;  %1743 = vrot.lane.b32.xlu1 %v8365_v20, %s7299_s21  ;;  %10402 = vst [vmem:[#allocation8_spill] sm:$0xff] %v8703_v24 }
 0x422   : > { %1745 = vrot.lane.b32.xlu2 %v8363_v48, %s7299_s21 }
 0x423   : > { %v1493_v4 = vpop.permute.xlu0 %1492  ;;  %v1540_v41 = vpop.permute.xlu1 %1539 }
 0x424   : > { %v8658_v51 = vpop.permute.xlu2 %1583  ;;  %v1501_v40 = vrot.slane %v1493_v4, 4  ;;  %v1555_v2 = vrot.slane %v1540_v41, 4  ;;  %4008 = vmatmul.bf16.vlgmr.msrb.gmra.mxu2 %v8642_v32  ;;  %4177 = vmatmul.bf16.vlgmr.msrb.gmra.mxu3 %v8644_v45 }
 0x426   : > { %v1509_v3 = vsel %vm1255_vm5, %v1500_v46, %v1501_v40  ;;  %v1563_v20 = vsel %vm1255_vm5, %v1555_v2, %v1556_v42 }
 0x427   : > { %v1510_v23 = vsel %vm10399_vm7, %v8585_v35, %v1509_v3  ;;  %v1564_v54 = vsel %vm1151_vm15, %v1540_v41, %v1563_v20  ;;  %v1597_v41 = vrot.slane %v8658_v51, 4  ;;  %vm10427_vm7 = vmmov %vm10426_vm6 }
 0x428   : > { %1518 = vst [vmem:[#allocation2 + $0xf8] sm:$0xff] %v1510_v23 }
 0x429   : > { %1575 = vst [vmem:[#allocation2 + $0x120] sm:$0xff] %v1564_v54  ;;  %1747 = vrot.lane.b32.xlu0 %v8373_v8, %s7299_s21  ;;  %1749 = vrot.lane.b32.xlu1 %v8389_v14, %s7299_s21  ;;  %v6321_v54 = vld [vmem:[#allocation2 + $0x34] sm:$0xf0] }
 0x42a   : > { %1751 = vrot.lane.b32.xlu2 %v8397_v31, %s7299_s21 }
 0x42b   : > { %v1544_v35 = vpop.permute.xlu0 %1543  ;;  %v1546_v34 = vpop.permute.xlu1 %1545 }
 0x42c   : > { %v1590_v60 = vpop.permute.xlu2 %1589  ;;  %v1557_v29 = vrot.slane %v1544_v35, 4  ;;  %v1558_v57 = vrot.slane %v1546_v34, 4  ;;  %3675 = vmatmul.bf16.gmra.mxu0 %v8673_v7  ;;  %3844 = vmatmul.bf16.gmra.mxu1 %v8675_v49 }
 0x42d   : > { %v1600_v46 = vrot.slane %v1590_v60, 4 }
 0x42e   : > { %v1565_v8 = vsel %vm1255_vm5, %v1557_v29, %v1558_v57 }
 0x42f   : > { %v1566_v21 = vsel %vm1151_vm15, %v1544_v35, %v1565_v8  ;;  %v8733_v35 = vor.u32 %v6321_v54, %v5824_v26 }
 0x430   : > { %1576 = vst [vmem:[#allocation2 + $0x128] sm:$0xff] %v1566_v21 }
 0x431   : > { %1753 = vrot.lane.b32.xlu0 %v8393_v30, %s7299_s21  ;;  %1779 = vrot.lane.b32.xlu1 %v8346_v61, %s7309_s14  ;;  %10404 = vst [vmem:[#allocation10_spill] sm:$0xff] %v8733_v35 }
 0x432   : > { %1781 = vrot.lane.b32.xlu2 %v8342_v22, %s7309_s14 }
 0x433   : > { %v1550_v31 = vpop.permute.xlu0 %1549  ;;  %v1552_v1 = vpop.permute.xlu1 %1551 }
 0x434   : > { %v8688_v62 = vpop.permute.xlu2 %1619  ;;  %v1560_v0 = vrot.slane %v1550_v31, 4  ;;  %v1561_v28 = vrot.slane %v1552_v1, 4  ;;  %4013 = vmatmul.bf16.gmra.mxu2 %v8673_v7  ;;  %4182 = vmatmul.bf16.gmra.mxu3 %v8675_v49 }
 0x436   : > { %v1567_v59 = vsel %vm1255_vm5, %v1559_v6, %v1560_v0  ;;  %v1569_v61 = vsel %vm1255_vm5, %v1561_v28, %v1562_v52  ;;  %v1635_v52 = vrot.slane %v8688_v62, 4 }
 0x437   : > { %v1568_v22 = vsel %vm1151_vm15, %v8629_v27, %v1567_v59  ;;  %v1570_v33 = vsel %vm1151_vm15, %v1552_v1, %v1569_v61  ;;  %v8705_v27 = vor.u32 %v6318_v9, %v5818_v44  ;;  %v5834_v9 = vld [vmem:[#allocation2 + $0x48] sm:$0xf0] }
 0x438   : > { %1577 = vst [vmem:[#allocation2 + $0x130] sm:$0xff] %v1568_v22 }
 0x439   : > { %1578 = vst [vmem:[#allocation2 + $0x138] sm:$0xff] %v1570_v33  ;;  %6937 = vrot.lane.b32.xlu0 %v7957_v19, %s7310_s26  ;;  %6942 = vrot.lane.b32.xlu1 %v7944_v11, %s7310_s26 }
 0x43a   : > { %6947 = vrot.lane.b32.xlu2 %v7960_v17, %s7279_s27  ;;  %10403 = vst [vmem:[#allocation9_spill] sm:$0xff] %v8705_v27 }
 0x43b   : > { %v1580_v10 = vpop.permute.xlu0 %1579  ;;  %v1582_v50 = vpop.permute.xlu1 %1581 }
 0x43c   : > { %v1626_v63 = vpop.permute.xlu2 %1625  ;;  %v1595_v38 = vrot.slane %v1580_v10, 4  ;;  %v1596_v39 = vrot.slane %v1582_v50, 4  ;;  %3680 = vmatmul.bf16.gmra.mxu0 %v8703_v24  ;;  %3849 = vmatmul.bf16.gmra.mxu1 %v8705_v27  ;;  %v6322_v50 = vld [vmem:[#allocation2 + $0x44] sm:$0xf] }
 0x43d   : > { %v1638_v0 = vrot.slane %v1626_v63, 4 }
 0x43e   : > { %v1603_v43 = vsel %vm1255_vm5, %v1595_v38, %v1596_v39 }
 0x43f   : > { %v1604_v15 = vsel %vm1146_vm14, %v1580_v10, %v1603_v43  ;;  %v5832_v10 = vld [vmem:[#allocation2 + $0x40] sm:$0xf] }
 0x440   : > { %1615 = vst [vmem:[#allocation2 + $0x140] sm:$0xff] %v1604_v15  ;;  %v8763_v63 = vor.u32 %v6323_v25, %v5832_v10 }
 0x441   : > { %6952 = vrot.lane.b32.xlu0 %v7948_v12, %s7279_s27  ;;  %6957 = vrot.lane.b32.xlu1 %v7957_v19, %s7311_s6 }
 0x442   : > { %6962 = vrot.lane.b32.xlu2 %v7944_v11, %s7311_s6  ;;  %10408 = vst [vmem:[#allocation12_spill] sm:$0xff] %v8763_v63 }
 0x443   : > { %v1586_v36 = vpop.permute.xlu0 %1585  ;;  %v1588_v4 = vpop.permute.xlu1 %1587 }
 0x444   : > { %v8718_v42 = vpop.permute.xlu2 %1631  ;;  %v1598_v40 = vrot.slane %v1586_v36, 4  ;;  %v1599_v2 = vrot.slane %v1588_v4, 4  ;;  %4018 = vmatmul.bf16.gmra.mxu2 %v8703_v24  ;;  %4187 = vmatmul.bf16.gmra.mxu3 %v8705_v27 }
 0x446   : > { %v1605_v3 = vsel %vm1255_vm5, %v1597_v41, %v1598_v40  ;;  %v1607_v20 = vsel %vm1255_vm5, %v1599_v2, %v1600_v46  ;;  %v1641_v2 = vrot.slane %v8718_v42, 4 }
 0x447   : > { %v1606_v47 = vsel %vm1146_vm14, %v8658_v51, %v1605_v3  ;;  %v1608_v23 = vsel %vm1146_vm14, %v1588_v4, %v1607_v20  ;;  %v8735_v51 = vor.u32 %v6320_v5, %v5826_v16 }
 0x448   : > { %1616 = vst [vmem:[#allocation2 + $0x148] sm:$0xff] %v1606_v47 }
 0x449   : > { %1617 = vst [vmem:[#allocation2 + $0x150] sm:$0xff] %v1608_v23  ;;  %6967 = vrot.lane.b32.xlu0 %v7960_v17, %s7312_s8  ;;  %6972 = vrot.lane.b32.xlu1 %v7948_v12, %s7312_s8 }
 0x44a   : > { %6977 = vrot.lane.b32.xlu2 %v7794_v18, %s7310_s26  ;;  %10405 = vst [vmem:[#allocation11_spill] sm:$0xff] %v8735_v51 }
 0x44b   : > { %v1592_v34 = vpop.permute.xlu0 %1591  ;;  %v1594_v60 = vpop.permute.xlu1 %1593 }
 0x44c   : > { %v1662_v29 = vpop.permute.xlu2 %1661  ;;  %v1601_v57 = vrot.slane %v1592_v34, 4  ;;  %v1602_v8 = vrot.slane %v1594_v60, 4  ;;  %3685 = vmatmul.bf16.gmra.mxu0 %v8733_v35  ;;  %3854 = vmatmul.bf16.gmra.mxu1 %v8735_v51  ;;  %v5842_v60 = vld [vmem:[#allocation2 + $0x58] sm:$0xf0] }
 0x44d   : > { %v1676_v3 = vrot.slane %v1662_v29, 4  ;;  %v5840_v29 = vld [vmem:[#allocation2 + $0x50] sm:$0xf] }
 0x44e   : > { %v1609_v21 = vsel %vm1255_vm5, %v1601_v57, %v1602_v8  ;;  %v6324_v57 = vld [vmem:[#allocation2 + $0x54] sm:$0xf] }
 0x44f   : > { %v1610_v31 = vsel %vm1146_vm14, %v1592_v34, %v1609_v21  ;;  %vm10406_vm14 = vcmask 654336   ;;  %v6325_v34 = vld [vmem:[#allocation2 + $0x54] sm:$0xf0] }
 0x450   : > { %1618 = vst [vmem:[#allocation2 + $0x158] sm:$0xff] %v1610_v31  ;;  %vm10407_vm15 = vmmov %vm10406_vm14  ;;  %v8795_v8 = vor.u32 %v6325_v34, %v5840_v29 }
 0x451   : > { %6982 = vrot.lane.b32.xlu0 %v7816_v56, %s7310_s26  ;;  %6987 = vrot.lane.b32.xlu1 %v7797_v53, %s7279_s27  ;;  %vm10410_vm8 = vmmov %vm10406_vm14 }
 0x452   : > { %6992 = vrot.lane.b32.xlu2 %v7821_v58, %s7279_s27  ;;  %s7313_s27 = smov 14   ;;  %vm10411_vm9 = vmmov %vm10410_vm8  ;;  %10413 = vst [vmem:[#allocation14_spill] sm:$0xff] %v8795_v8 }
 0x453   : > { %v1622_v1 = vpop.permute.xlu0 %1621  ;;  %v1624_v6 = vpop.permute.xlu1 %1623 }
 0x454   : > { %v8748_v28 = vpop.permute.xlu2 %1667  ;;  %v1636_v59 = vrot.slane %v1622_v1, 4  ;;  %v1637_v61 = vrot.slane %v1624_v6, 4  ;;  %4023 = vmatmul.bf16.gmra.mxu2 %v8733_v35  ;;  %4192 = vmatmul.bf16.gmra.mxu3 %v8735_v51 }
 0x456   : > { %v1643_v22 = vsel %vm1255_vm5, %v1635_v52, %v1636_v59  ;;  %v1645_v33 = vsel %vm1255_vm5, %v1637_v61, %v1638_v0 }
 0x457   : > { %v1644_v55 = vsel %vm10406_vm14, %v8688_v62, %v1643_v22  ;;  %v1646_v44 = vsel %vm10407_vm15, %v1624_v6, %v1645_v33  ;;  %v8765_v62 = vor.u32 %v6322_v50, %v5834_v9  ;;  %v1679_v33 = vrot.slane %v8748_v28, 4  ;;  %vm10430_vm14 = vmmov %vm10426_vm6 }
 0x458   : > { %1655 = vst [vmem:[#allocation2 + $0x160] sm:$0xff] %v1644_v55  ;;  %vm10431_vm15 = vmmov %vm10426_vm6 }
 0x459   : > { %1656 = vst [vmem:[#allocation2 + $0x168] sm:$0xff] %v1646_v44  ;;  %6997 = vrot.lane.b32.xlu0 %v7794_v18, %s7311_s6  ;;  %7002 = vrot.lane.b32.xlu1 %v7816_v56, %s7311_s6 }
 0x45a   : > { %7007 = vrot.lane.b32.xlu2 %v7797_v53, %s7312_s8  ;;  %10409 = vst [vmem:[#allocation13_spill] sm:$0xff] %v8765_v62 }
 0x45b   : > { %v1628_v38 = vpop.permute.xlu0 %1627  ;;  %v1630_v39 = vpop.permute.xlu1 %1629 }
 0x45c   : > { %v8767_v43 = vpop.permute.xlu2 %1673  ;;  %v1639_v15 = vrot.slane %v1628_v38, 4  ;;  %v1640_v36 = vrot.slane %v1630_v39, 4  ;;  %3690 = vmatmul.bf16.gmra.mxu0 %v8763_v63  ;;  %3859 = vmatmul.bf16.gmra.mxu1 %v8765_v62 }
 0x45d   : > { %v1682_v55 = vrot.slane %v8767_v43, 4  ;;  %v5848_v43 = vld [vmem:[#allocation2 + $0x60] sm:$0xf] }
 0x45e   : > { %v1647_v4 = vsel %vm1255_vm5, %v1639_v15, %v1640_v36  ;;  %v6327_v15 = vld [vmem:[#allocation2 + $0x64] sm:$0xf0]  ;;  %v5850_v36 = vld [vmem:[#allocation2 + $0x68] sm:$0xf0] }
 0x45f   : > { %v1648_v41 = vsel %vm10410_vm8, %v1628_v38, %v1647_v4  ;;  %v6326_v4 = vld [vmem:[#allocation2 + $0x64] sm:$0xf]  ;;  %vm10432_vm8 = vcmask 130048  }
 0x460   : > { %1657 = vst [vmem:[#allocation2 + $0x170] sm:$0xff] %v1648_v41  ;;  %v8826_v41 = vor.u32 %v6327_v15, %v5848_v43 }
 0x461   : > { %7012 = vrot.lane.b32.xlu0 %v7821_v58, %s7312_s8  ;;  %7017 = vrot.lane.b32.xlu1 %v7957_v19, %s7313_s27 }
 0x462   : > { %7022 = vrot.lane.b32.xlu2 %v7944_v11, %s7313_s27  ;;  %10418 = vst [vmem:[#allocation16_spill] sm:$0xff] %v8826_v41 }
 0x463   : > { %v1634_v46 = vpop.permute.xlu0 %1633  ;;  %v1660_v40 = vpop.permute.xlu1 %1659 }
 0x464   : > { %v8780_v20 = vpop.permute.xlu2 %1703  ;;  %v1642_v47 = vrot.slane %v1634_v46, 4  ;;  %v1675_v23 = vrot.slane %v1660_v40, 4  ;;  %4028 = vmatmul.bf16.gmra.mxu2 %v8763_v63  ;;  %4197 = vmatmul.bf16.gmra.mxu3 %v8765_v62 }
 0x466   : > { %v1649_v54 = vsel %vm1255_vm5, %v1641_v2, %v1642_v47  ;;  %v1683_v16 = vsel %vm1255_vm5, %v1675_v23, %v1676_v3 }
 0x467   : > { %v1650_v26 = vsel %vm10411_vm9, %v8718_v42, %v1649_v54  ;;  %v1684_v5 = vsel %vm10412_vm4, %v1660_v40, %v1683_v16  ;;  %v8797_v42 = vor.u32 %v6324_v57, %v5842_v60  ;;  %vm3003_vm9 = vcmp.ge.s32.totalorder %v8007_v37, 15 }
 0x468   : > { %1658 = vst [vmem:[#allocation2 + $0x178] sm:$0xff] %v1650_v26  ;;  %vm3004_vm4 = vcmp.ge.s32.totalorder %v8009_v13, 15 }
 0x469   : > { %1695 = vst [vmem:[#allocation2 + $0x180] sm:$0xff] %v1684_v5  ;;  %7027 = vrot.lane.b32.xlu0 %v7960_v17, %s7280_s28  ;;  %7032 = vrot.lane.b32.xlu1 %v7948_v12, %s7280_s28  ;;  %v1717_v5 = vrot.slane %v8780_v20, 4 }
 0x46a   : > { %7037 = vrot.lane.b32.xlu2 %v7957_v19, %s7314_s11  ;;  %10414 = vst [vmem:[#allocation15_spill] sm:$0xff] %v8797_v42 }
 0x46b   : > { %v1664_v21 = vpop.permute.xlu0 %1663  ;;  %v1666_v31 = vpop.permute.xlu1 %1665 }
 0x46c   : > { %v1710_v1 = vpop.permute.xlu2 %1709  ;;  %v1677_v6 = vrot.slane %v1664_v21, 4  ;;  %v1678_v52 = vrot.slane %v1666_v31, 4  ;;  %3695 = vmatmul.bf16.gmra.mxu0 %v8795_v8  ;;  %3864 = vmatmul.bf16.gmra.mxu1 %v8797_v42 }
 0x46d   : > { %v1720_v34 = vrot.slane %v1710_v1, 4  ;;  %v5856_v1 = vld [vmem:[#allocation2 + $0x70] sm:$0xf] }
 0x46e   : > { %v1685_v0 = vsel %vm1255_vm5, %v1677_v6, %v1678_v52 }
 0x46f   : > { %v1686_v59 = vsel %vm10415_vm10, %v1664_v21, %v1685_v0  ;;  %v6329_v0 = vld [vmem:[#allocation2 + $0x74] sm:$0xf0]  ;;  %vm3021_vm10 = vcmask 121856  }
 0x470   : > { %1696 = vst [vmem:[#allocation2 + $0x188] sm:$0xff] %v1686_v59  ;;  %v5858_v59 = vld [vmem:[#allocation2 + $0x78] sm:$0xf0] }
 0x471   : > { %7042 = vrot.lane.b32.xlu0 %v7944_v11, %s7314_s11  ;;  %7047 = vrot.lane.b32.xlu1 %v7960_v17, %s7315_s15 }
 0x472   : > { %7052 = vrot.lane.b32.xlu2 %v7948_v12, %s7315_s15 }
 0x473   : > { %v1670_v61 = vpop.permute.xlu0 %1669  ;;  %v1672_v22 = vpop.permute.xlu1 %1671 }
 0x474   : > { %v8811_v44 = vpop.permute.xlu2 %1739  ;;  %v1680_v25 = vrot.slane %v1670_v61, 4  ;;  %v1681_v9 = vrot.slane %v1672_v22, 4  ;;  %4033 = vmatmul.bf16.gmra.mxu2 %v8795_v8  ;;  %4202 = vmatmul.bf16.gmra.mxu3 %v8797_v42  ;;  %v6328_v61 = vld [vmem:[#allocation2 + $0x74] sm:$0xf] }
 0x475   : > { %v1755_v43 = vrot.slane %v8811_v44, 4 }
 0x476   : > { %v1687_v10 = vsel %vm1255_vm5, %v1679_v33, %v1680_v25  ;;  %v1689_v50 = vsel %vm1255_vm5, %v1681_v9, %v1682_v55  ;;  %v8855_v33 = vor.u32 %v6329_v0, %v5856_v1 }
 0x477   : > { %v1688_v38 = vsel %vm10416_vm13, %v8748_v28, %v1687_v10  ;;  %v1690_v39 = vsel %vm10417_vm1, %v1672_v22, %v1689_v50  ;;  %v8828_v28 = vor.u32 %v6326_v4, %v5850_v36  ;;  %v7264_v22 = vld [vmem:[#allocation2 + $0x108] sm:$0xff]  ;;  %vm10435_vm13 = vcmask 1039360  }
 0x478   : > { %1697 = vst [vmem:[#allocation2 + $0x190] sm:$0xff] %v1688_v38  ;;  %vm10436_vm1 = vmmov %vm10435_vm13 }
 0x479   : > { %1698 = vst [vmem:[#allocation2 + $0x198] sm:$0xff] %v1690_v39  ;;  %7057 = vrot.lane.b32.xlu0 %v7794_v18, %s7313_s27  ;;  %7062 = vrot.lane.b32.xlu1 %v7816_v56, %s7313_s27 }
 0x47a   : > { %7067 = vrot.lane.b32.xlu2 %v7797_v53, %s7280_s28  ;;  %10419 = vst [vmem:[#allocation17_spill] sm:$0xff] %v8828_v28 }
 0x47b   : > { %v1700_v46 = vpop.permute.xlu0 %1699  ;;  %v1702_v40 = vpop.permute.xlu1 %1701  ;;  %10423 = vst [vmem:[#allocation18_spill] sm:$0xff] %v8855_v33 }
 0x47c   : > { %v1746_v2 = vpop.permute.xlu2 %1745  ;;  %v1715_v3 = vrot.slane %v1700_v46, 4  ;;  %v1716_v47 = vrot.slane %v1702_v40, 4  ;;  %3700 = vmatmul.bf16.gmra.mxu0 %v8826_v41  ;;  %3869 = vmatmul.bf16.gmra.mxu1 %v8828_v28 }
 0x47d   : > { %v1758_v4 = vrot.slane %v1746_v2, 4 }
 0x47e   : > { %v1723_v23 = vsel %vm1255_vm5, %v1715_v3, %v1716_v47 }
 0x47f   : > { %v1724_v54 = vsel %vm10420_vm2, %v1700_v46, %v1723_v23  ;;  %vm10437_vm2 = vmmov %vm10436_vm1 }
 0x480   : > { %1735 = vst [vmem:[#allocation2 + $0x1a0] sm:$0xff] %v1724_v54 }
 0x481   : > { %7072 = vrot.lane.b32.xlu0 %v7821_v58, %s7280_s28  ;;  %7077 = vrot.lane.b32.xlu1 %v7794_v18, %s7314_s11  ;;  %s7316_s28 = smov 13  }
 0x482   : > { %7082 = vrot.lane.b32.xlu2 %v7816_v56, %s7314_s11 }
 0x483   : > { %v1706_v16 = vpop.permute.xlu0 %1705  ;;  %v1708_v26 = vpop.permute.xlu1 %1707 }
 0x484   : > { %v8841_v60 = vpop.permute.xlu2 %1751  ;;  %v1718_v29 = vrot.slane %v1706_v16, 4  ;;  %v1719_v57 = vrot.slane %v1708_v26, 4  ;;  %4038 = vmatmul.bf16.gmra.mxu2 %v8826_v41  ;;  %4207 = vmatmul.bf16.gmra.mxu3 %v8828_v28  ;;  %v6331_v16 = vld [vmem:[#allocation2 + $0x84] sm:$0xf0] }
 0x486   : > { %v1725_v21 = vsel %vm1255_vm5, %v1717_v5, %v1718_v29  ;;  %v1727_v31 = vsel %vm1255_vm5, %v1719_v57, %v1720_v34  ;;  %v5864_v34 = vld [vmem:[#allocation2 + $0x80] sm:$0xf]  ;;  %v6330_v29 = vld [vmem:[#allocation2 + $0x84] sm:$0xf] }
 0x487   : > { %v1726_v6 = vsel %vm10421_vm3, %v8780_v20, %v1725_v21  ;;  %v1728_v52 = vsel %vm10422_vm11, %v1708_v26, %v1727_v31  ;;  %v8857_v20 = vor.u32 %v6328_v61, %v5858_v59  ;;  %v5866_v26 = vld [vmem:[#allocation2 + $0x88] sm:$0xf0]  ;;  %vm10438_vm3 = vmmov %vm10436_vm1  ;;  %vm2688_vm11 = vcmask 89088  }
 0x488   : > { %1736 = vst [vmem:[#allocation2 + $0x1a8] sm:$0xff] %v1726_v6  ;;  %v8891_v21 = vor.u32 %v6330_v29, %v5866_v26  ;;  %v5872_v26 = vld [vmem:[#allocation2 + $0x90] sm:$0xf] }
 0x489   : > { %1737 = vst [vmem:[#allocation2 + $0x1b0] sm:$0xff] %v1728_v52  ;;  %7087 = vrot.lane.b32.xlu0 %v7797_v53, %s7315_s15  ;;  %7092 = vrot.lane.b32.xlu1 %v7821_v58, %s7315_s15 }
 0x48a   : > { %1783 = vrot.lane.b32.xlu2 %v7264_v22, %s7309_s14  ;;  %10424 = vst [vmem:[#allocation19_spill] sm:$0xff] %v8857_v20 }
 0x48b   : > { %v1712_v55 = vpop.permute.xlu0 %1711  ;;  %v1714_v25 = vpop.permute.xlu1 %1713  ;;  %10429 = vst [vmem:[#allocation21_spill] sm:$0xff] %v8891_v21 }
 0x48c   : > { %v8859_v9 = vpop.permute.xlu2 %1781  ;;  %v1721_v10 = vrot.slane %v1712_v55, 4  ;;  %v1722_v50 = vrot.slane %v1714_v25, 4  ;;  %3705 = vmatmul.bf16.gmra.mxu0 %v8855_v33  ;;  %3874 = vmatmul.bf16.gmra.mxu1 %v8857_v20 }
 0x48e   : > { %v1729_v38 = vsel %vm1255_vm5, %v1721_v10, %v1722_v50 }
 0x48f   : > { %v1730_v39 = vsel %vm10425_vm0, %v1712_v55, %v1729_v38  ;;  %v1761_v38 = vrot.slane %v8841_v60, 4  ;;  %vm2670_vm0 = vcmp.ge.s32.totalorder %v8007_v37, 11 }
 0x490   : > { %1738 = vst [vmem:[#allocation2 + $0x1b8] sm:$0xff] %v1730_v39  ;;  %v1796_v39 = vrot.slane %v8859_v9, 4 }
 0x491   : > { %1785 = vrot.lane.b32.xlu0 %v8363_v48, %s7309_s14  ;;  %7097 = vrot.lane.b32.xlu1 %v7957_v19, %s7316_s28 }
 0x492   : > { %7102 = vrot.lane.b32.xlu2 %v7944_v11, %s7316_s28 }
 0x493   : > { %v1742_v15 = vpop.permute.xlu0 %1741  ;;  %v1744_v36 = vpop.permute.xlu1 %1743 }
 0x494   : > { %v8872_v46 = vpop.permute.xlu2 %6947  ;;  %v1756_v40 = vrot.slane %v1742_v15, 4  ;;  %v1757_v3 = vrot.slane %v1744_v36, 4  ;;  %4043 = vmatmul.bf16.gmra.mxu2 %v8855_v33  ;;  %4212 = vmatmul.bf16.gmra.mxu3 %v8857_v20 }
 0x496   : > { %v1763_v48 = vsel %vm1255_vm5, %v1755_v43, %v1756_v40  ;;  %v1765_v47 = vsel %vm1255_vm5, %v1757_v3, %v1758_v4  ;;  %v6333_v3 = vld [vmem:[#allocation2 + $0x94] sm:$0xf0] }
 0x497   : > { %v1764_v23 = vsel %vm10426_vm6, %v8811_v44, %v1763_v48  ;;  %v1766_v54 = vsel %vm10427_vm7, %v1744_v36, %v1765_v47  ;;  %v8889_v44 = vor.u32 %v6331_v16, %v5864_v34  ;;  %v5874_v48 = vld [vmem:[#allocation2 + $0x98] sm:$0xf0]  ;;  %v8924_v29 = vor.u32 %v6333_v3, %v5872_v26 }
 0x498   : > { %1775 = vst [vmem:[#allocation2 + $0x1c0] sm:$0xff] %v1764_v23  ;;  %vm2671_vm6 = vcmp.ge.s32.totalorder %v8009_v13, 11  ;;  %vm2721_vm7 = vcmask 1006592  }
 0x499   : > { %1776 = vst [vmem:[#allocation2 + $0x1c8] sm:$0xff] %v1766_v54  ;;  %v3671_v2 = vpop.f32.mrf.mxu0  ;;  %v3840_v5 = vpop.f32.mrf.mxu1  ;;  %7107 = vrot.lane.b32.xlu0 %v7960_v17, %s7281_s29  ;;  %7112 = vrot.lane.b32.xlu1 %v7948_v12, %s7281_s29 }
 0x49a   : > { %v8885_v57 = vadd.f32 %v3840_v5, %v3671_v2  ;;  %7117 = vrot.lane.b32.xlu2 %v7957_v19, %s7317_s16  ;;  %10428 = vst [vmem:[#allocation20_spill] sm:$0xff] %v8889_v44  ;;  %v6332_v2 = vld [vmem:[#allocation2 + $0x94] sm:$0xf] }
 0x49b   : > { %v1748_v31 = vpop.permute.xlu0 %1747  ;;  %v1750_v6 = vpop.permute.xlu1 %1749  ;;  %10433 = vst [vmem:[#allocation22_spill] sm:$0xff] %v8924_v29 }
 0x49c   : > { %v8893_v52 = vpop.permute.xlu2 %6962  ;;  %v1759_v0 = vrot.slane %v1748_v31, 4  ;;  %v1760_v59 = vrot.slane %v1750_v6, 4  ;;  %3710 = vmatmul.bf16.gmra.mxu0 %v8889_v44  ;;  %3879 = vmatmul.bf16.gmra.mxu1 %v8891_v21  ;;  %v6949_v6 = vunpack.i.l.bf16 %v8872_v46 }
 0x49e   : > { %v1767_v1 = vsel %vm1255_vm5, %v1759_v0, %v1760_v59 }
 0x49f   : > { %v1768_v61 = vsel %vm10430_vm14, %v1748_v31, %v1767_v1  ;;  %v6950_v31 = vunpack.i.h.bf16 %v8872_v46  ;;  %vm10441_vm14 = vmmov %vm10436_vm1 }
 0x4a0   : > { %1777 = vst [vmem:[#allocation2 + $0x1d0] sm:$0xff] %v1768_v61 }
 0x4a1   : > { %v3673_v22 = vpop.f32.mrf.mxu0  ;;  %v3842_v55 = vpop.f32.mrf.mxu1  ;;  %7122 = vrot.lane.b32.xlu0 %v7944_v11, %s7317_s16  ;;  %7127 = vrot.lane.b32.xlu1 %v7960_v17, %s7318_s17  ;;  %v3058_v46 = vsel %vm10435_vm13, %v6949_v6, %v6950_v31  ;;  %vm10444_vm13 = vmmov %vm10436_vm1 }
 0x4a2   : > { %v8903_v25 = vadd.f32 %v3842_v55, %v3673_v22  ;;  %7132 = vrot.lane.b32.xlu2 %v7948_v12, %s7318_s17 }
 0x4a3   : > { %v1754_v10 = vpop.permute.xlu0 %1753  ;;  %v1780_v50 = vpop.permute.xlu1 %1779 }
 0x4a4   : > { %v8909_v15 = vpop.permute.xlu2 %6977  ;;  %v1762_v36 = vrot.slane %v1754_v10, 4  ;;  %v1795_v43 = vrot.slane %v1780_v50, 4  ;;  %4048 = vmatmul.bf16.gmra.mxu2 %v8889_v44  ;;  %4217 = vmatmul.bf16.gmra.mxu3 %v8891_v21 }
 0x4a6   : > { %v1769_v4 = vsel %vm1255_vm5, %v1761_v38, %v1762_v36  ;;  %v1803_v40 = vsel %vm1255_vm5, %v1795_v43, %v1796_v39 }
 0x4a7   : > { %v1770_v47 = vsel %vm10431_vm15, %v8841_v60, %v1769_v4  ;;  %v1804_v23 = vsel %vm10432_vm8, %v1780_v50, %v1803_v40  ;;  %v4009_v9 = vpop.f32.mrf.mxu2  ;;  %v4178_v54 = vpop.f32.mrf.mxu3  ;;  %v8926_v60 = vor.u32 %v6332_v2, %v5874_v48  ;;  %v3059_v50 = vsel %vm10436_vm1, %v6950_v31, %v6949_v6  ;;  %vm10442_vm15 = vmmov %vm10436_vm1 }
 0x4a8   : > { %1778 = vst [vmem:[#allocation2 + $0x1d8] sm:$0xff] %v1770_v47  ;;  %v8918_v16 = vadd.f32 %v4178_v54, %v4009_v9  ;;  %vm10443_vm8 = vmmov %vm10436_vm1  ;;  %vm10449_vm1 = vcmask 1031168  }
 0x4a9   : > { %1815 = vst [vmem:[#allocation2 + $0x1e0] sm:$0xff] %v1804_v23  ;;  %v3676_v5 = vpop.f32.mrf.mxu0  ;;  %v3845_v34 = vpop.f32.mrf.mxu1  ;;  %7137 = vrot.lane.b32.xlu0 %v7794_v18, %s7316_s28  ;;  %7142 = vrot.lane.b32.xlu1 %v7816_v56, %s7316_s28 }
 0x4aa   : > { %10434 = vst [vmem:[#allocation23_spill] sm:$0xff] %v8926_v60  ;;  %v8932_v59 = vadd.f32 %v3845_v34, %v3676_v5  ;;  %7147 = vrot.lane.b32.xlu2 %v7797_v53, %s7281_s29 }
 0x4ab   : > { %v6938_v1 = vpop.permute.xlu0 %6937  ;;  %v6943_v61 = vpop.permute.xlu1 %6942 }
 0x4ac   : > { %v8936_v22 = vpop.permute.xlu2 %6992  ;;  %v6940_v55 = vunpack.i.h.bf16 %v6938_v1  ;;  %v6939_v10 = vunpack.i.l.bf16 %v6938_v1  ;;  %3715 = vmatmul.bf16.gmra.mxu0 %v8924_v29  ;;  %3884 = vmatmul.bf16.gmra.mxu1 %v8926_v60  ;;  %v6945_v9 = vunpack.i.h.bf16 %v6943_v61  ;;  %v6944_v54 = vunpack.i.l.bf16 %v6943_v61 }
 0x4ae   : > { %v3026_v38 = vsel %vm3021_vm10, %v6939_v10, %v6940_v55  ;;  %v3027_v39 = vsel %vm3021_vm10, %v6940_v55, %v6939_v10  ;;  %v3028_v61 = vsel %vm3021_vm10, %v6944_v54, %v6945_v9  ;;  %v3029_v55 = vsel %vm3021_vm10, %v6945_v9, %v6944_v54 }
 0x4af   : > { %v3074_v36 = vsel %vm3003_vm9, %v3026_v38, %v3058_v46  ;;  %v3075_v43 = vsel %vm3004_vm4, %v3027_v39, %v3059_v50  ;;  %v4011_v4 = vpop.f32.mrf.mxu2  ;;  %v4180_v40 = vpop.f32.mrf.mxu3  ;;  %v6335_v50 = vld [vmem:[#allocation2 + $0xa4] sm:$0xf0] }
 0x4b0   : > { %v3080_v3 = vpack.c.bf16 %v3075_v43, %v3074_v36  ;;  %v8950_v48 = vadd.f32 %v4180_v40, %v4011_v4  ;;  %v5882_v4 = vld [vmem:[#allocation2 + $0xa8] sm:$0xf0] }
 0x4b1   : > { %v3678_v47 = vpop.f32.mrf.mxu0  ;;  %v3847_v23 = vpop.f32.mrf.mxu1  ;;  %7152 = vrot.lane.b32.xlu0 %v7821_v58, %s7281_s29  ;;  %7157 = vrot.lane.b32.xlu1 %v7794_v18, %s7317_s16  ;;  %s7319_s29 = smov 12  }
 0x4b2   : > { %3084 = vst [vmem:[#allocation3 + $0x1f0] sm:$0xff] %v3080_v3  ;;  %v8958_v2 = vadd.f32 %v3847_v23, %v3678_v47  ;;  %7162 = vrot.lane.b32.xlu2 %v7816_v56, %s7317_s16  ;;  %v5880_v47 = vld [vmem:[#allocation2 + $0xa0] sm:$0xf] }
 0x4b3   : > { %v6953_v5 = vpop.permute.xlu0 %6952  ;;  %v6958_v34 = vpop.permute.xlu1 %6957 }
 0x4b4   : > { %v8962_v31 = vpop.permute.xlu2 %7007  ;;  %v6955_v6 = vunpack.i.h.bf16 %v6953_v5  ;;  %v6954_v1 = vunpack.i.l.bf16 %v6953_v5  ;;  %4053 = vmatmul.bf16.gmra.mxu2 %v8924_v29  ;;  %4222 = vmatmul.bf16.gmra.mxu3 %v8926_v60  ;;  %v6960_v23 = vunpack.i.h.bf16 %v6958_v34  ;;  %v6959_v9 = vunpack.i.l.bf16 %v6958_v34 }
 0x4b6   : > { %v3060_v10 = vsel %vm10437_vm2, %v6954_v1, %v6955_v6  ;;  %v3061_v46 = vsel %vm10438_vm3, %v6955_v6, %v6954_v1  ;;  %v8980_v6 = vor.u32 %v6335_v50, %v5880_v47  ;;  %v6334_v1 = vld [vmem:[#allocation2 + $0xa4] sm:$0xf]  ;;  %vm10450_vm2 = vmmov %vm10449_vm1 }
 0x4b7   : > { %v3076_v38 = vsel %vm3003_vm9, %v3028_v61, %v3060_v10  ;;  %v3077_v39 = vsel %vm3004_vm4, %v3029_v55, %v3061_v46  ;;  %v4014_v36 = vpop.f32.mrf.mxu2  ;;  %v4183_v43 = vpop.f32.mrf.mxu3  ;;  %v7265_v10 = vld [vmem:[#allocation2 + $0x110] sm:$0xff]  ;;  %v8987_v34 = vor.u32 %v6334_v1, %v5882_v4  ;;  %v6965_v46 = vunpack.i.h.bf16 %v8893_v52  ;;  %vm10451_vm3 = vmmov %vm10449_vm1 }
 0x4b8   : > { %v3081_v40 = vpack.c.bf16 %v3077_v39, %v3076_v38  ;;  %v8974_v3 = vadd.f32 %v4183_v43, %v4014_v36  ;;  %10439 = vst [vmem:[#allocation24_spill] sm:$0xff] %v8980_v6  ;;  %v6964_v38 = vunpack.i.l.bf16 %v8893_v52  ;;  %v2693_v4 = vsel %vm2688_vm11, %v6959_v9, %v6960_v23 }
 0x4b9   : > { %v3681_v54 = vpop.f32.mrf.mxu0  ;;  %v3850_v5 = vpop.f32.mrf.mxu1  ;;  %7167 = vrot.lane.b32.xlu0 %v7797_v53, %s7318_s17  ;;  %7172 = vrot.lane.b32.xlu1 %v7821_v58, %s7318_s17  ;;  %10440 = vst [vmem:[#allocation25_spill] sm:$0xff] %v8987_v34  ;;  %v2694_v52 = vsel %vm2688_vm11, %v6960_v23, %v6959_v9 }
 0x4ba   : > { %3085 = vst [vmem:[#allocation3 + $0x1f8] sm:$0xff] %v3081_v40  ;;  %v8984_v55 = vadd.f32 %v3850_v5, %v3681_v54  ;;  %1787 = vrot.lane.b32.xlu2 %v7265_v10, %s7309_s14 }
 0x4bb   : > { %v6968_v50 = vpop.permute.xlu0 %6967  ;;  %v6973_v39 = vpop.permute.xlu1 %6972 }
 0x4bc   : > { %v8993_v36 = vpop.permute.xlu2 %7022  ;;  %v6970_v43 = vunpack.i.h.bf16 %v6968_v50  ;;  %v6969_v40 = vunpack.i.l.bf16 %v6968_v50  ;;  %v6975_v47 = vunpack.i.h.bf16 %v6973_v39  ;;  %v6974_v54 = vunpack.i.l.bf16 %v6973_v39  ;;  %3720 = vmatmul.bf16.gmra.mxu0 %v8980_v6  ;;  %3889 = vmatmul.bf16.gmra.mxu1 %v8987_v34 }
 0x4bd   : > { %v2695_v50 = vsel %vm2688_vm11, %v6964_v38, %v6965_v46  ;;  %v2696_v39 = vsel %vm2688_vm11, %v6965_v46, %v6964_v38  ;;  %v6994_v46 = vunpack.i.l.bf16 %v8936_v22 }
 0x4be   : > { %v2726_v5 = vsel %vm2721_vm7, %v6969_v40, %v6970_v43  ;;  %v2727_v1 = vsel %vm2721_vm7, %v6970_v43, %v6969_v40  ;;  %v2728_v10 = vsel %vm2721_vm7, %v6974_v54, %v6975_v47  ;;  %v2729_v61 = vsel %vm2721_vm7, %v6975_v47, %v6974_v54 }
 0x4bf   : > { %v2742_v0 = vsel %vm2670_vm0, %v2693_v4, %v2726_v5  ;;  %v2743_v26 = vsel %vm2671_vm6, %v2694_v52, %v2727_v1  ;;  %v4016_v60 = vpop.f32.mrf.mxu2  ;;  %v4185_v23 = vpop.f32.mrf.mxu3  ;;  %v2744_v43 = vsel %vm2670_vm0, %v2695_v50, %v2728_v10  ;;  %v2745_v40 = vsel %vm2671_vm6, %v2696_v39, %v2729_v61  ;;  %v7266_v52 = vld [vmem:[#allocation2 + $0x118] sm:$0xff]  ;;  %v6440_v10 = vld [vmem:[#allocation3 + $0x1f4] sm:$0xf] }
 0x4c0   : > { %v2748_v9 = vpack.c.bf16 %v2743_v26, %v2742_v0  ;;  %v9013_v47 = vadd.f32 %v4185_v23, %v4016_v60  ;;  %v6995_v54 = vunpack.i.h.bf16 %v8936_v22  ;;  %v2749_v38 = vpack.c.bf16 %v2745_v40, %v2744_v43  ;;  %v6304_v0 = vld [vmem:[#allocation3 + $0x1f0] sm:$0xf] }
 0x4c1   : > { %v3683_v4 = vpop.f32.mrf.mxu0  ;;  %v3852_v5 = vpop.f32.mrf.mxu1  ;;  %1789 = vrot.lane.b32.xlu0 %v8389_v14, %s7309_s14  ;;  %1791 = vrot.lane.b32.xlu1 %v7266_v52, %s7309_s14  ;;  %v6441_v26 = vld [vmem:[#allocation3 + $0x1f4] sm:$0xf0]  ;;  %v6306_v1 = vld [vmem:[#allocation3 + $0x1f8] sm:$0xf0]  ;;  %v6980_v50 = vunpack.i.h.bf16 %v8909_v15  ;;  %v6979_v14 = vunpack.i.l.bf16 %v8909_v15 }
 0x4c2   : > { %2752 = vst [vmem:[#allocation3 + $0x170] sm:$0xff] %v2748_v9  ;;  %v9022_v61 = vadd.f32 %v3852_v5, %v3683_v4  ;;  %1793 = vrot.lane.b32.xlu2 %v8393_v30, %s7309_s14  ;;  %v6305_v22 = vor.u32 %v6441_v26, %v6304_v0  ;;  %v6309_v43 = vor.u32 %v6440_v10, %v6306_v1  ;;  %v6337_v1 = vld [vmem:[#allocation2 + $0xb4] sm:$0xf0]  ;;  %v5890_v10 = vld [vmem:[#allocation2 + $0xb8] sm:$0xf0] }
 0x4c3   : > { %2753 = vst [vmem:[#allocation3 + $0x178] sm:$0xff] %v2749_v38  ;;  %v6983_v39 = vpop.permute.xlu0 %6982  ;;  %v6988_v23 = vpop.permute.xlu1 %6987  ;;  %v3056_v30 = vsel %vm10441_vm14, %v6994_v46, %v6995_v54  ;;  %v3057_v5 = vsel %vm10442_vm15, %v6995_v54, %v6994_v46  ;;  %vm2587_vm14 = vcmp.ge.s32.totalorder %v8009_v13, 10  ;;  %vm10455_vm15 = vmmov %vm10449_vm1 }
 0x4c4   : > { %v9028_v40 = vpop.permute.xlu2 %7037  ;;  %v6985_v9 = vunpack.i.h.bf16 %v6983_v39  ;;  %v6984_v52 = vunpack.i.l.bf16 %v6983_v39  ;;  %v6990_v60 = vunpack.i.h.bf16 %v6988_v23  ;;  %v6989_v4 = vunpack.i.l.bf16 %v6988_v23  ;;  %4058 = vmatmul.bf16.gmra.mxu2 %v8980_v6  ;;  %4227 = vmatmul.bf16.gmra.mxu3 %v8987_v34  ;;  %v6336_v6 = vld [vmem:[#allocation2 + $0xb4] sm:$0xf] }
 0x4c5   : > { %5060 = vmatpush.bf16.xpose.msra.mxu2 %v6305_v22  ;;  %5229 = vmatpush.bf16.xpose.msra.mxu3 %v6309_v43  ;;  %v3022_v39 = vsel %vm3021_vm10, %v6979_v14, %v6980_v50  ;;  %v3023_v23 = vsel %vm3021_vm10, %v6980_v50, %v6979_v14  ;;  %v7040_v21 = vunpack.i.h.bf16 %v9028_v40  ;;  %v7039_v44 = vunpack.i.l.bf16 %v9028_v40 }
 0x4c6   : > { %v3024_v15 = vsel %vm3021_vm10, %v6984_v52, %v6985_v9  ;;  %v3025_v38 = vsel %vm3021_vm10, %v6985_v9, %v6984_v52  ;;  %v3054_v0 = vsel %vm10443_vm8, %v6989_v4, %v6990_v60  ;;  %v3055_v26 = vsel %vm10444_vm13, %v6990_v60, %v6989_v4  ;;  %v5888_v4 = vld [vmem:[#allocation2 + $0xb0] sm:$0xf]  ;;  %vm10456_vm8 = vmmov %vm10449_vm1 }
 0x4c7   : > { %v3072_v34 = vsel %vm3003_vm9, %v3024_v15, %v3056_v30  ;;  %v3073_v54 = vsel %vm3004_vm4, %v3025_v38, %v3057_v5  ;;  %v4019_v46 = vpop.f32.mrf.mxu2  ;;  %v4188_v22 = vpop.f32.mrf.mxu3  ;;  %v3070_v9 = vsel %vm3003_vm9, %v3022_v39, %v3054_v0  ;;  %v3071_v60 = vsel %vm3004_vm4, %v3023_v23, %v3055_v26  ;;  %v5898_v26 = vld [vmem:[#allocation2 + $0xc8] sm:$0xf0]  ;;  %vm10457_vm13 = vmmov %vm10449_vm1 }
 0x4c8   : > { %v3079_v43 = vpack.c.bf16 %v3073_v54, %v3072_v34  ;;  %v9048_v52 = vadd.f32 %v4188_v22, %v4019_v46  ;;  %v3078_v50 = vpack.c.bf16 %v3071_v60, %v3070_v9  ;;  %v9054_v34 = vor.u32 %v6337_v1, %v5888_v4 }
 0x4c9   : > { %v3686_v14 = vpop.f32.mrf.mxu0  ;;  %v3855_v29 = vpop.f32.mrf.mxu1  ;;  %7177 = vrot.lane.b32.xlu0 %v7957_v19, %s7319_s29  ;;  %7182 = vrot.lane.b32.xlu1 %v7944_v11, %s7319_s29  ;;  %v9056_v30 = vor.u32 %v6336_v6, %v5890_v10  ;;  %v6240_v5 = vld [vmem:[#allocation3 + $0x170] sm:$0xf]  ;;  %v6424_v15 = vld [vmem:[#allocation3 + $0x174] sm:$0xf]  ;;  %v7010_v38 = vunpack.i.h.bf16 %v8962_v31  ;;  %v7009_v0 = vunpack.i.l.bf16 %v8962_v31  ;;  %vm2938_vm9 = vcmask 113664  }
 0x4ca   : > { %10445 = vst [vmem:[#allocation26_spill] sm:$0xff] %v9054_v34  ;;  %v9062_v39 = vadd.f32 %v3855_v29, %v3686_v14  ;;  %7187 = vrot.lane.b32.xlu2 %v7960_v17, %s7282_s30  ;;  %v6425_v23 = vld [vmem:[#allocation3 + $0x174] sm:$0xf0]  ;;  %v6242_v1 = vld [vmem:[#allocation3 + $0x178] sm:$0xf0]  ;;  %vm2920_vm4 = vcmp.ge.s32.totalorder %v8007_v37, 14 }
 0x4cb   : > { %10446 = vst [vmem:[#allocation27_spill] sm:$0xff] %v9056_v30  ;;  %v6998_v6 = vpop.permute.xlu0 %6997  ;;  %v7003_v10 = vpop.permute.xlu1 %7002  ;;  %v6241_v54 = vor.u32 %v6425_v23, %v6240_v5  ;;  %v6245_v46 = vor.u32 %v6424_v15, %v6242_v1  ;;  %v2722_v29 = vsel %vm2721_vm7, %v7009_v0, %v7010_v38  ;;  %vm2921_vm10 = vcmp.ge.s32.totalorder %v8009_v13, 14 }
 0x4cc   : > { %3083 = vst [vmem:[#allocation3 + $0x1e8] sm:$0xff] %v3079_v43  ;;  %v9066_v22 = vpop.permute.xlu2 %7052  ;;  %v7000_v9 = vunpack.i.h.bf16 %v6998_v6  ;;  %v6999_v31 = vunpack.i.l.bf16 %v6998_v6  ;;  %3725 = vmatmul.bf16.gmra.mxu0 %v9054_v34  ;;  %3894 = vmatmul.bf16.gmra.mxu1 %v9056_v30  ;;  %v2723_v43 = vsel %vm2721_vm7, %v7010_v38, %v7009_v0 }
 0x4cd   : > { %3082 = vst [vmem:[#allocation3 + $0x1e0] sm:$0xff] %v3078_v50  ;;  %4722 = vmatpush.bf16.xpose.msra.mxu0 %v6241_v54  ;;  %4891 = vmatpush.bf16.xpose.msra.mxu1 %v6245_v46  ;;  %v7005_v46 = vunpack.i.h.bf16 %v7003_v10  ;;  %v7055_v40 = vunpack.i.h.bf16 %v9066_v22 }
 0x4ce   : > { %v2689_v60 = vsel %vm2688_vm11, %v6999_v31, %v7000_v9  ;;  %v2690_v4 = vsel %vm2688_vm11, %v7000_v9, %v6999_v31  ;;  %v7004_v9 = vunpack.i.l.bf16 %v7003_v10 }
 0x4cf   : > { %v2738_v50 = vsel %vm2670_vm0, %v2689_v60, %v2722_v29  ;;  %v2739_v14 = vsel %vm2671_vm6, %v2690_v4, %v2723_v43  ;;  %v4021_v5 = vpop.f32.mrf.mxu2  ;;  %v4190_v15 = vpop.f32.mrf.mxu3 }
 0x4d0   : > { %v2746_v23 = vpack.c.bf16 %v2739_v14, %v2738_v50  ;;  %v9078_v1 = vadd.f32 %v4190_v15, %v4021_v5  ;;  %v2691_v10 = vsel %vm2688_vm11, %v7004_v9, %v7005_v46 }
 0x4d1   : > { %v9080_v6 = vpop.f32.mrf.mxu0  ;;  %v9082_v54 = vpop.f32.mrf.mxu1  ;;  %7192 = vrot.lane.b32.xlu0 %v7948_v12, %s7282_s30  ;;  %7197 = vrot.lane.b32.xlu1 %v7957_v19, %s7320_s18 }
 0x4d2   : > { %2750 = vst [vmem:[#allocation3 + $0x160] sm:$0xff] %v2746_v23  ;;  %7202 = vrot.lane.b32.xlu2 %v7944_v11, %s7320_s18  ;;  %v2692_v11 = vsel %vm2688_vm11, %v7005_v46, %v7004_v9  ;;  %v7024_v46 = vunpack.i.l.bf16 %v8993_v36  ;;  %vm10452_vm11 = vmmov %vm10449_vm1 }
 0x4d3   : > { %v6439_v38 = vld [vmem:[#allocation3 + $0x1e4] sm:$0xf0]  ;;  %v6298_v0 = vld [vmem:[#allocation3 + $0x1e8] sm:$0xf0]  ;;  %v7013_v60 = vpop.permute.xlu0 %7012  ;;  %v7018_v4 = vpop.permute.xlu1 %7017 }
 0x4d4   : > { %v6296_v29 = vld [vmem:[#allocation3 + $0x1e0] sm:$0xf]  ;;  %v6438_v43 = vld [vmem:[#allocation3 + $0x1e4] sm:$0xf]  ;;  %v9092_v5 = vpop.permute.xlu2 %7067  ;;  %v7015_v19 = vunpack.i.h.bf16 %v7013_v60  ;;  %v7014_v15 = vunpack.i.l.bf16 %v7013_v60  ;;  %4063 = vmatmul.bf16.gmra.mxu2 %v9054_v34  ;;  %4232 = vmatmul.bf16.gmra.mxu3 %v9056_v30  ;;  %v6339_v60 = vld [vmem:[#allocation2 + $0xc4] sm:$0xf0]  ;;  %v7025_v30 = vunpack.i.h.bf16 %v8993_v36  ;;  %v7020_v9 = vunpack.i.h.bf16 %v7018_v4 }
 0x4d5   : > { %v6297_v50 = vor.u32 %v6439_v38, %v6296_v29  ;;  %v6301_v14 = vor.u32 %v6438_v43, %v6298_v0  ;;  %v7019_v34 = vunpack.i.l.bf16 %v7018_v4 }
 0x4d6   : > { %v2724_v23 = vsel %vm2721_vm7, %v7014_v15, %v7015_v19  ;;  %v2725_v31 = vsel %vm2721_vm7, %v7015_v19, %v7014_v15  ;;  %vm2586_vm7 = vcmp.ge.s32.totalorder %v8007_v37, 10 }
 0x4d7   : > { %5061 = vmatpush.bf16.xpose.msra.mxu2 %v6297_v50  ;;  %5230 = vmatpush.bf16.xpose.msra.mxu3 %v6301_v14  ;;  %v2740_v38 = vsel %vm2670_vm0, %v2691_v10, %v2724_v23  ;;  %v2741_v0 = vsel %vm2671_vm6, %v2692_v11, %v2725_v31  ;;  %v4024_v29 = vpop.f32.mrf.mxu2  ;;  %v4193_v43 = vpop.f32.mrf.mxu3  ;;  %v5896_v31 = vld [vmem:[#allocation2 + $0xc0] sm:$0xf]  ;;  %v6338_v10 = vld [vmem:[#allocation2 + $0xc4] sm:$0xf]  ;;  %vm2604_vm0 = vcmask 80896   ;;  %vm2637_vm6 = vcmask 998400  }
 0x4d8   : > { %v2747_v50 = vpack.c.bf16 %v2741_v0, %v2740_v38  ;;  %v9104_v14 = vadd.f32 %v4193_v43, %v4024_v29  ;;  %v9120_v36 = vor.u32 %v6339_v60, %v5896_v31  ;;  %v9122_v4 = vor.u32 %v6338_v10, %v5898_v26 }
 0x4d9   : > { %v9108_v19 = vpop.f32.mrf.mxu0  ;;  %v9110_v15 = vpop.f32.mrf.mxu1  ;;  %7207 = vrot.lane.b32.xlu0 %v7960_v17, %s7287_s7  ;;  %7212 = vrot.lane.b32.xlu1 %v7948_v12, %s7287_s7  ;;  %v2945_v60 = vsel %vm2938_vm9, %v7024_v46, %v7025_v30  ;;  %v2946_v26 = vsel %vm2938_vm9, %v7025_v30, %v7024_v46  ;;  %v2944_v31 = vsel %vm2938_vm9, %v7020_v9, %v7019_v34 }
 0x4da   : > { %2751 = vst [vmem:[#allocation3 + $0x168] sm:$0xff] %v2747_v50  ;;  %7217 = vrot.lane.b32.xlu2 %v7794_v18, %s7319_s29  ;;  %v2943_v50 = vsel %vm2938_vm9, %v7019_v34, %v7020_v9 }
 0x4db   : > { %10447 = vst [vmem:[#allocation28_spill] sm:$0xff] %v9120_v36  ;;  %v7028_v17 = vpop.permute.xlu0 %7027  ;;  %v7033_v12 = vpop.permute.xlu1 %7032 }
 0x4dc   : > { %10448 = vst [vmem:[#allocation29_spill] sm:$0xff] %v9122_v4  ;;  %v9126_v23 = vpop.permute.xlu2 %7082  ;;  %v7030_v38 = vunpack.i.h.bf16 %v7028_v17  ;;  %v7029_v0 = vunpack.i.l.bf16 %v7028_v17  ;;  %v7035_v29 = vunpack.i.h.bf16 %v7033_v12  ;;  %v7034_v43 = vunpack.i.l.bf16 %v7033_v12  ;;  %3730 = vmatmul.bf16.gmra.mxu0 %v9120_v36  ;;  %3899 = vmatmul.bf16.gmra.mxu1 %v9122_v4 }
 0x4de   : > { %v2975_v10 = vsel %vm10449_vm1, %v7029_v0, %v7030_v38  ;;  %v2976_v11 = vsel %vm10450_vm2, %v7030_v38, %v7029_v0  ;;  %v2977_v17 = vsel %vm10451_vm3, %v7034_v43, %v7035_v29  ;;  %v2978_v12 = vsel %vm10452_vm11, %v7035_v29, %v7034_v43 }
 0x4df   : > { %v2991_v20 = vsel %vm2920_vm4, %v2943_v50, %v2975_v10  ;;  %v2992_v30 = vsel %vm2921_vm10, %v2944_v31, %v2976_v11  ;;  %v9144_v46 = vpop.f32.mrf.mxu2  ;;  %v9146_v34 = vpop.f32.mrf.mxu3  ;;  %v2993_v38 = vsel %vm2920_vm4, %v2945_v60, %v2977_v17  ;;  %v2994_v0 = vsel %vm2921_vm10, %v2946_v26, %v2978_v12  ;;  %v6422_v26 = vld [vmem:[#allocation3 + $0x164] sm:$0xf] }
 0x4e0   : > { %v2997_v9 = vpack.c.bf16 %v2992_v30, %v2991_v20  ;;  %v7054_v29 = vunpack.i.l.bf16 %v9066_v22  ;;  %v2998_v43 = vpack.c.bf16 %v2994_v0, %v2993_v38  ;;  %v6232_v20 = vld [vmem:[#allocation3 + $0x160] sm:$0xf]  ;;  %v2609_v10 = vsel %vm2604_vm0, %v7039_v44, %v7040_v21 }
 0x4e1   : > { %v9154_v50 = vpop.f32.mrf.mxu0  ;;  %v9156_v11 = vpop.f32.mrf.mxu1  ;;  %7222 = vrot.lane.b32.xlu0 %v7816_v56, %s7319_s29  ;;  %7227 = vrot.lane.b32.xlu1 %v7797_v53, %s7282_s30  ;;  %v6423_v60 = vld [vmem:[#allocation3 + $0x164] sm:$0xf0]  ;;  %v6234_v31 = vld [vmem:[#allocation3 + $0x168] sm:$0xf0]  ;;  %vm2838_vm2 = vcmp.ge.s32.totalorder %v8009_v13, 13  ;;  %vm10468_vm3 = vcmask 1022976  }
 0x4e2   : > { %3001 = vst [vmem:[#allocation3 + $0x1d0] sm:$0xff] %v2997_v9  ;;  %7232 = vrot.lane.b32.xlu2 %v7821_v58, %s7282_s30  ;;  %v6233_v22 = vor.u32 %v6423_v60, %v6232_v20  ;;  %v6237_v30 = vor.u32 %v6422_v26, %v6234_v31  ;;  %v2610_v20 = vsel %vm2604_vm0, %v7040_v21, %v7039_v44  ;;  %vm10469_vm11 = vmmov %vm10468_vm3  ;;  %s6313_s30 = sshll.u32 %s10695_s10, 9 }
 0x4e3   : > { %3002 = vst [vmem:[#allocation3 + $0x1d8] sm:$0xff] %v2998_v43  ;;  %v7043_v17 = vpop.permute.xlu0 %7042  ;;  %v7048_v12 = vpop.permute.xlu1 %7047  ;;  %v2644_v43 = vsel %vm2637_vm6, %v7054_v29, %v7055_v40  ;;  %v2645_v60 = vsel %vm2637_vm6, %v7055_v40, %v7054_v29  ;;  %s9938_s20 = scalar_lea.vmem %s10267_s2, %s6313_s30 }
 0x4e4   : > { %v9167_v38 = vpop.permute.xlu2 %1783  ;;  %v7045_v0 = vunpack.i.h.bf16 %v7043_v17  ;;  %v7044_v33 = vunpack.i.l.bf16 %v7043_v17  ;;  %v7050_v9 = vunpack.i.h.bf16 %v7048_v12  ;;  %v7049_v28 = vunpack.i.l.bf16 %v7048_v12  ;;  %4068 = vmatmul.bf16.gmra.mxu2 %v9120_v36  ;;  %4237 = vmatmul.bf16.gmra.mxu3 %v9122_v4 }
 0x4e5   : > { %4723 = vmatpush.bf16.xpose.msra.mxu0 %v6233_v22  ;;  %4892 = vmatpush.bf16.xpose.msra.mxu1 %v6237_v30  ;;  %v5906_v30 = vld [vmem:[#allocation2 + $0xd8] sm:$0xf0] }
 0x4e6   : > { %v2611_v31 = vsel %vm2604_vm0, %v7044_v33, %v7045_v0  ;;  %v2612_v26 = vsel %vm2604_vm0, %v7045_v0, %v7044_v33  ;;  %v2642_v17 = vsel %vm2637_vm6, %v7049_v28, %v7050_v9  ;;  %v2643_v12 = vsel %vm2637_vm6, %v7050_v9, %v7049_v28  ;;  %v6341_v33 = vld [vmem:[#allocation2 + $0xd4] sm:$0xf0]  ;;  %v5904_v9 = vld [vmem:[#allocation2 + $0xd0] sm:$0xf] }
 0x4e7   : > { %v2660_v36 = vsel %vm2586_vm7, %v2611_v31, %v2644_v43  ;;  %v2661_v44 = vsel %vm2587_vm14, %v2612_v26, %v2645_v60  ;;  %v2658_v21 = vsel %vm2586_vm7, %v2609_v10, %v2642_v17  ;;  %v2659_v40 = vsel %vm2587_vm14, %v2610_v20, %v2643_v12  ;;  %v9186_v29 = vpop.f32.mrf.mxu2  ;;  %v9188_v22 = vpop.f32.mrf.mxu3  ;;  %v6340_v10 = vld [vmem:[#allocation2 + $0xd4] sm:$0xf] }
 0x4e8   : > { %v2665_v0 = vpack.c.bf16 %v2661_v44, %v2660_v36  ;;  %v2664_v28 = vpack.c.bf16 %v2659_v40, %v2658_v21  ;;  %v7070_v31 = vunpack.i.h.bf16 %v9092_v5  ;;  %v7069_v26 = vunpack.i.l.bf16 %v9092_v5 }
 0x4e9   : > { %v9190_v4 = vpop.f32.mrf.mxu0  ;;  %v9192_v43 = vpop.f32.mrf.mxu1  ;;  %7237 = vrot.lane.b32.xlu0 %v7794_v18, %s7320_s18  ;;  %7242 = vrot.lane.b32.xlu1 %v7816_v56, %s7320_s18  ;;  %v6288_v20 = vld [vmem:[#allocation3 + $0x1d0] sm:$0xf]  ;;  %v6436_v60 = vld [vmem:[#allocation3 + $0x1d4] sm:$0xf]  ;;  %v9202_v36 = vor.u32 %v6341_v33, %v5904_v9  ;;  %v9204_v17 = vor.u32 %v6340_v10, %v5906_v30 }
 0x4ea   : > { %2669 = vst [vmem:[#allocation3 + $0x158] sm:$0xff] %v2665_v0  ;;  %7247 = vrot.lane.b32.xlu2 %v7797_v53, %s7287_s7  ;;  %v6437_v12 = vld [vmem:[#allocation3 + $0x1d4] sm:$0xf0]  ;;  %v6290_v18 = vld [vmem:[#allocation3 + $0x1d8] sm:$0xf0]  ;;  %v2971_v53 = vsel %vm10455_vm15, %v7069_v26, %v7070_v31  ;;  %v2972_v5 = vsel %vm10456_vm8, %v7070_v31, %v7069_v26  ;;  %vm2502_vm15 = vcmp.ge.s32.totalorder %v8007_v37, 9 }
 0x4eb   : > { %10453 = vst [vmem:[#allocation30_spill] sm:$0xff] %v9202_v36  ;;  %v7058_v44 = vpop.permute.xlu0 %7057  ;;  %v7063_v56 = vpop.permute.xlu1 %7062  ;;  %v6289_v21 = vor.u32 %v6437_v12, %v6288_v20  ;;  %v6293_v40 = vor.u32 %v6436_v60, %v6290_v18  ;;  %vm2503_vm8 = vcmp.ge.s32.totalorder %v8009_v13, 9 }
 0x4ec   : > { %10454 = vst [vmem:[#allocation31_spill] sm:$0xff] %v9204_v17  ;;  %v9206_v41 = vpop.permute.xlu2 %7102  ;;  %v7060_v42 = vunpack.i.h.bf16 %v7058_v44  ;;  %v7059_v8 = vunpack.i.l.bf16 %v7058_v44  ;;  %3735 = vmatmul.bf16.gmra.mxu0 %v9202_v36  ;;  %3904 = vmatmul.bf16.gmra.mxu1 %v9204_v17  ;;  %v7064_v26 = vunpack.i.l.bf16 %v7063_v56 }
 0x4ed   : > { %2668 = vst [vmem:[#allocation3 + $0x150] sm:$0xff] %v2664_v28  ;;  %5062 = vmatpush.bf16.xpose.msra.mxu2 %v6289_v21  ;;  %5231 = vmatpush.bf16.xpose.msra.mxu3 %v6293_v40 }
 0x4ee   : > { %v2939_v33 = vsel %vm2938_vm9, %v7059_v8, %v7060_v42  ;;  %v2940_v30 = vsel %vm2938_vm9, %v7060_v42, %v7059_v8  ;;  %v7065_v42 = vunpack.i.h.bf16 %v7063_v56 }
 0x4ef   : > { %v2987_v0 = vsel %vm2920_vm4, %v2939_v33, %v2971_v53  ;;  %v2988_v28 = vsel %vm2921_vm10, %v2940_v30, %v2972_v5  ;;  %v9218_v9 = vpop.f32.mrf.mxu2  ;;  %v9220_v10 = vpop.f32.mrf.mxu3 }
 0x4f0   : > { %v2995_v20 = vpack.c.bf16 %v2988_v28, %v2987_v0  ;;  %v2942_v56 = vsel %vm2938_vm9, %v7065_v42, %v7064_v26 }
 0x4f1   : > { %v9222_v60 = vpop.f32.mrf.mxu0  ;;  %v9224_v12 = vpop.f32.mrf.mxu1  ;;  %7252 = vrot.lane.b32.xlu0 %v7821_v58, %s7287_s7  ;;  %v6421_v31 = vld [vmem:[#allocation3 + $0x154] sm:$0xf0]  ;;  %v6226_v8 = vld [vmem:[#allocation3 + $0x158] sm:$0xf0]  ;;  %v2941_v58 = vsel %vm2938_vm9, %v7064_v26, %v7065_v42  ;;  %vm10462_vm9 = vcmask 130048  }
 0x4f2   : > { %2999 = vst [vmem:[#allocation3 + $0x1c0] sm:$0xff] %v2995_v20 }
 0x4f3   : > { %v7073_v21 = vpop.permute.xlu0 %7072  ;;  %v7078_v40 = vpop.permute.xlu1 %7077 }
 0x4f4   : > { %v6224_v18 = vld [vmem:[#allocation3 + $0x150] sm:$0xf]  ;;  %v6420_v44 = vld [vmem:[#allocation3 + $0x154] sm:$0xf]  ;;  %v9228_v33 = vpop.permute.xlu2 %7117  ;;  %v7075_v30 = vunpack.i.h.bf16 %v7073_v21  ;;  %v7074_v0 = vunpack.i.l.bf16 %v7073_v21  ;;  %4073 = vmatmul.bf16.gmra.mxu2 %v9202_v36  ;;  %4242 = vmatmul.bf16.gmra.mxu3 %v9204_v17  ;;  %v5914_v17 = vld [vmem:[#allocation2 + $0xe8] sm:$0xf0]  ;;  %v7080_v42 = vunpack.i.h.bf16 %v7078_v40  ;;  %v7079_v26 = vunpack.i.l.bf16 %v7078_v40 }
 0x4f5   : > { %v6225_v53 = vor.u32 %v6421_v31, %v6224_v18  ;;  %v6229_v5 = vor.u32 %v6420_v44, %v6226_v8  ;;  %v5912_v31 = vld [vmem:[#allocation2 + $0xe0] sm:$0xf] }
 0x4f6   : > { %v2973_v28 = vsel %vm10457_vm13, %v7074_v0, %v7075_v30  ;;  %v2974_v20 = vsel %vm10449_vm1, %v7075_v30, %v7074_v0 }
 0x4f7   : > { %4724 = vmatpush.bf16.xpose.msra.mxu0 %v6225_v53  ;;  %4893 = vmatpush.bf16.xpose.msra.mxu1 %v6229_v5  ;;  %v2989_v8 = vsel %vm2920_vm4, %v2941_v58, %v2973_v28  ;;  %v2990_v18 = vsel %vm2921_vm10, %v2942_v56, %v2974_v20  ;;  %v9240_v44 = vpop.f32.mrf.mxu2  ;;  %v9242_v21 = vpop.f32.mrf.mxu3  ;;  %v6343_v53 = vld [vmem:[#allocation2 + $0xe4] sm:$0xf0]  ;;  %v6342_v5 = vld [vmem:[#allocation2 + $0xe4] sm:$0xf]  ;;  %v7085_v56 = vunpack.i.h.bf16 %v9126_v23  ;;  %v7084_v28 = vunpack.i.l.bf16 %v9126_v23 }
 0x4f8   : > { %v2996_v36 = vpack.c.bf16 %v2990_v18, %v2989_v8  ;;  %v9248_v0 = vor.u32 %v6343_v53, %v5912_v31  ;;  %v9250_v58 = vor.u32 %v6342_v5, %v5914_v17  ;;  %v2606_v17 = vsel %vm2604_vm0, %v7080_v42, %v7079_v26 }
 0x4f9   : > { %v9244_v62 = vpop.f32.mrf.mxu0  ;;  %v9246_v30 = vpop.f32.mrf.mxu1  ;;  %vm2855_vm4 = vcmask 105472   ;;  %vm2837_vm10 = vcmp.ge.s32.totalorder %v8007_v37, 13 }
 0x4fa   : > { %10458 = vst [vmem:[#allocation32_spill] sm:$0xff] %v9244_v62 }
 0x4fb   : > { %10459 = vst [vmem:[#allocation33_spill] sm:$0xff] %v9246_v30  ;;  %v7088_v20 = vpop.permute.xlu0 %7087  ;;  %v7093_v63 = vpop.permute.xlu1 %7092 }
 0x4fc   : > { %3000 = vst [vmem:[#allocation3 + $0x1c8] sm:$0xff] %v2996_v36  ;;  %v9254_v51 = vpop.permute.xlu2 %7132  ;;  %v7090_v8 = vunpack.i.h.bf16 %v7088_v20  ;;  %v7089_v18 = vunpack.i.l.bf16 %v7088_v20  ;;  %v7095_v40 = vunpack.i.h.bf16 %v7093_v63  ;;  %v7094_v35 = vunpack.i.l.bf16 %v7093_v63  ;;  %3740 = vmatmul.bf16.gmra.mxu0 %v9248_v0  ;;  %3909 = vmatmul.bf16.gmra.mxu1 %v9250_v58 }
 0x4fd   : > { %10460 = vst [vmem:[#allocation34_spill] sm:$0xff] %v9248_v0  ;;  %v2605_v36 = vsel %vm2604_vm0, %v7079_v26, %v7080_v42  ;;  %v2607_v20 = vsel %vm2604_vm0, %v7084_v28, %v7085_v56  ;;  %v2608_v63 = vsel %vm2604_vm0, %v7085_v56, %v7084_v28  ;;  %vm10470_vm0 = vmmov %vm10468_vm3 }
 0x4fe   : > { %10461 = vst [vmem:[#allocation35_spill] sm:$0xff] %v9250_v58  ;;  %v2638_v31 = vsel %vm2637_vm6, %v7089_v18, %v7090_v8  ;;  %v2639_v23 = vsel %vm2637_vm6, %v7090_v8, %v7089_v18  ;;  %v2640_v53 = vsel %vm2637_vm6, %v7094_v35, %v7095_v40  ;;  %v2641_v5 = vsel %vm2637_vm6, %v7095_v40, %v7094_v35  ;;  %v6280_v18 = vld [vmem:[#allocation3 + $0x1c0] sm:$0xf]  ;;  %vm10471_vm6 = vmmov %vm10470_vm0 }
 0x4ff   : > { %v2654_v27 = vsel %vm2586_vm7, %v2605_v36, %v2638_v31  ;;  %v2655_v24 = vsel %vm2587_vm14, %v2606_v17, %v2639_v23  ;;  %v9270_v49 = vpop.f32.mrf.mxu2  ;;  %v9272_v42 = vpop.f32.mrf.mxu3  ;;  %v2656_v8 = vsel %vm2586_vm7, %v2607_v20, %v2640_v53  ;;  %v2657_v35 = vsel %vm2587_vm14, %v2608_v63, %v2641_v5  ;;  %v6434_v31 = vld [vmem:[#allocation3 + $0x1c4] sm:$0xf]  ;;  %vm10478_vm13 = vmmov %vm10470_vm0 }
 0x500   : > { %v2662_v26 = vpack.c.bf16 %v2655_v24, %v2654_v27  ;;  %v2663_v40 = vpack.c.bf16 %v2657_v35, %v2656_v8  ;;  %v1797_v53 = vrot.slane %v9167_v38, 4  ;;  %v6345_v8 = vld [vmem:[#allocation2 + $0xf4] sm:$0xf0]  ;;  %vm2520_vm7 = vcmask 72704   ;;  %vm10479_vm1 = vmmov %vm10470_vm0 }
 0x501   : > { %v9278_v56 = vpop.f32.mrf.mxu0  ;;  %v9280_v28 = vpop.f32.mrf.mxu1  ;;  %vm2553_vm14 = vcmask 990208  }
 0x502   : > { %2666 = vst [vmem:[#allocation3 + $0x140] sm:$0xff] %v2662_v26 }
 0x503   : > { %v6435_v36 = vld [vmem:[#allocation3 + $0x1c4] sm:$0xf0]  ;;  %v6282_v17 = vld [vmem:[#allocation3 + $0x1c8] sm:$0xf0]  ;;  %2667 = vst [vmem:[#allocation3 + $0x148] sm:$0xff] %v2663_v40  ;;  %v1786_v24 = vpop.permute.xlu0 %1785  ;;  %v7098_v27 = vpop.permute.xlu1 %7097 }
 0x504   : > { %v6281_v23 = vor.u32 %v6435_v36, %v6280_v18  ;;  %v6285_v7 = vor.u32 %v6434_v31, %v6282_v17  ;;  %v1798_v20 = vrot.slane %v1786_v24, 4  ;;  %4078 = vmatmul.bf16.gmra.mxu2 %v9248_v0  ;;  %4247 = vmatmul.bf16.gmra.mxu3 %v9250_v58  ;;  %v9285_v5 = vpop.permute.xlu2 %7147  ;;  %v5922_v40 = vld [vmem:[#allocation2 + $0xf8] sm:$0xf0]  ;;  %v5920_v36 = vld [vmem:[#allocation2 + $0xf0] sm:$0xf]  ;;  %v7100_v31 = vunpack.i.h.bf16 %v7098_v27 }
 0x505   : > { %v7099_v17 = vunpack.i.l.bf16 %v7098_v27 }
 0x506   : > { %5063 = vmatpush.bf16.xpose.msra.mxu2 %v6281_v23  ;;  %5232 = vmatpush.bf16.xpose.msra.mxu3 %v6285_v7  ;;  %v1805_v63 = vsel %vm1255_vm5, %v1797_v53, %v1798_v20  ;;  %v9298_v23 = vor.u32 %v6345_v8, %v5920_v36  ;;  %v6344_v53 = vld [vmem:[#allocation2 + $0xf4] sm:$0xf] }
 0x507   : > { %v1806_v26 = vsel %vm10462_vm9, %v9167_v38, %v1805_v63  ;;  %v9290_v35 = vpop.f32.mrf.mxu2  ;;  %v9292_v18 = vpop.f32.mrf.mxu3  ;;  %v7105_v38 = vunpack.i.h.bf16 %v9206_v41  ;;  %v7104_v63 = vunpack.i.l.bf16 %v9206_v41  ;;  %v9302_v0 = vor.u32 %v6344_v53, %v5922_v40  ;;  %vm10482_vm9 = vmmov %vm10470_vm0 }
 0x508   : > { %10463 = vst [vmem:[#allocation36_spill] sm:$0xff] %v9292_v18  ;;  %v2860_v41 = vsel %vm2855_vm4, %v7099_v17, %v7100_v31  ;;  %v2861_v40 = vsel %vm2855_vm4, %v7100_v31, %v7099_v17 }
 0x509   : > { %1816 = vst [vmem:[#allocation2 + $0x1e8] sm:$0xff] %v1806_v26  ;;  %v9294_v24 = vpop.f32.mrf.mxu0  ;;  %v9296_v7 = vpop.f32.mrf.mxu1  ;;  %v6216_v20 = vld [vmem:[#allocation3 + $0x140] sm:$0xf]  ;;  %v6418_v58 = vld [vmem:[#allocation3 + $0x144] sm:$0xf] }
 0x50a   : > { %10464 = vst [vmem:[#allocation37_spill] sm:$0xff] %v9294_v24  ;;  %v6419_v26 = vld [vmem:[#allocation3 + $0x144] sm:$0xf0]  ;;  %v6218_v45 = vld [vmem:[#allocation3 + $0x148] sm:$0xf0] }
 0x50b   : > { %10465 = vst [vmem:[#allocation38_spill] sm:$0xff] %v9296_v7  ;;  %v7108_v27 = vpop.permute.xlu0 %7107  ;;  %v7113_v32 = vpop.permute.xlu1 %7112  ;;  %v6217_v8 = vor.u32 %v6419_v26, %v6216_v20  ;;  %v6221_v36 = vor.u32 %v6418_v58, %v6218_v45  ;;  %v2863_v20 = vsel %vm2855_vm4, %v7105_v38, %v7104_v63 }
 0x50c   : > { %10466 = vst [vmem:[#allocation39_spill] sm:$0xff] %v9298_v23  ;;  %v7110_v7 = vunpack.i.h.bf16 %v7108_v27  ;;  %v7109_v24 = vunpack.i.l.bf16 %v7108_v27  ;;  %v7115_v30 = vunpack.i.h.bf16 %v7113_v32  ;;  %v7114_v62 = vunpack.i.l.bf16 %v7113_v32  ;;  %3745 = vmatmul.bf16.gmra.mxu0 %v9298_v23  ;;  %3914 = vmatmul.bf16.gmra.mxu1 %v9302_v0 }
 0x50d   : > { %10467 = vst [vmem:[#allocation40_spill] sm:$0xff] %v9302_v0  ;;  %4725 = vmatpush.bf16.xpose.msra.mxu0 %v6217_v8  ;;  %4894 = vmatpush.bf16.xpose.msra.mxu1 %v6221_v36  ;;  %v2862_v32 = vsel %vm2855_vm4, %v7104_v63, %v7105_v38  ;;  %v7119_v38 = vunpack.i.l.bf16 %v9228_v33  ;;  %v7135_v63 = vunpack.i.h.bf16 %v9254_v51 }
 0x50e   : > { %v2892_v53 = vsel %vm10468_vm3, %v7109_v24, %v7110_v7  ;;  %v2893_v18 = vsel %vm10469_vm11, %v7110_v7, %v7109_v24  ;;  %v2894_v45 = vsel %vm10470_vm0, %v7114_v62, %v7115_v30  ;;  %v2895_v58 = vsel %vm10471_vm6, %v7115_v30, %v7114_v62  ;;  %v9325_v7 = vpop.permute.xlu2 %7162  ;;  %vm10483_vm3 = vmmov %vm10470_vm0 }
 0x50f   : > { %v2908_v26 = vsel %vm2837_vm10, %v2860_v41, %v2892_v53  ;;  %v2909_v31 = vsel %vm2838_vm2, %v2861_v40, %v2893_v18  ;;  %v9320_v17 = vpop.f32.mrf.mxu2  ;;  %v9322_v27 = vpop.f32.mrf.mxu3  ;;  %v7120_v24 = vunpack.i.h.bf16 %v9228_v33  ;;  %v2910_v62 = vsel %vm2837_vm10, %v2862_v32, %v2894_v45 }
 0x510   : > { %v2914_v8 = vpack.c.bf16 %v2909_v31, %v2908_v26  ;;  %v2911_v30 = vsel %vm2838_vm2, %v2863_v20, %v2895_v58  ;;  %v7134_v18 = vunpack.i.l.bf16 %v9254_v51  ;;  %v10473_v53 = vmax.f32 %v8903_v25, %v8950_v48 }
 0x511   : > { %v2915_v36 = vpack.c.bf16 %v2911_v30, %v2910_v62  ;;  %v9334_v41 = vpop.f32.mrf.mxu0  ;;  %v9336_v40 = vpop.f32.mrf.mxu1  ;;  %v10474_v51 = vmax.f32 %v8885_v57, %v8918_v16  ;;  %v2525_v25 = vsel %vm2520_vm7, %v7119_v38, %v7120_v24  ;;  %v2526_v48 = vsel %vm2520_vm7, %v7120_v24, %v7119_v38 }
 0x512   : > { %10472 = vst [vmem:[#allocation41_spill] sm:$0xff] %v9336_v40  ;;  %v2560_v31 = vsel %vm2553_vm14, %v7134_v18, %v7135_v63  ;;  %vm2772_vm11 = vcmask 97280   ;;  %vm10492_vm0 = vcmask 1014784  }
 0x513   : > { %2918 = vst [vmem:[#allocation3 + $0x1b0] sm:$0xff] %v2914_v8  ;;  %4342 = vmax.xlane.f32.xlu2 %v10473_v53  ;;  %v7123_v33 = vpop.permute.xlu0 %7122  ;;  %v7128_v45 = vpop.permute.xlu1 %7127  ;;  %4339 = vmax.xlane.f32.xlu1 %v10474_v51  ;;  %v2561_v8 = vsel %vm2553_vm14, %v7135_v63, %v7134_v18  ;;  %v6346_v51 = vld [vmem:[#allocation2 + $0x104] sm:$0xf]  ;;  %vm10493_vm6 = vmmov %vm10492_vm0 }
 0x514   : > { %2919 = vst [vmem:[#allocation3 + $0x1b8] sm:$0xff] %v2915_v36  ;;  %v7125_v58 = vunpack.i.h.bf16 %v7123_v33  ;;  %v7124_v32 = vunpack.i.l.bf16 %v7123_v33  ;;  %v7130_v20 = vunpack.i.h.bf16 %v7128_v45  ;;  %v7129_v26 = vunpack.i.l.bf16 %v7128_v45  ;;  %4083 = vmatmul.bf16.gmra.mxu2 %v9298_v23  ;;  %4252 = vmatmul.bf16.gmra.mxu3 %v9302_v0  ;;  %v5928_v36 = vld [vmem:[#allocation2 + $0x100] sm:$0xf]  ;;  %v6347_v45 = vld [vmem:[#allocation2 + $0x104] sm:$0xf0] }
 0x515   : > { %v10476_v23 = vmax.f32 %v8984_v55, %v9048_v52 }
 0x516   : > { %v2527_v62 = vsel %vm2520_vm7, %v7124_v32, %v7125_v58  ;;  %v2528_v57 = vsel %vm2520_vm7, %v7125_v58, %v7124_v32  ;;  %v2558_v16 = vsel %vm2553_vm14, %v7129_v26, %v7130_v20  ;;  %v2559_v30 = vsel %vm2553_vm14, %v7130_v20, %v7129_v26  ;;  %v5930_v58 = vld [vmem:[#allocation2 + $0x108] sm:$0xf0] }
 0x517   : > { %v2576_v53 = vsel %vm2502_vm15, %v2527_v62, %v2560_v31  ;;  %v2577_v33 = vsel %vm2503_vm8, %v2528_v57, %v2561_v8  ;;  %v2574_v24 = vsel %vm2502_vm15, %v2525_v25, %v2558_v16  ;;  %v2575_v38 = vsel %vm2503_vm8, %v2526_v48, %v2559_v30  ;;  %v9364_v63 = vpop.f32.mrf.mxu2  ;;  %v9366_v18 = vpop.f32.mrf.mxu3 }
 0x518   : > { %v2581_v32 = vpack.c.bf16 %v2577_v33, %v2576_v53  ;;  %v2580_v20 = vpack.c.bf16 %v2575_v38, %v2574_v24  ;;  %v7150_v25 = vunpack.i.h.bf16 %v9285_v5  ;;  %v7149_v57 = vunpack.i.l.bf16 %v9285_v5  ;;  %v9374_v48 = vpop.permute.xlu2 %1787 }
 0x519   : > { %v9368_v26 = vpop.f32.mrf.mxu0  ;;  %v9370_v31 = vpop.f32.mrf.mxu1  ;;  %v9376_v16 = vor.u32 %v6347_v45, %v5928_v36  ;;  %v9378_v30 = vor.u32 %v6346_v51, %v5930_v58  ;;  %v10475_v33 = vmax.f32 %v8958_v2, %v9013_v47  ;;  %v4196_v45 = vadd.f32 %v9146_v34, %v9144_v46 }
 0x51a   : > { %v6272_v8 = vld [vmem:[#allocation3 + $0x1b0] sm:$0xf]  ;;  %v6432_v62 = vld [vmem:[#allocation3 + $0x1b4] sm:$0xf]  ;;  %2585 = vst [vmem:[#allocation3 + $0x138] sm:$0xff] %v2581_v32  ;;  %v10477_v2 = vmax.f32 %v8932_v59, %v8974_v3  ;;  %v2888_v47 = vsel %vm10478_vm13, %v7149_v57, %v7150_v25  ;;  %v2889_v55 = vsel %vm10479_vm1, %v7150_v25, %v7149_v57  ;;  %vm2419_vm1 = vcmp.ge.s32.totalorder %v8007_v37, 8 }
 0x51b   : > { %v6433_v0 = vld [vmem:[#allocation3 + $0x1b4] sm:$0xf0]  ;;  %v6274_v53 = vld [vmem:[#allocation3 + $0x1b8] sm:$0xf0]  ;;  %2584 = vst [vmem:[#allocation3 + $0x130] sm:$0xff] %v2580_v20  ;;  %4348 = vmax.xlane.f32.xlu2 %v10475_v33  ;;  %v7138_v24 = vpop.permute.xlu0 %7137  ;;  %v7143_v38 = vpop.permute.xlu1 %7142  ;;  %4351 = vmax.xlane.f32.xlu1 %v10476_v23  ;;  %v3858_v23 = vadd.f32 %v9082_v54, %v9080_v6 }
 0x51c   : > { %v6273_v5 = vor.u32 %v6433_v0, %v6272_v8  ;;  %v6277_v40 = vor.u32 %v6432_v62, %v6274_v53  ;;  %v7140_v32 = vunpack.i.h.bf16 %v7138_v24  ;;  %v7139_v36 = vunpack.i.l.bf16 %v7138_v24  ;;  %3750 = vmatmul.bf16.gmra.mxu0 %v9376_v16  ;;  %3919 = vmatmul.bf16.gmra.mxu1 %v9378_v30 }
 0x51d   : > { %4345 = vmax.xlane.f32.xlu0 %v10477_v2  ;;  %v4359_v58 = vmax.f32 %v3858_v23, %v4196_v45  ;;  %v7145_v6 = vunpack.i.h.bf16 %v7143_v38  ;;  %v7144_v54 = vunpack.i.l.bf16 %v7143_v38  ;;  %v10480_v53 = vmax.f32 %v9022_v61, %v9078_v1 }
 0x51e   : > { %5064 = vmatpush.bf16.xpose.msra.mxu2 %v6273_v5  ;;  %v2856_v52 = vsel %vm2855_vm4, %v7139_v36, %v7140_v32  ;;  %v2857_v0 = vsel %vm2855_vm4, %v7140_v32, %v7139_v36  ;;  %5233 = vmatpush.bf16.xpose.msra.mxu3 %v6277_v40  ;;  %v4199_v38 = vadd.f32 %v9188_v22, %v9186_v29  ;;  %v5936_v29 = vld [vmem:[#allocation2 + $0x110] sm:$0xf] }
 0x51f   : > { %v2904_v46 = vsel %vm2837_vm10, %v2856_v52, %v2888_v47  ;;  %v2905_v59 = vsel %vm2838_vm2, %v2857_v0, %v2889_v55  ;;  %v9403_v3 = vpop.f32.mrf.mxu2  ;;  %v9405_v34 = vpop.f32.mrf.mxu3  ;;  %v4201_v61 = vadd.f32 %v9220_v10, %v9218_v9  ;;  %v4204_v1 = vadd.f32 %v9242_v21, %v9240_v44  ;;  %v6349_v21 = vld [vmem:[#allocation2 + $0x114] sm:$0xf0] }
 0x520   : > { %v2912_v51 = vpack.c.bf16 %v2905_v59, %v2904_v46  ;;  %v9414_v36 = vpop.permute.xlu2 %1793  ;;  %v10481_v47 = vmax.f32 %v9062_v39, %v9104_v14  ;;  %v2858_v55 = vsel %vm2855_vm4, %v7144_v54, %v7145_v6  ;;  %v2859_v52 = vsel %vm2855_vm4, %v7145_v6, %v7144_v54  ;;  %v6348_v46 = vld [vmem:[#allocation2 + $0x114] sm:$0xf]  ;;  %v5938_v59 = vld [vmem:[#allocation2 + $0x118] sm:$0xf0] }
 0x521   : > { %v9407_v20 = vpop.f32.mrf.mxu0  ;;  %v9409_v8 = vpop.f32.mrf.mxu1  ;;  %v6417_v40 = vld [vmem:[#allocation3 + $0x134] sm:$0xf0]  ;;  %v6210_v62 = vld [vmem:[#allocation3 + $0x138] sm:$0xf0]  ;;  %v3861_v22 = vadd.f32 %v9110_v15, %v9108_v19  ;;  %v3866_v9 = vadd.f32 %v9192_v43, %v9190_v4  ;;  %v3868_v54 = vadd.f32 %v9224_v12, %v9222_v60  ;;  %vm10489_vm4 = vcmask 130048  }
 0x522   : > { %2916 = vst [vmem:[#allocation3 + $0x1a0] sm:$0xff] %v2912_v51  ;;  %v6208_v25 = vld [vmem:[#allocation3 + $0x130] sm:$0xf]  ;;  %v6416_v57 = vld [vmem:[#allocation3 + $0x134] sm:$0xf]  ;;  %v3863_v51 = vadd.f32 %v9156_v11, %v9154_v50  ;;  %v4206_v50 = vadd.f32 %v9272_v42, %v9270_v49  ;;  %v3873_v11 = vadd.f32 %v9280_v28, %v9278_v56  ;;  %v10484_v49 = vld [vmem:[#allocation36_spill] sm:$0xff]  ;;  %v4211_v56 = vadd.f32 %v9322_v27, %v9320_v17 }
 0x523   : > { %4354 = vmax.xlane.f32.xlu2 %v10480_v53  ;;  %v7153_v33 = vpop.permute.xlu0 %7152  ;;  %v7158_v24 = vpop.permute.xlu1 %7157  ;;  %4360 = vmax.xlane.f32.xlu1 %v4359_v58  ;;  %v6209_v5 = vor.u32 %v6417_v40, %v6208_v25  ;;  %v6213_v32 = vor.u32 %v6416_v57, %v6210_v62  ;;  %v4362_v15 = vmax.f32 %v3861_v22, %v4199_v38  ;;  %v7165_v53 = vunpack.i.h.bf16 %v9325_v7 }
 0x524   : > { %v7155_v45 = vunpack.i.h.bf16 %v7153_v33  ;;  %v7154_v2 = vunpack.i.l.bf16 %v7153_v33  ;;  %4088 = vmatmul.bf16.gmra.mxu2 %v9376_v16  ;;  %4257 = vmatmul.bf16.gmra.mxu3 %v9378_v30  ;;  %v4368_v58 = vmax.f32 %v3866_v9, %v4204_v1  ;;  %v7160_v4 = vunpack.i.h.bf16 %v7158_v24 }
 0x525   : > { %4357 = vmax.xlane.f32.xlu0 %v10481_v47  ;;  %4726 = vmatpush.bf16.xpose.msra.mxu0 %v6209_v5  ;;  %v7159_v43 = vunpack.i.l.bf16 %v7158_v24  ;;  %v4365_v6 = vmax.f32 %v3863_v51, %v4201_v61  ;;  %v9451_v25 = vor.u32 %v6349_v21, %v5936_v29  ;;  %v9453_v57 = vor.u32 %v6348_v46, %v5938_v59 }
 0x526   : > { %v2890_v0 = vsel %vm10482_vm9, %v7154_v2, %v7155_v45  ;;  %v2891_v23 = vsel %vm10483_vm3, %v7155_v45, %v7154_v2  ;;  %4895 = vmatpush.bf16.xpose.msra.mxu1 %v6213_v32  ;;  %v7164_v33 = vunpack.i.l.bf16 %v9325_v7  ;;  %v4209_v42 = vadd.f32 %v10484_v49, %v9290_v35  ;;  %v10488_v49 = vld [vmem:[#allocation38_spill] sm:$0xff] }
 0x527   : > { %v2906_v39 = vsel %vm2837_vm10, %v2858_v55, %v2890_v0  ;;  %v2907_v14 = vsel %vm2838_vm2, %v2859_v52, %v2891_v23  ;;  %v9439_v10 = vpop.f32.mrf.mxu2  ;;  %v9441_v44 = vpop.f32.mrf.mxu3  ;;  %v2521_v28 = vsel %vm2520_vm7, %v7159_v43, %v7160_v4  ;;  %v2522_v7 = vsel %vm2520_vm7, %v7160_v4, %v7159_v43  ;;  %vm10490_vm10 = vmmov %vm10489_vm4 }
 0x528   : > { %v2913_v19 = vpack.c.bf16 %v2907_v14, %v2906_v39  ;;  %v9469_v2 = vpop.permute.xlu2 %7187  ;;  %v2523_v35 = vsel %vm2520_vm7, %v7164_v33, %v7165_v53  ;;  %v2524_v55 = vsel %vm2520_vm7, %v7165_v53, %v7164_v33  ;;  %v10485_v39 = vld [vmem:[#allocation32_spill] sm:$0xff]  ;;  %v10486_v14 = vld [vmem:[#allocation33_spill] sm:$0xff]  ;;  %v4371_v46 = vmax.f32 %v3868_v54, %v4206_v50  ;;  %vm10494_vm7 = vmmov %vm10492_vm0 }
 0x529   : > { %v9445_v40 = vpop.f32.mrf.mxu0  ;;  %v9447_v62 = vpop.f32.mrf.mxu1  ;;  %v6264_v9 = vld [vmem:[#allocation3 + $0x1a0] sm:$0xf]  ;;  %v3871_v21 = vadd.f32 %v10486_v14, %v10485_v39  ;;  %v4377_v59 = vmax.f32 %v3873_v11, %v4211_v56  ;;  %v6430_v4 = vld [vmem:[#allocation3 + $0x1a4] sm:$0xf]  ;;  %v1799_v54 = vrot.slane %v9374_v48, 4  ;;  %v1802_v50 = vrot.slane %v9414_v36, 4 }
 0x52a   : > { %2917 = vst [vmem:[#allocation3 + $0x1a8] sm:$0xff] %v2913_v19  ;;  %vm2755_vm2 = vcmp.ge.s32.totalorder %v8009_v13, 12  ;;  %vm2420_vm9 = vcmp.ge.s32.totalorder %v8009_v13, 8 }
 0x52b   : > { %4363 = vmax.xlane.f32.xlu2 %v4362_v15  ;;  %v7168_v24 = vpop.permute.xlu0 %7167  ;;  %v7173_v5 = vpop.permute.xlu1 %7172  ;;  %4369 = vmax.xlane.f32.xlu1 %v4368_v58  ;;  %v4374_v33 = vmax.f32 %v3871_v21, %v4209_v42 }
 0x52c   : > { %v7170_v60 = vunpack.i.h.bf16 %v7168_v24  ;;  %v7169_v12 = vunpack.i.l.bf16 %v7168_v24  ;;  %v7175_v32 = vunpack.i.h.bf16 %v7173_v5  ;;  %v7174_v45 = vunpack.i.l.bf16 %v7173_v5  ;;  %3755 = vmatmul.bf16.gmra.mxu0 %v9451_v25  ;;  %3924 = vmatmul.bf16.gmra.mxu1 %v9453_v57 }
 0x52d   : > { %4366 = vmax.xlane.f32.xlu0 %v4365_v6 }
 0x52e   : > { %v2554_v38 = vsel %vm2553_vm14, %v7169_v12, %v7170_v60  ;;  %v2555_v61 = vsel %vm2553_vm14, %v7170_v60, %v7169_v12  ;;  %v2556_v1 = vsel %vm2553_vm14, %v7174_v45, %v7175_v32  ;;  %v2557_v47 = vsel %vm2553_vm14, %v7175_v32, %v7174_v45  ;;  %v10487_v45 = vld [vmem:[#allocation37_spill] sm:$0xff]  ;;  %vm10495_vm14 = vmmov %vm10492_vm0 }
 0x52f   : > { %v2570_v17 = vsel %vm2502_vm15, %v2521_v28, %v2554_v38  ;;  %v2571_v27 = vsel %vm2503_vm8, %v2522_v7, %v2555_v61  ;;  %v9481_v52 = vpop.f32.mrf.mxu2  ;;  %v9483_v0 = vpop.f32.mrf.mxu3  ;;  %v2572_v29 = vsel %vm2502_vm15, %v2523_v35, %v2556_v1  ;;  %v2573_v22 = vsel %vm2503_vm8, %v2524_v55, %v2557_v47  ;;  %v6351_v38 = vld [vmem:[#allocation2 + $0x124] sm:$0xf0]  ;;  %v5946_v61 = vld [vmem:[#allocation2 + $0x128] sm:$0xf0]  ;;  %v5944_v47 = vld [vmem:[#allocation2 + $0x120] sm:$0xf] }
 0x530   : > { %v2578_v23 = vpack.c.bf16 %v2571_v27, %v2570_v17  ;;  %v2579_v51 = vpack.c.bf16 %v2573_v22, %v2572_v29  ;;  %v4214_v12 = vadd.f32 %v9366_v18, %v9364_v63  ;;  %v4219_v32 = vadd.f32 %v9441_v44, %v9439_v10  ;;  %v9514_v1 = vpop.permute.xlu2 %7202  ;;  %v6350_v35 = vld [vmem:[#allocation2 + $0x124] sm:$0xf]  ;;  %v10491_v55 = vld [vmem:[#allocation41_spill] sm:$0xff] }
 0x531   : > { %v9491_v19 = vpop.f32.mrf.mxu0  ;;  %v9493_v15 = vpop.f32.mrf.mxu1  ;;  %v6431_v58 = vld [vmem:[#allocation3 + $0x1a4] sm:$0xf0]  ;;  %v6266_v43 = vld [vmem:[#allocation3 + $0x1a8] sm:$0xf0]  ;;  %v3876_v42 = vadd.f32 %v10488_v49, %v10487_v45  ;;  %v3881_v28 = vadd.f32 %v9370_v31, %v9368_v26  ;;  %v4216_v7 = vadd.f32 %v9405_v34, %v9403_v3  ;;  %v3878_v26 = vadd.f32 %v10491_v55, %v9334_v41 }
 0x532   : > { %2582 = vst [vmem:[#allocation3 + $0x120] sm:$0xff] %v2578_v23  ;;  %v6265_v6 = vor.u32 %v6431_v58, %v6264_v9  ;;  %v6269_v53 = vor.u32 %v6430_v4, %v6266_v43  ;;  %v7190_v23 = vunpack.i.h.bf16 %v9469_v2  ;;  %v7189_v29 = vunpack.i.l.bf16 %v9469_v2 }
 0x533   : > { %2583 = vst [vmem:[#allocation3 + $0x128] sm:$0xff] %v2579_v51  ;;  %4372 = vmax.xlane.f32.xlu2 %v4371_v46  ;;  %v1790_v24 = vpop.permute.xlu0 %1789  ;;  %v1792_v5 = vpop.permute.xlu1 %1791  ;;  %4378 = vmax.xlane.f32.xlu1 %v4377_v59  ;;  %v4380_v31 = vmax.f32 %v3876_v42, %v4214_v12  ;;  %v4386_v17 = vmax.f32 %v3881_v28, %v4219_v32  ;;  %vm2469_vm15 = vcmask 982016   ;;  %vm10496_vm8 = vcmask 64512  }
 0x534   : > { %v1800_v11 = vrot.slane %v1790_v24, 4  ;;  %v1801_v60 = vrot.slane %v1792_v5, 4  ;;  %4093 = vmatmul.bf16.gmra.mxu2 %v9451_v25  ;;  %4262 = vmatmul.bf16.gmra.mxu3 %v9453_v57  ;;  %v9524_v22 = vor.u32 %v6351_v38, %v5944_v47  ;;  %v9526_v9 = vor.u32 %v6350_v35, %v5946_v61  ;;  %vm10497_vm13 = vmmov %vm10496_vm8 }
 0x535   : > { %4375 = vmax.xlane.f32.xlu0 %v4374_v33  ;;  %5065 = vmatpush.bf16.xpose.msra.mxu2 %v6265_v6  ;;  %v4383_v41 = vmax.f32 %v3878_v26, %v4216_v7  ;;  %v4221_v2 = vadd.f32 %v9483_v0, %v9481_v52  ;;  %v2809_v43 = vsel %vm10492_vm0, %v7189_v29, %v7190_v23  ;;  %v7205_v38 = vunpack.i.h.bf16 %v9514_v1  ;;  %vm10498_vm3 = vmmov %vm10496_vm8 }
 0x536   : > { %v1807_v56 = vsel %vm1255_vm5, %v1799_v54, %v1800_v11  ;;  %v1809_v36 = vsel %vm1255_vm5, %v1801_v60, %v1802_v50  ;;  %5234 = vmatpush.bf16.xpose.msra.mxu3 %v6269_v53  ;;  %vm2754_vm5 = vcmp.ge.s32.totalorder %v8007_v37, 12  ;;  %v2810_v6 = vsel %vm10493_vm6, %v7190_v23, %v7189_v29  ;;  %vm10501_vm6 = vmmov %vm10492_vm0 }
 0x537   : > { %v1808_v63 = vsel %vm10489_vm4, %v9374_v48, %v1807_v56  ;;  %v1810_v18 = vsel %vm10490_vm10, %v1792_v5, %v1809_v36  ;;  %v4054_v10 = vpop.f32.mrf.mxu2  ;;  %v4223_v44 = vpop.f32.mrf.mxu3  ;;  %v3883_v24 = vadd.f32 %v9409_v8, %v9407_v20  ;;  %v3888_v11 = vadd.f32 %v9493_v15, %v9491_v19  ;;  %vm10499_vm4 = vmmov %vm10498_vm3 }
 0x538   : > { %1817 = vst [vmem:[#allocation2 + $0x1f0] sm:$0xff] %v1808_v63  ;;  %v4224_v5 = vadd.f32 %v4223_v44, %v4054_v10  ;;  %v3886_v32 = vadd.f32 %v9447_v62, %v9445_v40  ;;  %v9552_v8 = vpop.permute.xlu2 %7217  ;;  %v5952_v44 = vld [vmem:[#allocation2 + $0x130] sm:$0xf]  ;;  %v7204_v61 = vunpack.i.l.bf16 %v9514_v1  ;;  %vm10500_vm10 = vmmov %vm10492_vm0 }
 0x539   : > { %1818 = vst [vmem:[#allocation2 + $0x1f8] sm:$0xff] %v1810_v18  ;;  %v9518_v3 = vpop.f32.mrf.mxu0  ;;  %v9520_v48 = vpop.f32.mrf.mxu1  ;;  %v6200_v34 = vld [vmem:[#allocation3 + $0x120] sm:$0xf]  ;;  %v6414_v27 = vld [vmem:[#allocation3 + $0x124] sm:$0xf]  ;;  %v4389_v45 = vmax.f32 %v3883_v24, %v4221_v2  ;;  %v7219_v24 = vunpack.i.l.bf16 %v9552_v8 }
 0x53a   : > { %v6415_v39 = vld [vmem:[#allocation3 + $0x124] sm:$0xf0]  ;;  %v6202_v14 = vld [vmem:[#allocation3 + $0x128] sm:$0xf0]  ;;  %v4392_v28 = vmax.f32 %v3886_v32, %v4224_v5 }
 0x53b   : > { %4381 = vmax.xlane.f32.xlu2 %v4380_v31  ;;  %v7178_v21 = vpop.permute.xlu0 %7177  ;;  %v7183_v46 = vpop.permute.xlu1 %7182  ;;  %4387 = vmax.xlane.f32.xlu1 %v4386_v17  ;;  %v6201_v59 = vor.u32 %v6415_v39, %v6200_v34  ;;  %v6205_v51 = vor.u32 %v6414_v27, %v6202_v14  ;;  %v6353_v31 = vld [vmem:[#allocation2 + $0x134] sm:$0xf0]  ;;  %v6352_v17 = vld [vmem:[#allocation2 + $0x134] sm:$0xf]  ;;  %v5954_v34 = vld [vmem:[#allocation2 + $0x138] sm:$0xf0]  ;;  %v3891_v27 = vadd.f32 %v9520_v48, %v9518_v3 }
 0x53c   : > { %v7180_v58 = vunpack.i.h.bf16 %v7178_v21  ;;  %v7179_v4 = vunpack.i.l.bf16 %v7178_v21  ;;  %3760 = vmatmul.bf16.gmra.mxu0 %v9524_v22  ;;  %3929 = vmatmul.bf16.gmra.mxu1 %v9526_v9  ;;  %v7185_v42 = vunpack.i.h.bf16 %v7183_v46  ;;  %v7184_v56 = vunpack.i.l.bf16 %v7183_v46 }
 0x53d   : > { %4384 = vmax.xlane.f32.xlu0 %v4383_v41  ;;  %4727 = vmatpush.bf16.xpose.msra.mxu0 %v6201_v59  ;;  %v9572_v46 = vor.u32 %v6353_v31, %v5952_v44  ;;  %v9574_v59 = vor.u32 %v6352_v17, %v5954_v34 }
 0x53e   : > { %v2777_v53 = vsel %vm2772_vm11, %v7179_v4, %v7180_v58  ;;  %v2778_v33 = vsel %vm2772_vm11, %v7180_v58, %v7179_v4  ;;  %4896 = vmatpush.bf16.xpose.msra.mxu1 %v6205_v51  ;;  %v2779_v40 = vsel %vm2772_vm11, %v7184_v56, %v7185_v42  ;;  %v2780_v62 = vsel %vm2772_vm11, %v7185_v42, %v7184_v56 }
 0x53f   : > { %v2825_v54 = vsel %vm2754_vm5, %v2777_v53, %v2809_v43  ;;  %v2826_v52 = vsel %vm2755_vm2, %v2778_v33, %v2810_v6  ;;  %v4056_v0 = vpop.f32.mrf.mxu2  ;;  %v4225_v50 = vpop.f32.mrf.mxu3  ;;  %v2443_v51 = vsel %vm10496_vm8, %v7204_v61, %v7205_v38  ;;  %v2444_v58 = vsel %vm10497_vm13, %v7205_v38, %v7204_v61 }
 0x540   : > { %v2831_v60 = vpack.c.bf16 %v2826_v52, %v2825_v54  ;;  %v4226_v12 = vadd.f32 %v4225_v50, %v4056_v0  ;;  %v7233_v4 = vpop.permute.xlu2 %7232  ;;  %v7220_v33 = vunpack.i.h.bf16 %v9552_v8 }
 0x541   : > { %v9548_v49 = vpop.f32.mrf.mxu0  ;;  %v9550_v20 = vpop.f32.mrf.mxu1 }
 0x542   : > { %2835 = vst [vmem:[#allocation3 + $0x190] sm:$0xff] %v2831_v60  ;;  %v4395_v36 = vmax.f32 %v3888_v11, %v4226_v12  ;;  %v3893_v56 = vadd.f32 %v9550_v20, %v9548_v49  ;;  %v2774_v34 = vsel %vm2772_vm11, %v7220_v33, %v7219_v24 }
 0x543   : > { %4390 = vmax.xlane.f32.xlu2 %v4389_v45  ;;  %v7193_v7 = vpop.permute.xlu0 %7192  ;;  %v7198_v19 = vpop.permute.xlu1 %7197 }
 0x544   : > { %v7195_v15 = vunpack.i.h.bf16 %v7193_v7  ;;  %v7194_v63 = vunpack.i.l.bf16 %v7193_v7  ;;  %4098 = vmatmul.bf16.gmra.mxu2 %v9524_v22  ;;  %4267 = vmatmul.bf16.gmra.mxu3 %v9526_v9  ;;  %v7200_v39 = vunpack.i.h.bf16 %v7198_v19  ;;  %v7199_v14 = vunpack.i.l.bf16 %v7198_v19 }
 0x545   : > { %4396 = vmax.xlane.f32.xlu1 %v4395_v36  ;;  %4393 = vmax.xlane.f32.xlu0 %v4392_v28 }
 0x546   : > { %v2811_v18 = vsel %vm10494_vm7, %v7194_v63, %v7195_v15  ;;  %v2812_v10 = vsel %vm10495_vm14, %v7195_v15, %v7194_v63  ;;  %v2441_v5 = vsel %vm10498_vm3, %v7199_v14, %v7200_v39  ;;  %v2442_v54 = vsel %vm10499_vm4, %v7200_v39, %v7199_v14  ;;  %vm10502_vm7 = vmmov %vm10492_vm0 }
 0x547   : > { %v2827_v47 = vsel %vm2754_vm5, %v2779_v40, %v2811_v18  ;;  %v2828_v35 = vsel %vm2755_vm2, %v2780_v62, %v2812_v10  ;;  %v4059_v55 = vpop.f32.mrf.mxu2  ;;  %v4228_v26 = vpop.f32.mrf.mxu3  ;;  %v7235_v15 = vunpack.i.h.bf16 %v7233_v4  ;;  %v7234_v63 = vunpack.i.l.bf16 %v7233_v4 }
 0x548   : > { %v2832_v23 = vpack.c.bf16 %v2828_v35, %v2827_v47  ;;  %v4229_v29 = vadd.f32 %v4228_v26, %v4059_v55  ;;  %v2773_v35 = vsel %vm2772_vm11, %v7219_v24, %v7220_v33 }
 0x549   : > { %v9568_v41 = vpop.f32.mrf.mxu0  ;;  %v9570_v1 = vpop.f32.mrf.mxu1  ;;  %v6256_v19 = vld [vmem:[#allocation3 + $0x190] sm:$0xf]  ;;  %v6428_v10 = vld [vmem:[#allocation3 + $0x194] sm:$0xf] }
 0x54a   : > { %2836 = vst [vmem:[#allocation3 + $0x198] sm:$0xff] %v2832_v23  ;;  %v4398_v21 = vmax.f32 %v3891_v27, %v4229_v29  ;;  %v2807_v27 = vsel %vm10500_vm10, %v7234_v63, %v7235_v15  ;;  %v2808_v23 = vsel %vm10492_vm0, %v7235_v15, %v7234_v63  ;;  %v7248_v29 = vpop.permute.xlu2 %7247  ;;  %v3896_v33 = vadd.f32 %v9570_v1, %v9568_v41 }
 0x54b   : > { %v7208_v3 = vpop.permute.xlu0 %7207  ;;  %v7213_v48 = vpop.permute.xlu1 %7212 }
 0x54c   : > { %v7210_v2 = vunpack.i.h.bf16 %v7208_v3  ;;  %v7209_v43 = vunpack.i.l.bf16 %v7208_v3  ;;  %v7215_v6 = vunpack.i.h.bf16 %v7213_v48  ;;  %v7214_v53 = vunpack.i.l.bf16 %v7213_v48  ;;  %3765 = vmatmul.bf16.gmra.mxu0 %v9572_v46  ;;  %3934 = vmatmul.bf16.gmra.mxu1 %v9574_v59 }
 0x54d   : > { %4399 = vmax.xlane.f32.xlu2 %v4398_v21 }
 0x54e   : > { %v2474_v52 = vsel %vm2469_vm15, %v7209_v43, %v7210_v2  ;;  %v2475_v0 = vsel %vm2469_vm15, %v7210_v2, %v7209_v43  ;;  %v2476_v50 = vsel %vm2469_vm15, %v7214_v53, %v7215_v6  ;;  %v2477_v11 = vsel %vm2469_vm15, %v7215_v6, %v7214_v53  ;;  %v5962_v53 = vld [vmem:[#allocation2 + $0x148] sm:$0xf0] }
 0x54f   : > { %v2490_v60 = vsel %vm2419_vm1, %v2441_v5, %v2474_v52  ;;  %v2491_v12 = vsel %vm2420_vm9, %v2442_v54, %v2475_v0  ;;  %v2492_v32 = vsel %vm2419_vm1, %v2443_v51, %v2476_v50  ;;  %v2493_v45 = vsel %vm2420_vm9, %v2444_v58, %v2477_v11  ;;  %v4061_v8 = vpop.f32.mrf.mxu2  ;;  %v4230_v42 = vpop.f32.mrf.mxu3  ;;  %v6355_v58 = vld [vmem:[#allocation2 + $0x144] sm:$0xf0]  ;;  %v5960_v52 = vld [vmem:[#allocation2 + $0x140] sm:$0xf] }
 0x550   : > { %v2496_v36 = vpack.c.bf16 %v2491_v12, %v2490_v60  ;;  %v2497_v28 = vpack.c.bf16 %v2493_v45, %v2492_v32  ;;  %v4231_v7 = vadd.f32 %v4230_v42, %v4061_v8  ;;  %v9628_v11 = vor.u32 %v6355_v58, %v5960_v52  ;;  %v6354_v60 = vld [vmem:[#allocation2 + $0x144] sm:$0xf] }
 0x551   : > { %v9600_v40 = vpop.f32.mrf.mxu0  ;;  %v9602_v62 = vpop.f32.mrf.mxu1  ;;  %v6429_v18 = vld [vmem:[#allocation3 + $0x194] sm:$0xf0]  ;;  %v6258_v44 = vld [vmem:[#allocation3 + $0x198] sm:$0xf0]  ;;  %v7250_v45 = vunpack.i.h.bf16 %v7248_v29  ;;  %v7249_v8 = vunpack.i.l.bf16 %v7248_v29 }
 0x552   : > { %2500 = vst [vmem:[#allocation3 + $0x110] sm:$0xff] %v2496_v36  ;;  %v4401_v38 = vmax.f32 %v3893_v56, %v4231_v7  ;;  %v6257_v61 = vor.u32 %v6429_v18, %v6256_v19  ;;  %v6261_v47 = vor.u32 %v6428_v10, %v6258_v44  ;;  %v9630_v56 = vor.u32 %v6354_v60, %v5962_v53 }
 0x553   : > { %2501 = vst [vmem:[#allocation3 + $0x118] sm:$0xff] %v2497_v28  ;;  %v7223_v49 = vpop.permute.xlu0 %7222  ;;  %v7228_v20 = vpop.permute.xlu1 %7227  ;;  %v2470_v63 = vsel %vm2469_vm15, %v7249_v8, %v7250_v45  ;;  %v2471_v18 = vsel %vm2469_vm15, %v7250_v45, %v7249_v8  ;;  %v5968_v8 = vld [vmem:[#allocation2 + $0x150] sm:$0xf] }
 0x554   : > { %v7225_v55 = vunpack.i.h.bf16 %v7223_v49  ;;  %v7224_v26 = vunpack.i.l.bf16 %v7223_v49  ;;  %v7230_v31 = vunpack.i.h.bf16 %v7228_v20  ;;  %v7229_v17 = vunpack.i.l.bf16 %v7228_v20  ;;  %4103 = vmatmul.bf16.gmra.mxu2 %v9572_v46  ;;  %4272 = vmatmul.bf16.gmra.mxu3 %v9574_v59 }
 0x555   : > { %4402 = vmax.xlane.f32.xlu0 %v4401_v38  ;;  %5066 = vmatpush.bf16.xpose.msra.mxu2 %v6257_v61  ;;  %v3898_v20 = vadd.f32 %v9602_v62, %v9600_v40 }
 0x556   : > { %v2775_v39 = vsel %vm2772_vm11, %v7224_v26, %v7225_v55  ;;  %v2776_v14 = vsel %vm2772_vm11, %v7225_v55, %v7224_v26  ;;  %v2805_v21 = vsel %vm10501_vm6, %v7229_v17, %v7230_v31  ;;  %v2806_v51 = vsel %vm10502_vm7, %v7230_v31, %v7229_v17  ;;  %5235 = vmatpush.bf16.xpose.msra.mxu3 %v6261_v47 }
 0x557   : > { %v2823_v3 = vsel %vm2754_vm5, %v2775_v39, %v2807_v27  ;;  %v2824_v48 = vsel %vm2755_vm2, %v2776_v14, %v2808_v23  ;;  %v2821_v4 = vsel %vm2754_vm5, %v2773_v35, %v2805_v21  ;;  %v2822_v2 = vsel %vm2755_vm2, %v2774_v34, %v2806_v51  ;;  %v4064_v43 = vpop.f32.mrf.mxu2  ;;  %v4233_v6 = vpop.f32.mrf.mxu3  ;;  %vm10503_vm5 = vmmov %vm10498_vm3 }
 0x558   : > { %v2830_v24 = vpack.c.bf16 %v2824_v48, %v2823_v3  ;;  %v2829_v5 = vpack.c.bf16 %v2822_v2, %v2821_v4  ;;  %v4234_v54 = vadd.f32 %v4233_v6, %v4064_v43  ;;  %vm10504_vm2 = vmmov %vm10498_vm3 }
 0x559   : > { %v9624_v0 = vpop.f32.mrf.mxu0  ;;  %v9626_v50 = vpop.f32.mrf.mxu1  ;;  %v6192_v12 = vld [vmem:[#allocation3 + $0x110] sm:$0xf]  ;;  %v6412_v32 = vld [vmem:[#allocation3 + $0x114] sm:$0xf]  ;;  %vm10505_vm11 = vmmov %vm10504_vm2 }
 0x55a   : > { %2834 = vst [vmem:[#allocation3 + $0x188] sm:$0xff] %v2830_v24  ;;  %v4404_v42 = vmax.f32 %v3896_v33, %v4234_v54  ;;  %v6413_v41 = vld [vmem:[#allocation3 + $0x114] sm:$0xf0]  ;;  %v6194_v1 = vld [vmem:[#allocation3 + $0x118] sm:$0xf0]  ;;  %vm10506_vm14 = vmmov %vm10504_vm2  ;;  %v3901_v52 = vadd.f32 %v9626_v50, %v9624_v0 }
 0x55b   : > { %2833 = vst [vmem:[#allocation3 + $0x180] sm:$0xff] %v2829_v5  ;;  %v7238_v36 = vpop.permute.xlu0 %7237  ;;  %v6193_v28 = vor.u32 %v6413_v41, %v6192_v12  ;;  %v6197_v7 = vor.u32 %v6412_v32, %v6194_v1  ;;  %v7243_v38 = vpop.permute.xlu1 %7242  ;;  %v6357_v5 = vld [vmem:[#allocation2 + $0x154] sm:$0xf0]  ;;  %v5970_v54 = vld [vmem:[#allocation2 + $0x158] sm:$0xf0] }
 0x55c   : > { %v7240_v19 = vunpack.i.h.bf16 %v7238_v36  ;;  %v7239_v15 = vunpack.i.l.bf16 %v7238_v36  ;;  %3770 = vmatmul.bf16.gmra.mxu0 %v9628_v11  ;;  %3939 = vmatmul.bf16.gmra.mxu1 %v9630_v56  ;;  %v7245_v23 = vunpack.i.h.bf16 %v7243_v38  ;;  %v7244_v29 = vunpack.i.l.bf16 %v7243_v38 }
 0x55d   : > { %4405 = vmax.xlane.f32.xlu1 %v4404_v42  ;;  %4728 = vmatpush.bf16.xpose.msra.mxu0 %v6193_v28  ;;  %v6356_v42 = vld [vmem:[#allocation2 + $0x154] sm:$0xf]  ;;  %v9656_v37 = vor.u32 %v6357_v5, %v5968_v8 }
 0x55e   : > { %v2437_v10 = vsel %vm10503_vm5, %v7239_v15, %v7240_v19  ;;  %v2438_v44 = vsel %vm10504_vm2, %v7240_v19, %v7239_v15  ;;  %4897 = vmatpush.bf16.xpose.msra.mxu1 %v6197_v7  ;;  %v2439_v40 = vsel %vm10505_vm11, %v7244_v29, %v7245_v23  ;;  %v2440_v62 = vsel %vm10506_vm14, %v7245_v23, %v7244_v29  ;;  %v6360_v5 = vld [vmem:[#allocation2 + $0x174] sm:$0xf] }
 0x55f   : > { %v2486_v61 = vsel %vm2419_vm1, %v2437_v10, %v2470_v63  ;;  %v2487_v47 = vsel %vm2420_vm9, %v2438_v44, %v2471_v18  ;;  %v4066_v35 = vpop.f32.mrf.mxu2  ;;  %v4235_v49 = vpop.f32.mrf.mxu3  ;;  %v9658_v1 = vor.u32 %v6356_v42, %v5970_v54 }
 0x560   : > { %v2494_v55 = vpack.c.bf16 %v2487_v47, %v2486_v61  ;;  %v4236_v26 = vadd.f32 %v4235_v49, %v4066_v35  ;;  %v5976_v61 = vld [vmem:[#allocation2 + $0x160] sm:$0xf]  ;;  %v6359_v49 = vld [vmem:[#allocation2 + $0x164] sm:$0xf0] }
 0x561   : > { %v3733_v31 = vpop.f32.mrf.mxu0  ;;  %v3902_v17 = vpop.f32.mrf.mxu1  ;;  %v6427_v34 = vld [vmem:[#allocation3 + $0x184] sm:$0xf0]  ;;  %v6250_v27 = vld [vmem:[#allocation3 + $0x188] sm:$0xf0]  ;;  %v9664_v23 = vor.u32 %v6359_v49, %v5976_v61 }
 0x562   : > { %2498 = vst [vmem:[#allocation3 + $0x100] sm:$0xff] %v2494_v55  ;;  %v4407_v39 = vmax.f32 %v3898_v20, %v4236_v26  ;;  %v6248_v14 = vld [vmem:[#allocation3 + $0x180] sm:$0xf]  ;;  %v6426_v21 = vld [vmem:[#allocation3 + $0x184] sm:$0xf]  ;;  %v3903_v0 = vadd.f32 %v3902_v17, %v3733_v31 }
 0x563   : > { %v7253_v51 = vpop.permute.xlu0 %7252  ;;  %v6249_v58 = vor.u32 %v6427_v34, %v6248_v14  ;;  %v6253_v3 = vor.u32 %v6426_v21, %v6250_v27  ;;  %v6358_v20 = vld [vmem:[#allocation2 + $0x164] sm:$0xf]  ;;  %v5978_v55 = vld [vmem:[#allocation2 + $0x168] sm:$0xf0] }
 0x564   : > { %v7255_v48 = vunpack.i.h.bf16 %v7253_v51  ;;  %v7254_v4 = vunpack.i.l.bf16 %v7253_v51  ;;  %4108 = vmatmul.bf16.gmra.mxu2 %v9628_v11  ;;  %4277 = vmatmul.bf16.gmra.mxu3 %v9630_v56  ;;  %v9666_v29 = vor.u32 %v6358_v20, %v5978_v55 }
 0x565   : > { %4408 = vmax.xlane.f32.xlu2 %v4407_v39  ;;  %5067 = vmatpush.bf16.xpose.msra.mxu2 %v6249_v58 }
 0x566   : > { %v2472_v2 = vsel %vm2469_vm15, %v7254_v4, %v7255_v48  ;;  %v2473_v43 = vsel %vm2469_vm15, %v7255_v48, %v7254_v4  ;;  %5236 = vmatpush.bf16.xpose.msra.mxu3 %v6253_v3  ;;  %vm10586_vm15 = vcmask 15360  }
 0x567   : > { %v2488_v6 = vsel %vm2419_vm1, %v2439_v40, %v2472_v2  ;;  %v2489_v53 = vsel %vm2420_vm9, %v2440_v62, %v2473_v43  ;;  %v4069_v33 = vpop.f32.mrf.mxu2  ;;  %v4238_v24 = vpop.f32.mrf.mxu3  ;;  %v6361_v62 = vld [vmem:[#allocation2 + $0x174] sm:$0xf0]  ;;  %v5986_v2 = vld [vmem:[#allocation2 + $0x178] sm:$0xf0]  ;;  %vm10587_vm8 = vmmov %vm10586_vm15 }
 0x568   : > { %v2495_v60 = vpack.c.bf16 %v2489_v53, %v2488_v6  ;;  %v4239_v12 = vadd.f32 %v4238_v24, %v4069_v33  ;;  %v5984_v24 = vld [vmem:[#allocation2 + $0x170] sm:$0xf]  ;;  %vm10588_vm13 = vmmov %vm10587_vm8 }
 0x569   : > { %v3736_v32 = vpop.f32.mrf.mxu0  ;;  %v3905_v45 = vpop.f32.mrf.mxu1  ;;  %v6184_v28 = vld [vmem:[#allocation3 + $0x100] sm:$0xf]  ;;  %v6410_v63 = vld [vmem:[#allocation3 + $0x104] sm:$0xf]  ;;  %vm10589_vm1 = vmmov %vm10587_vm8 }
 0x56a   : > { %2499 = vst [vmem:[#allocation3 + $0x108] sm:$0xff] %v2495_v60  ;;  %v4410_v41 = vmax.f32 %v3901_v52, %v4239_v12  ;;  %v3906_v26 = vadd.f32 %v3905_v45, %v3736_v32  ;;  %v9672_v52 = vor.u32 %v6361_v62, %v5984_v24  ;;  %v9674_v60 = vor.u32 %v6360_v5, %v5986_v2  ;;  %vm10590_vm9 = vmmov %vm10589_vm1 }
 0x56b   : > { %vm10591_vm3 = vmmov %vm10589_vm1 }
 0x56c   : > { %3775 = vmatmul.bf16.gmra.mxu0 %v9656_v37  ;;  %3944 = vmatmul.bf16.gmra.mxu1 %v9658_v1  ;;  %vm10592_vm4 = vmmov %vm10589_vm1 }
 0x56d   : > { %4411 = vmax.xlane.f32.xlu0 %v4410_v41  ;;  %vm10593_vm10 = vmmov %vm10589_vm1 }
 0x56e   : > { %vm10594_vm0 = vmmov %vm10589_vm1 }
 0x56f   : > { %v4071_v13 = vpop.f32.mrf.mxu2  ;;  %v4240_v36 = vpop.f32.mrf.mxu3  ;;  %vm10595_vm6 = vmmov %vm10594_vm0 }
 0x570   : > { %v4241_v50 = vadd.f32 %v4240_v36, %v4071_v13  ;;  %vm10596_vm7 = vmmov %vm10594_vm0 }
 0x571   : > { %v3738_v7 = vpop.f32.mrf.mxu0  ;;  %v3907_v19 = vpop.f32.mrf.mxu1  ;;  %v6411_v15 = vld [vmem:[#allocation3 + $0x104] sm:$0xf0]  ;;  %v6186_v18 = vld [vmem:[#allocation3 + $0x108] sm:$0xf0]  ;;  %vm10597_vm5 = vmmov %vm10594_vm0 }
 0x572   : > { %v4413_v10 = vmax.f32 %v3903_v0, %v4241_v50  ;;  %v6185_v44 = vor.u32 %v6411_v15, %v6184_v28  ;;  %v6189_v38 = vor.u32 %v6410_v63, %v6186_v18  ;;  %v3908_v21 = vadd.f32 %v3907_v19, %v3738_v7  ;;  %v6363_v50 = vld [vmem:[#allocation2 + $0x184] sm:$0xf0]  ;;  %v5994_v28 = vld [vmem:[#allocation2 + $0x188] sm:$0xf0]  ;;  %v5992_v18 = vld [vmem:[#allocation2 + $0x180] sm:$0xf] }
 0x573   : > { %vm10598_vm2 = vmmov %vm10594_vm0 }
 0x574   : > { %4113 = vmatmul.bf16.gmra.mxu2 %v9656_v37  ;;  %4282 = vmatmul.bf16.gmra.mxu3 %v9658_v1  ;;  %vm10599_vm11 = vmmov %vm10594_vm0 }
 0x575   : > { %4414 = vmax.xlane.f32.xlu1 %v4413_v10  ;;  %4729 = vmatpush.bf16.xpose.msra.mxu0 %v6185_v44  ;;  %v6362_v10 = vld [vmem:[#allocation2 + $0x184] sm:$0xf]  ;;  %vm10600_vm14 = vmmov %vm10594_vm0 }
 0x576   : > { %4898 = vmatpush.bf16.xpose.msra.mxu1 %v6189_v38  ;;  %v9680_v38 = vor.u32 %v6363_v50, %v5992_v18  ;;  %v9682_v61 = vor.u32 %v6362_v10, %v5994_v28 }
 0x577   : > { %v4074_v47 = vpop.f32.mrf.mxu2  ;;  %v4243_v35 = vpop.f32.mrf.mxu3 }
 0x578   : > { %v4244_v31 = vadd.f32 %v4243_v35, %v4074_v47 }
 0x579   : > { %v3741_v17 = vpop.f32.mrf.mxu0  ;;  %v3910_v34 = vpop.f32.mrf.mxu1 }
 0x57a   : > { %v4416_v27 = vmax.f32 %v3906_v26, %v4244_v31  ;;  %v3911_v43 = vadd.f32 %v3910_v34, %v3741_v17  ;;  %v6000_v17 = vld [vmem:[#allocation2 + $0x190] sm:$0xf] }
 0x57c   : > { %3780 = vmatmul.bf16.gmra.mxu0 %v9664_v23  ;;  %3949 = vmatmul.bf16.gmra.mxu1 %v9666_v29 }
 0x57d   : > { %4417 = vmax.xlane.f32.xlu2 %v4416_v27 }
 0x57f   : > { %v4076_v39 = vpop.f32.mrf.mxu2  ;;  %v4245_v14 = vpop.f32.mrf.mxu3 }
 0x580   : > { %v4246_v51 = vadd.f32 %v4245_v14, %v4076_v39  ;;  %v6365_v39 = vld [vmem:[#allocation2 + $0x194] sm:$0xf0]  ;;  %v6364_v14 = vld [vmem:[#allocation2 + $0x194] sm:$0xf] }
 0x581   : > { %v3743_v58 = vpop.f32.mrf.mxu0  ;;  %v3912_v3 = vpop.f32.mrf.mxu1 }
 0x582   : > { %v4419_v48 = vmax.f32 %v3908_v21, %v4246_v51  ;;  %v3913_v45 = vadd.f32 %v3912_v3, %v3743_v58  ;;  %v6002_v21 = vld [vmem:[#allocation2 + $0x198] sm:$0xf0] }
 0x583   : > { %v9690_v62 = vor.u32 %v6364_v14, %v6002_v21 }
 0x584   : > { %4118 = vmatmul.bf16.gmra.mxu2 %v9664_v23  ;;  %4287 = vmatmul.bf16.gmra.mxu3 %v9666_v29 }
 0x585   : > { %4420 = vmax.xlane.f32.xlu0 %v4419_v48 }
 0x587   : > { %v4079_v4 = vpop.f32.mrf.mxu2  ;;  %v4248_v40 = vpop.f32.mrf.mxu3 }
 0x588   : > { %v4249_v6 = vadd.f32 %v4248_v40, %v4079_v4  ;;  %v9688_v40 = vor.u32 %v6365_v39, %v6000_v17  ;;  %v6368_v39 = vld [vmem:[#allocation2 + $0x1b4] sm:$0xf] }
 0x589   : > { %v3746_v53 = vpop.f32.mrf.mxu0  ;;  %v3915_v33 = vpop.f32.mrf.mxu1 }
 0x58a   : > { %v4422_v54 = vmax.f32 %v3911_v43, %v4249_v6  ;;  %v3916_v7 = vadd.f32 %v3915_v33, %v3746_v53 }
 0x58c   : > { %3785 = vmatmul.bf16.gmra.mxu0 %v9672_v52  ;;  %3954 = vmatmul.bf16.gmra.mxu1 %v9674_v60 }
 0x58d   : > { %4423 = vmax.xlane.f32.xlu1 %v4422_v54 }
 0x58f   : > { %v4081_v12 = vpop.f32.mrf.mxu2  ;;  %v4250_v32 = vpop.f32.mrf.mxu3 }
 0x590   : > { %v4251_v8 = vadd.f32 %v4250_v32, %v4081_v12  ;;  %v6367_v32 = vld [vmem:[#allocation2 + $0x1a4] sm:$0xf0] }
 0x591   : > { %v3748_v42 = vpop.f32.mrf.mxu0  ;;  %v3917_v41 = vpop.f32.mrf.mxu1 }
 0x592   : > { %v4425_v13 = vmax.f32 %v3913_v45, %v4251_v8  ;;  %v3918_v49 = vadd.f32 %v3917_v41, %v3748_v42  ;;  %v6010_v45 = vld [vmem:[#allocation2 + $0x1a8] sm:$0xf0] }
 0x594   : > { %4123 = vmatmul.bf16.gmra.mxu2 %v9672_v52  ;;  %4292 = vmatmul.bf16.gmra.mxu3 %v9674_v60 }
 0x595   : > { %4426 = vmax.xlane.f32.xlu2 %v4425_v13 }
 0x597   : > { %v4084_v36 = vpop.f32.mrf.mxu2  ;;  %v4253_v0 = vpop.f32.mrf.mxu3 }
 0x598   : > { %v4254_v19 = vadd.f32 %v4253_v0, %v4084_v36  ;;  %v6008_v36 = vld [vmem:[#allocation2 + $0x1a0] sm:$0xf]  ;;  %v6366_v0 = vld [vmem:[#allocation2 + $0x1a4] sm:$0xf] }
 0x599   : > { %v3751_v15 = vpop.f32.mrf.mxu0  ;;  %v3920_v63 = vpop.f32.mrf.mxu1  ;;  %v9696_v28 = vor.u32 %v6367_v32, %v6008_v36 }
 0x59a   : > { %v4428_v44 = vmax.f32 %v3916_v7, %v4254_v19  ;;  %v3921_v51 = vadd.f32 %v3920_v63, %v3751_v15  ;;  %v9698_v7 = vor.u32 %v6366_v0, %v6010_v45 }
 0x59c   : > { %3790 = vmatmul.bf16.gmra.mxu0 %v9680_v38  ;;  %3959 = vmatmul.bf16.gmra.mxu1 %v9682_v61 }
 0x59d   : > { %4429 = vmax.xlane.f32.xlu0 %v4428_v44 }
 0x59f   : > { %v4086_v47 = vpop.f32.mrf.mxu2  ;;  %v4255_v35 = vpop.f32.mrf.mxu3 }
 0x5a0   : > { %v4256_v20 = vadd.f32 %v4255_v35, %v4086_v47 }
 0x5a1   : > { %v3753_v55 = vpop.f32.mrf.mxu0  ;;  %v3922_v26 = vpop.f32.mrf.mxu1 }
 0x5a2   : > { %v4431_v31 = vmax.f32 %v3918_v49, %v4256_v20  ;;  %v3923_v6 = vadd.f32 %v3922_v26, %v3753_v55  ;;  %v6369_v20 = vld [vmem:[#allocation2 + $0x1b4] sm:$0xf0]  ;;  %v6018_v55 = vld [vmem:[#allocation2 + $0x1b8] sm:$0xf0] }
 0x5a4   : > { %4128 = vmatmul.bf16.gmra.mxu2 %v9680_v38  ;;  %4297 = vmatmul.bf16.gmra.mxu3 %v9682_v61 }
 0x5a5   : > { %4432 = vmax.xlane.f32.xlu1 %v4431_v31 }
 0x5a7   : > { %v4089_v34 = vpop.f32.mrf.mxu2  ;;  %v4258_v27 = vpop.f32.mrf.mxu3 }
 0x5a8   : > { %v4259_v58 = vadd.f32 %v4258_v27, %v4089_v34  ;;  %v6016_v27 = vld [vmem:[#allocation2 + $0x1b0] sm:$0xf] }
 0x5a9   : > { %v3756_v3 = vpop.f32.mrf.mxu0  ;;  %v3925_v48 = vpop.f32.mrf.mxu1  ;;  %v9704_v21 = vor.u32 %v6369_v20, %v6016_v27 }
 0x5aa   : > { %v4434_v4 = vmax.f32 %v3921_v51, %v4259_v58  ;;  %v3926_v8 = vadd.f32 %v3925_v48, %v3756_v3  ;;  %v9706_v51 = vor.u32 %v6368_v39, %v6018_v55 }
 0x5ab   : > { %10507 = vst [vmem:[#allocation36_spill] sm:$0xff] %v9704_v21 }
 0x5ac   : > { %3795 = vmatmul.bf16.gmra.mxu0 %v9688_v40  ;;  %3964 = vmatmul.bf16.gmra.mxu1 %v9690_v62  ;;  %10508 = vst [vmem:[#allocation32_spill] sm:$0xff] %v9706_v51 }
 0x5ad   : > { %4435 = vmax.xlane.f32.xlu2 %v4434_v4 }
 0x5af   : > { %v4091_v2 = vpop.f32.mrf.mxu2  ;;  %v4260_v43 = vpop.f32.mrf.mxu3 }
 0x5b0   : > { %v4261_v53 = vadd.f32 %v4260_v43, %v4091_v2 }
 0x5b1   : > { %v3758_v33 = vpop.f32.mrf.mxu0  ;;  %v3927_v24 = vpop.f32.mrf.mxu1 }
 0x5b2   : > { %v4437_v5 = vmax.f32 %v3923_v6, %v4261_v53  ;;  %v3928_v63 = vadd.f32 %v3927_v24, %v3758_v33  ;;  %v6024_v53 = vld [vmem:[#allocation2 + $0x1c0] sm:$0xf] }
 0x5b4   : > { %4133 = vmatmul.bf16.gmra.mxu2 %v9688_v40  ;;  %4302 = vmatmul.bf16.gmra.mxu3 %v9690_v62 }
 0x5b5   : > { %4438 = vmax.xlane.f32.xlu0 %v4437_v5  ;;  %v6371_v5 = vld [vmem:[#allocation2 + $0x1c4] sm:$0xf0] }
 0x5b7   : > { %v4094_v54 = vpop.f32.mrf.mxu2  ;;  %v4263_v12 = vpop.f32.mrf.mxu3 }
 0x5b8   : > { %v4264_v42 = vadd.f32 %v4263_v12, %v4094_v54  ;;  %v6370_v54 = vld [vmem:[#allocation2 + $0x1c4] sm:$0xf]  ;;  %v6026_v12 = vld [vmem:[#allocation2 + $0x1c8] sm:$0xf0] }
 0x5b9   : > { %v3761_v41 = vpop.f32.mrf.mxu0  ;;  %v3930_v13 = vpop.f32.mrf.mxu1  ;;  %v9714_v36 = vor.u32 %v6370_v54, %v6026_v12 }
 0x5ba   : > { %v4440_v50 = vmax.f32 %v3926_v8, %v4264_v42  ;;  %v3931_v26 = vadd.f32 %v3930_v13, %v3761_v41  ;;  %v9712_v13 = vor.u32 %v6371_v5, %v6024_v53  ;;  %v6042_v5 = vld [vmem:[#allocation2 + $0x1e8] sm:$0xf0] }
 0x5bb   : > { %10510 = vst [vmem:[#allocation37_spill] sm:$0xff] %v9714_v36 }
 0x5bc   : > { %3800 = vmatmul.bf16.gmra.mxu0 %v9696_v28  ;;  %3969 = vmatmul.bf16.gmra.mxu1 %v9698_v7  ;;  %10509 = vst [vmem:[#allocation33_spill] sm:$0xff] %v9712_v13 }
 0x5bd   : > { %4441 = vmax.xlane.f32.xlu1 %v4440_v50 }
 0x5bf   : > { %v4096_v19 = vpop.f32.mrf.mxu2  ;;  %v4265_v15 = vpop.f32.mrf.mxu3 }
 0x5c0   : > { %v4266_v18 = vadd.f32 %v4265_v15, %v4096_v19 }
 0x5c1   : > { %v3763_v10 = vpop.f32.mrf.mxu0  ;;  %v3932_v44 = vpop.f32.mrf.mxu1 }
 0x5c2   : > { %v4443_v47 = vmax.f32 %v3928_v63, %v4266_v18  ;;  %v3933_v48 = vadd.f32 %v3932_v44, %v3763_v10 }
 0x5c4   : > { %4138 = vmatmul.bf16.gmra.mxu2 %v9696_v28  ;;  %4307 = vmatmul.bf16.gmra.mxu3 %v9698_v7 }
 0x5c5   : > { %4444 = vmax.xlane.f32.xlu2 %v4443_v47 }
 0x5c7   : > { %v4099_v35 = vpop.f32.mrf.mxu2  ;;  %v4268_v49 = vpop.f32.mrf.mxu3 }
 0x5c8   : > { %v4269_v31 = vadd.f32 %v4268_v49, %v4099_v35  ;;  %v6373_v35 = vld [vmem:[#allocation2 + $0x1d4] sm:$0xf0]  ;;  %v6034_v49 = vld [vmem:[#allocation2 + $0x1d8] sm:$0xf0] }
 0x5c9   : > { %v3766_v17 = vpop.f32.mrf.mxu0  ;;  %v3935_v34 = vpop.f32.mrf.mxu1 }
 0x5ca   : > { %v4446_v14 = vmax.f32 %v3931_v26, %v4269_v31  ;;  %v3936_v32 = vadd.f32 %v3935_v34, %v3766_v17  ;;  %v6032_v17 = vld [vmem:[#allocation2 + $0x1d0] sm:$0xf]  ;;  %v6372_v34 = vld [vmem:[#allocation2 + $0x1d4] sm:$0xf] }
 0x5cb   : > { %v9720_v39 = vor.u32 %v6373_v35, %v6032_v17  ;;  %v6048_v35 = vld [vmem:[#allocation2 + $0x1f0] sm:$0xf] }
 0x5cc   : > { %3805 = vmatmul.bf16.gmra.mxu0 %v9704_v21  ;;  %3974 = vmatmul.bf16.gmra.mxu1 %v9706_v51 }
 0x5cd   : > { %4447 = vmax.xlane.f32.xlu0 %v4446_v14  ;;  %10511 = vst [vmem:[#allocation38_spill] sm:$0xff] %v9720_v39  ;;  %v9722_v14 = vor.u32 %v6372_v34, %v6034_v49 }
 0x5cf   : > { %v4101_v58 = vpop.f32.mrf.mxu2  ;;  %v4270_v3 = vpop.f32.mrf.mxu3  ;;  %10512 = vst [vmem:[#allocation41_spill] sm:$0xff] %v9722_v14 }
 0x5d0   : > { %v4271_v4 = vadd.f32 %v4270_v3, %v4101_v58 }
 0x5d1   : > { %v3768_v2 = vpop.f32.mrf.mxu0  ;;  %v3937_v43 = vpop.f32.mrf.mxu1 }
 0x5d2   : > { %v4449_v6 = vmax.f32 %v3933_v48, %v4271_v4  ;;  %v3938_v19 = vadd.f32 %v3937_v43, %v3768_v2 }
 0x5d4   : > { %4143 = vmatmul.bf16.gmra.mxu2 %v9704_v21  ;;  %4312 = vmatmul.bf16.gmra.mxu3 %v9706_v51 }
 0x5d5   : > { %4450 = vmax.xlane.f32.xlu1 %v4449_v6 }
 0x5d7   : > { %v4104_v33 = vpop.f32.mrf.mxu2  ;;  %v4273_v24 = vpop.f32.mrf.mxu3 }
 0x5d8   : > { %v4274_v45 = vadd.f32 %v4273_v24, %v4104_v33  ;;  %v6375_v24 = vld [vmem:[#allocation2 + $0x1e4] sm:$0xf0] }
 0x5d9   : > { %v3771_v8 = vpop.f32.mrf.mxu0  ;;  %v3940_v42 = vpop.f32.mrf.mxu1 }
 0x5da   : > { %v4452_v41 = vmax.f32 %v3936_v32, %v4274_v45  ;;  %v3941_v20 = vadd.f32 %v3940_v42, %v3771_v8  ;;  %v6040_v8 = vld [vmem:[#allocation2 + $0x1e0] sm:$0xf]  ;;  %v6374_v42 = vld [vmem:[#allocation2 + $0x1e4] sm:$0xf] }
 0x5dc   : > { %3810 = vmatmul.bf16.gmra.mxu0 %v9712_v13  ;;  %3979 = vmatmul.bf16.gmra.mxu1 %v9714_v36 }
 0x5dd   : > { %4453 = vmax.xlane.f32.xlu2 %v4452_v41 }
 0x5df   : > { %v4106_v0 = vpop.f32.mrf.mxu2  ;;  %v4275_v50 = vpop.f32.mrf.mxu3 }
 0x5e0   : > { %v4276_v15 = vadd.f32 %v4275_v50, %v4106_v0  ;;  %v9728_v0 = vor.u32 %v6375_v24, %v6040_v8  ;;  %v9730_v50 = vor.u32 %v6374_v42, %v6042_v5 }
 0x5e1   : > { %v3773_v63 = vpop.f32.mrf.mxu0  ;;  %v3942_v18 = vpop.f32.mrf.mxu1 }
 0x5e2   : > { %v4455_v10 = vmax.f32 %v3938_v19, %v4276_v15  ;;  %v3943_v48 = vadd.f32 %v3942_v18, %v3773_v63  ;;  %10513 = vst [vmem:[#allocation42_spill] sm:$0xff] %v9728_v0 }
 0x5e3   : > { %10514 = vst [vmem:[#allocation43_spill] sm:$0xff] %v9730_v50 }
 0x5e4   : > { %4148 = vmatmul.bf16.gmra.mxu2 %v9712_v13  ;;  %4317 = vmatmul.bf16.gmra.mxu3 %v9714_v36 }
 0x5e5   : > { %4456 = vmax.xlane.f32.xlu0 %v4455_v10 }
 0x5e7   : > { %v4109_v44 = vpop.f32.mrf.mxu2  ;;  %v4278_v47 = vpop.f32.mrf.mxu3 }
 0x5e8   : > { %v4279_v55 = vadd.f32 %v4278_v47, %v4109_v44 }
 0x5e9   : > { %v3776_v26 = vpop.f32.mrf.mxu0  ;;  %v3945_v31 = vpop.f32.mrf.mxu1 }
 0x5ea   : > { %v4458_v27 = vmax.f32 %v3941_v20, %v4279_v55  ;;  %v3946_v54 = vadd.f32 %v3945_v31, %v3776_v26  ;;  %v6377_v55 = vld [vmem:[#allocation2 + $0x1f4] sm:$0xf0]  ;;  %v6376_v26 = vld [vmem:[#allocation2 + $0x1f4] sm:$0xf]  ;;  %v6050_v31 = vld [vmem:[#allocation2 + $0x1f8] sm:$0xf0] }
 0x5ec   : > { %3815 = vmatmul.bf16.gmra.mxu0 %v9720_v39  ;;  %3984 = vmatmul.bf16.gmra.mxu1 %v9722_v14 }
 0x5ed   : > { %4459 = vmax.xlane.f32.xlu1 %v4458_v27 }
 0x5ef   : > { %v4111_v58 = vpop.f32.mrf.mxu2  ;;  %v4280_v3 = vpop.f32.mrf.mxu3 }
 0x5f0   : > { %v4281_v4 = vadd.f32 %v4280_v3, %v4111_v58 }
 0x5f1   : > { %v3778_v2 = vpop.f32.mrf.mxu0  ;;  %v3947_v43 = vpop.f32.mrf.mxu1 }
 0x5f2   : > { %v4461_v6 = vmax.f32 %v3943_v48, %v4281_v4  ;;  %v3948_v63 = vadd.f32 %v3947_v43, %v3778_v2  ;;  %v9736_v48 = vor.u32 %v6377_v55, %v6048_v35  ;;  %v9738_v4 = vor.u32 %v6376_v26, %v6050_v31 }
 0x5f4   : > { %4153 = vmatmul.bf16.gmra.mxu2 %v9720_v39  ;;  %4322 = vmatmul.bf16.gmra.mxu3 %v9722_v14  ;;  %10515 = vst [vmem:[#allocation44_spill] sm:$0xff] %v9736_v48 }
 0x5f5   : > { %4462 = vmax.xlane.f32.xlu2 %v4461_v6  ;;  %10516 = vst [vmem:[#allocation45_spill] sm:$0xff] %v9738_v4 }
 0x5f7   : > { %v4114_v53 = vpop.f32.mrf.mxu2  ;;  %v4283_v33 = vpop.f32.mrf.mxu3 }
 0x5f8   : > { %v4284_v12 = vadd.f32 %v4283_v33, %v4114_v53 }
 0x5f9   : > { %v3781_v32 = vpop.f32.mrf.mxu0  ;;  %v3950_v45 = vpop.f32.mrf.mxu1 }
 0x5fa   : > { %v4464_v41 = vmax.f32 %v3946_v54, %v4284_v12  ;;  %v3951_v17 = vadd.f32 %v3950_v45, %v3781_v32 }
 0x5fc   : > { %3820 = vmatmul.bf16.gmra.mxu0 %v9728_v0  ;;  %3989 = vmatmul.bf16.gmra.mxu1 %v9730_v50 }
 0x5fd   : > { %4465 = vmax.xlane.f32.xlu0 %v4464_v41 }
 0x5ff   : > { %v4116_v19 = vpop.f32.mrf.mxu2  ;;  %v4285_v15 = vpop.f32.mrf.mxu3 }
 0x600   : > { %v4286_v18 = vadd.f32 %v4285_v15, %v4116_v19  ;;  %v10517_v19 = vld [vmem:[#allocation4_spill] sm:$0xff]  ;;  %v10518_v15 = vld [vmem:[#allocation5_spill] sm:$0xff] }
 0x601   : > { %v3783_v10 = vpop.f32.mrf.mxu0  ;;  %v3952_v44 = vpop.f32.mrf.mxu1 }
 0x602   : > { %v4467_v47 = vmax.f32 %v3948_v63, %v4286_v18  ;;  %v3953_v6 = vadd.f32 %v3952_v44, %v3783_v10 }
 0x604   : > { %4158 = vmatmul.bf16.gmra.mxu2 %v9728_v0  ;;  %4327 = vmatmul.bf16.gmra.mxu3 %v9730_v50 }
 0x605   : > { %4468 = vmax.xlane.f32.xlu1 %v4467_v47 }
 0x607   : > { %v4119_v49 = vpop.f32.mrf.mxu2  ;;  %v4288_v20 = vpop.f32.mrf.mxu3 }
 0x608   : > { %v4289_v34 = vadd.f32 %v4288_v20, %v4119_v49 }
 0x609   : > { %v3786_v27 = vpop.f32.mrf.mxu0  ;;  %v3955_v58 = vpop.f32.mrf.mxu1 }
 0x60a   : > { %v4470_v3 = vmax.f32 %v3951_v17, %v4289_v34  ;;  %v3956_v32 = vadd.f32 %v3955_v58, %v3786_v27  ;;  %v10519_v58 = vld [vmem:[#allocation6_spill] sm:$0xff] }
 0x60c   : > { %3825 = vmatmul.bf16.gmra.mxu0 %v9736_v48  ;;  %3994 = vmatmul.bf16.gmra.mxu1 %v9738_v4 }
 0x60d   : > { %4471 = vmax.xlane.f32.xlu2 %v4470_v3  ;;  %v10520_v3 = vld [vmem:[#allocation7_spill] sm:$0xff] }
 0x60f   : > { %v4121_v2 = vpop.f32.mrf.mxu2  ;;  %v4290_v43 = vpop.f32.mrf.mxu3 }
 0x610   : > { %v4291_v53 = vadd.f32 %v4290_v43, %v4121_v2 }
 0x611   : > { %v3788_v33 = vpop.f32.mrf.mxu0  ;;  %v3957_v24 = vpop.f32.mrf.mxu1 }
 0x612   : > { %v4473_v5 = vmax.f32 %v3953_v6, %v4291_v53  ;;  %v3958_v10 = vadd.f32 %v3957_v24, %v3788_v33 }
 0x614   : > { %4163 = vmatmul.bf16.gmra.mxu2 %v9736_v48  ;;  %4332 = vmatmul.bf16.gmra.mxu3 %v9738_v4 }
 0x615   : > { %4474 = vmax.xlane.f32.xlu0 %v4473_v5 }
 0x617   : > { %v4124_v54 = vpop.f32.mrf.mxu2  ;;  %v4293_v12 = vpop.f32.mrf.mxu3 }
 0x618   : > { %v4294_v45 = vadd.f32 %v4293_v12, %v4124_v54 }
 0x619   : > { %v3791_v8 = vpop.f32.mrf.mxu0  ;;  %v3960_v42 = vpop.f32.mrf.mxu1 }
 0x61a   : > { %v4476_v41 = vmax.f32 %v3956_v32, %v4294_v45  ;;  %v3961_v26 = vadd.f32 %v3960_v42, %v3791_v8 }
 0x61c   : > { %4730 = vmatmul.bf16.vlgmr.msra.gmra.mxu0 %v10517_v19  ;;  %4899 = vmatmul.bf16.vlgmr.msra.gmra.mxu1 %v10518_v15 }
 0x61d   : > { %4477 = vmax.xlane.f32.xlu1 %v4476_v41 }
 0x61f   : > { %v4126_v63 = vpop.f32.mrf.mxu2  ;;  %v4295_v18 = vpop.f32.mrf.mxu3 }
 0x620   : > { %v4296_v44 = vadd.f32 %v4295_v18, %v4126_v63 }
 0x621   : > { %v3793_v47 = vpop.f32.mrf.mxu0  ;;  %v3962_v35 = vpop.f32.mrf.mxu1 }
 0x622   : > { %v4479_v49 = vmax.f32 %v3958_v10, %v4296_v44  ;;  %v3963_v6 = vadd.f32 %v3962_v35, %v3793_v47 }
 0x624   : > { %5068 = vmatmul.bf16.vlgmr.msra.gmra.mxu2 %v10517_v19  ;;  %5237 = vmatmul.bf16.vlgmr.msra.gmra.mxu3 %v10518_v15  ;;  %v10521_v19 = vld [vmem:[#allocation8_spill] sm:$0xff]  ;;  %v10522_v15 = vld [vmem:[#allocation9_spill] sm:$0xff] }
 0x625   : > { %4480 = vmax.xlane.f32.xlu2 %v4479_v49 }
 0x627   : > { %v4129_v20 = vpop.f32.mrf.mxu2  ;;  %v4298_v55 = vpop.f32.mrf.mxu3 }
 0x628   : > { %v4299_v31 = vadd.f32 %v4298_v55, %v4129_v20 }
 0x629   : > { %v3796_v17 = vpop.f32.mrf.mxu0  ;;  %v3965_v34 = vpop.f32.mrf.mxu1 }
 0x62a   : > { %v4482_v27 = vmax.f32 %v3961_v26, %v4299_v31  ;;  %v3966_v32 = vadd.f32 %v3965_v34, %v3796_v17 }
 0x62c   : > { %4735 = vmatmul.bf16.gmra.mxu0 %v10519_v58  ;;  %4904 = vmatmul.bf16.gmra.mxu1 %v10520_v3 }
 0x62d   : > { %4483 = vmax.xlane.f32.xlu0 %v4482_v27 }
 0x62f   : > { %v4131_v2 = vpop.f32.mrf.mxu2  ;;  %v4300_v43 = vpop.f32.mrf.mxu3 }
 0x630   : > { %v4301_v53 = vadd.f32 %v4300_v43, %v4131_v2 }
 0x631   : > { %v3798_v33 = vpop.f32.mrf.mxu0  ;;  %v3967_v24 = vpop.f32.mrf.mxu1 }
 0x632   : > { %v4485_v5 = vmax.f32 %v3963_v6, %v4301_v53  ;;  %v3968_v10 = vadd.f32 %v3967_v24, %v3798_v33 }
 0x634   : > { %5073 = vmatmul.bf16.gmra.mxu2 %v10519_v58  ;;  %5242 = vmatmul.bf16.gmra.mxu3 %v10520_v3  ;;  %v10523_v58 = vld [vmem:[#allocation10_spill] sm:$0xff]  ;;  %v10524_v3 = vld [vmem:[#allocation11_spill] sm:$0xff] }
 0x635   : > { %4486 = vmax.xlane.f32.xlu1 %v4485_v5 }
 0x637   : > { %v4134_v54 = vpop.f32.mrf.mxu2  ;;  %v4303_v12 = vpop.f32.mrf.mxu3 }
 0x638   : > { %v4304_v45 = vadd.f32 %v4303_v12, %v4134_v54 }
 0x639   : > { %v3801_v8 = vpop.f32.mrf.mxu0  ;;  %v3970_v42 = vpop.f32.mrf.mxu1 }
 0x63a   : > { %v4488_v41 = vmax.f32 %v3966_v32, %v4304_v45  ;;  %v3971_v26 = vadd.f32 %v3970_v42, %v3801_v8 }
 0x63c   : > { %4740 = vmatmul.bf16.gmra.mxu0 %v10521_v19  ;;  %4909 = vmatmul.bf16.gmra.mxu1 %v10522_v15 }
 0x63d   : > { %4489 = vmax.xlane.f32.xlu2 %v4488_v41 }
 0x63f   : > { %v4136_v63 = vpop.f32.mrf.mxu2  ;;  %v4305_v18 = vpop.f32.mrf.mxu3 }
 0x640   : > { %v4306_v44 = vadd.f32 %v4305_v18, %v4136_v63 }
 0x641   : > { %v3803_v47 = vpop.f32.mrf.mxu0  ;;  %v3972_v35 = vpop.f32.mrf.mxu1 }
 0x642   : > { %v4491_v49 = vmax.f32 %v3968_v10, %v4306_v44  ;;  %v3973_v6 = vadd.f32 %v3972_v35, %v3803_v47 }
 0x644   : > { %5078 = vmatmul.bf16.gmra.mxu2 %v10521_v19  ;;  %5247 = vmatmul.bf16.gmra.mxu3 %v10522_v15  ;;  %v10525_v19 = vld [vmem:[#allocation12_spill] sm:$0xff]  ;;  %v10526_v15 = vld [vmem:[#allocation13_spill] sm:$0xff] }
 0x645   : > { %4492 = vmax.xlane.f32.xlu0 %v4491_v49 }
 0x647   : > { %v4139_v20 = vpop.f32.mrf.mxu2  ;;  %v4308_v55 = vpop.f32.mrf.mxu3 }
 0x648   : > { %v4309_v31 = vadd.f32 %v4308_v55, %v4139_v20 }
 0x649   : > { %v3806_v17 = vpop.f32.mrf.mxu0  ;;  %v3975_v34 = vpop.f32.mrf.mxu1 }
 0x64a   : > { %v4494_v27 = vmax.f32 %v3971_v26, %v4309_v31  ;;  %v3976_v32 = vadd.f32 %v3975_v34, %v3806_v17 }
 0x64c   : > { %4745 = vmatmul.bf16.gmra.mxu0 %v10523_v58  ;;  %4914 = vmatmul.bf16.gmra.mxu1 %v10524_v3 }
 0x64d   : > { %4495 = vmax.xlane.f32.xlu1 %v4494_v27  ;;  %v9764_v27 = vpop.xlane.xlu2 %4342 }
 0x64f   : > { %v4141_v2 = vpop.f32.mrf.mxu2  ;;  %v4310_v43 = vpop.f32.mrf.mxu3 }
 0x650   : > { %v4311_v53 = vadd.f32 %v4310_v43, %v4141_v2  ;;  %v10527_v2 = vld [vmem:[#allocation14_spill] sm:$0xff]  ;;  %v10528_v43 = vld [vmem:[#allocation15_spill] sm:$0xff] }
 0x651   : > { %v3808_v33 = vpop.f32.mrf.mxu0  ;;  %v3977_v24 = vpop.f32.mrf.mxu1 }
 0x652   : > { %v4497_v5 = vmax.f32 %v3973_v6, %v4311_v53  ;;  %v3978_v10 = vadd.f32 %v3977_v24, %v3808_v33 }
 0x654   : > { %5083 = vmatmul.bf16.gmra.mxu2 %v10523_v58  ;;  %5252 = vmatmul.bf16.gmra.mxu3 %v10524_v3  ;;  %v9766_v3 = vpop.xlane.xlu1 %4339 }
 0x655   : > { %4498 = vmax.xlane.f32.xlu2 %v4497_v5 }
 0x657   : > { %v4144_v54 = vpop.f32.mrf.mxu2  ;;  %v4313_v12 = vpop.f32.mrf.mxu3 }
 0x658   : > { %v4314_v45 = vadd.f32 %v4313_v12, %v4144_v54 }
 0x659   : > { %v3811_v8 = vpop.f32.mrf.mxu0  ;;  %v3980_v42 = vpop.f32.mrf.mxu1 }
 0x65a   : > { %v4500_v41 = vmax.f32 %v3976_v32, %v4314_v45  ;;  %v3981_v26 = vadd.f32 %v3980_v42, %v3811_v8  ;;  %v9770_v32 = vpop.xlane.xlu2 %4348 }
 0x65c   : > { %4750 = vmatmul.bf16.gmra.mxu0 %v10525_v19  ;;  %4919 = vmatmul.bf16.gmra.mxu1 %v10526_v15  ;;  %v9774_v45 = vpop.xlane.xlu1 %4351 }
 0x65d   : > { %4501 = vmax.xlane.f32.xlu0 %v4500_v41 }
 0x65f   : > { %v4146_v63 = vpop.f32.mrf.mxu2  ;;  %v4315_v18 = vpop.f32.mrf.mxu3 }
 0x660   : > { %v4316_v44 = vadd.f32 %v4315_v18, %v4146_v63 }
 0x661   : > { %v3813_v47 = vpop.f32.mrf.mxu0  ;;  %v3982_v35 = vpop.f32.mrf.mxu1 }
 0x662   : > { %v4503_v49 = vmax.f32 %v3978_v10, %v4316_v44  ;;  %v3983_v33 = vadd.f32 %v3982_v35, %v3813_v47  ;;  %v9776_v10 = vpop.xlane.xlu0 %4345  ;;  %v10529_v44 = vld [vmem:[#allocation16_spill] sm:$0xff]  ;;  %v10530_v47 = vld [vmem:[#allocation17_spill] sm:$0xff]  ;;  %v9780_v35 = vpop.xlane.xlu2 %4354 }
 0x664   : > { %5088 = vmatmul.bf16.gmra.mxu2 %v10525_v19  ;;  %5257 = vmatmul.bf16.gmra.mxu3 %v10526_v15 }
 0x665   : > { %4504 = vmax.xlane.f32.xlu1 %v4503_v49 }
 0x667   : > { %v4149_v20 = vpop.f32.mrf.mxu2  ;;  %v4318_v55 = vpop.f32.mrf.mxu3 }
 0x668   : > { %v4319_v31 = vadd.f32 %v4318_v55, %v4149_v20  ;;  %v9782_v55 = vpop.xlane.xlu1 %4360 }
 0x669   : > { %v3816_v17 = vpop.f32.mrf.mxu0  ;;  %v3985_v34 = vpop.f32.mrf.mxu1 }
 0x66a   : > { %v4506_v58 = vmax.f32 %v3981_v26, %v4319_v31  ;;  %v3986_v41 = vadd.f32 %v3985_v34, %v3816_v17 }
 0x66c   : > { %4755 = vmatmul.bf16.gmra.mxu0 %v10527_v2  ;;  %4924 = vmatmul.bf16.gmra.mxu1 %v10528_v43 }
 0x66d   : > { %4507 = vmax.xlane.f32.xlu2 %v4506_v58 }
 0x66f   : > { %v4151_v6 = vpop.f32.mrf.mxu2  ;;  %v4320_v53 = vpop.f32.mrf.mxu3 }
 0x670   : > { %v4321_v24 = vadd.f32 %v4320_v53, %v4151_v6  ;;  %v9788_v53 = vpop.xlane.xlu2 %4363 }
 0x671   : > { %v3818_v5 = vpop.f32.mrf.mxu0  ;;  %v3987_v54 = vpop.f32.mrf.mxu1 }
 0x672   : > { %v4509_v12 = vmax.f32 %v3983_v33, %v4321_v24  ;;  %v3988_v26 = vadd.f32 %v3987_v54, %v3818_v5  ;;  %v9790_v5 = vpop.xlane.xlu1 %4369 }
 0x674   : > { %5093 = vmatmul.bf16.gmra.mxu2 %v10527_v2  ;;  %5262 = vmatmul.bf16.gmra.mxu3 %v10528_v43  ;;  %v9786_v2 = vpop.xlane.xlu0 %4357 }
 0x675   : > { %4510 = vmax.xlane.f32.xlu0 %v4509_v12 }
 0x677   : > { %v4154_v8 = vpop.f32.mrf.mxu2  ;;  %v4323_v42 = vpop.f32.mrf.mxu3 }
 0x678   : > { %v4324_v19 = vadd.f32 %v4323_v42, %v4154_v8  ;;  %v10531_v42 = vld [vmem:[#allocation18_spill] sm:$0xff] }
 0x679   : > { %v3821_v15 = vpop.f32.mrf.mxu0  ;;  %v3990_v63 = vpop.f32.mrf.mxu1 }
 0x67a   : > { %v4512_v18 = vmax.f32 %v3986_v41, %v4324_v19  ;;  %v3991_v33 = vadd.f32 %v3990_v63, %v3821_v15  ;;  %v10532_v41 = vld [vmem:[#allocation19_spill] sm:$0xff]  ;;  %v9796_v15 = vpop.xlane.xlu2 %4372 }
 0x67c   : > { %4760 = vmatmul.bf16.gmra.mxu0 %v10529_v44  ;;  %4929 = vmatmul.bf16.gmra.mxu1 %v10530_v47 }
 0x67d   : > { %4513 = vmax.xlane.f32.xlu1 %v4512_v18 }
 0x67f   : > { %v4156_v49 = vpop.f32.mrf.mxu2  ;;  %v4325_v20 = vpop.f32.mrf.mxu3 }
 0x680   : > { %v4326_v31 = vadd.f32 %v4325_v20, %v4156_v49 }
 0x681   : > { %v3823_v17 = vpop.f32.mrf.mxu0  ;;  %v3992_v34 = vpop.f32.mrf.mxu1 }
 0x682   : > { %v4515_v58 = vmax.f32 %v3988_v26, %v4326_v31  ;;  %v9798_v31 = vpop.xlane.xlu1 %4378 }
 0x684   : > { %5098 = vmatmul.bf16.gmra.mxu2 %v10529_v44  ;;  %5267 = vmatmul.bf16.gmra.mxu3 %v10530_v47  ;;  %v9794_v44 = vpop.xlane.xlu0 %4366  ;;  %v3993_v47 = vadd.f32 %v3992_v34, %v3823_v17 }
 0x685   : > { %4516 = vmax.xlane.f32.xlu2 %v4515_v58 }
 0x687   : > { %v4159_v43 = vpop.f32.mrf.mxu2  ;;  %v4328_v6 = vpop.f32.mrf.mxu3 }
 0x688   : > { %v4329_v24 = vadd.f32 %v4328_v6, %v4159_v43 }
 0x689   : > { %v3826_v12 = vpop.f32.mrf.mxu0  ;;  %v3995_v8 = vpop.f32.mrf.mxu1 }
 0x68a   : > { %v4518_v54 = vmax.f32 %v3991_v33, %v4329_v24  ;;  %v3996_v6 = vadd.f32 %v3995_v8, %v3826_v12 }
 0x68c   : > { %4765 = vmatmul.bf16.gmra.mxu0 %v10531_v42  ;;  %4934 = vmatmul.bf16.gmra.mxu1 %v10532_v41  ;;  %v9802_v17 = vpop.xlane.xlu0 %4375 }
 0x68d   : > { %4519 = vmax.xlane.f32.xlu0 %v4518_v54 }
 0x68f   : > { %v4161_v19 = vpop.f32.mrf.mxu2  ;;  %v4330_v18 = vpop.f32.mrf.mxu3 }
 0x690   : > { %v4331_v49 = vadd.f32 %v4330_v18, %v4161_v19  ;;  %v9804_v19 = vpop.xlane.xlu2 %4381  ;;  %v10533_v18 = vld [vmem:[#allocation20_spill] sm:$0xff] }
 0x691   : > { %v3828_v20 = vpop.f32.mrf.mxu0  ;;  %v3997_v26 = vpop.f32.mrf.mxu1 }
 0x692   : > { %v4521_v63 = vmax.f32 %v3993_v47, %v4331_v49  ;;  %v10534_v47 = vld [vmem:[#allocation21_spill] sm:$0xff] }
 0x694   : > { %5103 = vmatmul.bf16.gmra.mxu2 %v10531_v42  ;;  %5272 = vmatmul.bf16.gmra.mxu3 %v10532_v41  ;;  %v9808_v42 = vpop.xlane.xlu1 %4387 }
 0x695   : > { %4522 = vmax.xlane.f32.xlu1 %v4521_v63  ;;  %v3998_v63 = vadd.f32 %v3997_v26, %v3828_v20 }
 0x697   : > { %v4164_v58 = vpop.f32.mrf.mxu2  ;;  %v4333_v43 = vpop.f32.mrf.mxu3 }
 0x698   : > { %v4334_v33 = vadd.f32 %v4333_v43, %v4164_v58  ;;  %v9810_v43 = vpop.xlane.xlu0 %4384 }
 0x699   : > { %v4731_v24 = vpop.f32.mrf.mxu0  ;;  %v4900_v54 = vpop.f32.mrf.mxu1 }
 0x69a   : > { %v4524_v34 = vmax.f32 %v3996_v6, %v4334_v33  ;;  %v9814_v6 = vpop.xlane.xlu2 %4390  ;;  %v4901_v50 = vadd.f32 %v4900_v54, %v4731_v24 }
 0x69c   : > { %4770 = vmatmul.bf16.gmra.mxu0 %v10533_v18  ;;  %4939 = vmatmul.bf16.gmra.mxu1 %v10534_v47  ;;  %v9816_v48 = vpop.xlane.xlu1 %4396 }
 0x69d   : > { %4525 = vmax.xlane.f32.xlu2 %v4524_v34 }
 0x69f   : > { %v4166_v41 = vpop.f32.mrf.mxu2  ;;  %v4335_v49 = vpop.f32.mrf.mxu3 }
 0x6a0   : > { %v4336_v4 = vadd.f32 %v4335_v49, %v4166_v41  ;;  %v10535_v49 = vld [vmem:[#allocation22_spill] sm:$0xff] }
 0x6a1   : > { %v4733_v12 = vpop.f32.mrf.mxu0  ;;  %v4902_v8 = vpop.f32.mrf.mxu1 }
 0x6a2   : > { %v4527_v58 = vmax.f32 %v3998_v63, %v4336_v4  ;;  %v10536_v4 = vld [vmem:[#allocation23_spill] sm:$0xff]  ;;  %v4903_v39 = vadd.f32 %v4902_v8, %v4733_v12 }
 0x6a4   : > { %5108 = vmatmul.bf16.gmra.mxu2 %v10533_v18  ;;  %5277 = vmatmul.bf16.gmra.mxu3 %v10534_v47  ;;  %v9820_v18 = vpop.xlane.xlu0 %4393  ;;  %v9824_v14 = vpop.xlane.xlu1 %4405 }
 0x6a5   : > { %4528 = vmax.xlane.f32.xlu0 %v4527_v58  ;;  %v9822_v58 = vpop.xlane.xlu2 %4399  ;;  %10537 = vst [vmem:[#allocation4_spill] sm:$0xff] %v9824_v14 }
 0x6a7   : > { %v5069_v33 = vpop.f32.mrf.mxu2  ;;  %v5238_v34 = vpop.f32.mrf.mxu3 }
 0x6a8   : > { %v5239_v0 = vadd.f32 %v5238_v34, %v5069_v33 }
 0x6a9   : > { %v4736_v20 = vpop.f32.mrf.mxu0  ;;  %v4905_v26 = vpop.f32.mrf.mxu1 }
 0x6aa   : > { %v5398_v41 = vmax.f32 %v4901_v50, %v5239_v0  ;;  %v4906_v51 = vadd.f32 %v4905_v26, %v4736_v20 }
 0x6ac   : > { %4775 = vmatmul.bf16.gmra.mxu0 %v10535_v49  ;;  %4944 = vmatmul.bf16.gmra.mxu1 %v10536_v4  ;;  %v9828_v0 = vpop.xlane.xlu0 %4402  ;;  %v9832_v13 = vpop.xlane.xlu1 %4414 }
 0x6ad   : > { %5399 = vmax.xlane.f32.xlu1 %v5398_v41  ;;  %v9830_v41 = vpop.xlane.xlu2 %4408  ;;  %10539 = vst [vmem:[#allocation6_spill] sm:$0xff] %v9832_v13 }
 0x6ae   : > { %10538 = vst [vmem:[#allocation5_spill] sm:$0xff] %v9830_v41 }
 0x6af   : > { %v5071_v47 = vpop.f32.mrf.mxu2  ;;  %v5240_v63 = vpop.f32.mrf.mxu3 }
 0x6b0   : > { %v5241_v36 = vadd.f32 %v5240_v63, %v5071_v47  ;;  %v10540_v63 = vld [vmem:[#allocation24_spill] sm:$0xff] }
 0x6b1   : > { %v4738_v24 = vpop.f32.mrf.mxu0  ;;  %v4907_v54 = vpop.f32.mrf.mxu1 }
 0x6b2   : > { %v5401_v33 = vmax.f32 %v4903_v39, %v5241_v36  ;;  %v10541_v36 = vld [vmem:[#allocation25_spill] sm:$0xff]  ;;  %v4908_v41 = vadd.f32 %v4907_v54, %v4738_v24 }
 0x6b4   : > { %5113 = vmatmul.bf16.gmra.mxu2 %v10535_v49  ;;  %5282 = vmatmul.bf16.gmra.mxu3 %v10536_v4  ;;  %v9836_v39 = vpop.xlane.xlu0 %4411  ;;  %v9840_v21 = vpop.xlane.xlu1 %4423 }
 0x6b5   : > { %5402 = vmax.xlane.f32.xlu2 %v5401_v33  ;;  %10542 = vst [vmem:[#allocation7_spill] sm:$0xff] %v9836_v39  ;;  %v9838_v33 = vpop.xlane.xlu2 %4417 }
 0x6b6   : > { %10543 = vst [vmem:[#allocation8_spill] sm:$0xff] %v9838_v33 }
 0x6b7   : > { %v5074_v50 = vpop.f32.mrf.mxu2  ;;  %v5243_v34 = vpop.f32.mrf.mxu3  ;;  %10544 = vst [vmem:[#allocation9_spill] sm:$0xff] %v9840_v21 }
 0x6b8   : > { %v5244_v14 = vadd.f32 %v5243_v34, %v5074_v50 }
 0x6b9   : > { %v4741_v12 = vpop.f32.mrf.mxu0  ;;  %v4910_v8 = vpop.f32.mrf.mxu1 }
 0x6ba   : > { %v5404_v47 = vmax.f32 %v4906_v51, %v5244_v14  ;;  %v4911_v33 = vadd.f32 %v4910_v8, %v4741_v12 }
 0x6bc   : > { %4780 = vmatmul.bf16.gmra.mxu0 %v10540_v63  ;;  %4949 = vmatmul.bf16.gmra.mxu1 %v10541_v36  ;;  %v9844_v51 = vpop.xlane.xlu0 %4420  ;;  %v9848_v39 = vpop.xlane.xlu1 %4432 }
 0x6bd   : > { %5405 = vmax.xlane.f32.xlu0 %v5404_v47  ;;  %10545 = vst [vmem:[#allocation10_spill] sm:$0xff] %v9844_v51  ;;  %v9846_v47 = vpop.xlane.xlu2 %4426 }
 0x6be   : > { %10546 = vst [vmem:[#allocation11_spill] sm:$0xff] %v9846_v47 }
 0x6bf   : > { %v5076_v49 = vpop.f32.mrf.mxu2  ;;  %v5245_v4 = vpop.f32.mrf.mxu3  ;;  %10547 = vst [vmem:[#allocation12_spill] sm:$0xff] %v9848_v39 }
 0x6c0   : > { %v5246_v13 = vadd.f32 %v5245_v4, %v5076_v49  ;;  %v10548_v4 = vld [vmem:[#allocation26_spill] sm:$0xff] }
 0x6c1   : > { %v4743_v20 = vpop.f32.mrf.mxu0  ;;  %v4912_v26 = vpop.f32.mrf.mxu1 }
 0x6c2   : > { %v5407_v50 = vmax.f32 %v4908_v41, %v5246_v13  ;;  %v10549_v13 = vld [vmem:[#allocation27_spill] sm:$0xff]  ;;  %v4913_v47 = vadd.f32 %v4912_v26, %v4743_v20 }
 0x6c4   : > { %5118 = vmatmul.bf16.gmra.mxu2 %v10540_v63  ;;  %5287 = vmatmul.bf16.gmra.mxu3 %v10541_v36  ;;  %v9852_v41 = vpop.xlane.xlu0 %4429  ;;  %v9856_v51 = vpop.xlane.xlu1 %4441 }
 0x6c5   : > { %5408 = vmax.xlane.f32.xlu1 %v5407_v50  ;;  %10550 = vst [vmem:[#allocation13_spill] sm:$0xff] %v9852_v41  ;;  %v9854_v50 = vpop.xlane.xlu2 %4435 }
 0x6c6   : > { %10551 = vst [vmem:[#allocation14_spill] sm:$0xff] %v9854_v50 }
 0x6c7   : > { %v5079_v14 = vpop.f32.mrf.mxu2  ;;  %v5248_v34 = vpop.f32.mrf.mxu3  ;;  %10552 = vst [vmem:[#allocation15_spill] sm:$0xff] %v9856_v51 }
 0x6c8   : > { %v5249_v21 = vadd.f32 %v5248_v34, %v5079_v14 }
 0x6c9   : > { %v4746_v24 = vpop.f32.mrf.mxu0  ;;  %v4915_v54 = vpop.f32.mrf.mxu1 }
 0x6ca   : > { %v5410_v49 = vmax.f32 %v4911_v33, %v5249_v21  ;;  %v4916_v50 = vadd.f32 %v4915_v54, %v4746_v24 }
 0x6cc   : > { %4785 = vmatmul.bf16.gmra.mxu0 %v10548_v4  ;;  %4954 = vmatmul.bf16.gmra.mxu1 %v10549_v13  ;;  %v9860_v21 = vpop.xlane.xlu0 %4438  ;;  %v9864_v41 = vpop.xlane.xlu1 %4450 }
 0x6cd   : > { %5411 = vmax.xlane.f32.xlu2 %v5410_v49  ;;  %10553 = vst [vmem:[#allocation16_spill] sm:$0xff] %v9860_v21  ;;  %v9862_v49 = vpop.xlane.xlu2 %4444 }
 0x6ce   : > { %10554 = vst [vmem:[#allocation17_spill] sm:$0xff] %v9862_v49 }
 0x6cf   : > { %v5081_v63 = vpop.f32.mrf.mxu2  ;;  %v5250_v36 = vpop.f32.mrf.mxu3  ;;  %10555 = vst [vmem:[#allocation18_spill] sm:$0xff] %v9864_v41 }
 0x6d0   : > { %v5251_v39 = vadd.f32 %v5250_v36, %v5081_v63  ;;  %v10556_v36 = vld [vmem:[#allocation28_spill] sm:$0xff] }
 0x6d1   : > { %v4748_v12 = vpop.f32.mrf.mxu0  ;;  %v4917_v8 = vpop.f32.mrf.mxu1 }
 0x6d2   : > { %v5413_v14 = vmax.f32 %v4913_v47, %v5251_v39  ;;  %v10557_v39 = vld [vmem:[#allocation29_spill] sm:$0xff]  ;;  %v4918_v49 = vadd.f32 %v4917_v8, %v4748_v12 }
 0x6d4   : > { %5123 = vmatmul.bf16.gmra.mxu2 %v10548_v4  ;;  %5292 = vmatmul.bf16.gmra.mxu3 %v10549_v13  ;;  %v9868_v47 = vpop.xlane.xlu0 %4447  ;;  %v9872_v21 = vpop.xlane.xlu1 %4459 }
 0x6d5   : > { %5414 = vmax.xlane.f32.xlu0 %v5413_v14  ;;  %10558 = vst [vmem:[#allocation19_spill] sm:$0xff] %v9868_v47  ;;  %v9870_v14 = vpop.xlane.xlu2 %4453 }
 0x6d6   : > { %10559 = vst [vmem:[#allocation20_spill] sm:$0xff] %v9870_v14 }
 0x6d7   : > { %v5084_v33 = vpop.f32.mrf.mxu2  ;;  %v5253_v34 = vpop.f32.mrf.mxu3  ;;  %10560 = vst [vmem:[#allocation21_spill] sm:$0xff] %v9872_v21 }
 0x6d8   : > { %v5254_v51 = vadd.f32 %v5253_v34, %v5084_v33 }
 0x6d9   : > { %v4751_v20 = vpop.f32.mrf.mxu0  ;;  %v4920_v26 = vpop.f32.mrf.mxu1 }
 0x6da   : > { %v5416_v63 = vmax.f32 %v4916_v50, %v5254_v51  ;;  %v4921_v14 = vadd.f32 %v4920_v26, %v4751_v20 }
 0x6dc   : > { %4790 = vmatmul.bf16.gmra.mxu0 %v10556_v36  ;;  %4959 = vmatmul.bf16.gmra.mxu1 %v10557_v39  ;;  %v9876_v51 = vpop.xlane.xlu0 %4456  ;;  %v9880_v47 = vpop.xlane.xlu1 %4468 }
 0x6dd   : > { %5417 = vmax.xlane.f32.xlu1 %v5416_v63  ;;  %10561 = vst [vmem:[#allocation22_spill] sm:$0xff] %v9876_v51  ;;  %v9878_v63 = vpop.xlane.xlu2 %4462 }
 0x6de   : > { %10562 = vst [vmem:[#allocation23_spill] sm:$0xff] %v9878_v63 }
 0x6df   : > { %v5086_v4 = vpop.f32.mrf.mxu2  ;;  %v5255_v13 = vpop.f32.mrf.mxu3  ;;  %10563 = vst [vmem:[#allocation24_spill] sm:$0xff] %v9880_v47 }
 0x6e0   : > { %v5256_v41 = vadd.f32 %v5255_v13, %v5086_v4  ;;  %v10564_v13 = vld [vmem:[#allocation30_spill] sm:$0xff] }
 0x6e1   : > { %v4753_v24 = vpop.f32.mrf.mxu0  ;;  %v4922_v54 = vpop.f32.mrf.mxu1 }
 0x6e2   : > { %v5419_v33 = vmax.f32 %v4918_v49, %v5256_v41  ;;  %v10565_v41 = vld [vmem:[#allocation31_spill] sm:$0xff]  ;;  %v4923_v63 = vadd.f32 %v4922_v54, %v4753_v24 }
 0x6e4   : > { %5128 = vmatmul.bf16.gmra.mxu2 %v10556_v36  ;;  %5297 = vmatmul.bf16.gmra.mxu3 %v10557_v39  ;;  %v9884_v49 = vpop.xlane.xlu0 %4465  ;;  %v9888_v51 = vpop.xlane.xlu1 %4477 }
 0x6e5   : > { %5420 = vmax.xlane.f32.xlu2 %v5419_v33  ;;  %10566 = vst [vmem:[#allocation25_spill] sm:$0xff] %v9884_v49  ;;  %v9886_v33 = vpop.xlane.xlu2 %4471 }
 0x6e6   : > { %10567 = vst [vmem:[#allocation26_spill] sm:$0xff] %v9886_v33 }
 0x6e7   : > { %v5089_v50 = vpop.f32.mrf.mxu2  ;;  %v5258_v34 = vpop.f32.mrf.mxu3  ;;  %10568 = vst [vmem:[#allocation27_spill] sm:$0xff] %v9888_v51 }
 0x6e8   : > { %v5259_v21 = vadd.f32 %v5258_v34, %v5089_v50 }
 0x6e9   : > { %v4756_v12 = vpop.f32.mrf.mxu0  ;;  %v4925_v8 = vpop.f32.mrf.mxu1 }
 0x6ea   : > { %v5422_v4 = vmax.f32 %v4921_v14, %v5259_v21  ;;  %v4926_v33 = vadd.f32 %v4925_v8, %v4756_v12 }
 0x6ec   : > { %4795 = vmatmul.bf16.gmra.mxu0 %v10564_v13  ;;  %4964 = vmatmul.bf16.gmra.mxu1 %v10565_v41  ;;  %v9892_v21 = vpop.xlane.xlu0 %4474  ;;  %v9896_v49 = vpop.xlane.xlu1 %4486 }
 0x6ed   : > { %5423 = vmax.xlane.f32.xlu0 %v5422_v4  ;;  %10569 = vst [vmem:[#allocation28_spill] sm:$0xff] %v9892_v21  ;;  %v9894_v4 = vpop.xlane.xlu2 %4480 }
 0x6ee   : > { %10570 = vst [vmem:[#allocation29_spill] sm:$0xff] %v9894_v4 }
 0x6ef   : > { %v5091_v36 = vpop.f32.mrf.mxu2  ;;  %v5260_v39 = vpop.f32.mrf.mxu3  ;;  %10571 = vst [vmem:[#allocation30_spill] sm:$0xff] %v9896_v49 }
 0x6f0   : > { %v5261_v47 = vadd.f32 %v5260_v39, %v5091_v36  ;;  %v10572_v39 = vld [vmem:[#allocation34_spill] sm:$0xff] }
 0x6f1   : > { %v4758_v20 = vpop.f32.mrf.mxu0  ;;  %v4927_v26 = vpop.f32.mrf.mxu1 }
 0x6f2   : > { %v5425_v50 = vmax.f32 %v4923_v63, %v5261_v47  ;;  %v10573_v47 = vld [vmem:[#allocation35_spill] sm:$0xff]  ;;  %v4928_v4 = vadd.f32 %v4927_v26, %v4758_v20 }
 0x6f4   : > { %5133 = vmatmul.bf16.gmra.mxu2 %v10564_v13  ;;  %5302 = vmatmul.bf16.gmra.mxu3 %v10565_v41  ;;  %v9900_v63 = vpop.xlane.xlu0 %4483  ;;  %v9904_v21 = vpop.xlane.xlu1 %4495 }
 0x6f5   : > { %5426 = vmax.xlane.f32.xlu1 %v5425_v50  ;;  %10574 = vst [vmem:[#allocation31_spill] sm:$0xff] %v9900_v63  ;;  %v9902_v50 = vpop.xlane.xlu2 %4489 }
 0x6f6   : > { %10575 = vst [vmem:[#allocation34_spill] sm:$0xff] %v9902_v50 }
 0x6f7   : > { %v5094_v14 = vpop.f32.mrf.mxu2  ;;  %v5263_v34 = vpop.f32.mrf.mxu3  ;;  %10576 = vst [vmem:[#allocation35_spill] sm:$0xff] %v9904_v21 }
 0x6f8   : > { %v5264_v51 = vadd.f32 %v5263_v34, %v5094_v14 }
 0x6f9   : > { %v4761_v24 = vpop.f32.mrf.mxu0  ;;  %v4930_v54 = vpop.f32.mrf.mxu1 }
 0x6fa   : > { %v5428_v36 = vmax.f32 %v4926_v33, %v5264_v51  ;;  %v4931_v50 = vadd.f32 %v4930_v54, %v4761_v24 }
 0x6fc   : > { %4800 = vmatmul.bf16.gmra.mxu0 %v10572_v39  ;;  %4969 = vmatmul.bf16.gmra.mxu1 %v10573_v47  ;;  %v9908_v51 = vpop.xlane.xlu0 %4492  ;;  %v9912_v63 = vpop.xlane.xlu1 %4504 }
 0x6fd   : > { %5429 = vmax.xlane.f32.xlu2 %v5428_v36  ;;  %10577 = vst [vmem:[#allocation46_spill] sm:$0xff] %v9908_v51  ;;  %v9910_v36 = vpop.xlane.xlu2 %4498 }
 0x6fe   : > { %10578 = vst [vmem:[#allocation47_spill] sm:$0xff] %v9910_v36 }
 0x6ff   : > { %v5096_v13 = vpop.f32.mrf.mxu2  ;;  %v5265_v41 = vpop.f32.mrf.mxu3  ;;  %10579 = vst [vmem:[#allocation48_spill] sm:$0xff] %v9912_v63 }
 0x700   : > { %v5266_v49 = vadd.f32 %v5265_v41, %v5096_v13  ;;  %v10580_v41 = vld [vmem:[#allocation39_spill] sm:$0xff] }
 0x701   : > { %v4763_v12 = vpop.f32.mrf.mxu0  ;;  %v4932_v8 = vpop.f32.mrf.mxu1 }
 0x702   : > { %v5431_v14 = vmax.f32 %v4928_v4, %v5266_v49  ;;  %v10581_v49 = vld [vmem:[#allocation40_spill] sm:$0xff]  ;;  %v4933_v36 = vadd.f32 %v4932_v8, %v4763_v12 }
 0x704   : > { %5138 = vmatmul.bf16.gmra.mxu2 %v10572_v39  ;;  %5307 = vmatmul.bf16.gmra.mxu3 %v10573_v47  ;;  %v9916_v4 = vpop.xlane.xlu0 %4501  ;;  %v9920_v51 = vpop.xlane.xlu1 %4513 }
 0x705   : > { %5432 = vmax.xlane.f32.xlu0 %v5431_v14  ;;  %v9918_v14 = vpop.xlane.xlu2 %4507  ;;  %10583 = vst [vmem:[#allocation40_spill] sm:$0xff] %v9920_v51 }
 0x706   : > { %10582 = vst [vmem:[#allocation39_spill] sm:$0xff] %v9918_v14 }
 0x707   : > { %v5099_v33 = vpop.f32.mrf.mxu2  ;;  %v5268_v34 = vpop.f32.mrf.mxu3 }
 0x708   : > { %v5269_v21 = vadd.f32 %v5268_v34, %v5099_v33 }
 0x709   : > { %v4766_v20 = vpop.f32.mrf.mxu0  ;;  %v4935_v26 = vpop.f32.mrf.mxu1 }
 0x70a   : > { %v5434_v13 = vmax.f32 %v4931_v50, %v5269_v21  ;;  %v4936_v51 = vadd.f32 %v4935_v26, %v4766_v20 }
 0x70c   : > { %4805 = vmatmul.bf16.gmra.mxu0 %v10580_v41  ;;  %4974 = vmatmul.bf16.gmra.mxu1 %v10581_v49  ;;  %v9924_v21 = vpop.xlane.xlu0 %4510  ;;  %v9928_v14 = vpop.xlane.xlu1 %4522 }
 0x70d   : > { %5435 = vmax.xlane.f32.xlu1 %v5434_v13  ;;  %v9926_v13 = vpop.xlane.xlu2 %4516  ;;  %10584 = vst [vmem:[#allocation49_spill] sm:$0xff] %v9928_v14 }
 0x70f   : > { %v5101_v39 = vpop.f32.mrf.mxu2  ;;  %v5270_v47 = vpop.f32.mrf.mxu3 }
 0x710   : > { %v5271_v63 = vadd.f32 %v5270_v47, %v5101_v39 }
 0x711   : > { %v4768_v24 = vpop.f32.mrf.mxu0  ;;  %v4937_v54 = vpop.f32.mrf.mxu1 }
 0x712   : > { %v5437_v33 = vmax.f32 %v4933_v36, %v5271_v63  ;;  %v4938_v26 = vadd.f32 %v4937_v54, %v4768_v24 }
 0x714   : > { %5143 = vmatmul.bf16.gmra.mxu2 %v10580_v41  ;;  %5312 = vmatmul.bf16.gmra.mxu3 %v10581_v49  ;;  %v9933_v63 = vpop.xlane.xlu0 %4519 }
 0x715   : > { %5438 = vmax.xlane.f32.xlu2 %v5437_v33  ;;  %v9940_v20 = vpop.xlane.xlu2 %4525 }
 0x716   : > { %10585 = vst [vmem:[#allocation50_spill] sm:$0xff] %v9940_v20 }
 0x717   : > { %v5104_v50 = vpop.f32.mrf.mxu2  ;;  %v5273_v34 = vpop.f32.mrf.mxu3 }
 0x718   : > { %v5274_v12 = vadd.f32 %v5273_v34, %v5104_v50 }
 0x719   : > { %v4771_v8 = vpop.f32.mrf.mxu0  ;;  %v4940_v39 = vpop.f32.mrf.mxu1 }
 0x71a   : > { %v5440_v47 = vmax.f32 %v4936_v51, %v5274_v12  ;;  %v4941_v24 = vadd.f32 %v4940_v39, %v4771_v8 }
 0x71c   : > { %4810 = vmatmul.bf16.gmra.mxu0 %v9376_v16  ;;  %4979 = vmatmul.bf16.gmra.mxu1 %v9378_v30  ;;  %v9948_v20 = vpop.xlane.xlu0 %4528 }
 0x71d   : > { %5441 = vmax.xlane.f32.xlu0 %v5440_v47 }
 0x71f   : > { %v5106_v36 = vpop.f32.mrf.mxu2  ;;  %v5275_v41 = vpop.f32.mrf.mxu3 }
 0x720   : > { %v5276_v51 = vadd.f32 %v5275_v41, %v5106_v36  ;;  %v5400_v49 = vpop.xlane.xlu1 %5399 }
 0x721   : > { %v5590_v33 = vsel %vm1849_vm12, %v9766_v3, %v5400_v49  ;;  %v4773_v50 = vpop.f32.mrf.mxu0  ;;  %v4942_v34 = vpop.f32.mrf.mxu1 }
 0x722   : > { %v5443_v12 = vmax.f32 %v4938_v26, %v5276_v51  ;;  %5654 = vst.msk [vmem:[%s9938_s20] sm:$0xff] %vm10586_vm15, %v5590_v33  ;;  %v4943_v49 = vadd.f32 %v4942_v34, %v4773_v50  ;;  %vm10601_vm15 = vmmov %vm10594_vm0 }
 0x724   : > { %5148 = vmatmul.bf16.gmra.mxu2 %v9376_v16  ;;  %5317 = vmatmul.bf16.gmra.mxu3 %v9378_v30 }
 0x725   : > { %5444 = vmax.xlane.f32.xlu1 %v5443_v12 }
 0x727   : > { %v5109_v47 = vpop.f32.mrf.mxu2  ;;  %v5278_v14 = vpop.f32.mrf.mxu3 }
 0x728   : > { %v5279_v54 = vadd.f32 %v5278_v14, %v5109_v47  ;;  %v5403_v36 = vpop.xlane.xlu2 %5402 }
 0x729   : > { %v5591_v3 = vsel %vm1849_vm12, %v9764_v27, %v5403_v36  ;;  %v4776_v41 = vpop.f32.mrf.mxu0  ;;  %v4945_v26 = vpop.f32.mrf.mxu1 }
 0x72a   : > { %v5446_v51 = vmax.f32 %v4941_v24, %v5279_v54  ;;  %5655 = vst.msk [vmem:[%s9938_s20 + $0x8] sm:$0xff] %vm10587_vm8, %v5591_v3  ;;  %v4946_v54 = vadd.f32 %v4945_v26, %v4776_v41  ;;  %vm10602_vm8 = vmmov %vm10594_vm0 }
 0x72c   : > { %4815 = vmatmul.bf16.gmra.mxu0 %v9451_v25  ;;  %4984 = vmatmul.bf16.gmra.mxu1 %v9453_v57 }
 0x72d   : > { %5447 = vmax.xlane.f32.xlu2 %v5446_v51 }
 0x72f   : > { %v5111_v16 = vpop.f32.mrf.mxu2  ;;  %v5280_v30 = vpop.f32.mrf.mxu3 }
 0x730   : > { %v5281_v8 = vadd.f32 %v5280_v30, %v5111_v16  ;;  %v5406_v14 = vpop.xlane.xlu0 %5405 }
 0x731   : > { %v5592_v39 = vsel %vm1849_vm12, %v9776_v10, %v5406_v14  ;;  %v4778_v27 = vpop.f32.mrf.mxu0  ;;  %v4947_v33 = vpop.f32.mrf.mxu1 }
 0x732   : > { %v5449_v12 = vmax.f32 %v4943_v49, %v5281_v8  ;;  %5656 = vst.msk [vmem:[%s9938_s20 + $0x10] sm:$0xff] %vm10588_vm13, %v5592_v39  ;;  %v4948_v16 = vadd.f32 %v4947_v33, %v4778_v27  ;;  %vm10603_vm13 = vmmov %vm10594_vm0 }
 0x734   : > { %5153 = vmatmul.bf16.gmra.mxu2 %v9451_v25  ;;  %5322 = vmatmul.bf16.gmra.mxu3 %v9453_v57 }
 0x735   : > { %5450 = vmax.xlane.f32.xlu0 %v5449_v12 }
 0x737   : > { %v5114_v47 = vpop.f32.mrf.mxu2  ;;  %v5283_v24 = vpop.f32.mrf.mxu3 }
 0x738   : > { %v5284_v50 = vadd.f32 %v5283_v24, %v5114_v47  ;;  %v5409_v34 = vpop.xlane.xlu1 %5408 }
 0x739   : > { %v5593_v36 = vsel %vm1849_vm12, %v9770_v32, %v5409_v34  ;;  %v4781_v10 = vpop.f32.mrf.mxu0  ;;  %v4950_v3 = vpop.f32.mrf.mxu1 }
 0x73a   : > { %v5452_v51 = vmax.f32 %v4946_v54, %v5284_v50  ;;  %5657 = vst.msk [vmem:[%s9938_s20 + $0x18] sm:$0xff] %vm10589_vm1, %v5593_v36  ;;  %v4951_v12 = vadd.f32 %v4950_v3, %v4781_v10  ;;  %vm10604_vm1 = vmmov %vm10594_vm0 }
 0x73c   : > { %4820 = vmatmul.bf16.gmra.mxu0 %v9524_v22  ;;  %4989 = vmatmul.bf16.gmra.mxu1 %v9526_v9 }
 0x73d   : > { %5453 = vmax.xlane.f32.xlu1 %v5452_v51 }
 0x73f   : > { %v5116_v25 = vpop.f32.mrf.mxu2  ;;  %v5285_v57 = vpop.f32.mrf.mxu3 }
 0x740   : > { %v5286_v41 = vadd.f32 %v5285_v57, %v5116_v25  ;;  %v5412_v26 = vpop.xlane.xlu2 %5411 }
 0x741   : > { %v5594_v30 = vsel %vm1849_vm12, %v9774_v45, %v5412_v26  ;;  %v4783_v32 = vpop.f32.mrf.mxu0  ;;  %v4952_v49 = vpop.f32.mrf.mxu1 }
 0x742   : > { %v5455_v8 = vmax.f32 %v4948_v16, %v5286_v41  ;;  %5658 = vst.msk [vmem:[%s9938_s20 + $0x20] sm:$0xff] %vm10590_vm9, %v5594_v30  ;;  %v4953_v50 = vadd.f32 %v4952_v49, %v4783_v32  ;;  %vm10605_vm9 = vmmov %vm10594_vm0 }
 0x744   : > { %5158 = vmatmul.bf16.gmra.mxu2 %v9524_v22  ;;  %5327 = vmatmul.bf16.gmra.mxu3 %v9526_v9 }
 0x745   : > { %5456 = vmax.xlane.f32.xlu2 %v5455_v8 }
 0x747   : > { %v5119_v14 = vpop.f32.mrf.mxu2  ;;  %v5288_v39 = vpop.f32.mrf.mxu3 }
 0x748   : > { %v5289_v27 = vadd.f32 %v5288_v39, %v5119_v14  ;;  %v5415_v33 = vpop.xlane.xlu0 %5414 }
 0x749   : > { %v5595_v47 = vsel %vm1849_vm12, %v9780_v35, %v5415_v33  ;;  %v4786_v45 = vpop.f32.mrf.mxu0  ;;  %v4955_v24 = vpop.f32.mrf.mxu1 }
 0x74a   : > { %v5458_v54 = vmax.f32 %v4951_v12, %v5289_v27  ;;  %5659 = vst.msk [vmem:[%s9938_s20 + $0x28] sm:$0xff] %vm10591_vm3, %v5595_v47  ;;  %v4956_v16 = vadd.f32 %v4955_v24, %v4786_v45  ;;  %vm10606_vm3 = vmmov %vm10594_vm0 }
 0x74c   : > { %4825 = vmatmul.bf16.gmra.mxu0 %v9572_v46  ;;  %4994 = vmatmul.bf16.gmra.mxu1 %v9574_v59 }
 0x74d   : > { %5459 = vmax.xlane.f32.xlu0 %v5458_v54 }
 0x74f   : > { %v5121_v22 = vpop.f32.mrf.mxu2  ;;  %v5290_v9 = vpop.f32.mrf.mxu3 }
 0x750   : > { %v5291_v34 = vadd.f32 %v5290_v9, %v5121_v22  ;;  %v5418_v36 = vpop.xlane.xlu1 %5417 }
 0x751   : > { %v5596_v10 = vsel %vm1849_vm12, %v9786_v2, %v5418_v36  ;;  %v4788_v35 = vpop.f32.mrf.mxu0  ;;  %v4957_v3 = vpop.f32.mrf.mxu1 }
 0x752   : > { %v5461_v51 = vmax.f32 %v4953_v50, %v5291_v34  ;;  %5660 = vst.msk [vmem:[%s9938_s20 + $0x30] sm:$0xff] %vm10592_vm4, %v5596_v10  ;;  %v4958_v8 = vadd.f32 %v4957_v3, %v4788_v35  ;;  %vm10607_vm4 = vmmov %vm10594_vm0 }
 0x754   : > { %5163 = vmatmul.bf16.gmra.mxu2 %v9572_v46  ;;  %5332 = vmatmul.bf16.gmra.mxu3 %v9574_v59 }
 0x755   : > { %5462 = vmax.xlane.f32.xlu1 %v5461_v51 }
 0x757   : > { %v5124_v25 = vpop.f32.mrf.mxu2  ;;  %v5293_v57 = vpop.f32.mrf.mxu3 }
 0x758   : > { %v5294_v41 = vadd.f32 %v5293_v57, %v5124_v25  ;;  %v5421_v26 = vpop.xlane.xlu2 %5420 }
 0x759   : > { %v5597_v30 = vsel %vm1849_vm12, %v9782_v55, %v5421_v26  ;;  %v4791_v2 = vpop.f32.mrf.mxu0  ;;  %v4960_v32 = vpop.f32.mrf.mxu1 }
 0x75a   : > { %v5464_v49 = vmax.f32 %v4956_v16, %v5294_v41  ;;  %5661 = vst.msk [vmem:[%s9938_s20 + $0x38] sm:$0xff] %vm10593_vm10, %v5597_v30  ;;  %v4961_v24 = vadd.f32 %v4960_v32, %v4791_v2  ;;  %vm10611_vm10 = vmmov %vm10594_vm0 }
 0x75c   : > { %4830 = vmatmul.bf16.gmra.mxu0 %v9628_v11  ;;  %4999 = vmatmul.bf16.gmra.mxu1 %v9630_v56 }
 0x75d   : > { %5465 = vmax.xlane.f32.xlu2 %v5464_v49 }
 0x75f   : > { %v5126_v46 = vpop.f32.mrf.mxu2  ;;  %v5295_v59 = vpop.f32.mrf.mxu3 }
 0x760   : > { %v5296_v14 = vadd.f32 %v5295_v59, %v5126_v46  ;;  %v5424_v39 = vpop.xlane.xlu0 %5423 }
 0x761   : > { %v5598_v12 = vsel %vm1849_vm12, %v9788_v53, %v5424_v39  ;;  %v4793_v55 = vpop.f32.mrf.mxu0  ;;  %v4962_v27 = vpop.f32.mrf.mxu1 }
 0x762   : > { %v5467_v33 = vmax.f32 %v4958_v8, %v5296_v14  ;;  %5662 = vst.msk [vmem:[%s9938_s20 + $0x40] sm:$0xff] %vm10594_vm0, %v5598_v12  ;;  %v4963_v36 = vadd.f32 %v4962_v27, %v4793_v55 }
 0x764   : > { %5168 = vmatmul.bf16.gmra.mxu2 %v9628_v11  ;;  %5337 = vmatmul.bf16.gmra.mxu3 %v9630_v56 }
 0x765   : > { %5468 = vmax.xlane.f32.xlu0 %v5467_v33 }
 0x767   : > { %v5129_v47 = vpop.f32.mrf.mxu2  ;;  %v5298_v45 = vpop.f32.mrf.mxu3 }
 0x768   : > { %v5299_v54 = vadd.f32 %v5298_v45, %v5129_v47  ;;  %v5427_v22 = vpop.xlane.xlu1 %5426 }
 0x769   : > { %v5599_v9 = vsel %vm1849_vm12, %v9794_v44, %v5427_v22  ;;  %v4796_v53 = vpop.f32.mrf.mxu0  ;;  %v4965_v50 = vpop.f32.mrf.mxu1 }
 0x76a   : > { %v5470_v34 = vmax.f32 %v4961_v24, %v5299_v54  ;;  %5663 = vst.msk [vmem:[%s9938_s20 + $0x48] sm:$0xff] %vm10595_vm6, %v5599_v9  ;;  %v4966_v41 = vadd.f32 %v4965_v50, %v4796_v53  ;;  %vm10616_vm6 = vmmov %vm10594_vm0 }
 0x76c   : > { %4835 = vmatmul.bf16.gmra.mxu0 %v9656_v37  ;;  %5004 = vmatmul.bf16.gmra.mxu1 %v9658_v1 }
 0x76d   : > { %5471 = vmax.xlane.f32.xlu1 %v5470_v34 }
 0x76f   : > { %v5131_v11 = vpop.f32.mrf.mxu2  ;;  %v5300_v56 = vpop.f32.mrf.mxu3 }
 0x770   : > { %v5301_v10 = vadd.f32 %v5300_v56, %v5131_v11  ;;  %v5430_v35 = vpop.xlane.xlu2 %5429 }
 0x771   : > { %v5600_v3 = vsel %vm1849_vm12, %v9790_v5, %v5430_v35  ;;  %v4798_v44 = vpop.f32.mrf.mxu0  ;;  %v4967_v51 = vpop.f32.mrf.mxu1 }
 0x772   : > { %v5473_v25 = vmax.f32 %v4963_v36, %v5301_v10  ;;  %5664 = vst.msk [vmem:[%s9938_s20 + $0x50] sm:$0xff] %vm10596_vm7, %v5600_v3  ;;  %v4968_v46 = vadd.f32 %v4967_v51, %v4798_v44  ;;  %vm10618_vm7 = vmmov %vm10594_vm0 }
 0x774   : > { %5173 = vmatmul.bf16.gmra.mxu2 %v9656_v37  ;;  %5342 = vmatmul.bf16.gmra.mxu3 %v9658_v1 }
 0x775   : > { %5474 = vmax.xlane.f32.xlu2 %v5473_v25 }
 0x777   : > { %v5134_v57 = vpop.f32.mrf.mxu2  ;;  %v5303_v16 = vpop.f32.mrf.mxu3 }
 0x778   : > { %v5304_v26 = vadd.f32 %v5303_v16, %v5134_v57  ;;  %v5433_v30 = vpop.xlane.xlu0 %5432 }
 0x779   : > { %v5601_v2 = vsel %vm1849_vm12, %v9796_v15, %v5433_v30  ;;  %v4801_v5 = vpop.f32.mrf.mxu0  ;;  %v4970_v32 = vpop.f32.mrf.mxu1 }
 0x77a   : > { %v5476_v49 = vmax.f32 %v4966_v41, %v5304_v26  ;;  %5665 = vst.msk [vmem:[%s9938_s20 + $0x58] sm:$0xff] %vm10597_vm5, %v5601_v2  ;;  %v4971_v33 = vadd.f32 %v4970_v32, %v4801_v5  ;;  %vm10622_vm5 = vmmov %vm10594_vm0 }
 0x77c   : > { %4840 = vmatmul.bf16.gmra.mxu0 %v9664_v23  ;;  %5009 = vmatmul.bf16.gmra.mxu1 %v9666_v29 }
 0x77d   : > { %5477 = vmax.xlane.f32.xlu0 %v5476_v49 }
 0x77f   : > { %v5136_v37 = vpop.f32.mrf.mxu2  ;;  %v5305_v1 = vpop.f32.mrf.mxu3 }
 0x780   : > { %v5306_v59 = vadd.f32 %v5305_v1, %v5136_v37  ;;  %v5436_v8 = vpop.xlane.xlu1 %5435 }
 0x781   : > { %v5602_v14 = vsel %vm1849_vm12, %v9802_v17, %v5436_v8  ;;  %v4803_v15 = vpop.f32.mrf.mxu0  ;;  %v4972_v39 = vpop.f32.mrf.mxu1 }
 0x782   : > { %v5479_v12 = vmax.f32 %v4968_v46, %v5306_v59  ;;  %5666 = vst.msk [vmem:[%s9938_s20 + $0x60] sm:$0xff] %vm10598_vm2, %v5602_v14  ;;  %v4973_v9 = vadd.f32 %v4972_v39, %v4803_v15  ;;  %vm10624_vm2 = vmmov %vm10594_vm0 }
 0x784   : > { %5178 = vmatmul.bf16.gmra.mxu2 %v9664_v23  ;;  %5347 = vmatmul.bf16.gmra.mxu3 %v9666_v29 }
 0x785   : > { %5480 = vmax.xlane.f32.xlu1 %v5479_v12 }
 0x787   : > { %v5139_v55 = vpop.f32.mrf.mxu2  ;;  %v5308_v27 = vpop.f32.mrf.mxu3 }
 0x788   : > { %v5309_v47 = vadd.f32 %v5308_v27, %v5139_v55  ;;  %v5439_v45 = vpop.xlane.xlu2 %5438 }
 0x789   : > { %v5603_v24 = vsel %vm1849_vm12, %v9798_v31, %v5439_v45  ;;  %v4806_v17 = vpop.f32.mrf.mxu0  ;;  %v4975_v54 = vpop.f32.mrf.mxu1 }
 0x78a   : > { %v5482_v22 = vmax.f32 %v4971_v33, %v5309_v47  ;;  %5667 = vst.msk [vmem:[%s9938_s20 + $0x68] sm:$0xff] %vm10599_vm11, %v5603_v24  ;;  %v4976_v35 = vadd.f32 %v4975_v54, %v4806_v17  ;;  %vm10628_vm11 = vmmov %vm10594_vm0 }
 0x78c   : > { %4845 = vmatmul.bf16.gmra.mxu0 %v9672_v52  ;;  %5014 = vmatmul.bf16.gmra.mxu1 %v9674_v60 }
 0x78d   : > { %5483 = vmax.xlane.f32.xlu2 %v5482_v22 }
 0x78f   : > { %v5141_v23 = vpop.f32.mrf.mxu2  ;;  %v5310_v29 = vpop.f32.mrf.mxu3 }
 0x790   : > { %v5311_v53 = vadd.f32 %v5310_v29, %v5141_v23  ;;  %v5442_v50 = vpop.xlane.xlu0 %5441 }
 0x791   : > { %v5604_v34 = vsel %vm1849_vm12, %v9804_v19, %v5442_v50  ;;  %v4808_v31 = vpop.f32.mrf.mxu0  ;;  %v4977_v11 = vpop.f32.mrf.mxu1 }
 0x792   : > { %v5485_v56 = vmax.f32 %v4973_v9, %v5311_v53  ;;  %5668 = vst.msk [vmem:[%s9938_s20 + $0x70] sm:$0xff] %vm10600_vm14, %v5604_v34  ;;  %v4978_v16 = vadd.f32 %v4977_v11, %v4808_v31  ;;  %vm10630_vm14 = vmmov %vm10594_vm0 }
 0x794   : > { %5183 = vmatmul.bf16.gmra.mxu2 %v9672_v52  ;;  %5352 = vmatmul.bf16.gmra.mxu3 %v9674_v60 }
 0x795   : > { %5486 = vmax.xlane.f32.xlu0 %v5485_v56 }
 0x797   : > { %v5144_v36 = vpop.f32.mrf.mxu2  ;;  %v5313_v10 = vpop.f32.mrf.mxu3 }
 0x798   : > { %v5314_v3 = vadd.f32 %v5313_v10, %v5144_v36  ;;  %v5445_v44 = vpop.xlane.xlu1 %5444 }
 0x799   : > { %v5605_v51 = vsel %vm1849_vm12, %v9810_v43, %v5445_v44  ;;  %v4811_v19 = vpop.f32.mrf.mxu0  ;;  %v4980_v25 = vpop.f32.mrf.mxu1 }
 0x79a   : > { %v5488_v57 = vmax.f32 %v4976_v35, %v5314_v3  ;;  %5669 = vst.msk [vmem:[%s9938_s20 + $0x78] sm:$0xff] %vm10601_vm15, %v5605_v51  ;;  %v4981_v37 = vadd.f32 %v4980_v25, %v4811_v19  ;;  %v10608_v25 = vld [vmem:[#allocation36_spill] sm:$0xff]  ;;  %vm10634_vm15 = vmmov %vm10594_vm0 }
 0x79c   : > { %4850 = vmatmul.bf16.gmra.mxu0 %v9680_v38  ;;  %5019 = vmatmul.bf16.gmra.mxu1 %v9682_v61 }
 0x79d   : > { %5489 = vmax.xlane.f32.xlu1 %v5488_v57 }
 0x79f   : > { %v5146_v52 = vpop.f32.mrf.mxu2  ;;  %v5315_v60 = vpop.f32.mrf.mxu3 }
 0x7a0   : > { %v5316_v41 = vadd.f32 %v5315_v60, %v5146_v52  ;;  %v5448_v26 = vpop.xlane.xlu2 %5447 }
 0x7a1   : > { %v5606_v30 = vsel %vm1849_vm12, %v9808_v42, %v5448_v26  ;;  %v4813_v43 = vpop.f32.mrf.mxu0  ;;  %v4982_v2 = vpop.f32.mrf.mxu1 }
 0x7a2   : > { %v5491_v5 = vmax.f32 %v4978_v16, %v5316_v41  ;;  %5670 = vst.msk [vmem:[%s9938_s20 + $0x80] sm:$0xff] %vm10602_vm8, %v5606_v30  ;;  %v4983_v15 = vadd.f32 %v4982_v2, %v4813_v43  ;;  %v10610_v41 = vld [vmem:[#allocation4_spill] sm:$0xff]  ;;  %vm10636_vm8 = vmmov %vm10594_vm0 }
 0x7a4   : > { %5188 = vmatmul.bf16.gmra.mxu2 %v9680_v38  ;;  %5357 = vmatmul.bf16.gmra.mxu3 %v9682_v61 }
 0x7a5   : > { %5492 = vmax.xlane.f32.xlu2 %v5491_v5 }
 0x7a7   : > { %v5149_v32 = vpop.f32.mrf.mxu2  ;;  %v5318_v49 = vpop.f32.mrf.mxu3 }
 0x7a8   : > { %v5319_v1 = vadd.f32 %v5318_v49, %v5149_v32  ;;  %v5451_v46 = vpop.xlane.xlu0 %5450 }
 0x7a9   : > { %v5607_v59 = vsel %vm1849_vm12, %v9814_v6, %v5451_v46  ;;  %v4816_v42 = vpop.f32.mrf.mxu0  ;;  %v4985_v8 = vpop.f32.mrf.mxu1 }
 0x7aa   : > { %v5494_v14 = vmax.f32 %v4981_v37, %v5319_v1  ;;  %5671 = vst.msk [vmem:[%s9938_s20 + $0x88] sm:$0xff] %vm10603_vm13, %v5607_v59  ;;  %v4986_v24 = vadd.f32 %v4985_v8, %v4816_v42  ;;  %v10612_v1 = vld [vmem:[#allocation5_spill] sm:$0xff]  ;;  %vm10638_vm13 = vmmov %vm10594_vm0 }
 0x7ac   : > { %4855 = vmatmul.bf16.gmra.mxu0 %v9688_v40  ;;  %5024 = vmatmul.bf16.gmra.mxu1 %v9690_v62 }
 0x7ad   : > { %5495 = vmax.xlane.f32.xlu0 %v5494_v14  ;;  %v10613_v14 = vld [vmem:[#allocation33_spill] sm:$0xff] }
 0x7af   : > { %v5151_v38 = vpop.f32.mrf.mxu2  ;;  %v5320_v61 = vpop.f32.mrf.mxu3 }
 0x7b0   : > { %v5321_v39 = vadd.f32 %v5320_v61, %v5151_v38  ;;  %v5454_v12 = vpop.xlane.xlu1 %5453  ;;  %v10614_v38 = vld [vmem:[#allocation37_spill] sm:$0xff] }
 0x7b1   : > { %v5608_v55 = vsel %vm1849_vm12, %v9820_v18, %v5454_v12  ;;  %v4818_v6 = vpop.f32.mrf.mxu0  ;;  %v4987_v27 = vpop.f32.mrf.mxu1 }
 0x7b2   : > { %v5497_v33 = vmax.f32 %v4983_v15, %v5321_v39  ;;  %5672 = vst.msk [vmem:[%s9938_s20 + $0x90] sm:$0xff] %vm10604_vm1, %v5608_v55  ;;  %v4988_v9 = vadd.f32 %v4987_v27, %v4818_v6  ;;  %v10615_v6 = vld [vmem:[#allocation7_spill] sm:$0xff]  ;;  %vm10640_vm1 = vmmov %vm10594_vm0 }
 0x7b4   : > { %5193 = vmatmul.bf16.gmra.mxu2 %v9688_v40  ;;  %5362 = vmatmul.bf16.gmra.mxu3 %v9690_v62 }
 0x7b5   : > { %5498 = vmax.xlane.f32.xlu1 %v5497_v33 }
 0x7b7   : > { %v5154_v47 = vpop.f32.mrf.mxu2  ;;  %v5323_v45 = vpop.f32.mrf.mxu3 }
 0x7b8   : > { %v5324_v17 = vadd.f32 %v5323_v45, %v5154_v47  ;;  %v5457_v54 = vpop.xlane.xlu2 %5456 }
 0x7b9   : > { %v5609_v22 = vsel %vm1849_vm12, %v9816_v48, %v5457_v54  ;;  %v4821_v18 = vpop.f32.mrf.mxu0  ;;  %v4990_v23 = vpop.f32.mrf.mxu1 }
 0x7ba   : > { %v5500_v29 = vmax.f32 %v4986_v24, %v5324_v17  ;;  %5673 = vst.msk [vmem:[%s9938_s20 + $0x98] sm:$0xff] %vm10605_vm9, %v5609_v22  ;;  %v4991_v10 = vadd.f32 %v4990_v23, %v4821_v18  ;;  %v10617_v23 = vld [vmem:[#allocation6_spill] sm:$0xff]  ;;  %vm10642_vm9 = vmmov %vm10594_vm0 }
 0x7bc   : > { %4860 = vmatmul.bf16.gmra.mxu0 %v9696_v28  ;;  %5029 = vmatmul.bf16.gmra.mxu1 %v9698_v7 }
 0x7bd   : > { %5501 = vmax.xlane.f32.xlu2 %v5500_v29 }
 0x7bf   : > { %v5156_v40 = vpop.f32.mrf.mxu2  ;;  %v5325_v62 = vpop.f32.mrf.mxu3 }
 0x7c0   : > { %v5326_v53 = vadd.f32 %v5325_v62, %v5156_v40  ;;  %v5460_v50 = vpop.xlane.xlu0 %5459 }
 0x7c1   : > { %v5610_v34 = vsel %vm1849_vm12, %v9822_v58, %v5460_v50  ;;  %v4823_v48 = vpop.f32.mrf.mxu0  ;;  %v4992_v31 = vpop.f32.mrf.mxu1  ;;  %v10620_v50 = vld [vmem:[#allocation41_spill] sm:$0xff] }
 0x7c2   : > { %v5503_v11 = vmax.f32 %v4988_v9, %v5326_v53  ;;  %5674 = vst.msk [vmem:[%s9938_s20 + $0xa0] sm:$0xff] %vm10606_vm3, %v5610_v34  ;;  %v4993_v52 = vadd.f32 %v4992_v31, %v4823_v48  ;;  %v10619_v53 = vld [vmem:[#allocation38_spill] sm:$0xff]  ;;  %vm10644_vm3 = vmmov %vm10594_vm0 }
 0x7c4   : > { %5198 = vmatmul.bf16.gmra.mxu2 %v9696_v28  ;;  %5367 = vmatmul.bf16.gmra.mxu3 %v9698_v7  ;;  %v10609_v28 = vld [vmem:[#allocation32_spill] sm:$0xff] }
 0x7c5   : > { %5504 = vmax.xlane.f32.xlu0 %v5503_v11 }
 0x7c7   : > { %v5159_v56 = vpop.f32.mrf.mxu2  ;;  %v5328_v36 = vpop.f32.mrf.mxu3 }
 0x7c8   : > { %v5329_v35 = vadd.f32 %v5328_v36, %v5159_v56  ;;  %v5463_v3 = vpop.xlane.xlu1 %5462  ;;  %v10621_v36 = vld [vmem:[#allocation8_spill] sm:$0xff] }
 0x7c9   : > { %v5611_v44 = vsel %vm1849_vm12, %v9828_v0, %v5463_v3  ;;  %v4826_v58 = vpop.f32.mrf.mxu0  ;;  %v4995_v51 = vpop.f32.mrf.mxu1 }
 0x7ca   : > { %v5506_v19 = vmax.f32 %v4991_v10, %v5329_v35  ;;  %5675 = vst.msk [vmem:[%s9938_s20 + $0xa8] sm:$0xff] %vm10607_vm4, %v5611_v44  ;;  %v4996_v32 = vadd.f32 %v4995_v51, %v4826_v58  ;;  %vm10646_vm4 = vmmov %vm10594_vm0 }
 0x7cc   : > { %4865 = vmatmul.bf16.gmra.mxu0 %v10608_v25  ;;  %5034 = vmatmul.bf16.gmra.mxu1 %v10609_v28 }
 0x7cd   : > { %5507 = vmax.xlane.f32.xlu1 %v5506_v19 }
 0x7cf   : > { %v5161_v7 = vpop.f32.mrf.mxu2  ;;  %v5330_v57 = vpop.f32.mrf.mxu3 }
 0x7d0   : > { %v5331_v60 = vadd.f32 %v5330_v57, %v5161_v7  ;;  %v5466_v16 = vpop.xlane.xlu2 %5465  ;;  %v10623_v7 = vld [vmem:[#allocation10_spill] sm:$0xff] }
 0x7d1   : > { %v5612_v26 = vsel %vm1849_vm12, %v10610_v41, %v5466_v16  ;;  %v4828_v0 = vpop.f32.mrf.mxu0  ;;  %v4997_v30 = vpop.f32.mrf.mxu1  ;;  %v10625_v41 = vld [vmem:[#allocation42_spill] sm:$0xff] }
 0x7d2   : > { %v5509_v43 = vmax.f32 %v4993_v52, %v5331_v60  ;;  %5676 = vst.msk [vmem:[%s9938_s20 + $0xb0] sm:$0xff] %vm10611_vm10, %v5612_v26  ;;  %v4998_v39 = vadd.f32 %v4997_v30, %v4828_v0  ;;  %v10626_v26 = vld [vmem:[#allocation43_spill] sm:$0xff]  ;;  %vm10648_vm10 = vmmov %vm10594_vm0 }
 0x7d4   : > { %5203 = vmatmul.bf16.gmra.mxu2 %v10608_v25  ;;  %5372 = vmatmul.bf16.gmra.mxu3 %v10609_v28 }
 0x7d5   : > { %5510 = vmax.xlane.f32.xlu2 %v5509_v43 }
 0x7d7   : > { %v5164_v2 = vpop.f32.mrf.mxu2  ;;  %v5333_v5 = vpop.f32.mrf.mxu3 }
 0x7d8   : > { %v5334_v49 = vadd.f32 %v5333_v5, %v5164_v2  ;;  %v5469_v37 = vpop.xlane.xlu0 %5468 }
 0x7d9   : > { %v5613_v46 = vsel %vm1849_vm12, %v10612_v1, %v5469_v37  ;;  %v4831_v59 = vpop.f32.mrf.mxu0  ;;  %v5000_v42 = vpop.f32.mrf.mxu1 }
 0x7da   : > { %v5512_v8 = vmax.f32 %v4996_v32, %v5334_v49  ;;  %5677 = vst.msk [vmem:[%s9938_s20 + $0xb8] sm:$0xff] %vm10594_vm0, %v5613_v46  ;;  %v5001_v54 = vadd.f32 %v5000_v42, %v4831_v59  ;;  %v10627_v32 = vld [vmem:[#allocation9_spill] sm:$0xff] }
 0x7dc   : > { %4870 = vmatmul.bf16.gmra.mxu0 %v10613_v14  ;;  %5039 = vmatmul.bf16.gmra.mxu1 %v10614_v38 }
 0x7dd   : > { %5513 = vmax.xlane.f32.xlu0 %v5512_v8 }
 0x7df   : > { %v5166_v61 = vpop.f32.mrf.mxu2  ;;  %v5335_v15 = vpop.f32.mrf.mxu3 }
 0x7e0   : > { %v5336_v12 = vadd.f32 %v5335_v15, %v5166_v61  ;;  %v5472_v55 = vpop.xlane.xlu1 %5471  ;;  %v10629_v61 = vld [vmem:[#allocation11_spill] sm:$0xff] }
 0x7e1   : > { %v5614_v27 = vsel %vm1849_vm12, %v10615_v6, %v5472_v55  ;;  %v4833_v33 = vpop.f32.mrf.mxu0  ;;  %v5002_v47 = vpop.f32.mrf.mxu1  ;;  %v10631_v6 = vld [vmem:[#allocation44_spill] sm:$0xff] }
 0x7e2   : > { %v5515_v45 = vmax.f32 %v4998_v39, %v5336_v12  ;;  %5678 = vst.msk [vmem:[%s9938_s20 + $0xc0] sm:$0xff] %vm10616_vm6, %v5614_v27  ;;  %v5003_v31 = vadd.f32 %v5002_v47, %v4833_v33  ;;  %v10632_v27 = vld [vmem:[#allocation45_spill] sm:$0xff]  ;;  %vm10651_vm6 = vmmov %vm10594_vm0 }
 0x7e4   : > { %5208 = vmatmul.bf16.gmra.mxu2 %v10613_v14  ;;  %5377 = vmatmul.bf16.gmra.mxu3 %v10614_v38 }
 0x7e5   : > { %5516 = vmax.xlane.f32.xlu1 %v5515_v45 }
 0x7e7   : > { %v5169_v24 = vpop.f32.mrf.mxu2  ;;  %v5338_v17 = vpop.f32.mrf.mxu3 }
 0x7e8   : > { %v5339_v22 = vadd.f32 %v5338_v17, %v5169_v24  ;;  %v5475_v18 = vpop.xlane.xlu2 %5474 }
 0x7e9   : > { %v5615_v29 = vsel %vm1849_vm12, %v10617_v23, %v5475_v18  ;;  %v4836_v40 = vpop.f32.mrf.mxu0  ;;  %v5005_v62 = vpop.f32.mrf.mxu1 }
 0x7ea   : > { %v5518_v9 = vmax.f32 %v5001_v54, %v5339_v22  ;;  %5679 = vst.msk [vmem:[%s9938_s20 + $0xc8] sm:$0xff] %vm10618_vm7, %v5615_v29  ;;  %v5006_v19 = vadd.f32 %v5005_v62, %v4836_v40  ;;  %v10633_v54 = vld [vmem:[#allocation13_spill] sm:$0xff]  ;;  %vm10653_vm7 = vmmov %vm10594_vm0 }
 0x7ec   : > { %4875 = vmatmul.bf16.gmra.mxu0 %v10619_v53  ;;  %5044 = vmatmul.bf16.gmra.mxu1 %v10620_v50 }
 0x7ed   : > { %5519 = vmax.xlane.f32.xlu2 %v5518_v9 }
 0x7ef   : > { %v5171_v34 = vpop.f32.mrf.mxu2  ;;  %v5340_v48 = vpop.f32.mrf.mxu3 }
 0x7f0   : > { %v5341_v11 = vadd.f32 %v5340_v48, %v5171_v34  ;;  %v5478_v56 = vpop.xlane.xlu0 %5477  ;;  %v10635_v34 = vld [vmem:[#allocation12_spill] sm:$0xff] }
 0x7f1   : > { %v5616_v10 = vsel %vm1849_vm12, %v10621_v36, %v5478_v56  ;;  %v4838_v35 = vpop.f32.mrf.mxu0  ;;  %v5007_v3 = vpop.f32.mrf.mxu1 }
 0x7f2   : > { %v5521_v44 = vmax.f32 %v5003_v31, %v5341_v11  ;;  %5680 = vst.msk [vmem:[%s9938_s20 + $0xd0] sm:$0xff] %vm10622_vm5, %v5616_v10  ;;  %v5008_v43 = vadd.f32 %v5007_v3, %v4838_v35  ;;  %vm10655_vm5 = vmmov %vm10594_vm0 }
 0x7f4   : > { %5213 = vmatmul.bf16.gmra.mxu2 %v10619_v53  ;;  %5382 = vmatmul.bf16.gmra.mxu3 %v10620_v50 }
 0x7f5   : > { %5522 = vmax.xlane.f32.xlu0 %v5521_v44 }
 0x7f7   : > { %v5174_v58 = vpop.f32.mrf.mxu2  ;;  %v5343_v51 = vpop.f32.mrf.mxu3 }
 0x7f8   : > { %v5344_v25 = vadd.f32 %v5343_v51, %v5174_v58  ;;  %v5481_v28 = vpop.xlane.xlu1 %5480  ;;  %v10637_v58 = vld [vmem:[#allocation14_spill] sm:$0xff] }
 0x7f9   : > { %v5617_v57 = vsel %vm1849_vm12, %v10623_v7, %v5481_v28  ;;  %v4841_v52 = vpop.f32.mrf.mxu0  ;;  %v5010_v60 = vpop.f32.mrf.mxu1 }
 0x7fa   : > { %v5524_v16 = vmax.f32 %v5006_v19, %v5344_v25  ;;  %5681 = vst.msk [vmem:[%s9938_s20 + $0xd8] sm:$0xff] %vm10624_vm2, %v5617_v57  ;;  %v5011_v8 = vadd.f32 %v5010_v60, %v4841_v52  ;;  %vm10657_vm2 = vmmov %vm10594_vm0 }
 0x7fc   : > { %4880 = vmatmul.bf16.gmra.mxu0 %v10625_v41  ;;  %5049 = vmatmul.bf16.gmra.mxu1 %v10626_v26 }
 0x7fd   : > { %5525 = vmax.xlane.f32.xlu1 %v5524_v16 }
 0x7ff   : > { %v5176_v0 = vpop.f32.mrf.mxu2  ;;  %v5345_v30 = vpop.f32.mrf.mxu3 }
 0x800   : > { %v5346_v2 = vadd.f32 %v5345_v30, %v5176_v0  ;;  %v5484_v5 = vpop.xlane.xlu2 %5483 }
 0x801   : > { %v5618_v49 = vsel %vm1849_vm12, %v10627_v32, %v5484_v5  ;;  %v4843_v37 = vpop.f32.mrf.mxu0  ;;  %v5012_v1 = vpop.f32.mrf.mxu1 }
 0x802   : > { %v5527_v46 = vmax.f32 %v5008_v43, %v5346_v2  ;;  %5682 = vst.msk [vmem:[%s9938_s20 + $0xe0] sm:$0xff] %vm10628_vm11, %v5618_v49  ;;  %v5013_v45 = vadd.f32 %v5012_v1, %v4843_v37  ;;  %v10641_v1 = vld [vmem:[#allocation15_spill] sm:$0xff]  ;;  %vm10659_vm11 = vmmov %vm10594_vm0 }
 0x804   : > { %5218 = vmatmul.bf16.gmra.mxu2 %v10625_v41  ;;  %5387 = vmatmul.bf16.gmra.mxu3 %v10626_v26  ;;  %v10639_v41 = vld [vmem:[#allocation16_spill] sm:$0xff] }
 0x805   : > { %5528 = vmax.xlane.f32.xlu2 %v5527_v46 }
 0x807   : > { %v5179_v59 = vpop.f32.mrf.mxu2  ;;  %v5348_v42 = vpop.f32.mrf.mxu3 }
 0x808   : > { %v5349_v14 = vadd.f32 %v5348_v42, %v5179_v59  ;;  %v5487_v38 = vpop.xlane.xlu0 %5486 }
 0x809   : > { %v5619_v15 = vsel %vm1849_vm12, %v10629_v61, %v5487_v38  ;;  %v4846_v39 = vpop.f32.mrf.mxu0  ;;  %v5015_v12 = vpop.f32.mrf.mxu1 }
 0x80a   : > { %v5530_v55 = vmax.f32 %v5011_v8, %v5349_v14  ;;  %5683 = vst.msk [vmem:[%s9938_s20 + $0xe8] sm:$0xff] %vm10630_vm14, %v5619_v15  ;;  %v5016_v9 = vadd.f32 %v5015_v12, %v4846_v39  ;;  %v10643_v12 = vld [vmem:[#allocation17_spill] sm:$0xff]  ;;  %vm10661_vm14 = vmmov %vm10594_vm0 }
 0x80c   : > { %4885 = vmatmul.bf16.gmra.mxu0 %v10631_v6  ;;  %5054 = vmatmul.bf16.gmra.mxu1 %v10632_v27 }
 0x80d   : > { %5531 = vmax.xlane.f32.xlu0 %v5530_v55 }
 0x80f   : > { %v5181_v33 = vpop.f32.mrf.mxu2  ;;  %v5350_v47 = vpop.f32.mrf.mxu3 }
 0x810   : > { %v5351_v24 = vadd.f32 %v5350_v47, %v5181_v33  ;;  %v5490_v17 = vpop.xlane.xlu1 %5489 }
 0x811   : > { %v5620_v22 = vsel %vm1849_vm12, %v10633_v54, %v5490_v17  ;;  %v4848_v18 = vpop.f32.mrf.mxu0  ;;  %v5017_v23 = vpop.f32.mrf.mxu1 }
 0x812   : > { %v5533_v29 = vmax.f32 %v5013_v45, %v5351_v24  ;;  %5684 = vst.msk [vmem:[%s9938_s20 + $0xf0] sm:$0xff] %vm10634_vm15, %v5620_v22  ;;  %v5018_v35 = vadd.f32 %v5017_v23, %v4848_v18  ;;  %v10645_v22 = vld [vmem:[#allocation19_spill] sm:$0xff]  ;;  %vm10663_vm15 = vmmov %vm10594_vm0 }
 0x814   : > { %5223 = vmatmul.bf16.gmra.mxu2 %v10631_v6  ;;  %5392 = vmatmul.bf16.gmra.mxu3 %v10632_v27 }
 0x815   : > { %5534 = vmax.xlane.f32.xlu1 %v5533_v29 }
 0x817   : > { %v5184_v40 = vpop.f32.mrf.mxu2  ;;  %v5353_v62 = vpop.f32.mrf.mxu3 }
 0x818   : > { %v5354_v53 = vadd.f32 %v5353_v62, %v5184_v40  ;;  %v5493_v50 = vpop.xlane.xlu2 %5492 }
 0x819   : > { %v5621_v48 = vsel %vm1849_vm12, %v10635_v34, %v5493_v50  ;;  %v4851_v31 = vpop.f32.mrf.mxu0  ;;  %v5020_v11 = vpop.f32.mrf.mxu1 }
 0x81a   : > { %v5536_v56 = vmax.f32 %v5016_v9, %v5354_v53  ;;  %5685 = vst.msk [vmem:[%s9938_s20 + $0xf8] sm:$0xff] %vm10636_vm8, %v5621_v48  ;;  %v5021_v52 = vadd.f32 %v5020_v11, %v4851_v31  ;;  %v10647_v48 = vld [vmem:[#allocation18_spill] sm:$0xff]  ;;  %vm10665_vm8 = vmmov %vm10594_vm0 }
 0x81c   : > { %5537 = vmax.xlane.f32.xlu2 %v5536_v56 }
 0x81f   : > { %v5186_v36 = vpop.f32.mrf.mxu2  ;;  %v5355_v10 = vpop.f32.mrf.mxu3 }
 0x820   : > { %v5356_v3 = vadd.f32 %v5355_v10, %v5186_v36  ;;  %v5496_v44 = vpop.xlane.xlu0 %5495 }
 0x821   : > { %v5622_v51 = vsel %vm1849_vm12, %v10637_v58, %v5496_v44  ;;  %v4853_v19 = vpop.f32.mrf.mxu0  ;;  %v5022_v25 = vpop.f32.mrf.mxu1 }
 0x822   : > { %v5539_v28 = vmax.f32 %v5018_v35, %v5356_v3  ;;  %5686 = vst.msk [vmem:[%s9938_s20 + $0x100] sm:$0xff] %vm10638_vm13, %v5622_v51  ;;  %v5023_v32 = vadd.f32 %v5022_v25, %v4853_v19  ;;  %v10649_v51 = vld [vmem:[#allocation20_spill] sm:$0xff]  ;;  %vm10667_vm13 = vmmov %vm10594_vm0 }
 0x824   : > { %5540 = vmax.xlane.f32.xlu0 %v5539_v28 }
 0x827   : > { %v5189_v7 = vpop.f32.mrf.mxu2  ;;  %v5358_v57 = vpop.f32.mrf.mxu3 }
 0x828   : > { %v5359_v60 = vadd.f32 %v5358_v57, %v5189_v7  ;;  %v5499_v16 = vpop.xlane.xlu1 %5498 }
 0x829   : > { %v5623_v26 = vsel %vm1849_vm12, %v10639_v41, %v5499_v16  ;;  %v4856_v0 = vpop.f32.mrf.mxu0  ;;  %v5025_v30 = vpop.f32.mrf.mxu1 }
 0x82a   : > { %v5542_v43 = vmax.f32 %v5021_v52, %v5359_v60  ;;  %5687 = vst.msk [vmem:[%s9938_s20 + $0x108] sm:$0xff] %vm10640_vm1, %v5623_v26  ;;  %v5026_v61 = vadd.f32 %v5025_v30, %v4856_v0  ;;  %v10650_v26 = vld [vmem:[#allocation22_spill] sm:$0xff]  ;;  %vm10669_vm1 = vmmov %vm10594_vm0 }
 0x82c   : > { %5543 = vmax.xlane.f32.xlu1 %v5542_v43 }
 0x82f   : > { %v5191_v2 = vpop.f32.mrf.mxu2  ;;  %v5360_v5 = vpop.f32.mrf.mxu3 }
 0x830   : > { %v5361_v49 = vadd.f32 %v5360_v5, %v5191_v2  ;;  %v5502_v37 = vpop.xlane.xlu2 %5501 }
 0x831   : > { %v5624_v46 = vsel %vm1849_vm12, %v10641_v1, %v5502_v37  ;;  %v4858_v59 = vpop.f32.mrf.mxu0  ;;  %v5027_v42 = vpop.f32.mrf.mxu1 }
 0x832   : > { %v5545_v8 = vmax.f32 %v5023_v32, %v5361_v49  ;;  %5688 = vst.msk [vmem:[%s9938_s20 + $0x110] sm:$0xff] %vm10642_vm9, %v5624_v46  ;;  %v5028_v24 = vadd.f32 %v5027_v42, %v4858_v59  ;;  %v10652_v46 = vld [vmem:[#allocation21_spill] sm:$0xff]  ;;  %vm10671_vm9 = vmmov %vm10594_vm0 }
 0x834   : > { %5546 = vmax.xlane.f32.xlu2 %v5545_v8 }
 0x837   : > { %v5194_v14 = vpop.f32.mrf.mxu2  ;;  %v5363_v38 = vpop.f32.mrf.mxu3 }
 0x838   : > { %v5364_v15 = vadd.f32 %v5363_v38, %v5194_v14  ;;  %v5505_v39 = vpop.xlane.xlu0 %5504 }
 0x839   : > { %v5625_v55 = vsel %vm1849_vm12, %v10643_v12, %v5505_v39  ;;  %v4861_v6 = vpop.f32.mrf.mxu0  ;;  %v5030_v27 = vpop.f32.mrf.mxu1 }
 0x83a   : > { %v5548_v33 = vmax.f32 %v5026_v61, %v5364_v15  ;;  %5689 = vst.msk [vmem:[%s9938_s20 + $0x118] sm:$0xff] %vm10644_vm3, %v5625_v55  ;;  %v5031_v53 = vadd.f32 %v5030_v27, %v4861_v6  ;;  %v10654_v55 = vld [vmem:[#allocation23_spill] sm:$0xff]  ;;  %vm10673_vm3 = vmmov %vm10594_vm0 }
 0x83c   : > { %5549 = vmax.xlane.f32.xlu0 %v5548_v33 }
 0x83f   : > { %v5196_v47 = vpop.f32.mrf.mxu2  ;;  %v5365_v45 = vpop.f32.mrf.mxu3 }
 0x840   : > { %v5366_v17 = vadd.f32 %v5365_v45, %v5196_v47  ;;  %v5508_v54 = vpop.xlane.xlu1 %5507 }
 0x841   : > { %v5626_v18 = vsel %vm1849_vm12, %v10645_v22, %v5508_v54  ;;  %v4863_v23 = vpop.f32.mrf.mxu0  ;;  %v5032_v29 = vpop.f32.mrf.mxu1 }
 0x842   : > { %v5551_v40 = vmax.f32 %v5028_v24, %v5366_v17  ;;  %5690 = vst.msk [vmem:[%s9938_s20 + $0x120] sm:$0xff] %vm10646_vm4, %v5626_v18  ;;  %v5033_v3 = vadd.f32 %v5032_v29, %v4863_v23  ;;  %v10656_v18 = vld [vmem:[#allocation25_spill] sm:$0xff]  ;;  %vm10675_vm4 = vmmov %vm10594_vm0 }
 0x844   : > { %5552 = vmax.xlane.f32.xlu1 %v5551_v40 }
 0x847   : > { %v5199_v62 = vpop.f32.mrf.mxu2  ;;  %v5368_v9 = vpop.f32.mrf.mxu3 }
 0x848   : > { %v5369_v50 = vadd.f32 %v5368_v9, %v5199_v62  ;;  %v5511_v34 = vpop.xlane.xlu2 %5510 }
 0x849   : > { %v5627_v31 = vsel %vm1849_vm12, %v10647_v48, %v5511_v34  ;;  %v4866_v11 = vpop.f32.mrf.mxu0  ;;  %v5035_v56 = vpop.f32.mrf.mxu1 }
 0x84a   : > { %v5554_v36 = vmax.f32 %v5031_v53, %v5369_v50  ;;  %5691 = vst.msk [vmem:[%s9938_s20 + $0x128] sm:$0xff] %vm10648_vm10, %v5627_v31  ;;  %v5036_v60 = vadd.f32 %v5035_v56, %v4866_v11  ;;  %v10658_v31 = vld [vmem:[#allocation24_spill] sm:$0xff]  ;;  %vm10677_vm10 = vmmov %vm10594_vm0 }
 0x84c   : > { %5555 = vmax.xlane.f32.xlu2 %v5554_v36 }
 0x84f   : > { %v5201_v10 = vpop.f32.mrf.mxu2  ;;  %v5370_v35 = vpop.f32.mrf.mxu3 }
 0x850   : > { %v5371_v44 = vadd.f32 %v5370_v35, %v5201_v10  ;;  %v5514_v58 = vpop.xlane.xlu0 %5513 }
 0x851   : > { %v5628_v19 = vsel %vm1849_vm12, %v10649_v51, %v5514_v58  ;;  %v4868_v25 = vpop.f32.mrf.mxu0  ;;  %v5037_v28 = vpop.f32.mrf.mxu1 }
 0x852   : > { %v5557_v7 = vmax.f32 %v5033_v3, %v5371_v44  ;;  %5692 = vst.msk [vmem:[%s9938_s20 + $0x130] sm:$0xff] %vm10594_vm0, %v5628_v19  ;;  %v5038_v49 = vadd.f32 %v5037_v28, %v4868_v25  ;;  %v10660_v19 = vld [vmem:[#allocation26_spill] sm:$0xff] }
 0x854   : > { %5558 = vmax.xlane.f32.xlu0 %v5557_v7 }
 0x857   : > { %v5204_v57 = vpop.f32.mrf.mxu2  ;;  %v5373_v52 = vpop.f32.mrf.mxu3 }
 0x858   : > { %v5374_v16 = vadd.f32 %v5373_v52, %v5204_v57  ;;  %v5517_v41 = vpop.xlane.xlu1 %5516 }
 0x859   : > { %v5629_v0 = vsel %vm1849_vm12, %v10650_v26, %v5517_v41  ;;  %v4871_v30 = vpop.f32.mrf.mxu0  ;;  %v5040_v43 = vpop.f32.mrf.mxu1 }
 0x85a   : > { %v5560_v2 = vmax.f32 %v5036_v60, %v5374_v16  ;;  %5693 = vst.msk [vmem:[%s9938_s20 + $0x138] sm:$0xff] %vm10651_vm6, %v5629_v0  ;;  %v5041_v15 = vadd.f32 %v5040_v43, %v4871_v30  ;;  %v10662_v0 = vld [vmem:[#allocation28_spill] sm:$0xff]  ;;  %vm10679_vm6 = vmmov %vm10594_vm0 }
 0x85c   : > { %5561 = vmax.xlane.f32.xlu1 %v5560_v2 }
 0x85f   : > { %v5206_v5 = vpop.f32.mrf.mxu2  ;;  %v5375_v32 = vpop.f32.mrf.mxu3 }
 0x860   : > { %v5376_v37 = vadd.f32 %v5375_v32, %v5206_v5  ;;  %v5520_v1 = vpop.xlane.xlu2 %5519 }
 0x861   : > { %v5630_v59 = vsel %vm1849_vm12, %v10652_v46, %v5520_v1  ;;  %v4873_v42 = vpop.f32.mrf.mxu0  ;;  %v5042_v8 = vpop.f32.mrf.mxu1  ;;  %v10664_v1 = vld [vmem:[#allocation27_spill] sm:$0xff] }
 0x862   : > { %v5563_v14 = vmax.f32 %v5038_v49, %v5376_v37  ;;  %5694 = vst.msk [vmem:[%s9938_s20 + $0x140] sm:$0xff] %vm10653_vm7, %v5630_v59  ;;  %v5043_v17 = vadd.f32 %v5042_v8, %v4873_v42  ;;  %vm10681_vm7 = vmmov %vm10594_vm0 }
 0x864   : > { %5564 = vmax.xlane.f32.xlu2 %v5563_v14 }
 0x867   : > { %v5209_v38 = vpop.f32.mrf.mxu2  ;;  %v5378_v61 = vpop.f32.mrf.mxu3 }
 0x868   : > { %v5379_v39 = vadd.f32 %v5378_v61, %v5209_v38  ;;  %v5523_v12 = vpop.xlane.xlu0 %5522 }
 0x869   : > { %v5631_v6 = vsel %vm1849_vm12, %v10654_v55, %v5523_v12  ;;  %v4876_v33 = vpop.f32.mrf.mxu0  ;;  %v5045_v47 = vpop.f32.mrf.mxu1  ;;  %v10666_v12 = vld [vmem:[#allocation29_spill] sm:$0xff] }
 0x86a   : > { %v5566_v27 = vmax.f32 %v5041_v15, %v5379_v39  ;;  %5695 = vst.msk [vmem:[%s9938_s20 + $0x148] sm:$0xff] %vm10655_vm5, %v5631_v6  ;;  %v5046_v50 = vadd.f32 %v5045_v47, %v4876_v33  ;;  %vm10683_vm5 = vmmov %vm10594_vm0 }
 0x86c   : > { %5567 = vmax.xlane.f32.xlu0 %v5566_v27 }
 0x86f   : > { %v5211_v45 = vpop.f32.mrf.mxu2  ;;  %v5380_v24 = vpop.f32.mrf.mxu3 }
 0x870   : > { %v5381_v54 = vadd.f32 %v5380_v24, %v5211_v45  ;;  %v5526_v22 = vpop.xlane.xlu1 %5525 }
 0x871   : > { %v5632_v23 = vsel %vm1849_vm12, %v10656_v18, %v5526_v22  ;;  %v4878_v40 = vpop.f32.mrf.mxu0  ;;  %v5047_v62 = vpop.f32.mrf.mxu1  ;;  %v10668_v22 = vld [vmem:[#allocation31_spill] sm:$0xff] }
 0x872   : > { %v5569_v29 = vmax.f32 %v5043_v17, %v5381_v54  ;;  %5696 = vst.msk [vmem:[%s9938_s20 + $0x150] sm:$0xff] %vm10657_vm2, %v5632_v23  ;;  %v5048_v44 = vadd.f32 %v5047_v62, %v4878_v40  ;;  %v10670_v40 = vld [vmem:[#allocation30_spill] sm:$0xff]  ;;  %vm10684_vm2 = vmmov %vm10594_vm0 }
 0x874   : > { %5570 = vmax.xlane.f32.xlu1 %v5569_v29 }
 0x877   : > { %v5214_v9 = vpop.f32.mrf.mxu2  ;;  %v5383_v53 = vpop.f32.mrf.mxu3 }
 0x878   : > { %v5384_v34 = vadd.f32 %v5383_v53, %v5214_v9  ;;  %v5529_v48 = vpop.xlane.xlu2 %5528  ;;  %v10672_v53 = vld [vmem:[#allocation34_spill] sm:$0xff] }
 0x879   : > { %v5633_v11 = vsel %vm1849_vm12, %v10658_v31, %v5529_v48  ;;  %v4881_v36 = vpop.f32.mrf.mxu0  ;;  %v5050_v10 = vpop.f32.mrf.mxu1  ;;  %v10674_v48 = vld [vmem:[#allocation46_spill] sm:$0xff] }
 0x87a   : > { %v5572_v56 = vmax.f32 %v5046_v50, %v5384_v34  ;;  %5697 = vst.msk [vmem:[%s9938_s20 + $0x158] sm:$0xff] %vm10659_vm11, %v5633_v11  ;;  %v5051_v52 = vadd.f32 %v5050_v10, %v4881_v36  ;;  %vm10686_vm11 = vmmov %vm10594_vm0 }
 0x87c   : > { %5573 = vmax.xlane.f32.xlu2 %v5572_v56  ;;  %v10676_v56 = vld [vmem:[#allocation35_spill] sm:$0xff] }
 0x87f   : > { %v5216_v35 = vpop.f32.mrf.mxu2  ;;  %v5385_v3 = vpop.f32.mrf.mxu3 }
 0x880   : > { %v5386_v58 = vadd.f32 %v5385_v3, %v5216_v35  ;;  %v5532_v51 = vpop.xlane.xlu0 %5531  ;;  %v10678_v35 = vld [vmem:[#allocation47_spill] sm:$0xff] }
 0x881   : > { %v5634_v25 = vsel %vm1849_vm12, %v10660_v19, %v5532_v51  ;;  %v4883_v41 = vpop.f32.mrf.mxu0  ;;  %v5052_v26 = vpop.f32.mrf.mxu1  ;;  %v10680_v19 = vld [vmem:[#allocation48_spill] sm:$0xff] }
 0x882   : > { %v5575_v28 = vmax.f32 %v5048_v44, %v5386_v58  ;;  %5698 = vst.msk [vmem:[%s9938_s20 + $0x160] sm:$0xff] %vm10661_vm14, %v5634_v25  ;;  %v5053_v32 = vadd.f32 %v5052_v26, %v4883_v41  ;;  %vm10687_vm14 = vmmov %vm10594_vm0 }
 0x884   : > { %5576 = vmax.xlane.f32.xlu0 %v5575_v28 }
 0x887   : > { %v5219_v7 = vpop.f32.mrf.mxu2  ;;  %v5388_v57 = vpop.f32.mrf.mxu3 }
 0x888   : > { %v5389_v60 = vadd.f32 %v5388_v57, %v5219_v7  ;;  %v5535_v16 = vpop.xlane.xlu1 %5534  ;;  %v10682_v7 = vld [vmem:[#allocation39_spill] sm:$0xff] }
 0x889   : > { %v5635_v30 = vsel %vm1849_vm12, %v10662_v0, %v5535_v16  ;;  %v4886_v42 = vpop.f32.mrf.mxu0  ;;  %v5055_v8 = vpop.f32.mrf.mxu1  ;;  %v10685_v16 = vld [vmem:[#allocation40_spill] sm:$0xff] }
 0x88a   : > { %v5578_v43 = vmax.f32 %v5051_v52, %v5389_v60  ;;  %5699 = vst.msk [vmem:[%s9938_s20 + $0x168] sm:$0xff] %vm10663_vm15, %v5635_v30  ;;  %v5056_v61 = vadd.f32 %v5055_v8, %v4886_v42  ;;  %vm10688_vm15 = vmmov %vm10594_vm0 }
 0x88c   : > { %5579 = vmax.xlane.f32.xlu1 %v5578_v43 }
 0x88f   : > { %v5221_v2 = vpop.f32.mrf.mxu2  ;;  %v5390_v5 = vpop.f32.mrf.mxu3 }
 0x890   : > { %v5391_v49 = vadd.f32 %v5390_v5, %v5221_v2  ;;  %v5538_v37 = vpop.xlane.xlu2 %5537  ;;  %v10689_v2 = vld [vmem:[#allocation49_spill] sm:$0xff] }
 0x891   : > { %v5636_v46 = vsel %vm1849_vm12, %v10664_v1, %v5538_v37  ;;  %v4888_v27 = vpop.f32.mrf.mxu0  ;;  %v5057_v33 = vpop.f32.mrf.mxu1 }
 0x892   : > { %v5581_v59 = vmax.f32 %v5053_v32, %v5391_v49  ;;  %5700 = vst.msk [vmem:[%s9938_s20 + $0x170] sm:$0xff] %vm10665_vm8, %v5636_v46  ;;  %v5058_v24 = vadd.f32 %v5057_v33, %v4888_v27  ;;  %vm10690_vm8 = vmmov %vm10594_vm0  ;;  %v10691_v49 = vld [vmem:[#allocation50_spill] sm:$0xff] }
 0x894   : > { %5582 = vmax.xlane.f32.xlu2 %v5581_v59 }
 0x897   : > { %v5224_v14 = vpop.f32.mrf.mxu2  ;;  %v5393_v38 = vpop.f32.mrf.mxu3 }
 0x898   : > { %v5394_v15 = vadd.f32 %v5393_v38, %v5224_v14  ;;  %v5541_v39 = vpop.xlane.xlu0 %5540 }
 0x899   : > { %v5637_v55 = vsel %vm1849_vm12, %v10666_v12, %v5541_v39 }
 0x89a   : > { %v5584_v6 = vmax.f32 %v5056_v61, %v5394_v15  ;;  %5701 = vst.msk [vmem:[%s9938_s20 + $0x178] sm:$0xff] %vm10667_vm13, %v5637_v55  ;;  %vm10692_vm13 = vmmov %vm10594_vm0 }
 0x89c   : > { %5585 = vmax.xlane.f32.xlu0 %v5584_v6 }
 0x89f   : > { %v5226_v47 = vpop.f32.mrf.mxu2  ;;  %v5395_v45 = vpop.f32.mrf.mxu3 }
 0x8a0   : > { %v5396_v17 = vadd.f32 %v5395_v45, %v5226_v47  ;;  %v5544_v54 = vpop.xlane.xlu1 %5543 }
 0x8a1   : > { %v5638_v18 = vsel %vm1849_vm12, %v10668_v22, %v5544_v54 }
 0x8a2   : > { %v5587_v23 = vmax.f32 %v5058_v24, %v5396_v17  ;;  %5702 = vst.msk [vmem:[%s9938_s20 + $0x180] sm:$0xff] %vm10669_vm1, %v5638_v18  ;;  %vm10693_vm1 = vmmov %vm10594_vm0 }
 0x8a4   : > { %5588 = vmax.xlane.f32.xlu1 %v5587_v23 }
 0x8a7   : > { %v5547_v29 = vpop.xlane.xlu2 %5546 }
 0x8a8   : > { %v5639_v62 = vsel %vm1849_vm12, %v10670_v40, %v5547_v29 }
 0x8a9   : > { %5703 = vst.msk [vmem:[%s9938_s20 + $0x188] sm:$0xff] %vm10671_vm9, %v5639_v62 }
 0x8af   : > { %v5550_v9 = vpop.xlane.xlu0 %5549 }
 0x8b0   : > { %v5640_v50 = vsel %vm1849_vm12, %v10672_v53, %v5550_v9 }
 0x8b1   : > { %5704 = vst.msk [vmem:[%s9938_s20 + $0x190] sm:$0xff] %vm10673_vm3, %v5640_v50 }
 0x8b7   : > { %v5553_v34 = vpop.xlane.xlu1 %5552 }
 0x8b8   : > { %v5641_v31 = vsel %vm1849_vm12, %v10674_v48, %v5553_v34 }
 0x8b9   : > { %5705 = vst.msk [vmem:[%s9938_s20 + $0x198] sm:$0xff] %vm10675_vm4, %v5641_v31 }
 0x8bf   : > { %v5556_v11 = vpop.xlane.xlu2 %5555 }
 0x8c0   : > { %v5642_v36 = vsel %vm1849_vm12, %v10676_v56, %v5556_v11 }
 0x8c1   : > { %5706 = vst.msk [vmem:[%s9938_s20 + $0x1a0] sm:$0xff] %vm10677_vm10, %v5642_v36 }
 0x8c7   : > { %v5559_v10 = vpop.xlane.xlu0 %5558 }
 0x8c8   : > { %v5643_v3 = vsel %vm1849_vm12, %v10678_v35, %v5559_v10 }
 0x8c9   : > { %5707 = vst.msk [vmem:[%s9938_s20 + $0x1a8] sm:$0xff] %vm10594_vm0, %v5643_v3 }
 0x8cf   : > { %v5562_v44 = vpop.xlane.xlu1 %5561 }
 0x8d0   : > { %v5644_v58 = vsel %vm1849_vm12, %v9916_v4, %v5562_v44 }
 0x8d1   : > { %5708 = vst.msk [vmem:[%s9938_s20 + $0x1b0] sm:$0xff] %vm10679_vm6, %v5644_v58 }
 0x8d7   : > { %v5565_v51 = vpop.xlane.xlu2 %5564 }
 0x8d8   : > { %v5645_v25 = vsel %vm1849_vm12, %v10680_v19, %v5565_v51 }
 0x8d9   : > { %5709 = vst.msk [vmem:[%s9938_s20 + $0x1b8] sm:$0xff] %vm10681_vm7, %v5645_v25 }
 0x8df   : > { %v5568_v28 = vpop.xlane.xlu0 %5567 }
 0x8e0   : > { %v5646_v57 = vsel %vm1849_vm12, %v10682_v7, %v5568_v28 }
 0x8e1   : > { %5710 = vst.msk [vmem:[%s9938_s20 + $0x1c0] sm:$0xff] %vm10683_vm5, %v5646_v57 }
 0x8e7   : > { %v5571_v52 = vpop.xlane.xlu1 %5570 }
 0x8e8   : > { %v5647_v4 = vsel %vm1849_vm12, %v9924_v21, %v5571_v52 }
 0x8e9   : > { %5711 = vst.msk [vmem:[%s9938_s20 + $0x1c8] sm:$0xff] %vm10684_vm2, %v5647_v4 }
 0x8ef   : > { %v5574_v60 = vpop.xlane.xlu2 %5573 }
 0x8f0   : > { %v5648_v41 = vsel %vm1849_vm12, %v10685_v16, %v5574_v60 }
 0x8f1   : > { %5712 = vst.msk [vmem:[%s9938_s20 + $0x1d0] sm:$0xff] %vm10686_vm11, %v5648_v41 }
 0x8f7   : > { %v5577_v26 = vpop.xlane.xlu0 %5576 }
 0x8f8   : > { %v5649_v0 = vsel %vm1849_vm12, %v9926_v13, %v5577_v26 }
 0x8f9   : > { %5713 = vst.msk [vmem:[%s9938_s20 + $0x1d8] sm:$0xff] %vm10687_vm14, %v5649_v0 }
 0x8ff   : > { %v5580_v30 = vpop.xlane.xlu1 %5579 }
 0x900   : > { %v5650_v21 = vsel %vm1849_vm12, %v9933_v63, %v5580_v30 }
 0x901   : > { %5714 = vst.msk [vmem:[%s9938_s20 + $0x1e0] sm:$0xff] %vm10688_vm15, %v5650_v21 }
 0x907   : > { %v5583_v43 = vpop.xlane.xlu2 %5582 }
 0x908   : > { %v5651_v5 = vsel %vm1849_vm12, %v10689_v2, %v5583_v43 }
 0x909   : > { %5715 = vst.msk [vmem:[%s9938_s20 + $0x1e8] sm:$0xff] %vm10690_vm8, %v5651_v5 }
 0x90f   : > { %v5586_v32 = vpop.xlane.xlu0 %5585 }
 0x910   : > { %v5652_v37 = vsel %vm1849_vm12, %v10691_v49, %v5586_v32 }
 0x911   : > { %5716 = vst.msk [vmem:[%s9938_s20 + $0x1f0] sm:$0xff] %vm10692_vm13, %v5652_v37 }
 0x917   : > { %v5589_v13 = vpop.xlane.xlu1 %5588 }
 0x918   : > { %v5653_v1 = vsel %vm1849_vm12, %v9948_v20, %v5589_v13 }
 0x919   : > { %5717 = vst.msk [vmem:[%s9938_s20 + $0x1f8] sm:$0xff] %vm10693_vm1, %v5653_v1 }
 0x91a PF: > { %s12_s9 = sadd.s32 1, %s7273_s9  }
 0x91b   : > { %p9_p4 = scmp.ge.s32.totalorder %s12_s9, 4  }
 0x91d   :  { %11 = sbr.rel (!%p9_p4) target bundleno = 1 (0x1), region = 58 }

</bundles_post_ra>
